<compile_context>
chip_gen: v7x
topology: tpu7x:2x2x1
jax: 0.10.0
libtpu: 0.0.40
codegen_flags: <defaults>
</compile_context>

<pallas_src>
import numpy as np
import jax
import jax.numpy as jnp
from jax.experimental import pallas as pl
from jax.experimental.pallas import tpu as pltpu


# ---------------------------------------------------------------------------
# Static architecture constants (fc1 = Linear(128*10*12, 100) pins H, W).
# ---------------------------------------------------------------------------
H_IMG, W_IMG = 24, 28            # input 24x28 -> conv1 22x26 -> conv2 20x24 -> pool 10x12
R2 = 20 * W_IMG                  # conv2 rows kept (full-width layout)          = 560
R1 = 624                         # conv1 rows kept (must cover conv2's shifted reads)
XROWS = R1 + 2 * W_IMG + 8       # padded flattened-input rows (cover conv1 reads) = 688
POOL_H, POOL_W = 10, 12
PROWS = 128                      # pooled rows padded 120 -> 128 (dense (8,128) tiles)
FEAT = PROWS * 128               # 16384  (padded fc1 contraction length)
FC1_N = 128                      # fc1 outputs padded 100 -> 128 (lane dense)

# Full-width-trick safety margins (VMEM reads have no runtime bounds check).
assert R1 % 8 == 0 and R2 % 16 == 0 and R2 % 8 == 0
assert R1 >= R2 + 2 * W_IMG + 2, "conv2 shifted reads of h1 would go out of bounds"
assert XROWS >= R1 + 2 * W_IMG + 2, "conv1 im2col slices would go out of bounds"


# ---------------------------------------------------------------------------
# Kernel 1: conv1 + ReLU -> conv2 + ReLU -> AvgPool2d(2), one image per step
# ---------------------------------------------------------------------------
def _conv_pool_kernel(xcol_ref, w1_ref, b1_ref, w2_ref, b2_ref, pool_ref,
                      o_ref, h1_ref, h1cat_ref):
    """xcol_ref : [1, R1, 9*C]  bf16  host-side conv1 im2col (full-width rows)
       w1_ref   : [9*C, 64]     bf16  conv1 taps, row = (kh*3+kw)*C + c
       b1_ref   : [1, 64]       f32
       w2_ref   : [576, 128]    bf16  conv2 taps, row = (kh*3+kw)*64 + ci
       b2_ref   : [1, 128]      f32
       pool_ref : [128, R2]     bf16  0/0.25 pooling matrix (rows 120..127 zero)
       o_ref    : [1, 128, 128] bf16  pooled activations, row = ph*12+pw (pad = 0)
       h1_ref   : [R1, 64]      f32   scratch: conv1+ReLU output
       h1cat_ref: [R2, 576]     bf16  scratch: packed deep-K conv2 operand
    """
    # conv1 + ReLU: single bf16 MXU matmul (K = 9*C) over the pre-im2col'ed input.
    a1 = jnp.dot(xcol_ref[0], w1_ref[...], preferred_element_type=jnp.float32)
    h1_ref[...] = jnp.maximum(a1 + b1_ref[...], 0.0)

    # Pack the 9 kh/kw-shifted slices of h1 side by side -> [R2, 576] bf16.
    # (f32 h1 keeps the sublane shifts on the well-trodden path; cast here.)
    for kh in range(3):
        for kw in range(3):
            t = kh * 3 + kw
            off = kh * W_IMG + kw
            h1cat_ref[:, t * 64:(t + 1) * 64] = (
                h1_ref[off:off + R2, :].astype(jnp.bfloat16))

    # conv2 + ReLU: ONE deep-K bf16 matmul (no 9-pass accumulator, no spills).
    a2 = jnp.dot(h1cat_ref[...], w2_ref[...], preferred_element_type=jnp.float32)
    h2 = jnp.maximum(a2 + b2_ref[...], 0.0).astype(jnp.bfloat16)

    # AvgPool2d(2) as one bf16 matmul with the precomputed pooling matrix.
    pooled = jnp.dot(pool_ref[...], h2, preferred_element_type=jnp.float32)
    o_ref[0] = pooled.astype(jnp.bfloat16)


def conv_pool(xcol, w1, b1, w2, b2, pool_mat):
    B, r1, kc = xcol.shape
    return pl.pallas_call(
        _conv_pool_kernel,
        out_shape=jax.ShapeDtypeStruct((B, PROWS, 128), jnp.bfloat16),
        grid_spec=pltpu.PrefetchScalarGridSpec(
            num_scalar_prefetch=0,
            grid=(B,),
            in_specs=[
                pl.BlockSpec((1, r1, kc), lambda b: (b, 0, 0)),
                pl.BlockSpec((kc, 64), lambda b: (0, 0)),
                pl.BlockSpec((1, 64), lambda b: (0, 0)),
                pl.BlockSpec((576, 128), lambda b: (0, 0)),
                pl.BlockSpec((1, 128), lambda b: (0, 0)),
                pl.BlockSpec((PROWS, R2), lambda b: (0, 0)),
            ],
            out_specs=pl.BlockSpec((1, PROWS, 128), lambda b: (b, 0, 0)),
            scratch_shapes=[pltpu.VMEM((R1, 64), jnp.float32),
                            pltpu.VMEM((R2, 576), jnp.bfloat16)],
        ),
        compiler_params=pltpu.CompilerParams(
            dimension_semantics=("parallel",)),
    )(xcol, w1, b1, w2, b2, pool_mat)


# ---------------------------------------------------------------------------
# Kernel 2: fc1 + ReLU + fc2, K-tiled over the bf16 fc1 weight stream
# ---------------------------------------------------------------------------
def _fc_kernel(x_ref, w1_ref, b1_ref, w2_ref, b2_ref, o_ref, acc_ref):
    k = pl.program_id(0)

    @pl.when(k == 0)
    def _():
        acc_ref[...] = jnp.zeros_like(acc_ref)

    acc_ref[...] += jnp.dot(x_ref[...], w1_ref[...],
                            preferred_element_type=jnp.float32)

    @pl.when(k == pl.num_programs(0) - 1)
    def _():
        h = jnp.maximum(acc_ref[...] + b1_ref[...], 0.0)       # fc1 + ReLU
        # fc2 epilogue on the VPU/XLU: multiply by the (zero-padded) fc2 row and
        # lane-reduce; padded fc1 columns are exactly 0 so the result is exact.
        o_ref[...] = (jnp.sum(h * w2_ref[...], axis=-1, keepdims=True)
                      + b2_ref[...])


def fc_fused(feats, wf1, bf1, wf2, bf2, *, tk=8192):
    B, K = feats.shape
    N = wf1.shape[1]
    assert K % tk == 0
    return pl.pallas_call(
        _fc_kernel,
        out_shape=jax.ShapeDtypeStruct((B, 1), jnp.float32),
        grid_spec=pltpu.PrefetchScalarGridSpec(
            num_scalar_prefetch=0,
            grid=(K // tk,),
            in_specs=[
                pl.BlockSpec((B, tk), lambda k: (0, k)),
                pl.BlockSpec((tk, N), lambda k: (k, 0)),
                pl.BlockSpec((1, N), lambda k: (0, 0)),
                pl.BlockSpec((1, N), lambda k: (0, 0)),
                pl.BlockSpec((1, 1), lambda k: (0, 0)),
            ],
            out_specs=pl.BlockSpec((B, 1), lambda k: (0, 0)),
            scratch_shapes=[pltpu.VMEM((B, N), jnp.float32)],
        ),
        compiler_params=pltpu.CompilerParams(
            dimension_semantics=("arbitrary",)),
    )(feats, wf1, bf1, wf2, bf2)


# ---------------------------------------------------------------------------
# Host-side setup: pooling matrix, parameter init (PyTorch-equivalent), forward
# ---------------------------------------------------------------------------
def make_pool_matrix():
    """[128, R2] bf16: pooled row (ph*12+pw) = 0.25 * its 4 conv2 rows; rows >=120 zero."""
    p = np.zeros((PROWS, R2), np.float32)
    for ph in range(POOL_H):
        for pw in range(POOL_W):
            r = ph * POOL_W + pw
            for dh in range(2):
                for dw in range(2):
                    p[r, (2 * ph + dh) * W_IMG + (2 * pw + dw)] = 0.25
    return jnp.asarray(p, jnp.bfloat16)


def init_params(key, channels):
    """PyTorch-style 1/sqrt(fan_in) init in PyTorch layouts, repacked for the TPU kernels."""
    def uniform(k, shape, fan_in):
        bound = 1.0 / np.sqrt(fan_in)
        return jax.random.uniform(k, shape, jnp.float32, -bound, bound)

    feat_torch = 128 * POOL_H * POOL_W                          # 15360
    ks = jax.random.split(key, 8)
    w1 = uniform(ks[0], (64, channels, 3, 3), channels * 9)     # [O, C, kh, kw]
    b1 = uniform(ks[1], (64,), channels * 9)
    w2 = uniform(ks[2], (128, 64, 3, 3), 64 * 9)
    b2 = uniform(ks[3], (128,), 64 * 9)
    wf1 = uniform(ks[4], (100, feat_torch), feat_torch)         # [out, in = c*120 + prow]
    bf1 = uniform(ks[5], (100,), feat_torch)
    wf2 = uniform(ks[6], (1, 100), 100)
    bf2 = uniform(ks[7], (1,), 100)

    # conv1 taps -> [(kh*3+kw)*C + c, 64] bf16 (matches host im2col column order).
    w1k = jnp.transpose(w1, (2, 3, 1, 0)).reshape(9 * channels, 64).astype(jnp.bfloat16)
    # conv2 taps -> [(kh*3+kw)*64 + ci, 128] bf16 (matches in-kernel h1cat packing).
    w2k = jnp.transpose(w2, (2, 3, 1, 0)).reshape(9 * 64, 128).astype(jnp.bfloat16)

    # fc1: PyTorch input index = c*120 + prow; kernel feature index = prow*128 + c.
    # Pad prow 120->128 (matching the zero pool rows) and outputs 100->128; bf16 stream.
    wf1_3d = wf1.reshape(100, 128, POOL_H * POOL_W)             # [o, c, prow]
    wf1k = jnp.transpose(wf1_3d, (2, 1, 0))                     # [prow, c, o]
    wf1k = jnp.pad(wf1k, ((0, PROWS - POOL_H * POOL_W), (0, 0), (0, FC1_N - 100)))
    wf1k = wf1k.reshape(FEAT, FC1_N).astype(jnp.bfloat16)       # [16384, 128]

    bf1k = jnp.pad(bf1, (0, FC1_N - 100)).reshape(1, FC1_N)
    wf2k = jnp.pad(wf2, ((0, 0), (0, FC1_N - 100)))             # [1, 128] row for the VPU fc2
    bf2k = bf2.reshape(1, 1)

    return dict(w1=w1k, b1=b1.reshape(1, 64), w2=w2k, b2=b2.reshape(1, 128),
                wf1=wf1k, bf1=bf1k, wf2=wf2k, bf2=bf2k, pool=make_pool_matrix())


def im2col_conv1(x_nchw):
    """NCHW -> flattened full-width rows -> conv1 im2col [B, R1, 9*C] (bf16, tiny XLA glue)."""
    B, C, H, W = x_nchw.shape
    x = jnp.transpose(x_nchw, (0, 2, 3, 1)).reshape(B, H * W, C)
    x = jnp.pad(x, ((0, 0), (0, XROWS - H * W), (0, 0)))
    taps = [x[:, kh * W + kw: kh * W + kw + R1, :]
            for kh in range(3) for kw in range(3)]
    return jnp.concatenate(taps, axis=-1).astype(jnp.bfloat16)


@jax.jit
def net_forward(x_nchw, params):
    B = x_nchw.shape[0]
    xcol = im2col_conv1(x_nchw)                                 # [B, R1, 9*C] bf16
    pooled = conv_pool(xcol, params["w1"], params["b1"],
                       params["w2"], params["b2"], params["pool"])  # [B, 128, 128] bf16
    feats = pooled.reshape(B, FEAT)                             # free reshape (contiguous)
    return fc_fused(feats, params["wf1"], params["bf1"],
                    params["wf2"], params["bf2"])               # [B, 1] f32


if __name__ == "__main__":
    key = jax.random.PRNGKey(0)
    k_x, k_p = jax.random.split(key)

    channels = 4
    B = 2                                   # spatial 24x28 is pinned by fc1's 128*10*12
    x = jax.random.normal(k_x, (B, channels, H_IMG, W_IMG), jnp.float32)
    params = init_params(k_p, channels)

    out = net_forward(x, params)
    jax.block_until_ready(out)
    assert out.shape == (B, 1) and out.dtype == jnp.float32
    assert bool(jnp.all(jnp.isfinite(out)))
    print("KERNEL_OK")
</pallas_src>

<mosaic_0001>
module attributes {stable_mosaic.version = 11 : i64} {
  func.func @_conv_pool_kernel(%arg0: i32, %arg1: memref<1x624x36xbf16, #tpu.memory_space<vmem>>, %arg2: memref<36x64xbf16, #tpu.memory_space<vmem>>, %arg3: memref<1x64xf32, #tpu.memory_space<vmem>>, %arg4: memref<576x128xbf16, #tpu.memory_space<vmem>>, %arg5: memref<1x128xf32, #tpu.memory_space<vmem>>, %arg6: memref<128x560xbf16, #tpu.memory_space<vmem>>, %arg7: memref<1x128x128xbf16, #tpu.memory_space<vmem>>, %arg8: memref<624x64xf32, #tpu.memory_space<vmem>>, %arg9: memref<560x576xbf16, #tpu.memory_space<vmem>>) attributes {dimension_semantics = [#tpu.dimension_semantics<parallel>], iteration_bounds = array<i64: 2>, scalar_prefetch = 0 : i64, scratch_operands = 2 : i64, tpu.core_type = #tpu.core_type<tc>, window_params = [{transform_indices = @transform_0, window_bounds = array<i64: 1, 624, 36>}, {pipeline_mode = #tpu.pipeline_mode<synchronous>, transform_indices = @transform_1, window_bounds = array<i64: 36, 64>}, {pipeline_mode = #tpu.pipeline_mode<synchronous>, transform_indices = @transform_2, window_bounds = array<i64: 1, 64>}, {pipeline_mode = #tpu.pipeline_mode<synchronous>, transform_indices = @transform_3, window_bounds = array<i64: 576, 128>}, {pipeline_mode = #tpu.pipeline_mode<synchronous>, transform_indices = @transform_4, window_bounds = array<i64: 1, 128>}, {pipeline_mode = #tpu.pipeline_mode<synchronous>, transform_indices = @transform_5, window_bounds = array<i64: 128, 560>}, {transform_indices = @transform_6, window_bounds = array<i64: 1, 128, 128>}]} {
    %c0 = arith.constant 0 : index
    %c0_0 = arith.constant 0 : index
    %c0_1 = arith.constant 0 : index
    %0 = vector.load %arg1[%c0, %c0_0, %c0_1] : memref<1x624x36xbf16, #tpu.memory_space<vmem>>, vector<1x624x36xbf16>
    %1 = vector.shape_cast %0 : vector<1x624x36xbf16> to vector<624x36xbf16>
    %c0_2 = arith.constant 0 : index
    %c0_3 = arith.constant 0 : index
    %2 = vector.load %arg2[%c0_2, %c0_3] : memref<36x64xbf16, #tpu.memory_space<vmem>>, vector<36x64xbf16>
    %cst = arith.constant dense<0.000000e+00> : vector<624x64xf32>
    %3 = tpu.matmul %1, %2, %cst {dimension_numbers = #tpu.dot_dimension_numbers<[1], [0], [0], [1], [0, 0, 1, 1], [], []>} : vector<624x36xbf16>, vector<36x64xbf16>, vector<624x64xf32> -> vector<624x64xf32>
    %c0_4 = arith.constant 0 : index
    %c0_5 = arith.constant 0 : index
    %4 = vector.load %arg3[%c0_4, %c0_5] : memref<1x64xf32, #tpu.memory_space<vmem>>, vector<1x64xf32>
    %5 = vector.broadcast %4 : vector<1x64xf32> to vector<624x64xf32>
    %6 = arith.addf %3, %5 : vector<624x64xf32>
    %cst_6 = arith.constant 0.000000e+00 : f32
    %7 = vector.broadcast %cst_6 : f32 to vector<624x64xf32>
    %8 = arith.maximumf %6, %7 : vector<624x64xf32>
    %c0_7 = arith.constant 0 : index
    %c0_8 = arith.constant 0 : index
    %9 = vector.load %arg8[%c0_7, %c0_8] : memref<624x64xf32, #tpu.memory_space<vmem>>, vector<624x64xf32>
    tpu.vector_store %arg8[%c0_7, %c0_8], %8 {strides = array<i32>} : memref<624x64xf32, #tpu.memory_space<vmem>>, vector<624x64xf32>,
    %c0_9 = arith.constant 0 : index
    %c0_10 = arith.constant 0 : index
    %10 = vector.load %arg8[%c0_9, %c0_10] : memref<624x64xf32, #tpu.memory_space<vmem>>, vector<560x64xf32>
    %11 = arith.truncf %10 : vector<560x64xf32> to vector<560x64xbf16>
    %c0_11 = arith.constant 0 : index
    %c0_12 = arith.constant 0 : index
    %12 = vector.load %arg9[%c0_11, %c0_12] : memref<560x576xbf16, #tpu.memory_space<vmem>>, vector<560x64xbf16>
    tpu.vector_store %arg9[%c0_11, %c0_12], %11 {strides = array<i32>} : memref<560x576xbf16, #tpu.memory_space<vmem>>, vector<560x64xbf16>,
    %c1 = arith.constant 1 : index
    %c0_13 = arith.constant 0 : index
    %13 = vector.load %arg8[%c1, %c0_13] : memref<624x64xf32, #tpu.memory_space<vmem>>, vector<560x64xf32>
    %14 = arith.truncf %13 : vector<560x64xf32> to vector<560x64xbf16>
    %c0_14 = arith.constant 0 : index
    %c64 = arith.constant 64 : index
    %15 = vector.load %arg9[%c0_14, %c64] : memref<560x576xbf16, #tpu.memory_space<vmem>>, vector<560x64xbf16>
    tpu.vector_store %arg9[%c0_14, %c64], %14 {strides = array<i32>} : memref<560x576xbf16, #tpu.memory_space<vmem>>, vector<560x64xbf16>,
    %c2 = arith.constant 2 : index
    %c0_15 = arith.constant 0 : index
    %16 = vector.load %arg8[%c2, %c0_15] : memref<624x64xf32, #tpu.memory_space<vmem>>, vector<560x64xf32>
    %17 = arith.truncf %16 : vector<560x64xf32> to vector<560x64xbf16>
    %c0_16 = arith.constant 0 : index
    %c128 = arith.constant 128 : index
    %18 = vector.load %arg9[%c0_16, %c128] : memref<560x576xbf16, #tpu.memory_space<vmem>>, vector<560x64xbf16>
    tpu.vector_store %arg9[%c0_16, %c128], %17 {strides = array<i32>} : memref<560x576xbf16, #tpu.memory_space<vmem>>, vector<560x64xbf16>,
    %c28 = arith.constant 28 : index
    %c0_17 = arith.constant 0 : index
    %19 = vector.load %arg8[%c28, %c0_17] : memref<624x64xf32, #tpu.memory_space<vmem>>, vector<560x64xf32>
    %20 = arith.truncf %19 : vector<560x64xf32> to vector<560x64xbf16>
    %c0_18 = arith.constant 0 : index
    %c192 = arith.constant 192 : index
    %21 = vector.load %arg9[%c0_18, %c192] : memref<560x576xbf16, #tpu.memory_space<vmem>>, vector<560x64xbf16>
    tpu.vector_store %arg9[%c0_18, %c192], %20 {strides = array<i32>} : memref<560x576xbf16, #tpu.memory_space<vmem>>, vector<560x64xbf16>,
    %c29 = arith.constant 29 : index
    %c0_19 = arith.constant 0 : index
    %22 = vector.load %arg8[%c29, %c0_19] : memref<624x64xf32, #tpu.memory_space<vmem>>, vector<560x64xf32>
    %23 = arith.truncf %22 : vector<560x64xf32> to vector<560x64xbf16>
    %c0_20 = arith.constant 0 : index
    %c256 = arith.constant 256 : index
    %24 = vector.load %arg9[%c0_20, %c256] : memref<560x576xbf16, #tpu.memory_space<vmem>>, vector<560x64xbf16>
    tpu.vector_store %arg9[%c0_20, %c256], %23 {strides = array<i32>} : memref<560x576xbf16, #tpu.memory_space<vmem>>, vector<560x64xbf16>,
    %c30 = arith.constant 30 : index
    %c0_21 = arith.constant 0 : index
    %25 = vector.load %arg8[%c30, %c0_21] : memref<624x64xf32, #tpu.memory_space<vmem>>, vector<560x64xf32>
    %26 = arith.truncf %25 : vector<560x64xf32> to vector<560x64xbf16>
    %c0_22 = arith.constant 0 : index
    %c320 = arith.constant 320 : index
    %27 = vector.load %arg9[%c0_22, %c320] : memref<560x576xbf16, #tpu.memory_space<vmem>>, vector<560x64xbf16>
    tpu.vector_store %arg9[%c0_22, %c320], %26 {strides = array<i32>} : memref<560x576xbf16, #tpu.memory_space<vmem>>, vector<560x64xbf16>,
    %c56 = arith.constant 56 : index
    %c0_23 = arith.constant 0 : index
    %28 = vector.load %arg8[%c56, %c0_23] : memref<624x64xf32, #tpu.memory_space<vmem>>, vector<560x64xf32>
    %29 = arith.truncf %28 : vector<560x64xf32> to vector<560x64xbf16>
    %c0_24 = arith.constant 0 : index
    %c384 = arith.constant 384 : index
    %30 = vector.load %arg9[%c0_24, %c384] : memref<560x576xbf16, #tpu.memory_space<vmem>>, vector<560x64xbf16>
    tpu.vector_store %arg9[%c0_24, %c384], %29 {strides = array<i32>} : memref<560x576xbf16, #tpu.memory_space<vmem>>, vector<560x64xbf16>,
    %c57 = arith.constant 57 : index
    %c0_25 = arith.constant 0 : index
    %31 = vector.load %arg8[%c57, %c0_25] : memref<624x64xf32, #tpu.memory_space<vmem>>, vector<560x64xf32>
    %32 = arith.truncf %31 : vector<560x64xf32> to vector<560x64xbf16>
    %c0_26 = arith.constant 0 : index
    %c448 = arith.constant 448 : index
    %33 = vector.load %arg9[%c0_26, %c448] : memref<560x576xbf16, #tpu.memory_space<vmem>>, vector<560x64xbf16>
    tpu.vector_store %arg9[%c0_26, %c448], %32 {strides = array<i32>} : memref<560x576xbf16, #tpu.memory_space<vmem>>, vector<560x64xbf16>,
    %c58 = arith.constant 58 : index
    %c0_27 = arith.constant 0 : index
    %34 = vector.load %arg8[%c58, %c0_27] : memref<624x64xf32, #tpu.memory_space<vmem>>, vector<560x64xf32>
    %35 = arith.truncf %34 : vector<560x64xf32> to vector<560x64xbf16>
    %c0_28 = arith.constant 0 : index
    %c512 = arith.constant 512 : index
    %36 = vector.load %arg9[%c0_28, %c512] : memref<560x576xbf16, #tpu.memory_space<vmem>>, vector<560x64xbf16>
    tpu.vector_store %arg9[%c0_28, %c512], %35 {strides = array<i32>} : memref<560x576xbf16, #tpu.memory_space<vmem>>, vector<560x64xbf16>,
    %c0_29 = arith.constant 0 : index
    %c0_30 = arith.constant 0 : index
    %37 = vector.load %arg9[%c0_29, %c0_30] : memref<560x576xbf16, #tpu.memory_space<vmem>>, vector<560x576xbf16>
    %c0_31 = arith.constant 0 : index
    %c0_32 = arith.constant 0 : index
    %38 = vector.load %arg4[%c0_31, %c0_32] : memref<576x128xbf16, #tpu.memory_space<vmem>>, vector<576x128xbf16>
    %cst_33 = arith.constant dense<0.000000e+00> : vector<560x128xf32>
    %39 = tpu.matmul %37, %38, %cst_33 {dimension_numbers = #tpu.dot_dimension_numbers<[1], [0], [0], [1], [0, 0, 1, 1], [], []>} : vector<560x576xbf16>, vector<576x128xbf16>, vector<560x128xf32> -> vector<560x128xf32>
    %c0_34 = arith.constant 0 : index
    %c0_35 = arith.constant 0 : index
    %40 = vector.load %arg5[%c0_34, %c0_35] : memref<1x128xf32, #tpu.memory_space<vmem>>, vector<1x128xf32>
    %41 = vector.broadcast %40 : vector<1x128xf32> to vector<560x128xf32>
    %42 = arith.addf %39, %41 : vector<560x128xf32>
    %cst_36 = arith.constant 0.000000e+00 : f32
    %43 = vector.broadcast %cst_36 : f32 to vector<560x128xf32>
    %44 = arith.maximumf %42, %43 : vector<560x128xf32>
    %45 = arith.truncf %44 : vector<560x128xf32> to vector<560x128xbf16>
    %c0_37 = arith.constant 0 : index
    %c0_38 = arith.constant 0 : index
    %46 = vector.load %arg6[%c0_37, %c0_38] : memref<128x560xbf16, #tpu.memory_space<vmem>>, vector<128x560xbf16>
    %cst_39 = arith.constant dense<0.000000e+00> : vector<128x128xf32>
    %47 = tpu.matmul %46, %45, %cst_39 {dimension_numbers = #tpu.dot_dimension_numbers<[1], [0], [0], [1], [0, 0, 1, 1], [], []>} : vector<128x560xbf16>, vector<560x128xbf16>, vector<128x128xf32> -> vector<128x128xf32>
    %48 = arith.truncf %47 : vector<128x128xf32> to vector<128x128xbf16>
    %c0_40 = arith.constant 0 : index
    %c0_41 = arith.constant 0 : index
    %c0_42 = arith.constant 0 : index
    %49 = vector.load %arg7[%c0_40, %c0_41, %c0_42] : memref<1x128x128xbf16, #tpu.memory_space<vmem>>, vector<1x128x128xbf16>
    %50 = vector.shape_cast %49 : vector<1x128x128xbf16> to vector<128x128xbf16>
    %51 = vector.shape_cast %48 : vector<128x128xbf16> to vector<1x128x128xbf16>
    tpu.vector_store %arg7[%c0_40, %c0_41, %c0_42], %51 {strides = array<i32>} : memref<1x128x128xbf16, #tpu.memory_space<vmem>>, vector<1x128x128xbf16>,
    return
  }
  func.func @transform_0(%arg0: i32) -> (i32, i32, i32) {
    %c0_i32 = arith.constant 0 : i32
    %c0_i32_0 = arith.constant 0 : i32
    %c0_i32_1 = arith.constant 0 : i32
    return %arg0, %c0_i32, %c0_i32_0 : i32, i32, i32
  }
  func.func @transform_1(%arg0: i32) -> (i32, i32) {
    %c0_i32 = arith.constant 0 : i32
    %c0_i32_0 = arith.constant 0 : i32
    %c0_i32_1 = arith.constant 0 : i32
    return %c0_i32, %c0_i32_0 : i32, i32
  }
  func.func @transform_2(%arg0: i32) -> (i32, i32) {
    %c0_i32 = arith.constant 0 : i32
    %c0_i32_0 = arith.constant 0 : i32
    %c0_i32_1 = arith.constant 0 : i32
    return %c0_i32, %c0_i32_0 : i32, i32
  }
  func.func @transform_3(%arg0: i32) -> (i32, i32) {
    %c0_i32 = arith.constant 0 : i32
    %c0_i32_0 = arith.constant 0 : i32
    %c0_i32_1 = arith.constant 0 : i32
    return %c0_i32, %c0_i32_0 : i32, i32
  }
  func.func @transform_4(%arg0: i32) -> (i32, i32) {
    %c0_i32 = arith.constant 0 : i32
    %c0_i32_0 = arith.constant 0 : i32
    %c0_i32_1 = arith.constant 0 : i32
    return %c0_i32, %c0_i32_0 : i32, i32
  }
  func.func @transform_5(%arg0: i32) -> (i32, i32) {
    %c0_i32 = arith.constant 0 : i32
    %c0_i32_0 = arith.constant 0 : i32
    %c0_i32_1 = arith.constant 0 : i32
    return %c0_i32, %c0_i32_0 : i32, i32
  }
  func.func @transform_6(%arg0: i32) -> (i32, i32, i32) {
    %c0_i32 = arith.constant 0 : i32
    %c0_i32_0 = arith.constant 0 : i32
    %c0_i32_1 = arith.constant 0 : i32
    return %arg0, %c0_i32, %c0_i32_0 : i32, i32, i32
  }
}

module attributes {stable_mosaic.version = 11 : i64} {
  func.func @_fc_kernel(%arg0: i32, %arg1: memref<2x8192xbf16, #tpu.memory_space<vmem>>, %arg2: memref<8192x128xbf16, #tpu.memory_space<vmem>>, %arg3: memref<1x128xf32, #tpu.memory_space<vmem>>, %arg4: memref<1x128xf32, #tpu.memory_space<vmem>>, %arg5: memref<1x1xf32, #tpu.memory_space<vmem>>, %arg6: memref<2x1xf32, #tpu.memory_space<vmem>>, %arg7: memref<2x128xf32, #tpu.memory_space<vmem>>) attributes {dimension_semantics = [#tpu.dimension_semantics<arbitrary>], iteration_bounds = array<i64: 2>, scalar_prefetch = 0 : i64, scratch_operands = 1 : i64, tpu.core_type = #tpu.core_type<tc>, window_params = [{transform_indices = @transform_0, window_bounds = array<i64: 2, 8192>}, {transform_indices = @transform_1, window_bounds = array<i64: 8192, 128>}, {pipeline_mode = #tpu.pipeline_mode<synchronous>, transform_indices = @transform_2, window_bounds = array<i64: 1, 128>}, {pipeline_mode = #tpu.pipeline_mode<synchronous>, transform_indices = @transform_3, window_bounds = array<i64: 1, 128>}, {pipeline_mode = #tpu.pipeline_mode<synchronous>, transform_indices = @transform_4, window_bounds = array<i64: 1, 1>}, {pipeline_mode = #tpu.pipeline_mode<synchronous>, transform_indices = @transform_5, window_bounds = array<i64: 2, 1>}]} {
    %c0_i32 = arith.constant 0 : i32
    %0 = arith.cmpi eq, %arg0, %c0_i32 : i32
    %1 = arith.extui %0 : i1 to i32
    %c0_i32_0 = arith.constant 0 : i32
    %2 = arith.cmpi ne, %1, %c0_i32_0 : i32
    scf.if %2 {
      %cst_9 = arith.constant 0.000000e+00 : f32
      %12 = vector.broadcast %cst_9 : f32 to vector<2x128xf32>
      %c0_10 = arith.constant 0 : index
      %c0_11 = arith.constant 0 : index
      %13 = vector.load %arg7[%c0_10, %c0_11] : memref<2x128xf32, #tpu.memory_space<vmem>>, vector<2x128xf32>
      tpu.vector_store %arg7[%c0_10, %c0_11], %12 {strides = array<i32>} : memref<2x128xf32, #tpu.memory_space<vmem>>, vector<2x128xf32>,
    } else {
    }
    %c0 = arith.constant 0 : index
    %c0_1 = arith.constant 0 : index
    %3 = vector.load %arg7[%c0, %c0_1] : memref<2x128xf32, #tpu.memory_space<vmem>>, vector<2x128xf32>
    %c0_2 = arith.constant 0 : index
    %c0_3 = arith.constant 0 : index
    %4 = vector.load %arg1[%c0_2, %c0_3] : memref<2x8192xbf16, #tpu.memory_space<vmem>>, vector<2x8192xbf16>
    %c0_4 = arith.constant 0 : index
    %c0_5 = arith.constant 0 : index
    %5 = vector.load %arg2[%c0_4, %c0_5] : memref<8192x128xbf16, #tpu.memory_space<vmem>>, vector<8192x128xbf16>
    %cst = arith.constant dense<0.000000e+00> : vector<2x128xf32>
    %6 = tpu.matmul %4, %5, %cst {dimension_numbers = #tpu.dot_dimension_numbers<[1], [0], [0], [1], [0, 0, 1, 1], [], []>} : vector<2x8192xbf16>, vector<8192x128xbf16>, vector<2x128xf32> -> vector<2x128xf32>
    %7 = arith.addf %3, %6 : vector<2x128xf32>
    %c0_6 = arith.constant 0 : index
    %c0_7 = arith.constant 0 : index
    %8 = vector.load %arg7[%c0_6, %c0_7] : memref<2x128xf32, #tpu.memory_space<vmem>>, vector<2x128xf32>
    tpu.vector_store %arg7[%c0_6, %c0_7], %7 {strides = array<i32>} : memref<2x128xf32, #tpu.memory_space<vmem>>, vector<2x128xf32>,
    %c1_i32 = arith.constant 1 : i32
    %9 = arith.cmpi eq, %arg0, %c1_i32 : i32
    %10 = arith.extui %9 : i1 to i32
    %c0_i32_8 = arith.constant 0 : i32
    %11 = arith.cmpi ne, %10, %c0_i32_8 : i32
    scf.if %11 {
      %c0_9 = arith.constant 0 : index
      %c0_10 = arith.constant 0 : index
      %12 = vector.load %arg7[%c0_9, %c0_10] : memref<2x128xf32, #tpu.memory_space<vmem>>, vector<2x128xf32>
      %c0_11 = arith.constant 0 : index
      %c0_12 = arith.constant 0 : index
      %13 = vector.load %arg3[%c0_11, %c0_12] : memref<1x128xf32, #tpu.memory_space<vmem>>, vector<1x128xf32>
      %14 = vector.broadcast %13 : vector<1x128xf32> to vector<2x128xf32>
      %15 = arith.addf %12, %14 : vector<2x128xf32>
      %cst_13 = arith.constant 0.000000e+00 : f32
      %16 = vector.broadcast %cst_13 : f32 to vector<2x128xf32>
      %17 = arith.maximumf %15, %16 : vector<2x128xf32>
      %c0_14 = arith.constant 0 : index
      %c0_15 = arith.constant 0 : index
      %18 = vector.load %arg4[%c0_14, %c0_15] : memref<1x128xf32, #tpu.memory_space<vmem>>, vector<1x128xf32>
      %19 = vector.broadcast %18 : vector<1x128xf32> to vector<2x128xf32>
      %20 = arith.mulf %17, %19 : vector<2x128xf32>
      %cst_16 = arith.constant dense<0.000000e+00> : vector<2xf32>
      %21 = vector.multi_reduction <add>, %20, %cst_16 [1] : vector<2x128xf32> to vector<2xf32>
      %22 = vector.shape_cast %21 : vector<2xf32> to vector<2x1xf32>
      %c0_17 = arith.constant 0 : index
      %c0_18 = arith.constant 0 : index
      %23 = vector.load %arg5[%c0_17, %c0_18] : memref<1x1xf32, #tpu.memory_space<vmem>>, vector<1x1xf32>
      %24 = vector.broadcast %23 : vector<1x1xf32> to vector<2x1xf32>
      %25 = arith.addf %22, %24 : vector<2x1xf32>
      %c0_19 = arith.constant 0 : index
      %c0_20 = arith.constant 0 : index
      %26 = vector.load %arg6[%c0_19, %c0_20] : memref<2x1xf32, #tpu.memory_space<vmem>>, vector<2x1xf32>
      tpu.vector_store %arg6[%c0_19, %c0_20], %25 {strides = array<i32>} : memref<2x1xf32, #tpu.memory_space<vmem>>, vector<2x1xf32>,
    } else {
    }
    return
  }
  func.func @transform_0(%arg0: i32) -> (i32, i32) {
    %c0_i32 = arith.constant 0 : i32
    %c0_i32_0 = arith.constant 0 : i32
    return %c0_i32, %arg0 : i32, i32
  }
  func.func @transform_1(%arg0: i32) -> (i32, i32) {
    %c0_i32 = arith.constant 0 : i32
    %c0_i32_0 = arith.constant 0 : i32
    return %arg0, %c0_i32 : i32, i32
  }
  func.func @transform_2(%arg0: i32) -> (i32, i32) {
    %c0_i32 = arith.constant 0 : i32
    %c0_i32_0 = arith.constant 0 : i32
    %c0_i32_1 = arith.constant 0 : i32
    return %c0_i32, %c0_i32_0 : i32, i32
  }
  func.func @transform_3(%arg0: i32) -> (i32, i32) {
    %c0_i32 = arith.constant 0 : i32
    %c0_i32_0 = arith.constant 0 : i32
    %c0_i32_1 = arith.constant 0 : i32
    return %c0_i32, %c0_i32_0 : i32, i32
  }
  func.func @transform_4(%arg0: i32) -> (i32, i32) {
    %c0_i32 = arith.constant 0 : i32
    %c0_i32_0 = arith.constant 0 : i32
    %c0_i32_1 = arith.constant 0 : i32
    return %c0_i32, %c0_i32_0 : i32, i32
  }
  func.func @transform_5(%arg0: i32) -> (i32, i32) {
    %c0_i32 = arith.constant 0 : i32
    %c0_i32_0 = arith.constant 0 : i32
    %c0_i32_1 = arith.constant 0 : i32
    return %c0_i32, %c0_i32_0 : i32, i32
  }
}

</mosaic_0001>

<bundles_post_ra>
// kernel: net_forward.2
= control target key start
LH: loop header
LB: loop body
LE: loop exit
PB: predicated region body
PF: predicated region fallthrough
CT: control target
= control target key end

     0   :  { %s6686_s21 = smov 0   ;;  %s8197_s0 = inlined_call_operand.vmem [shape: bf16[2,624,36], index: 0, kind: input, shape index: {}]   ;;  %s8198_s1 = inlined_call_operand.vmem [shape: bf16[36,64], index: 1, kind: input, shape index: {}]   ;;  %s8199_s2 = inlined_call_operand.vmem [shape: f32[1,64], index: 2, kind: input, shape index: {}]   ;;  %s8200_s3 = inlined_call_operand.vmem [shape: bf16[576,128], index: 3, kind: input, shape index: {}]   ;;  %s8201_s4 = inlined_call_operand.vmem [shape: f32[1,128], index: 4, kind: input, shape index: {}]   ;;  %s8202_s5 = inlined_call_operand.vmem [shape: bf16[128,560], index: 5, kind: input, shape index: {}]   ;;  %s8203_s6 = inlined_call_operand.vmem [shape: bf16[2,128,128], index: 6, kind: output, shape index: {}]  }
   0x1 LB: > { %s5316_s22 = sadd.s32 4294967295, %s6645_s21   ;;  %p5320_p0 = scmp.ge.s32.totalorder %s6645_s21, 1  ;;  %s6645_s21 = sphi %s6686_s21, %s16_s21  }
   0x2   : > { %p212_p1 = scmp.lt.s32.totalorder %s6645_s21, 3 }
   0x4   : > { %p213_p2 = pnand %p5320_p0, %p212_p1 }
   0x5   : > { %v6503_v0 = vld [vmem:[%s8198_s1] sm:$0xff] (!%p213_p2)   ;;  %v6647_v1 = vmov (!%p213_p2), 0.0   ;;  %v6504_v2 = vld [vmem:[%s8198_s1 + $0x8] sm:$0xff] (!%p213_p2)   ;;  %vm671_vm0 = vcmask (!%p213_p2), 1041408   ;;  %vm6648_vm1 = vmmov (!%p213_p2), 0   ;;  %p242_p3 = scmp.lt.s32.totalorder (!%p213_p2), %s5316_s22, 1 }
   0x6   : > { %216 = sbr.rel (%p213_p2) target bundleno = 1730 (0x6c2), region = 44  ;;  %5828 = vmatprep.subr.bf16.mxu0 (!%p213_p2), %v6647_v1  ;;  %v6505_v3 = vld [vmem:[%s8198_s1 + $0x10] ss:$0 sps:$4 sm:$0x33] (!%p213_p2)   ;;  %5834 = vmatprep.mubr.msk.bf16.mxu0 (!%p213_p2), %vm6648_vm1, %v6647_v1  ;;  %vm553_vm2 = vcmask (!%p213_p2), 293888   ;;  %vm1098_vm3 = vcmask (!%p213_p2), 523264  }
   0x7   : > { %5829 = vmatpush3.bf16.msra.mxu0 (!%p213_p2), %v6503_v0  ;;  %v673_v4 = vsel (!%p213_p2), %vm671_vm0, %v6505_v3, 0  ;;  %v6825_v32 = vld [vmem:[%s8199_s2] ss:$0 sm:$0xff] (!%p213_p2)  ;;  %s6650_s25 = smov (!%p213_p2), 64   ;;  %vm1562_vm4 = vcmask (!%p213_p2), 1048064   ;;  %vm4865_vm5 = vcmask (!%p213_p2), 392192  }
   0x8   : > { %5830 = vmatprep.subr.bf16.mxu0 (!%p213_p2), %v6647_v1 }
   0xb   : > { %5831 = vmatpush3.bf16.msra.mxu0 (!%p213_p2), %v6504_v2 }
   0xc   : > { %5832 = vmatprep.subr.bf16.mxu0 (!%p213_p2), %v6647_v1 }
   0xd   : > { %s8205_s22 = smov (!%p242_p3, %s5316_s22), 1 }
   0xe   : > { %s6490_s29 = smul.u32 312, %s8205_s22  ;;  %s5544_s17 = sshll.u32 %s8205_s22, 6 }
   0xf   : > { %5833 = vmatpush3.bf16.msra.mxu0 %v673_v4  ;;  %s8183_s20 = scalar_lea.vmem %s8203_s6, %s5544_s17 }
  0x10   : > { %s6714_s8 = scalar_lea.vmem %s8197_s0, %s6490_s29 }
  0x11   : > { %v6506_v5 = vld [vmem:[%s6714_s8] sm:$0xff]   ;;  %v6507_v6 = vld [vmem:[%s6714_s8 + $0x8] sm:$0xff]   ;;  %v6508_v7 = vld [vmem:[%s6714_s8 + $0x10] sm:$0xff]  }
  0x12   : > { %5835 = vmatmul.mubr.msk.bf16.vlgmr.msra.gmra.mrb[0].mxu0 %vm553_vm2, %v6506_v5  ;;  %v6509_v8 = vld [vmem:[%s6714_s8 + $0x18] sm:$0xff]   ;;  %v6510_v9 = vld [vmem:[%s6714_s8 + $0x20] sm:$0xff]   ;;  %v6511_v10 = vld [vmem:[%s6714_s8 + $0x28] sm:$0xff]  }
  0x13   : > { %5838 = vmatprep.mubr.msk.bf16.mxu0 %vm6648_vm1, %v6647_v1  ;;  %v6512_v11 = vld [vmem:[%s6714_s8 + $0x30] sm:$0xff]   ;;  %v6513_v12 = vld [vmem:[%s6714_s8 + $0x38] sm:$0xff]   ;;  %v6514_v13 = vld [vmem:[%s6714_s8 + $0x40] sm:$0xff]  }
  0x14   : > { %v6515_v14 = vld [vmem:[%s6714_s8 + $0x48] sm:$0xff]   ;;  %v6516_v15 = vld [vmem:[%s6714_s8 + $0x50] sm:$0xff]   ;;  %v6517_v16 = vld [vmem:[%s6714_s8 + $0x58] sm:$0xff]  }
  0x15   : > { %v6518_v17 = vld [vmem:[%s6714_s8 + $0x60] sm:$0xff]   ;;  %v6519_v18 = vld [vmem:[%s6714_s8 + $0x68] sm:$0xff]   ;;  %v6520_v19 = vld [vmem:[%s6714_s8 + $0x70] sm:$0xff]  }
  0x16   : > { %v6521_v20 = vld [vmem:[%s6714_s8 + $0x78] sm:$0xff]   ;;  %v6522_v21 = vld [vmem:[%s6714_s8 + $0x80] sm:$0xff]   ;;  %v6523_v22 = vld [vmem:[%s6714_s8 + $0x88] sm:$0xff]  }
  0x17   : > { %v6524_v23 = vld [vmem:[%s6714_s8 + $0x90] sm:$0xff]   ;;  %v6525_v24 = vld [vmem:[%s6714_s8 + $0x98] sm:$0xff]   ;;  %v6526_v25 = vld [vmem:[%s6714_s8 + $0xa0] sm:$0xff]  }
  0x18   : > { %v6527_v26 = vld [vmem:[%s6714_s8 + $0xa8] sm:$0xff]   ;;  %v6528_v27 = vld [vmem:[%s6714_s8 + $0xb0] sm:$0xff]   ;;  %v6529_v28 = vld [vmem:[%s6714_s8 + $0xb8] sm:$0xff]  }
  0x19   : > { %v6530_v29 = vld [vmem:[%s6714_s8 + $0xc0] sm:$0xff]   ;;  %v6531_v30 = vld [vmem:[%s6714_s8 + $0xc8] sm:$0xff]   ;;  %v6532_v31 = vld [vmem:[%s6714_s8 + $0xd0] sm:$0xff]  }
  0x1a   : > { %5839 = vmatmul.mubr.msk.bf16.gmra.mrb[4].mxu0 %vm553_vm2, %v6507_v6  ;;  %v6533_v36 = vld [vmem:[%s6714_s8 + $0xd8] sm:$0xff]   ;;  %v6534_v45 = vld [vmem:[%s6714_s8 + $0xe0] sm:$0xff]   ;;  %v6535_v57 = vld [vmem:[%s6714_s8 + $0xe8] sm:$0xff]  }
  0x1b   : > { %5842 = vmatprep.mubr.msk.bf16.mxu0 %vm6648_vm1, %v6647_v1 }
  0x22   : > { %5843 = vmatmul.mubr.msk.bf16.gmra.mrb[8].mxu0 %vm553_vm2, %v6508_v7 }
  0x23   : > { %5846 = vmatprep.mubr.msk.bf16.mxu0 %vm6648_vm1, %v6647_v1 }
  0x2a   : > { %5847 = vmatmul.mubr.msk.bf16.gmra.mrb[12].mxu0 %vm553_vm2, %v6509_v8 }
  0x2b   : > { %5850 = vmatprep.mubr.msk.bf16.mxu0 %vm6648_vm1, %v6647_v1 }
  0x32   : > { %5851 = vmatmul.mubr.msk.bf16.gmra.mrb[16].mxu0 %vm553_vm2, %v6510_v9  ;;  %v6536_v9 = vld [vmem:[%s6714_s8 + $0xf0] sm:$0xff]  }
  0x33   : > { %5854 = vmatprep.mubr.msk.bf16.mxu0 %vm6648_vm1, %v6647_v1 }
  0x3a   : > { %5855 = vmatmul.mubr.msk.bf16.gmra.mrb[20].mxu0 %vm553_vm2, %v6511_v10 }
  0x3b   : > { %5858 = vmatprep.mubr.msk.bf16.mxu0 %vm6648_vm1, %v6647_v1 }
  0x42   : > { %5859 = vmatmul.mubr.msk.bf16.gmra.mrb[24].mxu0 %vm553_vm2, %v6512_v11 }
  0x43   : > { %5862 = vmatprep.mubr.msk.bf16.mxu0 %vm6648_vm1, %v6647_v1 }
  0x4a   : > { %5863 = vmatmul.mubr.msk.bf16.gmra.mrb[28].mxu0 %vm553_vm2, %v6513_v12 }
  0x4b   : > { %5866 = vmatprep.mubr.msk.bf16.mxu0 %vm6648_vm1, %v6647_v1 }
  0x52   : > { %5867 = vmatmul.mubr.msk.bf16.gmra.mrb[32].mxu0 %vm553_vm2, %v6514_v13 }
  0x53   : > { %5870 = vmatprep.mubr.msk.bf16.mxu0 %vm6648_vm1, %v6647_v1 }
  0x5a   : > { %5871 = vmatmul.mubr.msk.bf16.gmra.mrb[36].mxu0 %vm553_vm2, %v6515_v14 }
  0x5b   : > { %5874 = vmatprep.mubr.msk.bf16.mxu0 %vm6648_vm1, %v6647_v1 }
  0x62   : > { %5875 = vmatmul.mubr.msk.bf16.gmra.mrb[40].mxu0 %vm553_vm2, %v6516_v15 }
  0x63   : > { %5878 = vmatprep.mubr.msk.bf16.mxu0 %vm6648_vm1, %v6647_v1 }
  0x6a   : > { %5879 = vmatmul.mubr.msk.bf16.gmra.mrb[44].mxu0 %vm553_vm2, %v6517_v16 }
  0x6b   : > { %5882 = vmatprep.mubr.msk.bf16.mxu0 %vm6648_vm1, %v6647_v1 }
  0x72   : > { %5883 = vmatmul.mubr.msk.bf16.gmra.mrb[48].mxu0 %vm553_vm2, %v6518_v17 }
  0x73   : > { %5886 = vmatprep.mubr.msk.bf16.mxu0 %vm6648_vm1, %v6647_v1 }
  0x7a   : > { %5887 = vmatmul.mubr.msk.bf16.gmra.mrb[52].mxu0 %vm553_vm2, %v6519_v18 }
  0x7b   : > { %5890 = vmatprep.mubr.msk.bf16.mxu0 %vm6648_vm1, %v6647_v1 }
  0x82   : > { %5891 = vmatmul.mubr.msk.bf16.gmra.mrb[56].mxu0 %vm553_vm2, %v6520_v19 }
  0x83   : > { %5894 = vmatprep.mubr.msk.bf16.mxu0 %vm6648_vm1, %v6647_v1 }
  0x8a   : > { %5895 = vmatmul.mubr.msk.bf16.gmra.mrb[60].mxu0 %vm553_vm2, %v6521_v20 }
  0x8b   : > { %5898 = vmatprep.mubr.msk.bf16.mxu0 %vm6648_vm1, %v6647_v1 }
  0x92   : > { %5899 = vmatmul.mubr.msk.bf16.gmra.mrb[64].mxu0 %vm553_vm2, %v6522_v21 }
  0x93   : > { %5902 = vmatprep.mubr.msk.bf16.mxu0 %vm6648_vm1, %v6647_v1 }
  0x9a   : > { %5903 = vmatmul.mubr.msk.bf16.gmra.mrb[68].mxu0 %vm553_vm2, %v6523_v22 }
  0x9b   : > { %5906 = vmatprep.mubr.msk.bf16.mxu0 %vm6648_vm1, %v6647_v1 }
  0xa2   : > { %5907 = vmatmul.mubr.msk.bf16.gmra.mrb[72].mxu0 %vm553_vm2, %v6524_v23 }
  0xa3   : > { %5910 = vmatprep.mubr.msk.bf16.mxu0 %vm6648_vm1, %v6647_v1 }
  0xaa   : > { %5911 = vmatmul.mubr.msk.bf16.gmra.mrb[76].mxu0 %vm553_vm2, %v6525_v24 }
  0xab   : > { %5914 = vmatprep.mubr.msk.bf16.mxu0 %vm6648_vm1, %v6647_v1 }
  0xb2   : > { %5915 = vmatmul.mubr.msk.bf16.gmra.mrb[80].mxu0 %vm553_vm2, %v6526_v25 }
  0xb3   : > { %5918 = vmatprep.mubr.msk.bf16.mxu0 %vm6648_vm1, %v6647_v1 }
  0xba   : > { %5919 = vmatmul.mubr.msk.bf16.gmra.mrb[84].mxu0 %vm553_vm2, %v6527_v26 }
  0xbb   : > { %5922 = vmatprep.mubr.msk.bf16.mxu0 %vm6648_vm1, %v6647_v1 }
  0xc2   : > { %5923 = vmatmul.mubr.msk.bf16.gmra.mrb[88].mxu0 %vm553_vm2, %v6528_v27  ;;  %v6537_v27 = vld [vmem:[%s6714_s8 + $0xf8] sm:$0xff]  }
  0xc3   : > { %5926 = vmatprep.mubr.msk.bf16.mxu0 %vm6648_vm1, %v6647_v1 }
  0xca   : > { %5927 = vmatmul.mubr.msk.bf16.gmra.mrb[92].mxu0 %vm553_vm2, %v6529_v28 }
  0xcb   : > { %5930 = vmatprep.mubr.msk.bf16.mxu0 %vm6648_vm1, %v6647_v1 }
  0xd2   : > { %5931 = vmatmul.mubr.msk.bf16.gmra.mrb[96].mxu0 %vm553_vm2, %v6530_v29 }
  0xd3   : > { %5934 = vmatprep.mubr.msk.bf16.mxu0 %vm6648_vm1, %v6647_v1 }
  0xda   : > { %5935 = vmatmul.mubr.msk.bf16.gmra.mrb[100].mxu0 %vm553_vm2, %v6531_v30 }
  0xdb   : > { %5938 = vmatprep.mubr.msk.bf16.mxu0 %vm6648_vm1, %v6647_v1 }
  0xe2   : > { %5939 = vmatmul.mubr.msk.bf16.gmra.mrb[104].mxu0 %vm553_vm2, %v6532_v31 }
  0xe3   : > { %5942 = vmatprep.mubr.msk.bf16.mxu0 %vm6648_vm1, %v6647_v1 }
  0xe5   : > { %v709_v33 = vpop.f32.mrb[0].mxu0 }
  0xe6   : > { %v710_v34 = vadd.f32 %v6825_v32, %v709_v33  ;;  %v5836_v35 = vpop.f32.mrb[1].mxu0 }
  0xe7   : > { %v712_v37 = vpop.f32.mrb[2].mxu0 }
  0xe8   : > { %v1020_v38 = vmax.f32 %v710_v34, 0.0  ;;  %v713_v39 = vadd.f32 %v6825_v32, %v712_v37  ;;  %v5837_v40 = vpop.f32.mrb[3].mxu0 }
  0xea   : > { %1099 = vst.msk [vmem:[#allocation2] sm:$0xff] %vm1098_vm3, %v1020_v38  ;;  %v1021_v41 = vmax.f32 %v713_v39, 0.0  ;;  %5943 = vmatmul.mubr.msk.bf16.gmra.mrb[108].mxu0 %vm553_vm2, %v6533_v36 }
  0xeb   : > { %5946 = vmatprep.mubr.msk.bf16.mxu0 %vm6648_vm1, %v6647_v1 }
  0xec   : > { %1100 = vst.msk [vmem:[#allocation2 + $0x8] sm:$0xff] %vm1098_vm3, %v1021_v41 }
  0xed   : > { %v717_v42 = vpop.f32.mrb[4].mxu0 }
  0xee   : > { %v718_v43 = vadd.f32 %v6825_v32, %v717_v42  ;;  %v5840_v44 = vpop.f32.mrb[5].mxu0 }
  0xef   : > { %v720_v46 = vpop.f32.mrb[6].mxu0 }
  0xf0   : > { %v1022_v47 = vmax.f32 %v718_v43, 0.0  ;;  %v721_v48 = vadd.f32 %v6825_v32, %v720_v46  ;;  %v5841_v49 = vpop.f32.mrb[7].mxu0  ;;  %v6538_v46 = vld [vmem:[%s6714_s8 + $0x100] sm:$0xff]  }
  0xf1   : > { %v1177_v51 = vld [vmem:[#allocation2] sm:$0xff] }
  0xf2   : > { %1101 = vst.msk [vmem:[#allocation2 + $0x10] sm:$0xff] %vm1098_vm3, %v1022_v47  ;;  %v1023_v50 = vmax.f32 %v721_v48, 0.0  ;;  %5947 = vmatmul.mubr.msk.bf16.gmra.mrb[112].mxu0 %vm553_vm2, %v6534_v45 }
  0xf3   : > { %5950 = vmatprep.mubr.msk.bf16.mxu0 %vm6648_vm1, %v6647_v1  ;;  %v1178_v52 = vld [vmem:[#allocation2 + $0x8] sm:$0xff] }
  0xf4   : > { %1102 = vst.msk [vmem:[#allocation2 + $0x18] sm:$0xff] %vm1098_vm3, %v1023_v50  ;;  %v1247_v53 = vpack.c.bf16 %v1178_v52, %v1177_v51  ;;  %v1598_v62 = vld [vmem:[#allocation2 + $0x2] sm:$0xff] }
  0xf5   : > { %v725_v54 = vpop.f32.mrb[8].mxu0 }
  0xf6   : > { %v726_v55 = vadd.f32 %v6825_v32, %v725_v54  ;;  %v5844_v56 = vpop.f32.mrb[9].mxu0  ;;  %1282 = vst.msk [vmem:[#allocation3] sm:$0xff] %vm1098_vm3, %v1247_v53 }
  0xf7   : > { %v728_v58 = vpop.f32.mrb[10].mxu0 }
  0xf8   : > { %v1024_v59 = vmax.f32 %v726_v55, 0.0  ;;  %v729_v60 = vadd.f32 %v6825_v32, %v728_v58  ;;  %v5845_v61 = vpop.f32.mrb[11].mxu0 }
  0xf9   : > { %v1599_v63 = vld [vmem:[#allocation2 + $0xa] sm:$0xff] }
  0xfa   : > { %1103 = vst.msk [vmem:[#allocation2 + $0x20] sm:$0xff] %vm1098_vm3, %v1024_v59  ;;  %v1025_v0 = vmax.f32 %v729_v60, 0.0  ;;  %5951 = vmatmul.mubr.msk.bf16.gmra.mrb[116].mxu0 %vm553_vm2, %v6535_v57  ;;  %v1668_v2 = vpack.c.bf16 %v1599_v63, %v1598_v62  ;;  %v1179_v3 = vld [vmem:[#allocation2 + $0x10] sm:$0xff]  ;;  %v6539_v61 = vld [vmem:[%s6714_s8 + $0x108] sm:$0xff]  }
  0xfb   : > { %5954 = vmatprep.mubr.msk.bf16.mxu0 %vm6648_vm1, %v6647_v1  ;;  %v1180_v4 = vld [vmem:[#allocation2 + $0x18] sm:$0xff] }
  0xfc   : > { %1104 = vst.msk [vmem:[#allocation2 + $0x28] sm:$0xff] %vm1098_vm3, %v1025_v0  ;;  %v1248_v5 = vpack.c.bf16 %v1180_v4, %v1179_v3  ;;  %1703 = vst.msk [vmem:[#allocation3 + $0x8] sm:$0xff] %vm1098_vm3, %v1668_v2  ;;  %v1600_v15 = vld [vmem:[#allocation2 + $0x12] sm:$0xff] }
  0xfd   : > { %v733_v6 = vpop.f32.mrb[12].mxu0 }
  0xfe   : > { %v734_v7 = vadd.f32 %v6825_v32, %v733_v6  ;;  %v5848_v8 = vpop.f32.mrb[13].mxu0  ;;  %1283 = vst.msk [vmem:[#allocation3 + $0x28] sm:$0xff] %vm1098_vm3, %v1248_v5 }
  0xff   : > { %v736_v10 = vpop.f32.mrb[14].mxu0 }
 0x100   : > { %v1026_v11 = vmax.f32 %v734_v7, 0.0  ;;  %v737_v12 = vadd.f32 %v6825_v32, %v736_v10  ;;  %v5849_v13 = vpop.f32.mrb[15].mxu0 }
 0x101   : > { %v1601_v16 = vld [vmem:[#allocation2 + $0x1a] sm:$0xff] }
 0x102   : > { %1105 = vst.msk [vmem:[#allocation2 + $0x30] sm:$0xff] %vm1098_vm3, %v1026_v11  ;;  %v1027_v14 = vmax.f32 %v737_v12, 0.0  ;;  %5955 = vmatmul.mubr.msk.bf16.gmra.mrb[120].mxu0 %vm553_vm2, %v6536_v9  ;;  %v2018_v17 = vld [vmem:[#allocation2 + $0x1d] sm:$0xff]  ;;  %v1669_v19 = vpack.c.bf16 %v1601_v16, %v1600_v15 }
 0x103   : > { %5958 = vmatprep.mubr.msk.bf16.mxu0 %vm6648_vm1, %v6647_v1  ;;  %v2019_v18 = vld [vmem:[#allocation2 + $0x25] sm:$0xff] }
 0x104   : > { %1106 = vst.msk [vmem:[#allocation2 + $0x38] sm:$0xff] %vm1098_vm3, %v1027_v14  ;;  %v2088_v20 = vpack.c.bf16 %v2019_v18, %v2018_v17  ;;  %v1181_v21 = vld [vmem:[#allocation2 + $0x20] sm:$0xff]  ;;  %v1182_v22 = vld [vmem:[#allocation2 + $0x28] sm:$0xff]  ;;  %1704 = vst.msk [vmem:[#allocation3 + $0x30] sm:$0xff] %vm1098_vm3, %v1669_v19 }
 0x105   : > { %v741_v23 = vpop.f32.mrb[16].mxu0  ;;  %v1249_v24 = vpack.c.bf16 %v1182_v22, %v1181_v21  ;;  %v1602_v34 = vld [vmem:[#allocation2 + $0x22] sm:$0xff]  ;;  %v6540_v22 = vld [vmem:[%s6714_s8 + $0x110] sm:$0xff]  }
 0x106   : > { %v742_v25 = vadd.f32 %v6825_v32, %v741_v23  ;;  %v5852_v26 = vpop.f32.mrb[17].mxu0  ;;  %2123 = vst.msk [vmem:[#allocation3 + $0x10] sm:$0xff] %vm1098_vm3, %v2088_v20 }
 0x107   : > { %v744_v28 = vpop.f32.mrb[18].mxu0  ;;  %1284 = vst.msk [vmem:[#allocation3 + $0x50] sm:$0xff] %vm1098_vm3, %v1249_v24 }
 0x108   : > { %v1028_v29 = vmax.f32 %v742_v25, 0.0  ;;  %v745_v30 = vadd.f32 %v6825_v32, %v744_v28  ;;  %v5853_v31 = vpop.f32.mrb[19].mxu0 }
 0x109   : > { %v1603_v35 = vld [vmem:[#allocation2 + $0x2a] sm:$0xff] }
 0x10a   : > { %1107 = vst.msk [vmem:[#allocation2 + $0x40] sm:$0xff] %vm1098_vm3, %v1028_v29  ;;  %v1029_v33 = vmax.f32 %v745_v30, 0.0  ;;  %5959 = vmatmul.mubr.msk.bf16.gmra.mrb[124].mxu0 %vm553_vm2, %v6537_v27  ;;  %v2020_v36 = vld [vmem:[#allocation2 + $0x2d] sm:$0xff]  ;;  %v1670_v38 = vpack.c.bf16 %v1603_v35, %v1602_v34 }
 0x10b   : > { %5962 = vmatprep.mubr.msk.bf16.mxu0 %vm6648_vm1, %v6647_v1  ;;  %v2021_v37 = vld [vmem:[#allocation2 + $0x35] sm:$0xff] }
 0x10c   : > { %1108 = vst.msk [vmem:[#allocation2 + $0x48] sm:$0xff] %vm1098_vm3, %v1029_v33  ;;  %v2089_v39 = vpack.c.bf16 %v2021_v37, %v2020_v36  ;;  %v1183_v40 = vld [vmem:[#allocation2 + $0x30] sm:$0xff]  ;;  %v1184_v41 = vld [vmem:[#allocation2 + $0x38] sm:$0xff]  ;;  %1705 = vst.msk [vmem:[#allocation3 + $0x58] sm:$0xff] %vm1098_vm3, %v1670_v38 }
 0x10d   : > { %v749_v42 = vpop.f32.mrb[20].mxu0  ;;  %v1250_v43 = vpack.c.bf16 %v1184_v41, %v1183_v40  ;;  %v2438_v52 = vld [vmem:[#allocation2 + $0x38] sm:$0xff] }
 0x10e   : > { %v750_v44 = vadd.f32 %v6825_v32, %v749_v42  ;;  %v5856_v45 = vpop.f32.mrb[21].mxu0  ;;  %2124 = vst.msk [vmem:[#allocation3 + $0x38] sm:$0xff] %vm1098_vm3, %v2089_v39  ;;  %v1604_v63 = vld [vmem:[#allocation2 + $0x32] sm:$0xff] }
 0x10f   : > { %v752_v47 = vpop.f32.mrb[22].mxu0  ;;  %1285 = vst.msk [vmem:[#allocation3 + $0x78] sm:$0xff] %vm1098_vm3, %v1250_v43 }
 0x110   : > { %v1030_v48 = vmax.f32 %v750_v44, 0.0  ;;  %v753_v49 = vadd.f32 %v6825_v32, %v752_v47  ;;  %v5857_v50 = vpop.f32.mrb[23].mxu0  ;;  %v6541_v47 = vld [vmem:[%s6714_s8 + $0x118] sm:$0xff]  }
 0x111   : > { %v2439_v53 = vld [vmem:[#allocation2 + $0x40] sm:$0xff] }
 0x112   : > { %1109 = vst.msk [vmem:[#allocation2 + $0x50] sm:$0xff] %vm1098_vm3, %v1030_v48  ;;  %v1031_v51 = vmax.f32 %v753_v49, 0.0  ;;  %5963 = vmatmul.mubr.msk.bf16.gmra.mrb[128].mxu0 %vm553_vm2, %v6538_v46  ;;  %v2858_v54 = vld [vmem:[#allocation2 + $0x3a] sm:$0xff]  ;;  %v2508_v56 = vpack.c.bf16 %v2439_v53, %v2438_v52 }
 0x113   : > { %v2859_v55 = vld [vmem:[#allocation2 + $0x42] sm:$0xff]  ;;  %5966 = vmatprep.mubr.msk.bf16.mxu0 %vm6648_vm1, %v6647_v1  ;;  %v1605_v5 = vld [vmem:[#allocation2 + $0x3a] sm:$0xff] }
 0x114   : > { %v2928_v57 = vpack.c.bf16 %v2859_v55, %v2858_v54  ;;  %1110 = vst.msk [vmem:[#allocation2 + $0x58] sm:$0xff] %vm1098_vm3, %v1031_v51  ;;  %v2022_v58 = vld [vmem:[#allocation2 + $0x3d] sm:$0xff]  ;;  %v2023_v59 = vld [vmem:[#allocation2 + $0x45] sm:$0xff]  ;;  %2543 = vst.msk [vmem:[#allocation3 + $0x18] sm:$0xff] %vm1098_vm3, %v2508_v56  ;;  %v1671_v8 = vpack.c.bf16 %v1605_v5, %v1604_v63 }
 0x115   : > { %v757_v60 = vpop.f32.mrb[24].mxu0  ;;  %v2090_v62 = vpack.c.bf16 %v2023_v59, %v2022_v58  ;;  %v1185_v3 = vld [vmem:[#allocation2 + $0x40] sm:$0xff]  ;;  %v1186_v4 = vld [vmem:[#allocation2 + $0x48] sm:$0xff] }
 0x116   : > { %2963 = vst.msk [vmem:[#allocation3 + $0x20] sm:$0xff] %vm1098_vm3, %v2928_v57  ;;  %v758_v0 = vadd.f32 %v6825_v32, %v757_v60  ;;  %v5860_v2 = vpop.f32.mrb[25].mxu0  ;;  %v1251_v7 = vpack.c.bf16 %v1186_v4, %v1185_v3  ;;  %1706 = vst.msk [vmem:[#allocation3 + $0x80] sm:$0xff] %vm1098_vm3, %v1671_v8  ;;  %v2440_v13 = vld [vmem:[#allocation2 + $0x48] sm:$0xff]  ;;  %v6542_v8 = vld [vmem:[%s6714_s8 + $0x120] sm:$0xff]  }
 0x117   : > { %v760_v6 = vpop.f32.mrb[26].mxu0  ;;  %2125 = vst.msk [vmem:[#allocation3 + $0x60] sm:$0xff] %vm1098_vm3, %v2090_v62  ;;  %v1606_v24 = vld [vmem:[#allocation2 + $0x42] sm:$0xff] }
 0x118   : > { %v1032_v9 = vmax.f32 %v758_v0, 0.0  ;;  %v761_v10 = vadd.f32 %v6825_v32, %v760_v6  ;;  %v5861_v11 = vpop.f32.mrb[27].mxu0  ;;  %1286 = vst.msk [vmem:[#allocation3 + $0xa0] sm:$0xff] %vm1098_vm3, %v1251_v7 }
 0x119   : > { %v2441_v14 = vld [vmem:[#allocation2 + $0x50] sm:$0xff] }
 0x11a   : > { %1111 = vst.msk [vmem:[#allocation2 + $0x60] sm:$0xff] %vm1098_vm3, %v1032_v9  ;;  %v1033_v12 = vmax.f32 %v761_v10, 0.0  ;;  %5967 = vmatmul.mubr.msk.bf16.gmra.mrb[132].mxu0 %vm553_vm2, %v6539_v61  ;;  %v2860_v15 = vld [vmem:[#allocation2 + $0x4a] sm:$0xff]  ;;  %v2509_v17 = vpack.c.bf16 %v2441_v14, %v2440_v13 }
 0x11b   : > { %v2861_v16 = vld [vmem:[#allocation2 + $0x52] sm:$0xff]  ;;  %5970 = vmatprep.mubr.msk.bf16.mxu0 %vm6648_vm1, %v6647_v1  ;;  %v1607_v29 = vld [vmem:[#allocation2 + $0x4a] sm:$0xff] }
 0x11c   : > { %1112 = vst.msk [vmem:[#allocation2 + $0x68] sm:$0xff] %vm1098_vm3, %v1033_v12  ;;  %v2024_v18 = vld [vmem:[#allocation2 + $0x4d] sm:$0xff]  ;;  %v2025_v19 = vld [vmem:[#allocation2 + $0x55] sm:$0xff]  ;;  %v2929_v20 = vpack.c.bf16 %v2861_v16, %v2860_v15  ;;  %2544 = vst.msk [vmem:[#allocation3 + $0x40] sm:$0xff] %vm1098_vm3, %v2509_v17  ;;  %v1672_v33 = vpack.c.bf16 %v1607_v29, %v1606_v24 }
 0x11d   : > { %v765_v21 = vpop.f32.mrb[28].mxu0  ;;  %v2091_v23 = vpack.c.bf16 %v2025_v19, %v2024_v18  ;;  %v1187_v27 = vld [vmem:[#allocation2 + $0x50] sm:$0xff]  ;;  %v1188_v28 = vld [vmem:[#allocation2 + $0x58] sm:$0xff] }
 0x11e   : > { %v766_v25 = vadd.f32 %v6825_v32, %v765_v21  ;;  %v5864_v26 = vpop.f32.mrb[29].mxu0  ;;  %2964 = vst.msk [vmem:[#allocation3 + $0x48] sm:$0xff] %vm1098_vm3, %v2929_v20  ;;  %v1252_v31 = vpack.c.bf16 %v1188_v28, %v1187_v27  ;;  %1707 = vst.msk [vmem:[#allocation3 + $0xa8] sm:$0xff] %vm1098_vm3, %v1672_v33  ;;  %v2442_v38 = vld [vmem:[#allocation2 + $0x58] sm:$0xff]  ;;  %v6543_v33 = vld [vmem:[%s6714_s8 + $0x128] sm:$0xff]  }
 0x11f   : > { %v768_v30 = vpop.f32.mrb[30].mxu0  ;;  %2126 = vst.msk [vmem:[#allocation3 + $0x88] sm:$0xff] %vm1098_vm3, %v2091_v23  ;;  %v1608_v49 = vld [vmem:[#allocation2 + $0x52] sm:$0xff] }
 0x120   : > { %v1034_v34 = vmax.f32 %v766_v25, 0.0  ;;  %v769_v35 = vadd.f32 %v6825_v32, %v768_v30  ;;  %v5865_v36 = vpop.f32.mrb[31].mxu0  ;;  %1287 = vst.msk [vmem:[#allocation3 + $0xc8] sm:$0xff] %vm1098_vm3, %v1252_v31 }
 0x121   : > { %v2443_v39 = vld [vmem:[#allocation2 + $0x60] sm:$0xff] }
 0x122   : > { %1113 = vst.msk [vmem:[#allocation2 + $0x70] sm:$0xff] %vm1098_vm3, %v1034_v34  ;;  %v1035_v37 = vmax.f32 %v769_v35, 0.0  ;;  %5971 = vmatmul.mubr.msk.bf16.gmra.mrb[136].mxu0 %vm553_vm2, %v6540_v22  ;;  %v2862_v40 = vld [vmem:[#allocation2 + $0x5a] sm:$0xff]  ;;  %v2510_v42 = vpack.c.bf16 %v2443_v39, %v2442_v38 }
 0x123   : > { %v2863_v41 = vld [vmem:[#allocation2 + $0x62] sm:$0xff]  ;;  %5974 = vmatprep.mubr.msk.bf16.mxu0 %vm6648_vm1, %v6647_v1  ;;  %v1609_v54 = vld [vmem:[#allocation2 + $0x5a] sm:$0xff] }
 0x124   : > { %1114 = vst.msk [vmem:[#allocation2 + $0x78] sm:$0xff] %vm1098_vm3, %v1035_v37  ;;  %v2026_v43 = vld [vmem:[#allocation2 + $0x5d] sm:$0xff]  ;;  %v2027_v44 = vld [vmem:[#allocation2 + $0x65] sm:$0xff]  ;;  %v2930_v45 = vpack.c.bf16 %v2863_v41, %v2862_v40  ;;  %2545 = vst.msk [vmem:[#allocation3 + $0x68] sm:$0xff] %vm1098_vm3, %v2510_v42  ;;  %v1673_v57 = vpack.c.bf16 %v1609_v54, %v1608_v49 }
 0x125   : > { %v773_v46 = vpop.f32.mrb[32].mxu0  ;;  %v2092_v48 = vpack.c.bf16 %v2027_v44, %v2026_v43  ;;  %v1189_v52 = vld [vmem:[#allocation2 + $0x60] sm:$0xff]  ;;  %v1190_v53 = vld [vmem:[#allocation2 + $0x68] sm:$0xff] }
 0x126   : > { %v774_v50 = vadd.f32 %v6825_v32, %v773_v46  ;;  %v5868_v51 = vpop.f32.mrb[33].mxu0  ;;  %2965 = vst.msk [vmem:[#allocation3 + $0x70] sm:$0xff] %vm1098_vm3, %v2930_v45  ;;  %v1253_v56 = vpack.c.bf16 %v1190_v53, %v1189_v52  ;;  %1708 = vst.msk [vmem:[#allocation3 + $0xd0] sm:$0xff] %vm1098_vm3, %v1673_v57  ;;  %v2444_v62 = vld [vmem:[#allocation2 + $0x68] sm:$0xff]  ;;  %v6544_v57 = vld [vmem:[%s6714_s8 + $0x130] sm:$0xff]  }
 0x127   : > { %v776_v55 = vpop.f32.mrb[34].mxu0  ;;  %2127 = vst.msk [vmem:[#allocation3 + $0xb0] sm:$0xff] %vm1098_vm3, %v2092_v48  ;;  %v1610_v10 = vld [vmem:[#allocation2 + $0x62] sm:$0xff] }
 0x128   : > { %v1036_v58 = vmax.f32 %v774_v50, 0.0  ;;  %v777_v59 = vadd.f32 %v6825_v32, %v776_v55  ;;  %v5869_v60 = vpop.f32.mrb[35].mxu0  ;;  %1288 = vst.msk [vmem:[#allocation3 + $0xf0] sm:$0xff] %vm1098_vm3, %v1253_v56 }
 0x129   : > { %v2445_v63 = vld [vmem:[#allocation2 + $0x70] sm:$0xff] }
 0x12a   : > { %1115 = vst.msk [vmem:[#allocation2 + $0x80] sm:$0xff] %vm1098_vm3, %v1036_v58  ;;  %v1037_v61 = vmax.f32 %v777_v59, 0.0  ;;  %5975 = vmatmul.mubr.msk.bf16.gmra.mrb[140].mxu0 %vm553_vm2, %v6541_v47  ;;  %v2864_v0 = vld [vmem:[#allocation2 + $0x6a] sm:$0xff]  ;;  %v2511_v3 = vpack.c.bf16 %v2445_v63, %v2444_v62 }
 0x12b   : > { %v2865_v2 = vld [vmem:[#allocation2 + $0x72] sm:$0xff]  ;;  %5978 = vmatprep.mubr.msk.bf16.mxu0 %vm6648_vm1, %v6647_v1  ;;  %v1611_v15 = vld [vmem:[#allocation2 + $0x6a] sm:$0xff] }
 0x12c   : > { %1116 = vst.msk [vmem:[#allocation2 + $0x88] sm:$0xff] %vm1098_vm3, %v1037_v61  ;;  %v2028_v4 = vld [vmem:[#allocation2 + $0x6d] sm:$0xff]  ;;  %v2029_v5 = vld [vmem:[#allocation2 + $0x75] sm:$0xff]  ;;  %v2931_v6 = vpack.c.bf16 %v2865_v2, %v2864_v0  ;;  %2546 = vst.msk [vmem:[#allocation3 + $0x90] sm:$0xff] %vm1098_vm3, %v2511_v3  ;;  %v1674_v18 = vpack.c.bf16 %v1611_v15, %v1610_v10 }
 0x12d   : > { %v781_v7 = vpop.f32.mrb[36].mxu0  ;;  %v2093_v9 = vpack.c.bf16 %v2029_v5, %v2028_v4  ;;  %v1191_v13 = vld [vmem:[#allocation2 + $0x70] sm:$0xff]  ;;  %v1192_v14 = vld [vmem:[#allocation2 + $0x78] sm:$0xff] }
 0x12e   : > { %v782_v11 = vadd.f32 %v6825_v32, %v781_v7  ;;  %v5872_v12 = vpop.f32.mrb[37].mxu0  ;;  %2966 = vst.msk [vmem:[#allocation3 + $0x98] sm:$0xff] %vm1098_vm3, %v2931_v6  ;;  %v1254_v17 = vpack.c.bf16 %v1192_v14, %v1191_v13  ;;  %1709 = vst.msk [vmem:[#allocation3 + $0xf8] sm:$0xff] %vm1098_vm3, %v1674_v18  ;;  %v2446_v23 = vld [vmem:[#allocation2 + $0x78] sm:$0xff] }
 0x12f   : > { %v784_v16 = vpop.f32.mrb[38].mxu0  ;;  %2128 = vst.msk [vmem:[#allocation3 + $0xd8] sm:$0xff] %vm1098_vm3, %v2093_v9  ;;  %v1612_v35 = vld [vmem:[#allocation2 + $0x72] sm:$0xff] }
 0x130   : > { %v1038_v19 = vmax.f32 %v782_v11, 0.0  ;;  %v785_v20 = vadd.f32 %v6825_v32, %v784_v16  ;;  %v5873_v21 = vpop.f32.mrb[39].mxu0  ;;  %1289 = vst.msk [vmem:[#allocation3 + $0x118] sm:$0xff] %vm1098_vm3, %v1254_v17 }
 0x131   : > { %v2447_v24 = vld [vmem:[#allocation2 + $0x80] sm:$0xff] }
 0x132   : > { %1117 = vst.msk [vmem:[#allocation2 + $0x90] sm:$0xff] %vm1098_vm3, %v1038_v19  ;;  %v1039_v22 = vmax.f32 %v785_v20, 0.0  ;;  %5979 = vmatmul.mubr.msk.bf16.gmra.mrb[144].mxu0 %vm553_vm2, %v6542_v8  ;;  %v2866_v25 = vld [vmem:[#allocation2 + $0x7a] sm:$0xff]  ;;  %v2512_v27 = vpack.c.bf16 %v2447_v24, %v2446_v23 }
 0x133   : > { %v2867_v26 = vld [vmem:[#allocation2 + $0x82] sm:$0xff]  ;;  %5982 = vmatprep.mubr.msk.bf16.mxu0 %vm6648_vm1, %v6647_v1  ;;  %v1613_v40 = vld [vmem:[#allocation2 + $0x7a] sm:$0xff] }
 0x134   : > { %1118 = vst.msk [vmem:[#allocation2 + $0x98] sm:$0xff] %vm1098_vm3, %v1039_v22  ;;  %v2030_v28 = vld [vmem:[#allocation2 + $0x7d] sm:$0xff]  ;;  %v2031_v29 = vld [vmem:[#allocation2 + $0x85] sm:$0xff]  ;;  %v2932_v30 = vpack.c.bf16 %v2867_v26, %v2866_v25  ;;  %2547 = vst.msk [vmem:[#allocation3 + $0xb8] sm:$0xff] %vm1098_vm3, %v2512_v27  ;;  %v1675_v43 = vpack.c.bf16 %v1613_v40, %v1612_v35 }
 0x135   : > { %v789_v31 = vpop.f32.mrb[40].mxu0  ;;  %v2094_v34 = vpack.c.bf16 %v2031_v29, %v2030_v28  ;;  %v1193_v38 = vld [vmem:[#allocation2 + $0x80] sm:$0xff]  ;;  %v1194_v39 = vld [vmem:[#allocation2 + $0x88] sm:$0xff] }
 0x136   : > { %v790_v36 = vadd.f32 %v6825_v32, %v789_v31  ;;  %v5876_v37 = vpop.f32.mrb[41].mxu0  ;;  %2967 = vst.msk [vmem:[#allocation3 + $0xc0] sm:$0xff] %vm1098_vm3, %v2932_v30  ;;  %v1255_v42 = vpack.c.bf16 %v1194_v39, %v1193_v38  ;;  %1710 = vst.msk [vmem:[#allocation3 + $0x120] sm:$0xff] %vm1098_vm3, %v1675_v43  ;;  %v2448_v48 = vld [vmem:[#allocation2 + $0x88] sm:$0xff] }
 0x137   : > { %v792_v41 = vpop.f32.mrb[42].mxu0  ;;  %2129 = vst.msk [vmem:[#allocation3 + $0x100] sm:$0xff] %vm1098_vm3, %v2094_v34  ;;  %v1614_v59 = vld [vmem:[#allocation2 + $0x82] sm:$0xff] }
 0x138   : > { %v1040_v44 = vmax.f32 %v790_v36, 0.0  ;;  %v793_v45 = vadd.f32 %v6825_v32, %v792_v41  ;;  %v5877_v46 = vpop.f32.mrb[43].mxu0  ;;  %1290 = vst.msk [vmem:[#allocation3 + $0x140] sm:$0xff] %vm1098_vm3, %v1255_v42 }
 0x139   : > { %v2449_v49 = vld [vmem:[#allocation2 + $0x90] sm:$0xff] }
 0x13a   : > { %1119 = vst.msk [vmem:[#allocation2 + $0xa0] sm:$0xff] %vm1098_vm3, %v1040_v44  ;;  %v1041_v47 = vmax.f32 %v793_v45, 0.0  ;;  %5983 = vmatmul.mubr.msk.bf16.gmra.mrb[148].mxu0 %vm553_vm2, %v6543_v33  ;;  %v2868_v50 = vld [vmem:[#allocation2 + $0x8a] sm:$0xff]  ;;  %v2513_v52 = vpack.c.bf16 %v2449_v49, %v2448_v48 }
 0x13b   : > { %v2869_v51 = vld [vmem:[#allocation2 + $0x92] sm:$0xff]  ;;  %5986 = vmatprep.mubr.msk.bf16.mxu0 %vm6648_vm1, %v6647_v1  ;;  %v1615_v0 = vld [vmem:[#allocation2 + $0x8a] sm:$0xff] }
 0x13c   : > { %1120 = vst.msk [vmem:[#allocation2 + $0xa8] sm:$0xff] %vm1098_vm3, %v1041_v47  ;;  %v2032_v53 = vld [vmem:[#allocation2 + $0x8d] sm:$0xff]  ;;  %v2033_v54 = vld [vmem:[#allocation2 + $0x95] sm:$0xff]  ;;  %v2933_v55 = vpack.c.bf16 %v2869_v51, %v2868_v50  ;;  %2548 = vst.msk [vmem:[#allocation3 + $0xe0] sm:$0xff] %vm1098_vm3, %v2513_v52  ;;  %v1676_v4 = vpack.c.bf16 %v1615_v0, %v1614_v59 }
 0x13d   : > { %v797_v56 = vpop.f32.mrb[44].mxu0  ;;  %v2095_v58 = vpack.c.bf16 %v2033_v54, %v2032_v53  ;;  %v1195_v62 = vld [vmem:[#allocation2 + $0x90] sm:$0xff]  ;;  %v1196_v63 = vld [vmem:[#allocation2 + $0x98] sm:$0xff] }
 0x13e   : > { %v798_v60 = vadd.f32 %v6825_v32, %v797_v56  ;;  %v5880_v61 = vpop.f32.mrb[45].mxu0  ;;  %2968 = vst.msk [vmem:[#allocation3 + $0xe8] sm:$0xff] %vm1098_vm3, %v2933_v55  ;;  %v1256_v3 = vpack.c.bf16 %v1196_v63, %v1195_v62  ;;  %1711 = vst.msk [vmem:[#allocation3 + $0x148] sm:$0xff] %vm1098_vm3, %v1676_v4  ;;  %v2450_v9 = vld [vmem:[#allocation2 + $0x98] sm:$0xff] }
 0x13f   : > { %v800_v2 = vpop.f32.mrb[46].mxu0  ;;  %2130 = vst.msk [vmem:[#allocation3 + $0x128] sm:$0xff] %vm1098_vm3, %v2095_v58  ;;  %v1616_v19 = vld [vmem:[#allocation2 + $0x92] sm:$0xff] }
 0x140   : > { %v1042_v5 = vmax.f32 %v798_v60, 0.0  ;;  %v801_v6 = vadd.f32 %v6825_v32, %v800_v2  ;;  %v5881_v7 = vpop.f32.mrb[47].mxu0  ;;  %1291 = vst.msk [vmem:[#allocation3 + $0x168] sm:$0xff] %vm1098_vm3, %v1256_v3 }
 0x141   : > { %v2451_v10 = vld [vmem:[#allocation2 + $0xa0] sm:$0xff] }
 0x142   : > { %1121 = vst.msk [vmem:[#allocation2 + $0xb0] sm:$0xff] %vm1098_vm3, %v1042_v5  ;;  %v1043_v8 = vmax.f32 %v801_v6, 0.0  ;;  %5987 = vmatmul.mubr.msk.bf16.gmra.mrb[152].mxu0 %vm553_vm2, %v6544_v57  ;;  %v2870_v11 = vld [vmem:[#allocation2 + $0x9a] sm:$0xff]  ;;  %v2514_v13 = vpack.c.bf16 %v2451_v10, %v2450_v9 }
 0x143   : > { %v2871_v12 = vld [vmem:[#allocation2 + $0xa2] sm:$0xff]  ;;  %v1617_v24 = vld [vmem:[#allocation2 + $0x9a] sm:$0xff] }
 0x144   : > { %1122 = vst.msk [vmem:[#allocation2 + $0xb8] sm:$0xff] %vm1098_vm3, %v1043_v8  ;;  %v2034_v14 = vld [vmem:[#allocation2 + $0x9d] sm:$0xff]  ;;  %v2035_v15 = vld [vmem:[#allocation2 + $0xa5] sm:$0xff]  ;;  %v2934_v16 = vpack.c.bf16 %v2871_v12, %v2870_v11  ;;  %2549 = vst.msk [vmem:[#allocation3 + $0x108] sm:$0xff] %vm1098_vm3, %v2514_v13  ;;  %v1677_v27 = vpack.c.bf16 %v1617_v24, %v1616_v19 }
 0x145   : > { %v805_v17 = vpop.f32.mrb[48].mxu0  ;;  %v2096_v18 = vpack.c.bf16 %v2035_v15, %v2034_v14  ;;  %v1197_v22 = vld [vmem:[#allocation2 + $0xa0] sm:$0xff]  ;;  %v1198_v23 = vld [vmem:[#allocation2 + $0xa8] sm:$0xff] }
 0x146   : > { %v806_v20 = vadd.f32 %v6825_v32, %v805_v17  ;;  %v5884_v21 = vpop.f32.mrb[49].mxu0  ;;  %2969 = vst.msk [vmem:[#allocation3 + $0x110] sm:$0xff] %vm1098_vm3, %v2934_v16  ;;  %v1257_v26 = vpack.c.bf16 %v1198_v23, %v1197_v22  ;;  %1712 = vst.msk [vmem:[#allocation3 + $0x170] sm:$0xff] %vm1098_vm3, %v1677_v27  ;;  %v2452_v33 = vld [vmem:[#allocation2 + $0xa8] sm:$0xff] }
 0x147   : > { %v808_v25 = vpop.f32.mrb[50].mxu0  ;;  %2131 = vst.msk [vmem:[#allocation3 + $0x150] sm:$0xff] %vm1098_vm3, %v2096_v18  ;;  %v1618_v43 = vld [vmem:[#allocation2 + $0xa2] sm:$0xff] }
 0x148   : > { %v1044_v28 = vmax.f32 %v806_v20, 0.0  ;;  %v809_v29 = vadd.f32 %v6825_v32, %v808_v25  ;;  %v5885_v30 = vpop.f32.mrb[51].mxu0  ;;  %1292 = vst.msk [vmem:[#allocation3 + $0x190] sm:$0xff] %vm1098_vm3, %v1257_v26 }
 0x149   : > { %v2453_v34 = vld [vmem:[#allocation2 + $0xb0] sm:$0xff] }
 0x14a   : > { %1123 = vst.msk [vmem:[#allocation2 + $0xc0] sm:$0xff] %vm1098_vm3, %v1044_v28  ;;  %v1045_v31 = vmax.f32 %v809_v29, 0.0  ;;  %v2872_v35 = vld [vmem:[#allocation2 + $0xaa] sm:$0xff]  ;;  %v2515_v37 = vpack.c.bf16 %v2453_v34, %v2452_v33 }
 0x14b   : > { %v2873_v36 = vld [vmem:[#allocation2 + $0xb2] sm:$0xff]  ;;  %v1619_v48 = vld [vmem:[#allocation2 + $0xaa] sm:$0xff] }
 0x14c   : > { %1124 = vst.msk [vmem:[#allocation2 + $0xc8] sm:$0xff] %vm1098_vm3, %v1045_v31  ;;  %v2036_v38 = vld [vmem:[#allocation2 + $0xad] sm:$0xff]  ;;  %v2037_v39 = vld [vmem:[#allocation2 + $0xb5] sm:$0xff]  ;;  %v2935_v40 = vpack.c.bf16 %v2873_v36, %v2872_v35  ;;  %2550 = vst.msk [vmem:[#allocation3 + $0x130] sm:$0xff] %vm1098_vm3, %v2515_v37  ;;  %v1678_v51 = vpack.c.bf16 %v1619_v48, %v1618_v43 }
 0x14d   : > { %v813_v41 = vpop.f32.mrb[52].mxu0  ;;  %v2097_v42 = vpack.c.bf16 %v2037_v39, %v2036_v38  ;;  %v1199_v46 = vld [vmem:[#allocation2 + $0xb0] sm:$0xff]  ;;  %v1200_v47 = vld [vmem:[#allocation2 + $0xb8] sm:$0xff] }
 0x14e   : > { %v814_v44 = vadd.f32 %v6825_v32, %v813_v41  ;;  %v5888_v45 = vpop.f32.mrb[53].mxu0  ;;  %2970 = vst.msk [vmem:[#allocation3 + $0x138] sm:$0xff] %vm1098_vm3, %v2935_v40  ;;  %v1258_v50 = vpack.c.bf16 %v1200_v47, %v1199_v46  ;;  %1713 = vst.msk [vmem:[#allocation3 + $0x198] sm:$0xff] %vm1098_vm3, %v1678_v51  ;;  %v2454_v56 = vld [vmem:[#allocation2 + $0xb8] sm:$0xff] }
 0x14f   : > { %v816_v49 = vpop.f32.mrb[54].mxu0  ;;  %2132 = vst.msk [vmem:[#allocation3 + $0x178] sm:$0xff] %vm1098_vm3, %v2097_v42  ;;  %v1620_v3 = vld [vmem:[#allocation2 + $0xb2] sm:$0xff] }
 0x150   : > { %v1046_v52 = vmax.f32 %v814_v44, 0.0  ;;  %v817_v53 = vadd.f32 %v6825_v32, %v816_v49  ;;  %v5889_v54 = vpop.f32.mrb[55].mxu0  ;;  %1293 = vst.msk [vmem:[#allocation3 + $0x1b8] sm:$0xff] %vm1098_vm3, %v1258_v50 }
 0x151   : > { %v2455_v57 = vld [vmem:[#allocation2 + $0xc0] sm:$0xff] }
 0x152   : > { %1125 = vst.msk [vmem:[#allocation2 + $0xd0] sm:$0xff] %vm1098_vm3, %v1046_v52  ;;  %v1047_v55 = vmax.f32 %v817_v53, 0.0  ;;  %v2874_v58 = vld [vmem:[#allocation2 + $0xba] sm:$0xff]  ;;  %v2516_v60 = vpack.c.bf16 %v2455_v57, %v2454_v56 }
 0x153   : > { %v2875_v59 = vld [vmem:[#allocation2 + $0xc2] sm:$0xff]  ;;  %v1621_v8 = vld [vmem:[#allocation2 + $0xba] sm:$0xff] }
 0x154   : > { %1126 = vst.msk [vmem:[#allocation2 + $0xd8] sm:$0xff] %vm1098_vm3, %v1047_v55  ;;  %v2038_v61 = vld [vmem:[#allocation2 + $0xbd] sm:$0xff]  ;;  %v2039_v62 = vld [vmem:[#allocation2 + $0xc5] sm:$0xff]  ;;  %v2936_v63 = vpack.c.bf16 %v2875_v59, %v2874_v58  ;;  %2551 = vst.msk [vmem:[#allocation3 + $0x158] sm:$0xff] %vm1098_vm3, %v2516_v60  ;;  %v1679_v11 = vpack.c.bf16 %v1621_v8, %v1620_v3 }
 0x155   : > { %v821_v0 = vpop.f32.mrb[56].mxu0  ;;  %v2098_v2 = vpack.c.bf16 %v2039_v62, %v2038_v61  ;;  %v1201_v6 = vld [vmem:[#allocation2 + $0xc0] sm:$0xff]  ;;  %v1202_v7 = vld [vmem:[#allocation2 + $0xc8] sm:$0xff] }
 0x156   : > { %v822_v4 = vadd.f32 %v6825_v32, %v821_v0  ;;  %v5892_v5 = vpop.f32.mrb[57].mxu0  ;;  %2971 = vst.msk [vmem:[#allocation3 + $0x160] sm:$0xff] %vm1098_vm3, %v2936_v63  ;;  %v1259_v10 = vpack.c.bf16 %v1202_v7, %v1201_v6  ;;  %1714 = vst.msk [vmem:[#allocation3 + $0x1c0] sm:$0xff] %vm1098_vm3, %v1679_v11  ;;  %v2456_v16 = vld [vmem:[#allocation2 + $0xc8] sm:$0xff] }
 0x157   : > { %v824_v9 = vpop.f32.mrb[58].mxu0  ;;  %2133 = vst.msk [vmem:[#allocation3 + $0x1a0] sm:$0xff] %vm1098_vm3, %v2098_v2  ;;  %v1622_v26 = vld [vmem:[#allocation2 + $0xc2] sm:$0xff] }
 0x158   : > { %v1048_v12 = vmax.f32 %v822_v4, 0.0  ;;  %v825_v13 = vadd.f32 %v6825_v32, %v824_v9  ;;  %v5893_v14 = vpop.f32.mrb[59].mxu0  ;;  %1294 = vst.msk [vmem:[#allocation3 + $0x1e0] sm:$0xff] %vm1098_vm3, %v1259_v10 }
 0x159   : > { %v2457_v17 = vld [vmem:[#allocation2 + $0xd0] sm:$0xff] }
 0x15a   : > { %1127 = vst.msk [vmem:[#allocation2 + $0xe0] sm:$0xff] %vm1098_vm3, %v1048_v12  ;;  %v1049_v15 = vmax.f32 %v825_v13, 0.0  ;;  %v2876_v18 = vld [vmem:[#allocation2 + $0xca] sm:$0xff]  ;;  %v2517_v20 = vpack.c.bf16 %v2457_v17, %v2456_v16 }
 0x15b   : > { %v2877_v19 = vld [vmem:[#allocation2 + $0xd2] sm:$0xff]  ;;  %v1623_v31 = vld [vmem:[#allocation2 + $0xca] sm:$0xff] }
 0x15c   : > { %1128 = vst.msk [vmem:[#allocation2 + $0xe8] sm:$0xff] %vm1098_vm3, %v1049_v15  ;;  %v2040_v21 = vld [vmem:[#allocation2 + $0xcd] sm:$0xff]  ;;  %v2041_v22 = vld [vmem:[#allocation2 + $0xd5] sm:$0xff]  ;;  %v2937_v23 = vpack.c.bf16 %v2877_v19, %v2876_v18  ;;  %2552 = vst.msk [vmem:[#allocation3 + $0x180] sm:$0xff] %vm1098_vm3, %v2517_v20  ;;  %v1680_v35 = vpack.c.bf16 %v1623_v31, %v1622_v26 }
 0x15d   : > { %v829_v24 = vpop.f32.mrb[60].mxu0  ;;  %v2099_v25 = vpack.c.bf16 %v2041_v22, %v2040_v21  ;;  %v1203_v29 = vld [vmem:[#allocation2 + $0xd0] sm:$0xff]  ;;  %v1204_v30 = vld [vmem:[#allocation2 + $0xd8] sm:$0xff] }
 0x15e   : > { %v830_v27 = vadd.f32 %v6825_v32, %v829_v24  ;;  %v5896_v28 = vpop.f32.mrb[61].mxu0  ;;  %2972 = vst.msk [vmem:[#allocation3 + $0x188] sm:$0xff] %vm1098_vm3, %v2937_v23  ;;  %v1260_v34 = vpack.c.bf16 %v1204_v30, %v1203_v29  ;;  %1715 = vst.msk [vmem:[#allocation3 + $0x1e8] sm:$0xff] %vm1098_vm3, %v1680_v35  ;;  %v2458_v40 = vld [vmem:[#allocation2 + $0xd8] sm:$0xff] }
 0x15f   : > { %v832_v33 = vpop.f32.mrb[62].mxu0  ;;  %2134 = vst.msk [vmem:[#allocation3 + $0x1c8] sm:$0xff] %vm1098_vm3, %v2099_v25  ;;  %v1624_v50 = vld [vmem:[#allocation2 + $0xd2] sm:$0xff] }
 0x160   : > { %v1050_v36 = vmax.f32 %v830_v27, 0.0  ;;  %v833_v37 = vadd.f32 %v6825_v32, %v832_v33  ;;  %v5897_v38 = vpop.f32.mrb[63].mxu0  ;;  %1295 = vst.msk [vmem:[#allocation3 + $0x208] sm:$0xff] %vm1098_vm3, %v1260_v34 }
 0x161   : > { %v2459_v41 = vld [vmem:[#allocation2 + $0xe0] sm:$0xff] }
 0x162   : > { %1129 = vst.msk [vmem:[#allocation2 + $0xf0] sm:$0xff] %vm1098_vm3, %v1050_v36  ;;  %v1051_v39 = vmax.f32 %v833_v37, 0.0  ;;  %v2878_v42 = vld [vmem:[#allocation2 + $0xda] sm:$0xff]  ;;  %v2518_v44 = vpack.c.bf16 %v2459_v41, %v2458_v40 }
 0x163   : > { %v2879_v43 = vld [vmem:[#allocation2 + $0xe2] sm:$0xff]  ;;  %v1625_v55 = vld [vmem:[#allocation2 + $0xda] sm:$0xff] }
 0x164   : > { %1130 = vst.msk [vmem:[#allocation2 + $0xf8] sm:$0xff] %vm1098_vm3, %v1051_v39  ;;  %v2042_v45 = vld [vmem:[#allocation2 + $0xdd] sm:$0xff]  ;;  %v2043_v46 = vld [vmem:[#allocation2 + $0xe5] sm:$0xff]  ;;  %v2938_v47 = vpack.c.bf16 %v2879_v43, %v2878_v42  ;;  %2553 = vst.msk [vmem:[#allocation3 + $0x1a8] sm:$0xff] %vm1098_vm3, %v2518_v44  ;;  %v1681_v58 = vpack.c.bf16 %v1625_v55, %v1624_v50 }
 0x165   : > { %v837_v48 = vpop.f32.mrb[64].mxu0  ;;  %v2100_v49 = vpack.c.bf16 %v2043_v46, %v2042_v45  ;;  %v1205_v53 = vld [vmem:[#allocation2 + $0xe0] sm:$0xff]  ;;  %v1206_v54 = vld [vmem:[#allocation2 + $0xe8] sm:$0xff] }
 0x166   : > { %v838_v51 = vadd.f32 %v6825_v32, %v837_v48  ;;  %v5900_v52 = vpop.f32.mrb[65].mxu0  ;;  %2973 = vst.msk [vmem:[#allocation3 + $0x1b0] sm:$0xff] %vm1098_vm3, %v2938_v47  ;;  %v1261_v57 = vpack.c.bf16 %v1206_v54, %v1205_v53  ;;  %1716 = vst.msk [vmem:[#allocation3 + $0x210] sm:$0xff] %vm1098_vm3, %v1681_v58  ;;  %v2460_v63 = vld [vmem:[#allocation2 + $0xe8] sm:$0xff]  ;;  %v7023_v44 = vld [vmem:[%s8199_s2] ss:$0 sm:$0xff] }
 0x167   : > { %v840_v56 = vpop.f32.mrb[66].mxu0  ;;  %2135 = vst.msk [vmem:[#allocation3 + $0x1f0] sm:$0xff] %vm1098_vm3, %v2100_v49  ;;  %v1626_v10 = vld [vmem:[#allocation2 + $0xe2] sm:$0xff] }
 0x168   : > { %v1052_v59 = vmax.f32 %v838_v51, 0.0  ;;  %v841_v60 = vadd.f32 %v6825_v32, %v840_v56  ;;  %v5901_v61 = vpop.f32.mrb[67].mxu0  ;;  %1296 = vst.msk [vmem:[#allocation3 + $0x230] sm:$0xff] %vm1098_vm3, %v1261_v57 }
 0x169   : > { %v2461_v0 = vld [vmem:[#allocation2 + $0xf0] sm:$0xff] }
 0x16a   : > { %1131 = vst.msk [vmem:[#allocation2 + $0x100] sm:$0xff] %vm1098_vm3, %v1052_v59  ;;  %v1053_v62 = vmax.f32 %v841_v60, 0.0  ;;  %v2880_v2 = vld [vmem:[#allocation2 + $0xea] sm:$0xff]  ;;  %v2519_v4 = vpack.c.bf16 %v2461_v0, %v2460_v63 }
 0x16b   : > { %v2881_v3 = vld [vmem:[#allocation2 + $0xf2] sm:$0xff]  ;;  %v1627_v15 = vld [vmem:[#allocation2 + $0xea] sm:$0xff] }
 0x16c   : > { %1132 = vst.msk [vmem:[#allocation2 + $0x108] sm:$0xff] %vm1098_vm3, %v1053_v62  ;;  %v2044_v5 = vld [vmem:[#allocation2 + $0xed] sm:$0xff]  ;;  %v2045_v6 = vld [vmem:[#allocation2 + $0xf5] sm:$0xff]  ;;  %v2939_v7 = vpack.c.bf16 %v2881_v3, %v2880_v2  ;;  %2554 = vst.msk [vmem:[#allocation3 + $0x1d0] sm:$0xff] %vm1098_vm3, %v2519_v4  ;;  %v1682_v18 = vpack.c.bf16 %v1627_v15, %v1626_v10 }
 0x16d   : > { %v845_v8 = vpop.f32.mrb[68].mxu0  ;;  %v2101_v9 = vpack.c.bf16 %v2045_v6, %v2044_v5  ;;  %v1207_v13 = vld [vmem:[#allocation2 + $0xf0] sm:$0xff]  ;;  %v1208_v14 = vld [vmem:[#allocation2 + $0xf8] sm:$0xff] }
 0x16e   : > { %v846_v11 = vadd.f32 %v6825_v32, %v845_v8  ;;  %v5904_v12 = vpop.f32.mrb[69].mxu0  ;;  %2974 = vst.msk [vmem:[#allocation3 + $0x1d8] sm:$0xff] %vm1098_vm3, %v2939_v7  ;;  %v1262_v17 = vpack.c.bf16 %v1208_v14, %v1207_v13  ;;  %1717 = vst.msk [vmem:[#allocation3 + $0x238] sm:$0xff] %vm1098_vm3, %v1682_v18  ;;  %v2462_v23 = vld [vmem:[#allocation2 + $0xf8] sm:$0xff] }
 0x16f   : > { %v848_v16 = vpop.f32.mrb[70].mxu0  ;;  %2136 = vst.msk [vmem:[#allocation3 + $0x218] sm:$0xff] %vm1098_vm3, %v2101_v9  ;;  %v1628_v34 = vld [vmem:[#allocation2 + $0xf2] sm:$0xff] }
 0x170   : > { %v1054_v19 = vmax.f32 %v846_v11, 0.0  ;;  %v849_v20 = vadd.f32 %v6825_v32, %v848_v16  ;;  %v5905_v21 = vpop.f32.mrb[71].mxu0  ;;  %1297 = vst.msk [vmem:[#allocation3 + $0x258] sm:$0xff] %vm1098_vm3, %v1262_v17 }
 0x171   : > { %v2463_v24 = vld [vmem:[#allocation2 + $0x100] sm:$0xff] }
 0x172   : > { %1133 = vst.msk [vmem:[#allocation2 + $0x110] sm:$0xff] %vm1098_vm3, %v1054_v19  ;;  %v1055_v22 = vmax.f32 %v849_v20, 0.0  ;;  %v2882_v25 = vld [vmem:[#allocation2 + $0xfa] sm:$0xff]  ;;  %v2520_v27 = vpack.c.bf16 %v2463_v24, %v2462_v23 }
 0x173   : > { %v2883_v26 = vld [vmem:[#allocation2 + $0x102] sm:$0xff]  ;;  %v1629_v39 = vld [vmem:[#allocation2 + $0xfa] sm:$0xff] }
 0x174   : > { %1134 = vst.msk [vmem:[#allocation2 + $0x118] sm:$0xff] %vm1098_vm3, %v1055_v22  ;;  %v2046_v28 = vld [vmem:[#allocation2 + $0xfd] sm:$0xff]  ;;  %v2047_v29 = vld [vmem:[#allocation2 + $0x105] sm:$0xff]  ;;  %v2940_v30 = vpack.c.bf16 %v2883_v26, %v2882_v25  ;;  %2555 = vst.msk [vmem:[#allocation3 + $0x1f8] sm:$0xff] %vm1098_vm3, %v2520_v27  ;;  %v1683_v42 = vpack.c.bf16 %v1629_v39, %v1628_v34 }
 0x175   : > { %v853_v31 = vpop.f32.mrb[72].mxu0  ;;  %v2102_v33 = vpack.c.bf16 %v2047_v29, %v2046_v28  ;;  %v1209_v37 = vld [vmem:[#allocation2 + $0x100] sm:$0xff]  ;;  %v1210_v38 = vld [vmem:[#allocation2 + $0x108] sm:$0xff] }
 0x176   : > { %v854_v35 = vadd.f32 %v6825_v32, %v853_v31  ;;  %v5908_v36 = vpop.f32.mrb[73].mxu0  ;;  %2975 = vst.msk [vmem:[#allocation3 + $0x200] sm:$0xff] %vm1098_vm3, %v2940_v30  ;;  %v1263_v41 = vpack.c.bf16 %v1210_v38, %v1209_v37  ;;  %1718 = vst.msk [vmem:[#allocation3 + $0x260] sm:$0xff] %vm1098_vm3, %v1683_v42  ;;  %v2464_v47 = vld [vmem:[#allocation2 + $0x108] sm:$0xff] }
 0x177   : > { %v856_v40 = vpop.f32.mrb[74].mxu0  ;;  %2137 = vst.msk [vmem:[#allocation3 + $0x240] sm:$0xff] %vm1098_vm3, %v2102_v33  ;;  %v1630_v57 = vld [vmem:[#allocation2 + $0x102] sm:$0xff] }
 0x178   : > { %v1056_v43 = vmax.f32 %v854_v35, 0.0  ;;  %v857_v45 = vadd.f32 %v7023_v44, %v856_v40  ;;  %v5909_v32 = vpop.f32.mrb[75].mxu0  ;;  %1298 = vst.msk [vmem:[#allocation3 + $0x280] sm:$0xff] %vm1098_vm3, %v1263_v41 }
 0x179   : > { %v2465_v48 = vld [vmem:[#allocation2 + $0x110] sm:$0xff] }
 0x17a   : > { %1135 = vst.msk [vmem:[#allocation2 + $0x120] sm:$0xff] %vm1098_vm3, %v1056_v43  ;;  %v1057_v46 = vmax.f32 %v857_v45, 0.0  ;;  %v2884_v49 = vld [vmem:[#allocation2 + $0x10a] sm:$0xff]  ;;  %v2521_v51 = vpack.c.bf16 %v2465_v48, %v2464_v47 }
 0x17b   : > { %v2885_v50 = vld [vmem:[#allocation2 + $0x112] sm:$0xff]  ;;  %v1631_v62 = vld [vmem:[#allocation2 + $0x10a] sm:$0xff] }
 0x17c   : > { %1136 = vst.msk [vmem:[#allocation2 + $0x128] sm:$0xff] %vm1098_vm3, %v1057_v46  ;;  %v2048_v52 = vld [vmem:[#allocation2 + $0x10d] sm:$0xff]  ;;  %v2049_v53 = vld [vmem:[#allocation2 + $0x115] sm:$0xff]  ;;  %v2941_v54 = vpack.c.bf16 %v2885_v50, %v2884_v49  ;;  %2556 = vst.msk [vmem:[#allocation3 + $0x220] sm:$0xff] %vm1098_vm3, %v2521_v51  ;;  %v1684_v2 = vpack.c.bf16 %v1631_v62, %v1630_v57 }
 0x17d   : > { %v861_v55 = vpop.f32.mrb[76].mxu0  ;;  %v2103_v56 = vpack.c.bf16 %v2049_v53, %v2048_v52  ;;  %v1211_v60 = vld [vmem:[#allocation2 + $0x110] sm:$0xff]  ;;  %v1212_v61 = vld [vmem:[#allocation2 + $0x118] sm:$0xff] }
 0x17e   : > { %v862_v58 = vadd.f32 %v7023_v44, %v861_v55  ;;  %v5912_v59 = vpop.f32.mrb[77].mxu0  ;;  %2976 = vst.msk [vmem:[#allocation3 + $0x228] sm:$0xff] %vm1098_vm3, %v2941_v54  ;;  %v1264_v0 = vpack.c.bf16 %v1212_v61, %v1211_v60  ;;  %1719 = vst.msk [vmem:[#allocation3 + $0x288] sm:$0xff] %vm1098_vm3, %v1684_v2  ;;  %v2466_v7 = vld [vmem:[#allocation2 + $0x118] sm:$0xff] }
 0x17f   : > { %v864_v63 = vpop.f32.mrb[78].mxu0  ;;  %2138 = vst.msk [vmem:[#allocation3 + $0x268] sm:$0xff] %vm1098_vm3, %v2103_v56  ;;  %v1632_v17 = vld [vmem:[#allocation2 + $0x112] sm:$0xff]  ;;  %v6545_v59 = vld [vmem:[%s8200_s3] sm:$0xff]  }
 0x180   : > { %v1058_v3 = vmax.f32 %v862_v58, 0.0  ;;  %v865_v4 = vadd.f32 %v7023_v44, %v864_v63  ;;  %v5913_v5 = vpop.f32.mrb[79].mxu0  ;;  %1299 = vst.msk [vmem:[#allocation3 + $0x2a8] sm:$0xff] %vm1098_vm3, %v1264_v0  ;;  %v6649_v0 = vmov 0  }
 0x181   : > { %v2467_v8 = vld [vmem:[#allocation2 + $0x120] sm:$0xff]  ;;  %6160 = vmatprep.subr.bf16.mxu1 %v6649_v0  ;;  %3573 = vmatprep.subr.bf16.mxu0 %v6649_v0 }
 0x182   : > { %1137 = vst.msk [vmem:[#allocation2 + $0x130] sm:$0xff] %vm1098_vm3, %v1058_v3  ;;  %v1059_v6 = vmax.f32 %v865_v4, 0.0  ;;  %v2886_v9 = vld [vmem:[#allocation2 + $0x11a] sm:$0xff]  ;;  %v2522_v11 = vpack.c.bf16 %v2467_v8, %v2466_v7  ;;  %6176 = vmatpush1.bf16.msra.mxu1 %v6545_v59  ;;  %3574 = vmatpush1.bf16.msra.mxu0 %v6545_v59 }
 0x183   : > { %v2887_v10 = vld [vmem:[#allocation2 + $0x122] sm:$0xff]  ;;  %v1633_v22 = vld [vmem:[#allocation2 + $0x11a] sm:$0xff]  ;;  %6161 = vmatprep.subr.bf16.mxu1 %v6649_v0  ;;  %3575 = vmatprep.subr.bf16.mxu0 %v6649_v0 }
 0x184   : > { %1138 = vst.msk [vmem:[#allocation2 + $0x138] sm:$0xff] %vm1098_vm3, %v1059_v6  ;;  %v2050_v12 = vld [vmem:[#allocation2 + $0x11d] sm:$0xff]  ;;  %v2051_v13 = vld [vmem:[#allocation2 + $0x125] sm:$0xff]  ;;  %v2942_v14 = vpack.c.bf16 %v2887_v10, %v2886_v9  ;;  %2557 = vst.msk [vmem:[#allocation3 + $0x248] sm:$0xff] %vm1098_vm3, %v2522_v11  ;;  %v1685_v25 = vpack.c.bf16 %v1633_v22, %v1632_v17 }
 0x185   : > { %v869_v15 = vpop.f32.mrb[80].mxu0  ;;  %v2104_v16 = vpack.c.bf16 %v2051_v13, %v2050_v12  ;;  %v1213_v20 = vld [vmem:[#allocation2 + $0x120] sm:$0xff]  ;;  %v1214_v21 = vld [vmem:[#allocation2 + $0x128] sm:$0xff] }
 0x186   : > { %v870_v18 = vadd.f32 %v7023_v44, %v869_v15  ;;  %v5916_v19 = vpop.f32.mrb[81].mxu0  ;;  %2977 = vst.msk [vmem:[#allocation3 + $0x250] sm:$0xff] %vm1098_vm3, %v2942_v14  ;;  %v1265_v24 = vpack.c.bf16 %v1214_v21, %v1213_v20  ;;  %1720 = vst.msk [vmem:[#allocation3 + $0x2b0] sm:$0xff] %vm1098_vm3, %v1685_v25  ;;  %v2468_v30 = vld [vmem:[#allocation2 + $0x128] sm:$0xff] }
 0x187   : > { %v872_v23 = vpop.f32.mrb[82].mxu0  ;;  %2139 = vst.msk [vmem:[#allocation3 + $0x290] sm:$0xff] %vm1098_vm3, %v2104_v16  ;;  %v1634_v41 = vld [vmem:[#allocation2 + $0x122] sm:$0xff] }
 0x188   : > { %v1060_v26 = vmax.f32 %v870_v18, 0.0  ;;  %v873_v27 = vadd.f32 %v7023_v44, %v872_v23  ;;  %v5917_v28 = vpop.f32.mrb[83].mxu0  ;;  %1300 = vst.msk [vmem:[#allocation3 + $0x2d0] sm:$0xff] %vm1098_vm3, %v1265_v24  ;;  %v6546_v15 = vld [vmem:[%s8200_s3 + $0x8] sm:$0xff]   ;;  %v6547_v23 = vld [vmem:[%s8200_s3 + $0x10] sm:$0xff]  }
 0x189   : > { %v2469_v31 = vld [vmem:[#allocation2 + $0x130] sm:$0xff]  ;;  %6177 = vmatpush1.bf16.msra.mxu1 %v6546_v15  ;;  %3576 = vmatpush1.bf16.msra.mxu0 %v6546_v15 }
 0x18a   : > { %1139 = vst.msk [vmem:[#allocation2 + $0x140] sm:$0xff] %vm1098_vm3, %v1060_v26  ;;  %v1061_v29 = vmax.f32 %v873_v27, 0.0  ;;  %v2888_v33 = vld [vmem:[#allocation2 + $0x12a] sm:$0xff]  ;;  %v2523_v35 = vpack.c.bf16 %v2469_v31, %v2468_v30  ;;  %6162 = vmatprep.subr.bf16.mxu1 %v6649_v0  ;;  %3577 = vmatprep.subr.bf16.mxu0 %v6649_v0 }
 0x18b   : > { %v2889_v34 = vld [vmem:[#allocation2 + $0x132] sm:$0xff]  ;;  %v1635_v46 = vld [vmem:[#allocation2 + $0x12a] sm:$0xff] }
 0x18c   : > { %1140 = vst.msk [vmem:[#allocation2 + $0x148] sm:$0xff] %vm1098_vm3, %v1061_v29  ;;  %v2052_v36 = vld [vmem:[#allocation2 + $0x12d] sm:$0xff]  ;;  %v2053_v37 = vld [vmem:[#allocation2 + $0x135] sm:$0xff]  ;;  %v2943_v38 = vpack.c.bf16 %v2889_v34, %v2888_v33  ;;  %2558 = vst.msk [vmem:[#allocation3 + $0x270] sm:$0xff] %vm1098_vm3, %v2523_v35  ;;  %v1686_v49 = vpack.c.bf16 %v1635_v46, %v1634_v41 }
 0x18d   : > { %v877_v39 = vpop.f32.mrb[84].mxu0  ;;  %v2105_v40 = vpack.c.bf16 %v2053_v37, %v2052_v36  ;;  %v1215_v45 = vld [vmem:[#allocation2 + $0x130] sm:$0xff]  ;;  %v1216_v32 = vld [vmem:[#allocation2 + $0x138] sm:$0xff]  ;;  %6178 = vmatpush1.bf16.msra.mxu1 %v6547_v23  ;;  %3578 = vmatpush1.bf16.msra.mxu0 %v6547_v23 }
 0x18e   : > { %v878_v42 = vadd.f32 %v7023_v44, %v877_v39  ;;  %v5920_v43 = vpop.f32.mrb[85].mxu0  ;;  %2978 = vst.msk [vmem:[#allocation3 + $0x278] sm:$0xff] %vm1098_vm3, %v2943_v38  ;;  %v1266_v48 = vpack.c.bf16 %v1216_v32, %v1215_v45  ;;  %1721 = vst.msk [vmem:[#allocation3 + $0x2d8] sm:$0xff] %vm1098_vm3, %v1686_v49  ;;  %v2470_v54 = vld [vmem:[#allocation2 + $0x138] sm:$0xff]  ;;  %6163 = vmatprep.subr.bf16.mxu1 %v6649_v0  ;;  %3579 = vmatprep.subr.bf16.mxu0 %v6649_v0  ;;  %v6549_v49 = vld [vmem:[%s8200_s3 + $0x20] sm:$0xff]  }
 0x18f   : > { %v880_v47 = vpop.f32.mrb[86].mxu0  ;;  %2140 = vst.msk [vmem:[#allocation3 + $0x2b8] sm:$0xff] %vm1098_vm3, %v2105_v40  ;;  %v1636_v3 = vld [vmem:[#allocation2 + $0x132] sm:$0xff] }
 0x190   : > { %v1062_v50 = vmax.f32 %v878_v42, 0.0  ;;  %v881_v51 = vadd.f32 %v7023_v44, %v880_v47  ;;  %v5921_v52 = vpop.f32.mrb[87].mxu0  ;;  %1301 = vst.msk [vmem:[#allocation3 + $0x2f8] sm:$0xff] %vm1098_vm3, %v1266_v48  ;;  %v6548_v41 = vld [vmem:[%s8200_s3 + $0x18] sm:$0xff]  }
 0x191   : > { %v2471_v55 = vld [vmem:[#allocation2 + $0x140] sm:$0xff]  ;;  %6179 = vmatpush1.bf16.msra.mxu1 %v6548_v41  ;;  %3580 = vmatpush1.bf16.msra.mxu0 %v6548_v41 }
 0x192   : > { %1141 = vst.msk [vmem:[#allocation2 + $0x150] sm:$0xff] %vm1098_vm3, %v1062_v50  ;;  %v1063_v53 = vmax.f32 %v881_v51, 0.0  ;;  %v2890_v56 = vld [vmem:[#allocation2 + $0x13a] sm:$0xff]  ;;  %v2524_v58 = vpack.c.bf16 %v2471_v55, %v2470_v54  ;;  %6164 = vmatprep.subr.bf16.mxu1 %v6649_v0  ;;  %3581 = vmatprep.subr.bf16.mxu0 %v6649_v0 }
 0x193   : > { %v2891_v57 = vld [vmem:[#allocation2 + $0x142] sm:$0xff]  ;;  %v1637_v8 = vld [vmem:[#allocation2 + $0x13a] sm:$0xff] }
 0x194   : > { %1142 = vst.msk [vmem:[#allocation2 + $0x158] sm:$0xff] %vm1098_vm3, %v1063_v53  ;;  %v2054_v60 = vld [vmem:[#allocation2 + $0x13d] sm:$0xff]  ;;  %v2055_v61 = vld [vmem:[#allocation2 + $0x145] sm:$0xff]  ;;  %v2944_v62 = vpack.c.bf16 %v2891_v57, %v2890_v56  ;;  %2559 = vst.msk [vmem:[#allocation3 + $0x298] sm:$0xff] %vm1098_vm3, %v2524_v58  ;;  %v1687_v11 = vpack.c.bf16 %v1637_v8, %v1636_v3 }
 0x195   : > { %v885_v63 = vpop.f32.mrb[88].mxu0  ;;  %v2106_v2 = vpack.c.bf16 %v2055_v61, %v2054_v60  ;;  %v1217_v6 = vld [vmem:[#allocation2 + $0x140] sm:$0xff]  ;;  %v1218_v7 = vld [vmem:[#allocation2 + $0x148] sm:$0xff]  ;;  %6180 = vmatpush1.bf16.msra.mxu1 %v6549_v49  ;;  %3582 = vmatpush1.bf16.msra.mxu0 %v6549_v49 }
 0x196   : > { %v886_v4 = vadd.f32 %v7023_v44, %v885_v63  ;;  %v5924_v5 = vpop.f32.mrb[89].mxu0  ;;  %2979 = vst.msk [vmem:[#allocation3 + $0x2a0] sm:$0xff] %vm1098_vm3, %v2944_v62  ;;  %v1267_v10 = vpack.c.bf16 %v1218_v7, %v1217_v6  ;;  %1722 = vst.msk [vmem:[#allocation3 + $0x300] sm:$0xff] %vm1098_vm3, %v1687_v11  ;;  %v2472_v17 = vld [vmem:[#allocation2 + $0x148] sm:$0xff]  ;;  %6165 = vmatprep.subr.bf16.mxu1 %v6649_v0  ;;  %3583 = vmatprep.subr.bf16.mxu0 %v6649_v0 }
 0x197   : > { %v888_v9 = vpop.f32.mrb[90].mxu0  ;;  %2141 = vst.msk [vmem:[#allocation3 + $0x2e0] sm:$0xff] %vm1098_vm3, %v2106_v2  ;;  %v1638_v28 = vld [vmem:[#allocation2 + $0x142] sm:$0xff] }
 0x198   : > { %v1064_v12 = vmax.f32 %v886_v4, 0.0  ;;  %v889_v13 = vadd.f32 %v7023_v44, %v888_v9  ;;  %v5925_v14 = vpop.f32.mrb[91].mxu0  ;;  %1302 = vst.msk [vmem:[#allocation3 + $0x320] sm:$0xff] %vm1098_vm3, %v1267_v10  ;;  %v6550_v4 = vld [vmem:[%s8200_s3 + $0x28] sm:$0xff]  }
 0x199   : > { %v2473_v18 = vld [vmem:[#allocation2 + $0x150] sm:$0xff]  ;;  %6181 = vmatpush1.bf16.msra.mxu1 %v6550_v4  ;;  %3584 = vmatpush1.bf16.msra.mxu0 %v6550_v4 }
 0x19a   : > { %1143 = vst.msk [vmem:[#allocation2 + $0x160] sm:$0xff] %vm1098_vm3, %v1064_v12  ;;  %v1065_v16 = vmax.f32 %v889_v13, 0.0  ;;  %v2892_v19 = vld [vmem:[#allocation2 + $0x14a] sm:$0xff]  ;;  %v2525_v21 = vpack.c.bf16 %v2473_v18, %v2472_v17  ;;  %6166 = vmatprep.subr.bf16.mxu1 %v6649_v0  ;;  %3585 = vmatprep.subr.bf16.mxu0 %v6649_v0 }
 0x19b   : > { %v2893_v20 = vld [vmem:[#allocation2 + $0x152] sm:$0xff]  ;;  %v1639_v34 = vld [vmem:[#allocation2 + $0x14a] sm:$0xff] }
 0x19c   : > { %v2945_v22 = vpack.c.bf16 %v2893_v20, %v2892_v19  ;;  %1144 = vst.msk [vmem:[#allocation2 + $0x168] sm:$0xff] %vm1098_vm3, %v1065_v16  ;;  %v2056_v24 = vld [vmem:[#allocation2 + $0x14d] sm:$0xff]  ;;  %v2057_v25 = vld [vmem:[#allocation2 + $0x155] sm:$0xff]  ;;  %2560 = vst.msk [vmem:[#allocation3 + $0x2c0] sm:$0xff] %vm1098_vm3, %v2525_v21  ;;  %v1688_v37 = vpack.c.bf16 %v1639_v34, %v1638_v28 }
 0x19d   : > { %v893_v26 = vpop.f32.mrb[92].mxu0  ;;  %v2107_v27 = vpack.c.bf16 %v2057_v25, %v2056_v24  ;;  %v1219_v31 = vld [vmem:[#allocation2 + $0x150] sm:$0xff]  ;;  %v1220_v33 = vld [vmem:[#allocation2 + $0x158] sm:$0xff] }
 0x19e   : > { %2980 = vst.msk [vmem:[#allocation3 + $0x2c8] sm:$0xff] %vm1098_vm3, %v2945_v22  ;;  %v894_v29 = vadd.f32 %v7023_v44, %v893_v26  ;;  %v5928_v30 = vpop.f32.mrb[93].mxu0  ;;  %v1268_v36 = vpack.c.bf16 %v1220_v33, %v1219_v31  ;;  %1723 = vst.msk [vmem:[#allocation3 + $0x328] sm:$0xff] %vm1098_vm3, %v1688_v37  ;;  %v2474_v43 = vld [vmem:[#allocation2 + $0x158] sm:$0xff]  ;;  %v6551_v12 = vld [vmem:[%s8200_s3 + $0x30] sm:$0xff]  }
 0x19f   : > { %v896_v35 = vpop.f32.mrb[94].mxu0  ;;  %2142 = vst.msk [vmem:[#allocation3 + $0x308] sm:$0xff] %vm1098_vm3, %v2107_v27  ;;  %v1640_v54 = vld [vmem:[#allocation2 + $0x152] sm:$0xff]  ;;  %6182 = vmatpush1.bf16.msra.mxu1 %v6551_v12  ;;  %3586 = vmatpush1.bf16.msra.mxu0 %v6551_v12 }
 0x1a0   : > { %v1066_v38 = vmax.f32 %v894_v29, 0.0  ;;  %v897_v39 = vadd.f32 %v7023_v44, %v896_v35  ;;  %v5929_v40 = vpop.f32.mrb[95].mxu0  ;;  %1303 = vst.msk [vmem:[#allocation3 + $0x348] sm:$0xff] %vm1098_vm3, %v1268_v36  ;;  %6167 = vmatprep.subr.bf16.mxu1 %v6649_v0  ;;  %3587 = vmatprep.subr.bf16.mxu0 %v6649_v0  ;;  %v6552_v29 = vld [vmem:[%s8200_s3 + $0x38] sm:$0xff]  }
 0x1a1   : > { %v2475_v45 = vld [vmem:[#allocation2 + $0x160] sm:$0xff] }
 0x1a2   : > { %1145 = vst.msk [vmem:[#allocation2 + $0x170] sm:$0xff] %vm1098_vm3, %v1066_v38  ;;  %v1067_v42 = vmax.f32 %v897_v39, 0.0  ;;  %v2894_v32 = vld [vmem:[#allocation2 + $0x15a] sm:$0xff]  ;;  %v2526_v47 = vpack.c.bf16 %v2475_v45, %v2474_v43 }
 0x1a3   : > { %v2895_v46 = vld [vmem:[#allocation2 + $0x162] sm:$0xff]  ;;  %v1641_v59 = vld [vmem:[#allocation2 + $0x15a] sm:$0xff]  ;;  %6183 = vmatpush1.bf16.msra.mxu1 %v6552_v29  ;;  %3588 = vmatpush1.bf16.msra.mxu0 %v6552_v29 }
 0x1a4   : > { %v2946_v48 = vpack.c.bf16 %v2895_v46, %v2894_v32  ;;  %1146 = vst.msk [vmem:[#allocation2 + $0x178] sm:$0xff] %vm1098_vm3, %v1067_v42  ;;  %v2058_v50 = vld [vmem:[#allocation2 + $0x15d] sm:$0xff]  ;;  %v2059_v51 = vld [vmem:[#allocation2 + $0x165] sm:$0xff]  ;;  %2561 = vst.msk [vmem:[#allocation3 + $0x2e8] sm:$0xff] %vm1098_vm3, %v2526_v47  ;;  %v1689_v62 = vpack.c.bf16 %v1641_v59, %v1640_v54  ;;  %6168 = vmatprep.subr.bf16.mxu1 %v6649_v0  ;;  %3589 = vmatprep.subr.bf16.mxu0 %v6649_v0 }
 0x1a5   : > { %v901_v52 = vpop.f32.mrb[96].mxu0  ;;  %v2108_v53 = vpack.c.bf16 %v2059_v51, %v2058_v50  ;;  %v1221_v57 = vld [vmem:[#allocation2 + $0x160] sm:$0xff]  ;;  %v1222_v58 = vld [vmem:[#allocation2 + $0x168] sm:$0xff] }
 0x1a6   : > { %2981 = vst.msk [vmem:[#allocation3 + $0x2f0] sm:$0xff] %vm1098_vm3, %v2946_v48  ;;  %v902_v55 = vadd.f32 %v7023_v44, %v901_v52  ;;  %v5932_v56 = vpop.f32.mrb[97].mxu0  ;;  %v1269_v61 = vpack.c.bf16 %v1222_v58, %v1221_v57  ;;  %1724 = vst.msk [vmem:[#allocation3 + $0x350] sm:$0xff] %vm1098_vm3, %v1689_v62  ;;  %v2476_v6 = vld [vmem:[#allocation2 + $0x168] sm:$0xff]  ;;  %v6553_v38 = vld [vmem:[%s8200_s3 + $0x40] sm:$0xff]  }
 0x1a7   : > { %v904_v60 = vpop.f32.mrb[98].mxu0  ;;  %2143 = vst.msk [vmem:[#allocation3 + $0x330] sm:$0xff] %vm1098_vm3, %v2108_v53  ;;  %v1642_v17 = vld [vmem:[#allocation2 + $0x162] sm:$0xff]  ;;  %6184 = vmatpush1.bf16.msra.mxu1 %v6553_v38  ;;  %3590 = vmatpush1.bf16.msra.mxu0 %v6553_v38 }
 0x1a8   : > { %v1068_v63 = vmax.f32 %v902_v55, 0.0  ;;  %v905_v2 = vadd.f32 %v7023_v44, %v904_v60  ;;  %v5933_v3 = vpop.f32.mrb[99].mxu0  ;;  %1304 = vst.msk [vmem:[#allocation3 + $0x370] sm:$0xff] %vm1098_vm3, %v1269_v61  ;;  %6169 = vmatprep.subr.bf16.mxu1 %v6649_v0  ;;  %3591 = vmatprep.subr.bf16.mxu0 %v6649_v0  ;;  %v6554_v55 = vld [vmem:[%s8200_s3 + $0x48] sm:$0xff]  }
 0x1a9   : > { %v2477_v7 = vld [vmem:[#allocation2 + $0x170] sm:$0xff] }
 0x1aa   : > { %1147 = vst.msk [vmem:[#allocation2 + $0x180] sm:$0xff] %vm1098_vm3, %v1068_v63  ;;  %v1069_v5 = vmax.f32 %v905_v2, 0.0  ;;  %v2896_v8 = vld [vmem:[#allocation2 + $0x16a] sm:$0xff]  ;;  %v2527_v10 = vpack.c.bf16 %v2477_v7, %v2476_v6 }
 0x1ab   : > { %v2897_v9 = vld [vmem:[#allocation2 + $0x172] sm:$0xff]  ;;  %v1643_v22 = vld [vmem:[#allocation2 + $0x16a] sm:$0xff]  ;;  %6185 = vmatpush1.bf16.msra.mxu1 %v6554_v55  ;;  %3592 = vmatpush1.bf16.msra.mxu0 %v6554_v55 }
 0x1ac   : > { %v2947_v11 = vpack.c.bf16 %v2897_v9, %v2896_v8  ;;  %1148 = vst.msk [vmem:[#allocation2 + $0x188] sm:$0xff] %vm1098_vm3, %v1069_v5  ;;  %v2060_v13 = vld [vmem:[#allocation2 + $0x16d] sm:$0xff]  ;;  %v2061_v14 = vld [vmem:[#allocation2 + $0x175] sm:$0xff]  ;;  %2562 = vst.msk [vmem:[#allocation3 + $0x310] sm:$0xff] %vm1098_vm3, %v2527_v10  ;;  %v1690_v25 = vpack.c.bf16 %v1643_v22, %v1642_v17  ;;  %6170 = vmatprep.subr.bf16.mxu1 %v6649_v0  ;;  %3593 = vmatprep.subr.bf16.mxu0 %v6649_v0 }
 0x1ad   : > { %v909_v15 = vpop.f32.mrb[100].mxu0  ;;  %v2109_v16 = vpack.c.bf16 %v2061_v14, %v2060_v13  ;;  %v1223_v20 = vld [vmem:[#allocation2 + $0x170] sm:$0xff]  ;;  %v1224_v21 = vld [vmem:[#allocation2 + $0x178] sm:$0xff] }
 0x1ae   : > { %2982 = vst.msk [vmem:[#allocation3 + $0x318] sm:$0xff] %vm1098_vm3, %v2947_v11  ;;  %v910_v18 = vadd.f32 %v7023_v44, %v909_v15  ;;  %v5936_v19 = vpop.f32.mrb[101].mxu0  ;;  %v1270_v24 = vpack.c.bf16 %v1224_v21, %v1223_v20  ;;  %1725 = vst.msk [vmem:[#allocation3 + $0x378] sm:$0xff] %vm1098_vm3, %v1690_v25  ;;  %v2478_v31 = vld [vmem:[#allocation2 + $0x178] sm:$0xff]  ;;  %v6555_v63 = vld [vmem:[%s8200_s3 + $0x50] sm:$0xff]  }
 0x1af   : > { %v912_v23 = vpop.f32.mrb[102].mxu0  ;;  %2144 = vst.msk [vmem:[#allocation3 + $0x358] sm:$0xff] %vm1098_vm3, %v2109_v16  ;;  %v1644_v43 = vld [vmem:[#allocation2 + $0x172] sm:$0xff]  ;;  %6186 = vmatpush1.bf16.msra.mxu1 %v6555_v63  ;;  %3594 = vmatpush1.bf16.msra.mxu0 %v6555_v63 }
 0x1b0   : > { %v1070_v26 = vmax.f32 %v910_v18, 0.0  ;;  %v913_v27 = vadd.f32 %v7023_v44, %v912_v23  ;;  %v5937_v28 = vpop.f32.mrb[103].mxu0  ;;  %1305 = vst.msk [vmem:[#allocation3 + $0x398] sm:$0xff] %vm1098_vm3, %v1270_v24  ;;  %6171 = vmatprep.subr.bf16.mxu1 %v6649_v0  ;;  %3595 = vmatprep.subr.bf16.mxu0 %v6649_v0  ;;  %v6556_v18 = vld [vmem:[%s8200_s3 + $0x58] sm:$0xff]  }
 0x1b1   : > { %v2479_v33 = vld [vmem:[#allocation2 + $0x180] sm:$0xff] }
 0x1b2   : > { %1149 = vst.msk [vmem:[#allocation2 + $0x190] sm:$0xff] %vm1098_vm3, %v1070_v26  ;;  %v1071_v30 = vmax.f32 %v913_v27, 0.0  ;;  %v2898_v34 = vld [vmem:[#allocation2 + $0x17a] sm:$0xff]  ;;  %v2528_v36 = vpack.c.bf16 %v2479_v33, %v2478_v31 }
 0x1b3   : > { %v2899_v35 = vld [vmem:[#allocation2 + $0x182] sm:$0xff]  ;;  %v1645_v48 = vld [vmem:[#allocation2 + $0x17a] sm:$0xff]  ;;  %6187 = vmatpush1.bf16.msra.mxu1 %v6556_v18  ;;  %3596 = vmatpush1.bf16.msra.mxu0 %v6556_v18 }
 0x1b4   : > { %v2948_v37 = vpack.c.bf16 %v2899_v35, %v2898_v34  ;;  %1150 = vst.msk [vmem:[#allocation2 + $0x198] sm:$0xff] %vm1098_vm3, %v1071_v30  ;;  %v2062_v39 = vld [vmem:[#allocation2 + $0x17d] sm:$0xff]  ;;  %v2063_v40 = vld [vmem:[#allocation2 + $0x185] sm:$0xff]  ;;  %2563 = vst.msk [vmem:[#allocation3 + $0x338] sm:$0xff] %vm1098_vm3, %v2528_v36  ;;  %v1691_v51 = vpack.c.bf16 %v1645_v48, %v1644_v43  ;;  %6172 = vmatprep.subr.bf16.mxu1 %v6649_v0  ;;  %3597 = vmatprep.subr.bf16.mxu0 %v6649_v0 }
 0x1b5   : > { %v917_v41 = vpop.f32.mrb[104].mxu0  ;;  %v2110_v42 = vpack.c.bf16 %v2063_v40, %v2062_v39  ;;  %v1225_v46 = vld [vmem:[#allocation2 + $0x180] sm:$0xff]  ;;  %v1226_v47 = vld [vmem:[#allocation2 + $0x188] sm:$0xff] }
 0x1b6   : > { %2983 = vst.msk [vmem:[#allocation3 + $0x340] sm:$0xff] %vm1098_vm3, %v2948_v37  ;;  %v918_v45 = vadd.f32 %v7023_v44, %v917_v41  ;;  %v5940_v32 = vpop.f32.mrb[105].mxu0  ;;  %v1271_v50 = vpack.c.bf16 %v1226_v47, %v1225_v46  ;;  %1726 = vst.msk [vmem:[#allocation3 + $0x3a0] sm:$0xff] %vm1098_vm3, %v1691_v51  ;;  %v2480_v57 = vld [vmem:[#allocation2 + $0x188] sm:$0xff]  ;;  %v6557_v28 = vld [vmem:[%s8200_s3 + $0x60] sm:$0xff]  }
 0x1b7   : > { %v920_v49 = vpop.f32.mrb[106].mxu0  ;;  %2145 = vst.msk [vmem:[#allocation3 + $0x380] sm:$0xff] %vm1098_vm3, %v2110_v42  ;;  %v1646_v6 = vld [vmem:[#allocation2 + $0x182] sm:$0xff]  ;;  %6188 = vmatpush1.bf16.msra.mxu1 %v6557_v28  ;;  %3598 = vmatpush1.bf16.msra.mxu0 %v6557_v28 }
 0x1b8   : > { %v1072_v52 = vmax.f32 %v918_v45, 0.0  ;;  %v921_v53 = vadd.f32 %v7023_v44, %v920_v49  ;;  %v5941_v54 = vpop.f32.mrb[107].mxu0  ;;  %1306 = vst.msk [vmem:[#allocation3 + $0x3c0] sm:$0xff] %vm1098_vm3, %v1271_v50  ;;  %6173 = vmatprep.subr.bf16.mxu1 %v6649_v0  ;;  %3599 = vmatprep.subr.bf16.mxu0 %v6649_v0  ;;  %v6558_v45 = vld [vmem:[%s8200_s3 + $0x68] sm:$0xff]  }
 0x1b9   : > { %v2481_v58 = vld [vmem:[#allocation2 + $0x190] sm:$0xff] }
 0x1ba   : > { %1151 = vst.msk [vmem:[#allocation2 + $0x1a0] sm:$0xff] %vm1098_vm3, %v1072_v52  ;;  %v1073_v56 = vmax.f32 %v921_v53, 0.0  ;;  %v2900_v59 = vld [vmem:[#allocation2 + $0x18a] sm:$0xff]  ;;  %v2529_v61 = vpack.c.bf16 %v2481_v58, %v2480_v57 }
 0x1bb   : > { %v2901_v60 = vld [vmem:[#allocation2 + $0x192] sm:$0xff]  ;;  %v1647_v11 = vld [vmem:[#allocation2 + $0x18a] sm:$0xff]  ;;  %6189 = vmatpush1.bf16.msra.mxu1 %v6558_v45  ;;  %3600 = vmatpush1.bf16.msra.mxu0 %v6558_v45 }
 0x1bc   : > { %v2949_v62 = vpack.c.bf16 %v2901_v60, %v2900_v59  ;;  %1152 = vst.msk [vmem:[#allocation2 + $0x1a8] sm:$0xff] %vm1098_vm3, %v1073_v56  ;;  %v2064_v2 = vld [vmem:[#allocation2 + $0x18d] sm:$0xff]  ;;  %v2065_v3 = vld [vmem:[#allocation2 + $0x195] sm:$0xff]  ;;  %2564 = vst.msk [vmem:[#allocation3 + $0x360] sm:$0xff] %vm1098_vm3, %v2529_v61  ;;  %v1692_v14 = vpack.c.bf16 %v1647_v11, %v1646_v6  ;;  %6174 = vmatprep.subr.bf16.mxu1 %v6649_v0  ;;  %3601 = vmatprep.subr.bf16.mxu0 %v6649_v0 }
 0x1bd   : > { %v925_v4 = vpop.f32.mrb[108].mxu0  ;;  %v2111_v5 = vpack.c.bf16 %v2065_v3, %v2064_v2  ;;  %v1227_v9 = vld [vmem:[#allocation2 + $0x190] sm:$0xff]  ;;  %v1228_v10 = vld [vmem:[#allocation2 + $0x198] sm:$0xff] }
 0x1be   : > { %2984 = vst.msk [vmem:[#allocation3 + $0x368] sm:$0xff] %vm1098_vm3, %v2949_v62  ;;  %v926_v7 = vadd.f32 %v7023_v44, %v925_v4  ;;  %v5944_v8 = vpop.f32.mrb[109].mxu0  ;;  %v1272_v13 = vpack.c.bf16 %v1228_v10, %v1227_v9  ;;  %1727 = vst.msk [vmem:[#allocation3 + $0x3c8] sm:$0xff] %vm1098_vm3, %v1692_v14  ;;  %v2482_v21 = vld [vmem:[#allocation2 + $0x198] sm:$0xff]  ;;  %v6559_v52 = vld [vmem:[%s8200_s3 + $0x70] sm:$0xff]  }
 0x1bf   : > { %v928_v12 = vpop.f32.mrb[110].mxu0  ;;  %2146 = vst.msk [vmem:[#allocation3 + $0x3a8] sm:$0xff] %vm1098_vm3, %v2111_v5  ;;  %v1648_v37 = vld [vmem:[#allocation2 + $0x192] sm:$0xff]  ;;  %6190 = vmatpush1.bf16.msra.mxu1 %v6559_v52  ;;  %3602 = vmatpush1.bf16.msra.mxu0 %v6559_v52 }
 0x1c0   : > { %v1074_v15 = vmax.f32 %v926_v7, 0.0  ;;  %v929_v16 = vadd.f32 %v7023_v44, %v928_v12  ;;  %v5945_v17 = vpop.f32.mrb[111].mxu0  ;;  %1307 = vst.msk [vmem:[#allocation3 + $0x3e8] sm:$0xff] %vm1098_vm3, %v1272_v13  ;;  %6175 = vmatprep.subr.bf16.mxu1 %v6649_v0  ;;  %3603 = vmatprep.subr.bf16.mxu0 %v6649_v0  ;;  %v6560_v5 = vld [vmem:[%s8200_s3 + $0x78] sm:$0xff]  }
 0x1c1   : > { %v2902_v19 = vld [vmem:[#allocation2 + $0x19a] sm:$0xff] }
 0x1c2   : > { %1153 = vst.msk [vmem:[#allocation2 + $0x1b0] sm:$0xff] %vm1098_vm3, %v1074_v15  ;;  %v1075_v20 = vmax.f32 %v929_v16, 0.0  ;;  %v2483_v22 = vld [vmem:[#allocation2 + $0x1a0] sm:$0xff] }
 0x1c3   : > { %v2903_v23 = vld [vmem:[#allocation2 + $0x1a2] sm:$0xff]  ;;  %v2530_v26 = vpack.c.bf16 %v2483_v22, %v2482_v21  ;;  %v1649_v38 = vld [vmem:[#allocation2 + $0x19a] sm:$0xff]  ;;  %6191 = vmatpush1.bf16.msra.mxu1 %v6560_v5  ;;  %3604 = vmatpush1.bf16.msra.mxu0 %v6560_v5 }
 0x1c4   : > { %v1229_v24 = vld [vmem:[#allocation2 + $0x1a0] sm:$0xff]  ;;  %v1230_v25 = vld [vmem:[#allocation2 + $0x1a8] sm:$0xff]  ;;  %v2950_v27 = vpack.c.bf16 %v2903_v23, %v2902_v19  ;;  %1154 = vst.msk [vmem:[#allocation2 + $0x1b8] sm:$0xff] %vm1098_vm3, %v1075_v20  ;;  %v1693_v40 = vpack.c.bf16 %v1649_v38, %v1648_v37  ;;  %3886 = vmatprep.subr.bf16.mxu1 %v6649_v0 }
 0x1c5   : > { %v1273_v29 = vpack.c.bf16 %v1230_v25, %v1229_v24  ;;  %v933_v30 = vpop.f32.mrb[112].mxu0  ;;  %v2066_v31 = vld [vmem:[#allocation2 + $0x19d] sm:$0xff]  ;;  %v2067_v33 = vld [vmem:[#allocation2 + $0x1a5] sm:$0xff]  ;;  %2565 = vst.msk [vmem:[#allocation3 + $0x388] sm:$0xff] %vm1098_vm3, %v2530_v26 }
 0x1c6   : > { %2985 = vst.msk [vmem:[#allocation3 + $0x390] sm:$0xff] %vm1098_vm3, %v2950_v27  ;;  %v934_v34 = vadd.f32 %v7023_v44, %v933_v30  ;;  %v5948_v35 = vpop.f32.mrb[113].mxu0  ;;  %v2112_v36 = vpack.c.bf16 %v2067_v33, %v2066_v31  ;;  %1728 = vst.msk [vmem:[#allocation3 + $0x3f0] sm:$0xff] %vm1098_vm3, %v1693_v40  ;;  %v2484_v54 = vld [vmem:[#allocation2 + $0x1a8] sm:$0xff] }
 0x1c7   : > { %1308 = vst.msk [vmem:[#allocation3 + $0x410] sm:$0xff] %vm1098_vm3, %v1273_v29  ;;  %v936_v39 = vpop.f32.mrb[114].mxu0  ;;  %v1369_v28 = vld [vmem:[#allocation2 + $0x1a1] sm:$0xff] }
 0x1c8   : > { %v1076_v41 = vmax.f32 %v934_v34, 0.0  ;;  %v937_v42 = vadd.f32 %v7023_v44, %v936_v39  ;;  %v5949_v43 = vpop.f32.mrb[115].mxu0  ;;  %2147 = vst.msk [vmem:[#allocation3 + $0x3d0] sm:$0xff] %vm1098_vm3, %v2112_v36 }
 0x1c9   : > { %v2904_v32 = vld [vmem:[#allocation2 + $0x1aa] sm:$0xff] }
 0x1ca   : > { %1155 = vst.msk [vmem:[#allocation2 + $0x1c0] sm:$0xff] %vm1098_vm3, %v1076_v41  ;;  %v1077_v46 = vmax.f32 %v937_v42, 0.0  ;;  %v1694_v47 = vpack.c.bf16 %v2904_v32, %v2903_v23  ;;  %v1231_v49 = vld [vmem:[#allocation2 + $0x1b0] sm:$0xff] }
 0x1cb   : > { %v2905_v48 = vld [vmem:[#allocation2 + $0x1b2] sm:$0xff]  ;;  %v1370_v12 = vld [vmem:[#allocation2 + $0x1a9] sm:$0xff] }
 0x1cc   : > { %v1232_v50 = vld [vmem:[#allocation2 + $0x1b8] sm:$0xff]  ;;  %v2951_v51 = vpack.c.bf16 %v2905_v48, %v2904_v32  ;;  %1156 = vst.msk [vmem:[#allocation2 + $0x1c8] sm:$0xff] %vm1098_vm3, %v1077_v46  ;;  %1729 = vst.msk [vmem:[#allocation3 + $0x418] sm:$0xff] %vm1098_vm3, %v1694_v47  ;;  %v2068_v56 = vld [vmem:[#allocation2 + $0x1ad] sm:$0xff]  ;;  %v1413_v33 = vpack.c.bf16 %v1370_v12, %v1369_v28 }
 0x1cd   : > { %v1274_v53 = vpack.c.bf16 %v1232_v50, %v1231_v49  ;;  %v941_v55 = vpop.f32.mrb[116].mxu0  ;;  %v2069_v57 = vld [vmem:[#allocation2 + $0x1b5] sm:$0xff] }
 0x1ce   : > { %v2485_v58 = vld [vmem:[#allocation2 + $0x1b0] sm:$0xff]  ;;  %2986 = vst.msk [vmem:[#allocation3 + $0x3b8] sm:$0xff] %vm1098_vm3, %v2951_v51  ;;  %v942_v59 = vadd.f32 %v7023_v44, %v941_v55  ;;  %v5952_v60 = vpop.f32.mrb[117].mxu0  ;;  %v2113_v61 = vpack.c.bf16 %v2069_v57, %v2068_v56  ;;  %v2486_v17 = vld [vmem:[#allocation2 + $0x1b8] sm:$0xff] }
 0x1cf   : > { %1309 = vst.msk [vmem:[#allocation3 + $0x438] sm:$0xff] %vm1098_vm3, %v1274_v53  ;;  %v2531_v62 = vpack.c.bf16 %v2485_v58, %v2484_v54  ;;  %v944_v63 = vpop.f32.mrb[118].mxu0  ;;  %v1371_v55 = vld [vmem:[#allocation2 + $0x1b1] sm:$0xff] }
 0x1d0   : > { %v1078_v2 = vmax.f32 %v942_v59, 0.0  ;;  %v945_v3 = vadd.f32 %v7023_v44, %v944_v63  ;;  %v5953_v4 = vpop.f32.mrb[119].mxu0  ;;  %2148 = vst.msk [vmem:[#allocation3 + $0x3f8] sm:$0xff] %vm1098_vm3, %v2113_v61 }
 0x1d1   : > { %2566 = vst.msk [vmem:[#allocation3 + $0x3b0] sm:$0xff] %vm1098_vm3, %v2531_v62  ;;  %v2906_v6 = vld [vmem:[#allocation2 + $0x1ba] sm:$0xff] }
 0x1d2   : > { %1157 = vst.msk [vmem:[#allocation2 + $0x1d0] sm:$0xff] %vm1098_vm3, %v1078_v2  ;;  %v1079_v7 = vmax.f32 %v945_v3, 0.0  ;;  %v1695_v8 = vpack.c.bf16 %v2906_v6, %v2905_v48  ;;  %v1790_v10 = vld [vmem:[#allocation2 + $0x1bc] sm:$0xff] }
 0x1d3   : > { %v2907_v9 = vld [vmem:[#allocation2 + $0x1c2] sm:$0xff]  ;;  %v1372_v32 = vld [vmem:[#allocation2 + $0x1b9] sm:$0xff] }
 0x1d4   : > { %v1791_v11 = vld [vmem:[#allocation2 + $0x1c4] sm:$0xff]  ;;  %v2952_v13 = vpack.c.bf16 %v2907_v9, %v2906_v6  ;;  %1158 = vst.msk [vmem:[#allocation2 + $0x1d8] sm:$0xff] %vm1098_vm3, %v1079_v7  ;;  %1730 = vst.msk [vmem:[#allocation3 + $0x440] sm:$0xff] %vm1098_vm3, %v1695_v8  ;;  %v1414_v60 = vpack.c.bf16 %v1372_v32, %v1371_v55 }
 0x1d5   : > { %v1834_v14 = vpack.c.bf16 %v1791_v11, %v1790_v10  ;;  %v1233_v15 = vld [vmem:[#allocation2 + $0x1c0] sm:$0xff]  ;;  %v1234_v16 = vld [vmem:[#allocation2 + $0x1c8] sm:$0xff]  ;;  %v949_v18 = vpop.f32.mrb[120].mxu0 }
 0x1d6   : > { %v1275_v19 = vpack.c.bf16 %v1234_v16, %v1233_v15  ;;  %v2070_v20 = vld [vmem:[#allocation2 + $0x1bd] sm:$0xff]  ;;  %v2071_v21 = vld [vmem:[#allocation2 + $0x1c5] sm:$0xff]  ;;  %2987 = vst.msk [vmem:[#allocation3 + $0x3e0] sm:$0xff] %vm1098_vm3, %v2952_v13  ;;  %v950_v23 = vadd.f32 %v7023_v44, %v949_v18  ;;  %v5956_v24 = vpop.f32.mrb[121].mxu0 }
 0x1d7   : > { %v2487_v22 = vld [vmem:[#allocation2 + $0x1c0] sm:$0xff]  ;;  %1930 = vrot.lane.b32.xlu0 %v1834_v14, %s6650_s25  ;;  %v2114_v25 = vpack.c.bf16 %v2071_v21, %v2070_v20  ;;  %v952_v27 = vpop.f32.mrb[122].mxu0  ;;  %v2488_v52 = vld [vmem:[#allocation2 + $0x1c8] sm:$0xff] }
 0x1d8   : > { %v2532_v26 = vpack.c.bf16 %v2487_v22, %v2486_v17  ;;  %1310 = vst.msk [vmem:[#allocation3 + $0x460] sm:$0xff] %vm1098_vm3, %v1275_v19  ;;  %v1080_v29 = vmax.f32 %v950_v23, 0.0  ;;  %v953_v30 = vadd.f32 %v7023_v44, %v952_v27  ;;  %v5957_v31 = vpop.f32.mrb[123].mxu0  ;;  %v1373_v2 = vld [vmem:[#allocation2 + $0x1c1] sm:$0xff] }
 0x1d9   : > { %2149 = vst.msk [vmem:[#allocation3 + $0x420] sm:$0xff] %vm1098_vm3, %v2114_v25  ;;  %v2908_v34 = vld [vmem:[#allocation2 + $0x1ca] sm:$0xff] }
 0x1da   : > { %2567 = vst.msk [vmem:[#allocation3 + $0x3d8] sm:$0xff] %vm1098_vm3, %v2532_v26  ;;  %1159 = vst.msk [vmem:[#allocation2 + $0x1e0] sm:$0xff] %vm1098_vm3, %v1080_v29  ;;  %v1081_v35 = vmax.f32 %v953_v30, 0.0  ;;  %v1696_v36 = vpack.c.bf16 %v2908_v34, %v2907_v9  ;;  %v1792_v38 = vld [vmem:[#allocation2 + $0x1cc] sm:$0xff]  ;;  %v7241_v26 = vld [vmem:[%s8199_s2] ss:$0 sm:$0xff] }
 0x1db   : > { %1509 = vrot.lane.b32.xlu0 %v1413_v33, %s6650_s25  ;;  %v2909_v37 = vld [vmem:[#allocation2 + $0x1d2] sm:$0xff]  ;;  %v1374_v62 = vld [vmem:[#allocation2 + $0x1c9] sm:$0xff] }
 0x1dc   : > { %v1793_v39 = vld [vmem:[#allocation2 + $0x1d4] sm:$0xff]  ;;  %v2953_v40 = vpack.c.bf16 %v2909_v37, %v2908_v34  ;;  %1160 = vst.msk [vmem:[#allocation2 + $0x1e8] sm:$0xff] %vm1098_vm3, %v1081_v35  ;;  %1731 = vst.msk [vmem:[#allocation3 + $0x468] sm:$0xff] %vm1098_vm3, %v1696_v36  ;;  %v1415_v9 = vpack.c.bf16 %v1374_v62, %v1373_v2 }
 0x1dd   : > { %v1835_v41 = vpack.c.bf16 %v1793_v39, %v1792_v38  ;;  %v1235_v42 = vld [vmem:[#allocation2 + $0x1d0] sm:$0xff]  ;;  %v1236_v43 = vld [vmem:[#allocation2 + $0x1d8] sm:$0xff]  ;;  %v957_v45 = vpop.f32.mrb[124].mxu0 }
 0x1de   : > { %v1276_v46 = vpack.c.bf16 %v1236_v43, %v1235_v42  ;;  %v2072_v47 = vld [vmem:[#allocation2 + $0x1cd] sm:$0xff]  ;;  %v2073_v48 = vld [vmem:[#allocation2 + $0x1d5] sm:$0xff]  ;;  %2988 = vst.msk [vmem:[#allocation3 + $0x408] sm:$0xff] %vm1098_vm3, %v2953_v40  ;;  %v958_v49 = vadd.f32 %v7023_v44, %v957_v45  ;;  %v5960_v50 = vpop.f32.mrb[125].mxu0 }
 0x1df   : > { %1932 = vrot.lane.b32.xlu1 %v1835_v41, %s6650_s25  ;;  %v2115_v51 = vpack.c.bf16 %v2073_v48, %v2072_v47  ;;  %v2489_v53 = vld [vmem:[#allocation2 + $0x1d0] sm:$0xff]  ;;  %v960_v54 = vpop.f32.mrb[126].mxu0  ;;  %v2490_v15 = vld [vmem:[#allocation2 + $0x1d8] sm:$0xff] }
 0x1e0   : > { %1311 = vst.msk [vmem:[#allocation3 + $0x488] sm:$0xff] %vm1098_vm3, %v1276_v46  ;;  %v2533_v56 = vpack.c.bf16 %v2489_v53, %v2488_v52  ;;  %v1082_v57 = vmax.f32 %v958_v49, 0.0  ;;  %v961_v58 = vadd.f32 %v7023_v44, %v960_v54  ;;  %v5961_v59 = vpop.f32.mrb[127].mxu0  ;;  %v1375_v22 = vld [vmem:[#allocation2 + $0x1d1] sm:$0xff] }
 0x1e1   : > { %2150 = vst.msk [vmem:[#allocation3 + $0x448] sm:$0xff] %vm1098_vm3, %v2115_v51  ;;  %v2910_v61 = vld [vmem:[#allocation2 + $0x1da] sm:$0xff] }
 0x1e2   : > { %2568 = vst.msk [vmem:[#allocation3 + $0x400] sm:$0xff] %vm1098_vm3, %v2533_v56  ;;  %1161 = vst.msk [vmem:[#allocation2 + $0x1f0] sm:$0xff] %vm1098_vm3, %v1082_v57  ;;  %v1083_v63 = vmax.f32 %v961_v58, 0.0  ;;  %v1237_v3 = vld [vmem:[#allocation2 + $0x1e0] sm:$0xff]  ;;  %v1697_v4 = vpack.c.bf16 %v2910_v61, %v2909_v37 }
 0x1e3   : > { %1511 = vrot.lane.b32.xlu1 %v1414_v60, %s6650_s25  ;;  %v2911_v5 = vld [vmem:[#allocation2 + $0x1e2] sm:$0xff]  ;;  %v1376_v13 = vld [vmem:[#allocation2 + $0x1d9] sm:$0xff] }
 0x1e4   : > { %v1794_v6 = vld [vmem:[#allocation2 + $0x1dc] sm:$0xff]  ;;  %v1795_v7 = vld [vmem:[#allocation2 + $0x1e4] sm:$0xff]  ;;  %v2954_v8 = vpack.c.bf16 %v2911_v5, %v2910_v61  ;;  %1162 = vst.msk [vmem:[#allocation2 + $0x1f8] sm:$0xff] %vm1098_vm3, %v1083_v63  ;;  %1732 = vst.msk [vmem:[#allocation3 + $0x490] sm:$0xff] %vm1098_vm3, %v1697_v4  ;;  %v1416_v28 = vpack.c.bf16 %v1376_v13, %v1375_v22 }
 0x1e5   : > { %v1836_v10 = vpack.c.bf16 %v1795_v7, %v1794_v6  ;;  %v1238_v11 = vld [vmem:[#allocation2 + $0x1e8] sm:$0xff]  ;;  %v965_v12 = vpop.f32.mrb[128].mxu0  ;;  %v2074_v18 = vld [vmem:[#allocation2 + $0x1dd] sm:$0xff] }
 0x1e6   : > { %v1277_v14 = vpack.c.bf16 %v1238_v11, %v1237_v3  ;;  %2989 = vst.msk [vmem:[#allocation3 + $0x430] sm:$0xff] %vm1098_vm3, %v2954_v8  ;;  %v966_v16 = vadd.f32 %v7023_v44, %v965_v12  ;;  %v5964_v17 = vpop.f32.mrb[129].mxu0  ;;  %v2075_v19 = vld [vmem:[#allocation2 + $0x1e5] sm:$0xff] }
 0x1e7   : > { %1513 = vrot.lane.b32.xlu1 %v1415_v9, %s6650_s25  ;;  %1934 = vrot.lane.b32.xlu0 %v1836_v10, %s6650_s25  ;;  %v2491_v20 = vld [vmem:[#allocation2 + $0x1e0] sm:$0xff]  ;;  %v968_v21 = vpop.f32.mrb[130].mxu0  ;;  %v2116_v23 = vpack.c.bf16 %v2075_v19, %v2074_v18  ;;  %v2492_v32 = vld [vmem:[#allocation2 + $0x1e8] sm:$0xff] }
 0x1e8   : > { %1312 = vst.msk [vmem:[#allocation3 + $0x4b0] sm:$0xff] %vm1098_vm3, %v1277_v14  ;;  %v2534_v24 = vpack.c.bf16 %v2491_v20, %v2490_v15  ;;  %v1084_v25 = vmax.f32 %v966_v16, 0.0  ;;  %v969_v44 = vadd.f32 %v7241_v26, %v968_v21  ;;  %v5965_v27 = vpop.f32.mrb[131].mxu0  ;;  %v1377_v33 = vld [vmem:[#allocation2 + $0x1e1] sm:$0xff] }
 0x1e9   : > { %v2912_v29 = vld [vmem:[#allocation2 + $0x1ea] sm:$0xff]  ;;  %2151 = vst.msk [vmem:[#allocation3 + $0x470] sm:$0xff] %vm1098_vm3, %v2116_v23 }
 0x1ea   : > { %v1378_v30 = vld [vmem:[#allocation2 + $0x1e9] sm:$0xff]  ;;  %2569 = vst.msk [vmem:[#allocation3 + $0x428] sm:$0xff] %vm1098_vm3, %v2534_v24  ;;  %1163 = vst.msk [vmem:[#allocation2 + $0x200] sm:$0xff] %vm1098_vm3, %v1084_v25  ;;  %v1085_v31 = vmax.f32 %v969_v44, 0.0  ;;  %v1698_v35 = vpack.c.bf16 %v2912_v29, %v2911_v5 }
 0x1eb   : > { %1515 = vrot.lane.b32.xlu1 %v1416_v28, %s6650_s25  ;;  %v1239_v34 = vld [vmem:[#allocation2 + $0x1f0] sm:$0xff]  ;;  %v1417_v40 = vpack.c.bf16 %v1378_v30, %v1377_v33  ;;  %v1240_v42 = vld [vmem:[#allocation2 + $0x1f8] sm:$0xff] }
 0x1ec   : > { %v2913_v36 = vld [vmem:[#allocation2 + $0x1f2] sm:$0xff]  ;;  %1164 = vst.msk [vmem:[#allocation2 + $0x208] sm:$0xff] %vm1098_vm3, %v1085_v31  ;;  %1733 = vst.msk [vmem:[#allocation3 + $0x4b8] sm:$0xff] %vm1098_vm3, %v1698_v35  ;;  %v1278_v45 = vpack.c.bf16 %v1240_v42, %v1239_v34 }
 0x1ed   : > { %v1796_v37 = vld [vmem:[#allocation2 + $0x1ec] sm:$0xff]  ;;  %v1797_v38 = vld [vmem:[#allocation2 + $0x1f4] sm:$0xff]  ;;  %v2955_v39 = vpack.c.bf16 %v2913_v36, %v2912_v29  ;;  %v973_v43 = vpop.f32.mrb[132].mxu0 }
 0x1ee   : > { %v1837_v41 = vpack.c.bf16 %v1797_v38, %v1796_v37  ;;  %v974_v46 = vadd.f32 %v7241_v26, %v973_v43  ;;  %v5968_v47 = vpop.f32.mrb[133].mxu0  ;;  %v2076_v48 = vld [vmem:[#allocation2 + $0x1ed] sm:$0xff]  ;;  %v2077_v49 = vld [vmem:[#allocation2 + $0x1f5] sm:$0xff]  ;;  %1313 = vst.msk [vmem:[#allocation3 + $0x4d8] sm:$0xff] %vm1098_vm3, %v1278_v45 }
 0x1ef   : > { %2990 = vst.msk [vmem:[#allocation3 + $0x458] sm:$0xff] %vm1098_vm3, %v2955_v39  ;;  %1517 = vrot.lane.b32.xlu1 %v1417_v40, %s6650_s25  ;;  %v2493_v50 = vld [vmem:[#allocation2 + $0x1f0] sm:$0xff]  ;;  %v976_v51 = vpop.f32.mrb[134].mxu0  ;;  %v2117_v52 = vpack.c.bf16 %v2077_v49, %v2076_v48  ;;  %v2494_v18 = vld [vmem:[#allocation2 + $0x1f8] sm:$0xff] }
 0x1f0   : > { %1936 = vrot.lane.b32.xlu0 %v1837_v41, %s6650_s25  ;;  %v2535_v53 = vpack.c.bf16 %v2493_v50, %v2492_v32  ;;  %v1086_v54 = vmax.f32 %v974_v46, 0.0  ;;  %v977_v55 = vadd.f32 %v7241_v26, %v976_v51  ;;  %v5969_v56 = vpop.f32.mrb[135].mxu0  ;;  %v1379_v57 = vld [vmem:[#allocation2 + $0x1f1] sm:$0xff] }
 0x1f1   : > { %v1380_v58 = vld [vmem:[#allocation2 + $0x1f9] sm:$0xff]  ;;  %2152 = vst.msk [vmem:[#allocation3 + $0x498] sm:$0xff] %vm1098_vm3, %v2117_v52 }
 0x1f2   : > { %v1660_v59 = vld [vmem:[#allocation2 + $0x1f2] sm:$0xff]  ;;  %2570 = vst.msk [vmem:[#allocation3 + $0x450] sm:$0xff] %vm1098_vm3, %v2535_v53  ;;  %v2914_v60 = vld [vmem:[#allocation2 + $0x1fa] sm:$0xff]  ;;  %1165 = vst.msk [vmem:[#allocation2 + $0x210] sm:$0xff] %vm1098_vm3, %v1086_v54  ;;  %v1087_v61 = vmax.f32 %v977_v55, 0.0  ;;  %v1418_v62 = vpack.c.bf16 %v1380_v58, %v1379_v57 }
 0x1f3   : > { %v1241_v63 = vld [vmem:[#allocation2 + $0x200] sm:$0xff]  ;;  %v1242_v9 = vld [vmem:[#allocation2 + $0x208] sm:$0xff] }
 0x1f4   : > { %v1661_v2 = vld [vmem:[#allocation2 + $0x1fa] sm:$0xff]  ;;  %v2915_v3 = vld [vmem:[#allocation2 + $0x202] sm:$0xff]  ;;  %1166 = vst.msk [vmem:[#allocation2 + $0x218] sm:$0xff] %vm1098_vm3, %v1087_v61  ;;  %1519 = vrot.lane.b32.xlu1 %v1418_v62, %s6650_s25  ;;  %v1279_v11 = vpack.c.bf16 %v1242_v9, %v1241_v63 }
 0x1f5   : > { %v1798_v4 = vld [vmem:[#allocation2 + $0x1fc] sm:$0xff]  ;;  %v1799_v5 = vld [vmem:[#allocation2 + $0x204] sm:$0xff]  ;;  %v1699_v6 = vpack.c.bf16 %v1661_v2, %v1660_v59  ;;  %v2956_v7 = vpack.c.bf16 %v2915_v3, %v2914_v60  ;;  %v981_v10 = vpop.f32.mrb[136].mxu0 }
 0x1f6   : > { %v1838_v8 = vpack.c.bf16 %v1799_v5, %v1798_v4  ;;  %v982_v12 = vadd.f32 %v7241_v26, %v981_v10  ;;  %v5972_v13 = vpop.f32.mrb[137].mxu0  ;;  %v2078_v14 = vld [vmem:[#allocation2 + $0x1fd] sm:$0xff]  ;;  %v2079_v15 = vld [vmem:[#allocation2 + $0x205] sm:$0xff]  ;;  %1314 = vst.msk [vmem:[#allocation3 + $0x500] sm:$0xff] %vm1098_vm3, %v1279_v11 }
 0x1f7   : > { %1734 = vst.msk [vmem:[#allocation3 + $0x4e0] sm:$0xff] %vm1098_vm3, %v1699_v6  ;;  %2991 = vst.msk [vmem:[#allocation3 + $0x480] sm:$0xff] %vm1098_vm3, %v2956_v7  ;;  %v984_v16 = vpop.f32.mrb[138].mxu0  ;;  %v2118_v17 = vpack.c.bf16 %v2079_v15, %v2078_v14  ;;  %v2495_v19 = vld [vmem:[#allocation2 + $0x200] sm:$0xff]  ;;  %v2496_v48 = vld [vmem:[#allocation2 + $0x208] sm:$0xff] }
 0x1f8   : > { %1938 = vrot.lane.b32.xlu0 %v1838_v8, %s6650_s25  ;;  %v1088_v20 = vmax.f32 %v982_v12, 0.0  ;;  %v985_v21 = vadd.f32 %v7241_v26, %v984_v16  ;;  %v5973_v22 = vpop.f32.mrb[139].mxu0  ;;  %v2536_v23 = vpack.c.bf16 %v2495_v19, %v2494_v18  ;;  %v1381_v24 = vld [vmem:[#allocation2 + $0x201] sm:$0xff] }
 0x1f9   : > { %v1382_v25 = vld [vmem:[#allocation2 + $0x209] sm:$0xff]  ;;  %2153 = vst.msk [vmem:[#allocation3 + $0x4c0] sm:$0xff] %vm1098_vm3, %v2118_v17 }
 0x1fa   : > { %v1662_v44 = vld [vmem:[#allocation2 + $0x202] sm:$0xff]  ;;  %v2916_v27 = vld [vmem:[#allocation2 + $0x20a] sm:$0xff]  ;;  %1167 = vst.msk [vmem:[#allocation2 + $0x220] sm:$0xff] %vm1098_vm3, %v1088_v20  ;;  %v1089_v28 = vmax.f32 %v985_v21, 0.0  ;;  %v1419_v29 = vpack.c.bf16 %v1382_v25, %v1381_v24  ;;  %2571 = vst.msk [vmem:[#allocation3 + $0x478] sm:$0xff] %vm1098_vm3, %v2536_v23 }
 0x1fb   : > { %v1243_v30 = vld [vmem:[#allocation2 + $0x210] sm:$0xff]  ;;  %v1244_v39 = vld [vmem:[#allocation2 + $0x218] sm:$0xff]  ;;  %v2159_v23 = vld [vmem:[#allocation2 + $0x26] sm:$0xff] }
 0x1fc   : > { %v1663_v31 = vld [vmem:[#allocation2 + $0x20a] sm:$0xff]  ;;  %v2917_v33 = vld [vmem:[#allocation2 + $0x212] sm:$0xff]  ;;  %1168 = vst.msk [vmem:[#allocation2 + $0x228] sm:$0xff] %vm1098_vm3, %v1089_v28  ;;  %1521 = vrot.lane.b32.xlu1 %v1419_v29, %s6650_s25  ;;  %v1280_v41 = vpack.c.bf16 %v1244_v39, %v1243_v30 }
 0x1fd   : > { %v1800_v34 = vld [vmem:[#allocation2 + $0x20c] sm:$0xff]  ;;  %v1801_v35 = vld [vmem:[#allocation2 + $0x214] sm:$0xff]  ;;  %v1700_v36 = vpack.c.bf16 %v1663_v31, %v1662_v44  ;;  %v2957_v37 = vpack.c.bf16 %v2917_v33, %v2916_v27  ;;  %v989_v40 = vpop.f32.mrb[140].mxu0 }
 0x1fe   : > { %v1839_v38 = vpack.c.bf16 %v1801_v35, %v1800_v34  ;;  %v990_v42 = vadd.f32 %v7241_v26, %v989_v40  ;;  %v5976_v43 = vpop.f32.mrb[141].mxu0  ;;  %v2080_v45 = vld [vmem:[#allocation2 + $0x20d] sm:$0xff]  ;;  %v2081_v32 = vld [vmem:[#allocation2 + $0x215] sm:$0xff]  ;;  %1315 = vst.msk [vmem:[#allocation3 + $0x528] sm:$0xff] %vm1098_vm3, %v1280_v41 }
 0x1ff   : > { %1735 = vst.msk [vmem:[#allocation3 + $0x508] sm:$0xff] %vm1098_vm3, %v1700_v36  ;;  %2992 = vst.msk [vmem:[#allocation3 + $0x4a8] sm:$0xff] %vm1098_vm3, %v2957_v37  ;;  %v992_v46 = vpop.f32.mrb[142].mxu0  ;;  %v2119_v47 = vpack.c.bf16 %v2081_v32, %v2080_v45  ;;  %v2497_v49 = vld [vmem:[#allocation2 + $0x210] sm:$0xff]  ;;  %v2498_v15 = vld [vmem:[#allocation2 + $0x218] sm:$0xff] }
 0x200   : > { %1940 = vrot.lane.b32.xlu0 %v1839_v38, %s6650_s25  ;;  %v1090_v50 = vmax.f32 %v990_v42, 0.0  ;;  %v993_v51 = vadd.f32 %v7241_v26, %v992_v46  ;;  %v5977_v52 = vpop.f32.mrb[143].mxu0  ;;  %v2537_v53 = vpack.c.bf16 %v2497_v49, %v2496_v48  ;;  %v1383_v54 = vld [vmem:[#allocation2 + $0x211] sm:$0xff]  ;;  %v2158_v36 = vld [vmem:[#allocation2 + $0x1e] sm:$0xff] }
 0x201   : > { %v1384_v55 = vld [vmem:[#allocation2 + $0x219] sm:$0xff]  ;;  %2154 = vst.msk [vmem:[#allocation3 + $0x4e8] sm:$0xff] %vm1098_vm3, %v2119_v47  ;;  %v2228_v45 = vpack.c.bf16 %v2159_v23, %v2158_v36  ;;  %v2160_v52 = vld [vmem:[#allocation2 + $0x2e] sm:$0xff] }
 0x202   : > { %v1664_v56 = vld [vmem:[#allocation2 + $0x212] sm:$0xff]  ;;  %v2918_v57 = vld [vmem:[#allocation2 + $0x21a] sm:$0xff]  ;;  %1169 = vst.msk [vmem:[#allocation2 + $0x230] sm:$0xff] %vm1098_vm3, %v1090_v50  ;;  %v1091_v58 = vmax.f32 %v993_v51, 0.0  ;;  %v1420_v59 = vpack.c.bf16 %v1384_v55, %v1383_v54  ;;  %2572 = vst.msk [vmem:[#allocation3 + $0x4a0] sm:$0xff] %vm1098_vm3, %v2537_v53 }
 0x203   : > { %v1245_v60 = vld [vmem:[#allocation2 + $0x220] sm:$0xff]  ;;  %v1246_v6 = vld [vmem:[#allocation2 + $0x228] sm:$0xff]  ;;  %v2161_v48 = vld [vmem:[#allocation2 + $0x36] sm:$0xff] }
 0x204   : > { %v1665_v61 = vld [vmem:[#allocation2 + $0x21a] sm:$0xff]  ;;  %v2919_v62 = vld [vmem:[#allocation2 + $0x222] sm:$0xff]  ;;  %1170 = vst.msk [vmem:[#allocation2 + $0x238] sm:$0xff] %vm1098_vm3, %v1091_v58  ;;  %1523 = vrot.lane.b32.xlu1 %v1420_v59, %s6650_s25  ;;  %v1281_v8 = vpack.c.bf16 %v1246_v6, %v1245_v60  ;;  %v2229_v55 = vpack.c.bf16 %v2161_v48, %v2160_v52 }
 0x205   : > { %v1802_v63 = vld [vmem:[#allocation2 + $0x21c] sm:$0xff]  ;;  %v1803_v2 = vld [vmem:[#allocation2 + $0x224] sm:$0xff]  ;;  %v1701_v3 = vpack.c.bf16 %v1665_v61, %v1664_v56  ;;  %v2958_v4 = vpack.c.bf16 %v2919_v62, %v2918_v57  ;;  %v997_v7 = vpop.f32.mrb[144].mxu0 }
 0x206   : > { %v1840_v5 = vpack.c.bf16 %v1803_v2, %v1802_v63  ;;  %v998_v9 = vadd.f32 %v7241_v26, %v997_v7  ;;  %v5980_v10 = vpop.f32.mrb[145].mxu0  ;;  %v2082_v11 = vld [vmem:[#allocation2 + $0x21d] sm:$0xff]  ;;  %v2083_v12 = vld [vmem:[#allocation2 + $0x225] sm:$0xff]  ;;  %1316 = vst.msk [vmem:[#allocation3 + $0x550] sm:$0xff] %vm1098_vm3, %v1281_v8 }
 0x207   : > { %1736 = vst.msk [vmem:[#allocation3 + $0x530] sm:$0xff] %vm1098_vm3, %v1701_v3  ;;  %2993 = vst.msk [vmem:[#allocation3 + $0x4d0] sm:$0xff] %vm1098_vm3, %v2958_v4  ;;  %v1000_v13 = vpop.f32.mrb[146].mxu0  ;;  %v2120_v14 = vpack.c.bf16 %v2083_v12, %v2082_v11  ;;  %v2499_v16 = vld [vmem:[#allocation2 + $0x220] sm:$0xff]  ;;  %v2500_v37 = vld [vmem:[#allocation2 + $0x228] sm:$0xff] }
 0x208   : > { %1942 = vrot.lane.b32.xlu0 %v1840_v5, %s6650_s25  ;;  %v1092_v17 = vmax.f32 %v998_v9, 0.0  ;;  %v1001_v18 = vadd.f32 %v7241_v26, %v1000_v13  ;;  %v5981_v19 = vpop.f32.mrb[147].mxu0  ;;  %v2538_v20 = vpack.c.bf16 %v2499_v16, %v2498_v15  ;;  %v1385_v21 = vld [vmem:[#allocation2 + $0x221] sm:$0xff]  ;;  %v2578_v12 = vld [vmem:[#allocation2 + $0x39] sm:$0xff] }
 0x209   : > { %v1386_v22 = vld [vmem:[#allocation2 + $0x229] sm:$0xff]  ;;  %2155 = vst.msk [vmem:[#allocation3 + $0x510] sm:$0xff] %vm1098_vm3, %v2120_v14  ;;  %v2162_v4 = vld [vmem:[#allocation2 + $0x3e] sm:$0xff]  ;;  %v2165_v13 = vld [vmem:[#allocation2 + $0x56] sm:$0xff] }
 0x20a   : > { %v2920_v24 = vld [vmem:[#allocation2 + $0x22a] sm:$0xff]  ;;  %1171 = vst.msk [vmem:[#allocation2 + $0x240] sm:$0xff] %vm1098_vm3, %v1092_v17  ;;  %v1093_v25 = vmax.f32 %v1001_v18, 0.0  ;;  %v1421_v44 = vpack.c.bf16 %v1386_v22, %v1385_v21  ;;  %v1666_v27 = vld [vmem:[#allocation2 + $0x222] sm:$0xff]  ;;  %2573 = vst.msk [vmem:[#allocation3 + $0x4c8] sm:$0xff] %vm1098_vm3, %v2538_v20 }
 0x20b   : > { %v1667_v28 = vld [vmem:[#allocation2 + $0x22a] sm:$0xff]  ;;  %v2921_v29 = vld [vmem:[#allocation2 + $0x232] sm:$0xff]  ;;  %v2579_v5 = vld [vmem:[#allocation2 + $0x41] sm:$0xff] }
 0x20c   : > { %v1804_v30 = vld [vmem:[#allocation2 + $0x22c] sm:$0xff]  ;;  %v1805_v31 = vld [vmem:[#allocation2 + $0x234] sm:$0xff]  ;;  %v1702_v33 = vpack.c.bf16 %v1667_v28, %v1666_v27  ;;  %v2959_v34 = vpack.c.bf16 %v2921_v29, %v2920_v24  ;;  %1172 = vst.msk [vmem:[#allocation2 + $0x248] sm:$0xff] %vm1098_vm3, %v1093_v25  ;;  %1525 = vrot.lane.b32.xlu1 %v1421_v44, %s6650_s25  ;;  %v2648_v15 = vpack.c.bf16 %v2579_v5, %v2578_v12  ;;  %v2587_v48 = vld [vmem:[#allocation2 + $0x81] sm:$0xff] }
 0x20d   : > { %v1841_v35 = vpack.c.bf16 %v1805_v31, %v1804_v30  ;;  %v1005_v38 = vpop.f32.mrb[148].mxu0  ;;  %v2084_v39 = vld [vmem:[#allocation2 + $0x22d] sm:$0xff]  ;;  %v2085_v40 = vld [vmem:[#allocation2 + $0x235] sm:$0xff]  ;;  %v2166_v31 = vld [vmem:[#allocation2 + $0x5e] sm:$0xff] }
 0x20e   : > { %1737 = vst.msk [vmem:[#allocation3 + $0x558] sm:$0xff] %vm1098_vm3, %v1702_v33  ;;  %v2501_v41 = vld [vmem:[#allocation2 + $0x230] sm:$0xff]  ;;  %2994 = vst.msk [vmem:[#allocation3 + $0x4f8] sm:$0xff] %vm1098_vm3, %v2959_v34  ;;  %v1006_v42 = vadd.f32 %v7241_v26, %v1005_v38  ;;  %v5984_v43 = vpop.f32.mrb[149].mxu0  ;;  %v2121_v32 = vpack.c.bf16 %v2085_v40, %v2084_v39  ;;  %v2163_v56 = vld [vmem:[#allocation2 + $0x46] sm:$0xff] }
 0x20f   : > { %1944 = vrot.lane.b32.xlu0 %v1841_v35, %s6650_s25  ;;  %v2539_v46 = vpack.c.bf16 %v2501_v41, %v2500_v37  ;;  %v1008_v47 = vpop.f32.mrb[150].mxu0  ;;  %v2502_v57 = vld [vmem:[#allocation2 + $0x238] sm:$0xff]  ;;  %v2230_v9 = vpack.c.bf16 %v2163_v56, %v2162_v4  ;;  %v2164_v19 = vld [vmem:[#allocation2 + $0x4e] sm:$0xff]  ;;  %v2167_v28 = vld [vmem:[#allocation2 + $0x66] sm:$0xff] }
 0x210   : > { %v1094_v49 = vmax.f32 %v1006_v42, 0.0  ;;  %v1009_v50 = vadd.f32 %v7241_v26, %v1008_v47  ;;  %2298 = vrot.lane.b32.xlu1 %v2228_v45, %s6650_s25  ;;  %v5985_v51 = vpop.f32.mrb[151].mxu0  ;;  %2156 = vst.msk [vmem:[#allocation3 + $0x538] sm:$0xff] %vm1098_vm3, %v2121_v32  ;;  %v2581_v20 = vld [vmem:[#allocation2 + $0x51] sm:$0xff]  ;;  %v2231_v21 = vpack.c.bf16 %v2165_v13, %v2164_v19  ;;  %v2580_v22 = vld [vmem:[#allocation2 + $0x49] sm:$0xff]  ;;  %v2583_v33 = vld [vmem:[#allocation2 + $0x61] sm:$0xff]  ;;  %v2232_v34 = vpack.c.bf16 %v2167_v28, %v2166_v31 }
 0x211   : > { %2574 = vst.msk [vmem:[#allocation3 + $0x4f0] sm:$0xff] %vm1098_vm3, %v2539_v46  ;;  %v2922_v53 = vld [vmem:[#allocation2 + $0x23a] sm:$0xff]  ;;  %v2168_v38 = vld [vmem:[#allocation2 + $0x6e] sm:$0xff]  ;;  %v2171_v43 = vld [vmem:[#allocation2 + $0x86] sm:$0xff] }
 0x212   : > { %1173 = vst.msk [vmem:[#allocation2 + $0x250] sm:$0xff] %vm1098_vm3, %v1094_v49  ;;  %v1095_v54 = vmax.f32 %v1009_v50, 0.0  ;;  %v1806_v59 = vld [vmem:[#allocation2 + $0x23c] sm:$0xff]  ;;  %v2585_v39 = vld [vmem:[#allocation2 + $0x71] sm:$0xff]  ;;  %v2584_v42 = vld [vmem:[#allocation2 + $0x69] sm:$0xff] }
 0x213   : > { %v2923_v58 = vld [vmem:[#allocation2 + $0x242] sm:$0xff]  ;;  %v2582_v35 = vld [vmem:[#allocation2 + $0x59] sm:$0xff]  ;;  %v2651_v32 = vpack.c.bf16 %v2585_v39, %v2584_v42  ;;  %v2593_v4 = vld [vmem:[#allocation2 + $0xb1] sm:$0xff] }
 0x214   : > { %v1807_v60 = vld [vmem:[#allocation2 + $0x244] sm:$0xff]  ;;  %v2960_v61 = vpack.c.bf16 %v2923_v58, %v2922_v53  ;;  %1174 = vst.msk [vmem:[#allocation2 + $0x258] sm:$0xff] %vm1098_vm3, %v1095_v54  ;;  %2300 = vrot.lane.b32.xlu1 %v2229_v55, %s6650_s25  ;;  %v2169_v36 = vld [vmem:[#allocation2 + $0x76] sm:$0xff]  ;;  %v2650_v37 = vpack.c.bf16 %v2583_v33, %v2582_v35  ;;  %v2172_v53 = vld [vmem:[#allocation2 + $0x8e] sm:$0xff] }
 0x215   : > { %v1842_v62 = vpack.c.bf16 %v1807_v60, %v1806_v59  ;;  %v2086_v63 = vld [vmem:[#allocation2 + $0x23d] sm:$0xff]  ;;  %v2087_v2 = vld [vmem:[#allocation2 + $0x245] sm:$0xff]  ;;  %v1013_v6 = vpop.f32.mrb[152].mxu0  ;;  %v2233_v41 = vpack.c.bf16 %v2169_v36, %v2168_v38  ;;  %v2589_v54 = vld [vmem:[#allocation2 + $0x91] sm:$0xff] }
 0x216   : > { %v2503_v3 = vld [vmem:[#allocation2 + $0x240] sm:$0xff]  ;;  %v2122_v7 = vpack.c.bf16 %v2087_v2, %v2086_v63  ;;  %2995 = vst.msk [vmem:[#allocation3 + $0x520] sm:$0xff] %vm1098_vm3, %v2960_v61  ;;  %v1014_v10 = vadd.f32 %v7241_v26, %v1013_v6  ;;  %v5988_v11 = vpop.f32.mrb[153].mxu0  ;;  %v2504_v24 = vld [vmem:[#allocation2 + $0x248] sm:$0xff]  ;;  %v2173_v51 = vld [vmem:[#allocation2 + $0x96] sm:$0xff] }
 0x217   : > { %v2540_v8 = vpack.c.bf16 %v2503_v3, %v2502_v57  ;;  %1946 = vrot.lane.b32.xlu0 %v1842_v62, %s6650_s25  ;;  %v1016_v14 = vpop.f32.mrb[154].mxu0  ;;  %v2170_v47 = vld [vmem:[#allocation2 + $0x7e] sm:$0xff]  ;;  %v2235_v55 = vpack.c.bf16 %v2173_v51, %v2172_v53  ;;  %v2588_v56 = vld [vmem:[#allocation2 + $0x89] sm:$0xff]  ;;  %v2177_v63 = vld [vmem:[#allocation2 + $0xb6] sm:$0xff] }
 0x218   : > { %2157 = vst.msk [vmem:[#allocation3 + $0x560] sm:$0xff] %vm1098_vm3, %v2122_v7  ;;  %2302 = vrot.lane.b32.xlu1 %v2230_v9, %s6650_s25  ;;  %v1096_v16 = vmax.f32 %v1014_v10, 0.0  ;;  %v1017_v17 = vadd.f32 %v7241_v26, %v1016_v14  ;;  %v5989_v18 = vpop.f32.mrb[155].mxu0  ;;  %v2649_v26 = vpack.c.bf16 %v2581_v20, %v2580_v22  ;;  %v2234_v49 = vpack.c.bf16 %v2171_v43, %v2170_v47  ;;  %v2586_v50 = vld [vmem:[#allocation2 + $0x79] sm:$0xff]  ;;  %v2175_v57 = vld [vmem:[#allocation2 + $0xa6] sm:$0xff]  ;;  %v2176_v3 = vld [vmem:[#allocation2 + $0xae] sm:$0xff] }
 0x219   : > { %2575 = vst.msk [vmem:[#allocation3 + $0x518] sm:$0xff] %vm1098_vm3, %v2540_v8  ;;  %v2505_v25 = vld [vmem:[#allocation2 + $0x250] sm:$0xff]  ;;  %v2652_v52 = vpack.c.bf16 %v2587_v48, %v2586_v50  ;;  %v2653_v58 = vpack.c.bf16 %v2589_v54, %v2588_v56  ;;  %v2174_v59 = vld [vmem:[#allocation2 + $0x9e] sm:$0xff]  ;;  %v2237_v5 = vpack.c.bf16 %v2177_v63, %v2176_v3  ;;  %v2179_v7 = vld [vmem:[#allocation2 + $0xc6] sm:$0xff] }
 0x21a   : > { %1175 = vst.msk [vmem:[#allocation2 + $0x260] sm:$0xff] %vm1098_vm3, %v1096_v16  ;;  %v1097_v23 = vmax.f32 %v1017_v17, 0.0  ;;  %v2924_v44 = vld [vmem:[#allocation2 + $0x24a] sm:$0xff]  ;;  %v2541_v29 = vpack.c.bf16 %v2505_v25, %v2504_v24  ;;  %v2591_v60 = vld [vmem:[#allocation2 + $0xa1] sm:$0xff]  ;;  %v2236_v61 = vpack.c.bf16 %v2175_v57, %v2174_v59  ;;  %v2590_v62 = vld [vmem:[#allocation2 + $0x99] sm:$0xff] }
 0x21b   : > { %2718 = vrot.lane.b32.xlu0 %v2648_v15, %s6650_s25  ;;  %v2925_v27 = vld [vmem:[#allocation2 + $0x252] sm:$0xff]  ;;  %v2654_v2 = vpack.c.bf16 %v2591_v60, %v2590_v62  ;;  %v2592_v6 = vld [vmem:[#allocation2 + $0xa9] sm:$0xff]  ;;  %v2178_v9 = vld [vmem:[#allocation2 + $0xbe] sm:$0xff] }
 0x21c   : > { %v2961_v30 = vpack.c.bf16 %v2925_v27, %v2924_v44  ;;  %2304 = vrot.lane.b32.xlu1 %v2231_v21, %s6650_s25  ;;  %1176 = vst.msk [vmem:[#allocation2 + $0x268] sm:$0xff] %vm1098_vm3, %v1097_v23  ;;  %2576 = vst.msk [vmem:[#allocation3 + $0x540] sm:$0xff] %vm1098_vm3, %v2541_v29  ;;  %v2655_v8 = vpack.c.bf16 %v2593_v4, %v2592_v6  ;;  %v2595_v10 = vld [vmem:[#allocation2 + $0xc1] sm:$0xff]  ;;  %v2238_v11 = vpack.c.bf16 %v2179_v7, %v2178_v9  ;;  %v2594_v12 = vld [vmem:[#allocation2 + $0xb9] sm:$0xff] }
 0x21d   : > { %v2181_v13 = vld [vmem:[#allocation2 + $0xd6] sm:$0xff]  ;;  %v2656_v14 = vpack.c.bf16 %v2595_v10, %v2594_v12  ;;  %v2180_v15 = vld [vmem:[#allocation2 + $0xce] sm:$0xff]  ;;  %v2183_v19 = vld [vmem:[#allocation2 + $0xe6] sm:$0xff] }
 0x21e   : > { %2996 = vst.msk [vmem:[#allocation3 + $0x548] sm:$0xff] %vm1098_vm3, %v2961_v30  ;;  %v2597_v16 = vld [vmem:[#allocation2 + $0xd1] sm:$0xff]  ;;  %v2239_v17 = vpack.c.bf16 %v2181_v13, %v2180_v15  ;;  %v2596_v18 = vld [vmem:[#allocation2 + $0xc9] sm:$0xff]  ;;  %v2182_v21 = vld [vmem:[#allocation2 + $0xde] sm:$0xff] }
 0x21f   : > { %2720 = vrot.lane.b32.xlu0 %v2649_v26, %s6650_s25  ;;  %v2657_v20 = vpack.c.bf16 %v2597_v16, %v2596_v18  ;;  %v2599_v22 = vld [vmem:[#allocation2 + $0xe1] sm:$0xff]  ;;  %v2240_v23 = vpack.c.bf16 %v2183_v19, %v2182_v21  ;;  %v2598_v24 = vld [vmem:[#allocation2 + $0xd9] sm:$0xff]  ;;  %v2184_v27 = vld [vmem:[#allocation2 + $0xee] sm:$0xff] }
 0x220   : > { %2306 = vrot.lane.b32.xlu1 %v2232_v34, %s6650_s25  ;;  %v2185_v25 = vld [vmem:[#allocation2 + $0xf6] sm:$0xff]  ;;  %v2658_v44 = vpack.c.bf16 %v2599_v22, %v2598_v24  ;;  %v2600_v30 = vld [vmem:[#allocation2 + $0xe9] sm:$0xff]  ;;  %v2186_v33 = vld [vmem:[#allocation2 + $0xfe] sm:$0xff] }
 0x221   : > { %v2926_v40 = vld [vmem:[#allocation2 + $0x25a] sm:$0xff]  ;;  %v2601_v28 = vld [vmem:[#allocation2 + $0xf1] sm:$0xff]  ;;  %v2241_v29 = vpack.c.bf16 %v2185_v25, %v2184_v27  ;;  %v2187_v26 = vld [vmem:[#allocation2 + $0x106] sm:$0xff] }
 0x222   : > { %v2659_v31 = vpack.c.bf16 %v2601_v28, %v2600_v30  ;;  %v2603_v34 = vld [vmem:[#allocation2 + $0x101] sm:$0xff]  ;;  %v2242_v35 = vpack.c.bf16 %v2187_v26, %v2186_v33  ;;  %v2602_v36 = vld [vmem:[#allocation2 + $0xf9] sm:$0xff]  ;;  %v2604_v43 = vld [vmem:[#allocation2 + $0x109] sm:$0xff] }
 0x223   : > { %2722 = vrot.lane.b32.xlu0 %v2650_v37, %s6650_s25  ;;  %v2927_v45 = vld [vmem:[#allocation2 + $0x262] sm:$0xff]  ;;  %v2189_v37 = vld [vmem:[#allocation2 + $0x116] sm:$0xff]  ;;  %v2660_v39 = vpack.c.bf16 %v2603_v34, %v2602_v36  ;;  %v2196_v12 = vld [vmem:[#allocation2 + $0x14e] sm:$0xff] }
 0x224   : > { %2308 = vrot.lane.b32.xlu1 %v2233_v41, %s6650_s25  ;;  %v2962_v46 = vpack.c.bf16 %v2927_v45, %v2926_v40  ;;  %v2188_v40 = vld [vmem:[#allocation2 + $0x10e] sm:$0xff]  ;;  %v2191_v45 = vld [vmem:[#allocation2 + $0x126] sm:$0xff]  ;;  %v2190_v47 = vld [vmem:[#allocation2 + $0x11e] sm:$0xff] }
 0x225   : > { %v2605_v41 = vld [vmem:[#allocation2 + $0x111] sm:$0xff]  ;;  %v2243_v42 = vpack.c.bf16 %v2189_v37, %v2188_v40  ;;  %v2607_v48 = vld [vmem:[#allocation2 + $0x121] sm:$0xff]  ;;  %v2606_v50 = vld [vmem:[#allocation2 + $0x119] sm:$0xff] }
 0x226   : > { %2997 = vst.msk [vmem:[#allocation3 + $0x570] sm:$0xff] %vm1098_vm3, %v2962_v46  ;;  %v2661_v46 = vpack.c.bf16 %v2605_v41, %v2604_v43  ;;  %v2193_v51 = vld [vmem:[#allocation2 + $0x136] sm:$0xff]  ;;  %v2662_v54 = vpack.c.bf16 %v2607_v48, %v2606_v50  ;;  %v2608_v59 = vld [vmem:[#allocation2 + $0x129] sm:$0xff]  ;;  %v2611_v3 = vld [vmem:[#allocation2 + $0x141] sm:$0xff] }
 0x227   : > { %2724 = vrot.lane.b32.xlu0 %v2651_v32, %s6650_s25  ;;  %v2609_v56 = vld [vmem:[#allocation2 + $0x131] sm:$0xff]  ;;  %v2195_v60 = vld [vmem:[#allocation2 + $0x146] sm:$0xff]  ;;  %v2610_v6 = vld [vmem:[#allocation2 + $0x139] sm:$0xff] }
 0x228   : > { %2310 = vrot.lane.b32.xlu1 %v2234_v49, %s6650_s25  ;;  %v2244_v49 = vpack.c.bf16 %v2191_v45, %v2190_v47  ;;  %v2663_v63 = vpack.c.bf16 %v2609_v56, %v2608_v59  ;;  %v2197_v7 = vld [vmem:[#allocation2 + $0x156] sm:$0xff]  ;;  %v2612_v16 = vld [vmem:[#allocation2 + $0x149] sm:$0xff]  ;;  %v2198_v21 = vld [vmem:[#allocation2 + $0x15e] sm:$0xff] }
 0x229   : > { %v2613_v13 = vld [vmem:[#allocation2 + $0x151] sm:$0xff]  ;;  %v2615_v22 = vld [vmem:[#allocation2 + $0x161] sm:$0xff]  ;;  %v2614_v25 = vld [vmem:[#allocation2 + $0x159] sm:$0xff] }
 0x22a   : > { %v6563_v15 = vld [vmem:[%s8200_s3 + $0x90] sm:$0xff]   ;;  %v6564_v24 = vld [vmem:[%s8200_s3 + $0x98] sm:$0xff]   ;;  %v2666_v30 = vpack.c.bf16 %v2615_v22, %v2614_v25  ;;  %v6565_v34 = vld [vmem:[%s8200_s3 + $0xa0] sm:$0xff]  }
 0x22b   : > { %2726 = vrot.lane.b32.xlu0 %v2652_v52, %s6650_s25  ;;  %v2200_v26 = vld [vmem:[#allocation2 + $0x16e] sm:$0xff]  ;;  %v2203_v36 = vld [vmem:[#allocation2 + $0x186] sm:$0xff]  ;;  %v2618_v45 = vld [vmem:[#allocation2 + $0x179] sm:$0xff] }
 0x22c   : > { %2312 = vrot.lane.b32.xlu1 %v2235_v55, %s6650_s25  ;;  %v2192_v55 = vld [vmem:[#allocation2 + $0x12e] sm:$0xff]  ;;  %v2619_v40 = vld [vmem:[#allocation2 + $0x181] sm:$0xff] }
 0x22d   : > { %v2245_v57 = vpack.c.bf16 %v2193_v51, %v2192_v55  ;;  %v6566_v43 = vld [vmem:[%s8200_s3 + $0xa8] sm:$0xff]   ;;  %v2668_v48 = vpack.c.bf16 %v2619_v40, %v2618_v45  ;;  %v2621_v50 = vld [vmem:[#allocation2 + $0x191] sm:$0xff] }
 0x22f   : > { %2728 = vrot.lane.b32.xlu0 %v2653_v58, %s6650_s25  ;;  %v6561_v58 = vld [vmem:[%s8200_s3 + $0x80] sm:$0xff]  }
 0x230   : > { %2314 = vrot.lane.b32.xlu1 %v2236_v61, %s6650_s25 }
 0x233   : > { %2730 = vrot.lane.b32.xlu0 %v2654_v2, %s6650_s25  ;;  %v2194_v2 = vld [vmem:[#allocation2 + $0x13e] sm:$0xff] }
 0x234   : > { %2316 = vrot.lane.b32.xlu1 %v2237_v5, %s6650_s25  ;;  %v2246_v4 = vpack.c.bf16 %v2195_v60, %v2194_v2  ;;  %v6562_v5 = vld [vmem:[%s8200_s3 + $0x88] sm:$0xff]  }
 0x237   : > { %2732 = vrot.lane.b32.xlu0 %v2655_v8, %s6650_s25 }
 0x238   : > { %2318 = vrot.lane.b32.xlu1 %v2238_v11, %s6650_s25  ;;  %v2664_v11 = vpack.c.bf16 %v2611_v3, %v2610_v6  ;;  %v2625_v6 = vld [vmem:[#allocation2 + $0x1b1] sm:$0xff] }
 0x23b   : > { %2734 = vrot.lane.b32.xlu0 %v2656_v14, %s6650_s25  ;;  %v2247_v14 = vpack.c.bf16 %v2197_v7, %v2196_v12 }
 0x23c   : > { %2320 = vrot.lane.b32.xlu1 %v2239_v17, %s6650_s25  ;;  %v2199_v17 = vld [vmem:[#allocation2 + $0x166] sm:$0xff] }
 0x23f   : > { %2736 = vrot.lane.b32.xlu0 %v2657_v20, %s6650_s25  ;;  %v2665_v20 = vpack.c.bf16 %v2613_v13, %v2612_v16  ;;  %v2210_v13 = vld [vmem:[#allocation2 + $0x1be] sm:$0xff] }
 0x240   : > { %2322 = vrot.lane.b32.xlu1 %v2240_v23, %s6650_s25  ;;  %v2248_v23 = vpack.c.bf16 %v2199_v17, %v2198_v21  ;;  %v6570_v17 = vld [vmem:[%s8200_s3 + $0xc8] sm:$0xff]  }
 0x243   : > { %2738 = vrot.lane.b32.xlu0 %v2658_v44, %s6650_s25  ;;  %v2201_v44 = vld [vmem:[#allocation2 + $0x176] sm:$0xff] }
 0x244   : > { %2324 = vrot.lane.b32.xlu1 %v2241_v29, %s6650_s25  ;;  %v2249_v33 = vpack.c.bf16 %v2201_v44, %v2200_v26  ;;  %v6571_v44 = vld [vmem:[%s8200_s3 + $0xd0] sm:$0xff]   ;;  %v2214_v26 = vld [vmem:[#allocation2 + $0x1de] sm:$0xff] }
 0x247   : > { %2740 = vrot.lane.b32.xlu0 %v2659_v31, %s6650_s25  ;;  %v2617_v31 = vld [vmem:[#allocation2 + $0x171] sm:$0xff] }
 0x248   : > { %2326 = vrot.lane.b32.xlu1 %v2242_v35, %s6650_s25  ;;  %v2616_v35 = vld [vmem:[#allocation2 + $0x169] sm:$0xff] }
 0x249   : > { %v1931_v38 = vpop.permute.xlu0 %1930 }
 0x24a   : > { %2009 = vst.msk [vmem:[#allocation3 + $0x418] sm:$0xff] %vm1562_vm4, %v1931_v38  ;;  %v2667_v38 = vpack.c.bf16 %v2617_v31, %v2616_v35  ;;  %v2631_v31 = vld [vmem:[#allocation2 + $0x1e1] sm:$0xff]  ;;  %v6572_v35 = vld [vmem:[%s8200_s3 + $0xd8] sm:$0xff]  }
 0x24b   : > { %2742 = vrot.lane.b32.xlu0 %v2660_v39, %s6650_s25  ;;  %v2202_v39 = vld [vmem:[#allocation2 + $0x17e] sm:$0xff] }
 0x24c   : > { %2328 = vrot.lane.b32.xlu1 %v2243_v42, %s6650_s25  ;;  %v2250_v42 = vpack.c.bf16 %v2203_v36, %v2202_v39  ;;  %v2630_v36 = vld [vmem:[#allocation2 + $0x1d9] sm:$0xff] }
 0x24d   : > { %v1510_v32 = vpop.permute.xlu0 %1509  ;;  %v2674_v40 = vpack.c.bf16 %v2631_v31, %v2630_v36 }
 0x24e   : > { %1589 = vst.msk [vmem:[#allocation3 + $0x410] sm:$0xff] %vm1562_vm4, %v1510_v32  ;;  %v2205_v32 = vld [vmem:[#allocation2 + $0x196] sm:$0xff] }
 0x24f   : > { %2744 = vrot.lane.b32.xlu0 %v2661_v46, %s6650_s25 }
 0x250   : > { %2330 = vrot.lane.b32.xlu1 %v2244_v49, %s6650_s25  ;;  %v2204_v49 = vld [vmem:[#allocation2 + $0x18e] sm:$0xff] }
 0x251   : > { %v1933_v52 = vpop.permute.xlu1 %1932  ;;  %v3129_v53 = vld [vmem:[#allocation3 + $0x418] sm:$0xff]  ;;  %v2251_v51 = vpack.c.bf16 %v2205_v32, %v2204_v49  ;;  %v6573_v32 = vld [vmem:[%s8200_s3 + $0xe0] sm:$0xff]  }
 0x252   : > { %2010 = vst.msk [vmem:[#allocation3 + $0x440] sm:$0xff] %vm1562_vm4, %v1933_v52  ;;  %3813 = vmatprep.mubr.bf16.mxu1 %v3129_v53  ;;  %v6567_v52 = vld [vmem:[%s8200_s3 + $0xb0] sm:$0xff]  }
 0x253   : > { %2746 = vrot.lane.b32.xlu0 %v2662_v54, %s6650_s25  ;;  %v2620_v53 = vld [vmem:[#allocation2 + $0x189] sm:$0xff] }
 0x254   : > { %2332 = vrot.lane.b32.xlu1 %v2245_v57, %s6650_s25  ;;  %v2207_v54 = vld [vmem:[#allocation2 + $0x1a6] sm:$0xff]  ;;  %v2669_v56 = vpack.c.bf16 %v2621_v50, %v2620_v53  ;;  %v2206_v57 = vld [vmem:[#allocation2 + $0x19e] sm:$0xff] }
 0x255   : > { %v1512_v61 = vpop.permute.xlu1 %1511  ;;  %v3128_v62 = vld [vmem:[#allocation3 + $0x410] sm:$0xff]  ;;  %v2252_v60 = vpack.c.bf16 %v2207_v54, %v2206_v57  ;;  %v6574_v54 = vld [vmem:[%s8200_s3 + $0xe8] sm:$0xff]  }
 0x256   : > { %1590 = vst.msk [vmem:[#allocation3 + $0x438] sm:$0xff] %vm1562_vm4, %v1512_v61  ;;  %3814 = vmatmul.mubr.bf16.vlgmr.msra.gmra.mrb[0].mxu1 %v3128_v62  ;;  %v6568_v61 = vld [vmem:[%s8200_s3 + $0xb8] sm:$0xff]  }
 0x257   : > { %2748 = vrot.lane.b32.xlu0 %v2663_v63, %s6650_s25  ;;  %3887 = vmatpush1.bf16.msra.mxu1 %v6561_v58  ;;  %v2623_v58 = vld [vmem:[#allocation2 + $0x1a1] sm:$0xff]  ;;  %v2622_v62 = vld [vmem:[#allocation2 + $0x199] sm:$0xff] }
 0x258   : > { %3888 = vmatprep.subr.bf16.mxu1 %v6649_v0  ;;  %2334 = vrot.lane.b32.xlu1 %v2246_v4, %s6650_s25  ;;  %v2209_v63 = vld [vmem:[#allocation2 + $0x1b6] sm:$0xff]  ;;  %v2670_v4 = vpack.c.bf16 %v2623_v58, %v2622_v62  ;;  %v2218_v50 = vld [vmem:[#allocation2 + $0x1fe] sm:$0xff] }
 0x259   : > { %v1514_v8 = vpop.permute.xlu1 %1513  ;;  %v1935_v9 = vpop.permute.xlu0 %1934  ;;  %v3134_v10 = vld [vmem:[#allocation3 + $0x440] sm:$0xff] }
 0x25a   : > { %1591 = vst.msk [vmem:[#allocation3 + $0x460] sm:$0xff] %vm1562_vm4, %v1514_v8  ;;  %2011 = vst.msk [vmem:[#allocation3 + $0x468] sm:$0xff] %vm1562_vm4, %v1935_v9  ;;  %3821 = vmatprep.mubr.bf16.mxu1 %v3134_v10  ;;  %v6569_v8 = vld [vmem:[%s8200_s3 + $0xc0] sm:$0xff]   ;;  %v2624_v9 = vld [vmem:[#allocation2 + $0x1a9] sm:$0xff] }
 0x25b   : > { %2750 = vrot.lane.b32.xlu0 %v2664_v11, %s6650_s25  ;;  %3889 = vmatpush1.bf16.msra.mxu1 %v6562_v5  ;;  %v2208_v5 = vld [vmem:[#allocation2 + $0x1ae] sm:$0xff]  ;;  %v2211_v10 = vld [vmem:[#allocation2 + $0x1c6] sm:$0xff]  ;;  %v2671_v12 = vpack.c.bf16 %v2625_v6, %v2624_v9 }
 0x25c   : > { %3890 = vmatprep.subr.bf16.mxu1 %v6649_v0  ;;  %2336 = vrot.lane.b32.xlu1 %v2247_v14, %s6650_s25  ;;  %v2253_v7 = vpack.c.bf16 %v2209_v63, %v2208_v5  ;;  %v2627_v14 = vld [vmem:[#allocation2 + $0x1c1] sm:$0xff]  ;;  %v2254_v16 = vpack.c.bf16 %v2211_v10, %v2210_v13  ;;  %v2638_v13 = vld [vmem:[#allocation2 + $0x219] sm:$0xff] }
 0x25d   : > { %v1516_v18 = vpop.permute.xlu1 %1515  ;;  %v3133_v19 = vld [vmem:[#allocation3 + $0x438] sm:$0xff] }
 0x25e   : > { %1592 = vst.msk [vmem:[#allocation3 + $0x488] sm:$0xff] %vm1562_vm4, %v1516_v18  ;;  %3822 = vmatmul.mubr.bf16.gmra.mrb[4].mxu1 %v3133_v19  ;;  %v2626_v18 = vld [vmem:[#allocation2 + $0x1b9] sm:$0xff]  ;;  %v2639_v9 = vld [vmem:[#allocation2 + $0x221] sm:$0xff] }
 0x25f   : > { %2752 = vrot.lane.b32.xlu0 %v2665_v20, %s6650_s25  ;;  %3891 = vmatpush1.bf16.msra.mxu1 %v6563_v15  ;;  %v2213_v19 = vld [vmem:[#allocation2 + $0x1d6] sm:$0xff]  ;;  %v2672_v22 = vpack.c.bf16 %v2627_v14, %v2626_v18  ;;  %v2224_v18 = vld [vmem:[#allocation2 + $0x22e] sm:$0xff] }
 0x260   : > { %3892 = vmatprep.subr.bf16.mxu1 %v6649_v0  ;;  %2338 = vrot.lane.b32.xlu1 %v2248_v23, %s6650_s25  ;;  %v2212_v23 = vld [vmem:[#allocation2 + $0x1ce] sm:$0xff]  ;;  %v2225_v14 = vld [vmem:[#allocation2 + $0x236] sm:$0xff] }
 0x261   : > { %v1518_v27 = vpop.permute.xlu1 %1517  ;;  %v3139_v29 = vld [vmem:[#allocation3 + $0x468] sm:$0xff]  ;;  %v3138_v37 = vld [vmem:[#allocation3 + $0x460] sm:$0xff]  ;;  %v2255_v25 = vpack.c.bf16 %v2213_v19, %v2212_v23  ;;  %v2227_v23 = vld [vmem:[#allocation2 + $0x246] sm:$0xff] }
 0x262   : > { %v1937_v28 = vpop.permute.xlu0 %1936  ;;  %1593 = vst.msk [vmem:[#allocation3 + $0x4b0] sm:$0xff] %vm1562_vm4, %v1518_v27  ;;  %3829 = vmatprep.mubr.bf16.mxu1 %v3139_v29  ;;  %v2628_v27 = vld [vmem:[#allocation2 + $0x1c9] sm:$0xff]  ;;  %v2641_v19 = vld [vmem:[#allocation2 + $0x231] sm:$0xff] }
 0x263   : > { %2012 = vst.msk [vmem:[#allocation3 + $0x490] sm:$0xff] %vm1562_vm4, %v1937_v28  ;;  %2754 = vrot.lane.b32.xlu0 %v2666_v30, %s6650_s25  ;;  %3893 = vmatpush1.bf16.msra.mxu1 %v6564_v24  ;;  %v2629_v24 = vld [vmem:[#allocation2 + $0x1d1] sm:$0xff]  ;;  %v2215_v28 = vld [vmem:[#allocation2 + $0x1e6] sm:$0xff] }
 0x264   : > { %3894 = vmatprep.subr.bf16.mxu1 %v6649_v0  ;;  %2340 = vrot.lane.b32.xlu1 %v2249_v33, %s6650_s25  ;;  %v2673_v30 = vpack.c.bf16 %v2629_v24, %v2628_v27  ;;  %v2507_v24 = vld [vmem:[#allocation2 + $0x260] sm:$0xff] }
 0x265   : > { %v3143_v55 = vld [vmem:[#allocation3 + $0x488] sm:$0xff] }
 0x266   : > { %3830 = vmatmul.mubr.bf16.gmra.mrb[8].mxu1 %v3138_v37  ;;  %v1520_v41 = vpop.permute.xlu1 %1519  ;;  %v2217_v37 = vld [vmem:[#allocation2 + $0x1f6] sm:$0xff] }
 0x267   : > { %2756 = vrot.lane.b32.xlu0 %v2667_v38, %s6650_s25  ;;  %3895 = vmatpush1.bf16.msra.mxu1 %v6565_v34  ;;  %1594 = vst.msk [vmem:[#allocation3 + $0x4d8] sm:$0xff] %vm1562_vm4, %v1520_v41  ;;  %v2256_v34 = vpack.c.bf16 %v2215_v28, %v2214_v26  ;;  %v2216_v41 = vld [vmem:[#allocation2 + $0x1ee] sm:$0xff]  ;;  %v2643_v26 = vld [vmem:[#allocation2 + $0x241] sm:$0xff] }
 0x268   : > { %3896 = vmatprep.subr.bf16.mxu1 %v6649_v0  ;;  %2342 = vrot.lane.b32.xlu1 %v2250_v42, %s6650_s25  ;;  %v2633_v42 = vld [vmem:[#allocation2 + $0x1f1] sm:$0xff]  ;;  %v2257_v45 = vpack.c.bf16 %v2217_v37, %v2216_v41 }
 0x269   : > { %v3148_v11 = vld [vmem:[#allocation3 + $0x4b0] sm:$0xff] }
 0x26a   : > { %v1939_v46 = vpop.permute.xlu0 %1938  ;;  %v3144_v47 = vld [vmem:[#allocation3 + $0x490] sm:$0xff] }
 0x26b   : > { %2013 = vst.msk [vmem:[#allocation3 + $0x4b8] sm:$0xff] %vm1562_vm4, %v1939_v46  ;;  %3837 = vmatprep.mubr.bf16.mxu1 %v3144_v47  ;;  %2758 = vrot.lane.b32.xlu0 %v2668_v48, %s6650_s25  ;;  %v2632_v46 = vld [vmem:[#allocation2 + $0x1e9] sm:$0xff] }
 0x26c   : > { %3897 = vmatpush1.bf16.msra.mxu1 %v6566_v43  ;;  %2344 = vrot.lane.b32.xlu1 %v2251_v51, %s6650_s25  ;;  %v2219_v47 = vld [vmem:[#allocation2 + $0x206] sm:$0xff]  ;;  %v2675_v49 = vpack.c.bf16 %v2633_v42, %v2632_v46 }
 0x26d   : > { %3898 = vmatprep.subr.bf16.mxu1 %v6649_v0  ;;  %v2635_v51 = vld [vmem:[#allocation2 + $0x201] sm:$0xff]  ;;  %v2258_v53 = vpack.c.bf16 %v2219_v47, %v2218_v50  ;;  %v2644_v42 = vld [vmem:[#allocation2 + $0x249] sm:$0xff] }
 0x26e   : > { %3838 = vmatmul.mubr.bf16.gmra.mrb[12].mxu1 %v3143_v55  ;;  %v1522_v59 = vpop.permute.xlu1 %1521  ;;  %v3153_v29 = vld [vmem:[#allocation3 + $0x4d8] sm:$0xff]  ;;  %v2634_v55 = vld [vmem:[#allocation2 + $0x1f9] sm:$0xff] }
 0x26f   : > { %2760 = vrot.lane.b32.xlu0 %v2669_v56, %s6650_s25  ;;  %1595 = vst.msk [vmem:[#allocation3 + $0x500] sm:$0xff] %vm1562_vm4, %v1522_v59  ;;  %v2221_v56 = vld [vmem:[#allocation2 + $0x216] sm:$0xff]  ;;  %v2676_v59 = vpack.c.bf16 %v2635_v51, %v2634_v55  ;;  %v6577_v46 = vld [vmem:[%s8200_s3 + $0x100] sm:$0xff]   ;;  %v1322_v55 = vld [vmem:[#allocation2 + $0x29] sm:$0xff] }
 0x270   : > { %3899 = vmatpush1.bf16.msra.mxu1 %v6567_v52  ;;  %2346 = vrot.lane.b32.xlu1 %v2252_v60, %s6650_s25  ;;  %v2220_v60 = vld [vmem:[#allocation2 + $0x20e] sm:$0xff] }
 0x271   : > { %3900 = vmatprep.subr.bf16.mxu1 %v6649_v0  ;;  %v2259_v63 = vpack.c.bf16 %v2221_v56, %v2220_v60  ;;  %v1319_v51 = vld [vmem:[#allocation2 + $0x11] sm:$0xff] }
 0x272   : > { %v1941_v2 = vpop.permute.xlu0 %1940  ;;  %v3149_v3 = vld [vmem:[#allocation3 + $0x4b8] sm:$0xff] }
 0x273   : > { %2014 = vst.msk [vmem:[#allocation3 + $0x4e0] sm:$0xff] %vm1562_vm4, %v1941_v2  ;;  %3845 = vmatprep.mubr.bf16.mxu1 %v3149_v3  ;;  %2762 = vrot.lane.b32.xlu0 %v2670_v4, %s6650_s25  ;;  %v6575_v2 = vld [vmem:[%s8200_s3 + $0xf0] sm:$0xff]   ;;  %v2223_v4 = vld [vmem:[#allocation2 + $0x226] sm:$0xff] }
 0x274   : > { %3901 = vmatpush1.bf16.msra.mxu1 %v6568_v61  ;;  %2348 = vrot.lane.b32.xlu1 %v2253_v7, %s6650_s25  ;;  %v2637_v61 = vld [vmem:[#allocation2 + $0x211] sm:$0xff]  ;;  %v2636_v3 = vld [vmem:[#allocation2 + $0x209] sm:$0xff] }
 0x275   : > { %3902 = vmatprep.subr.bf16.mxu1 %v6649_v0  ;;  %v2677_v7 = vpack.c.bf16 %v2637_v61, %v2636_v3  ;;  %v1738_v61 = vld [vmem:[#allocation2 + $0x1c] sm:$0xff] }
 0x276   : > { %3846 = vmatmul.mubr.bf16.gmra.mrb[16].mxu1 %v3148_v11  ;;  %v1524_v15 = vpop.permute.xlu1 %1523  ;;  %v3158_v48 = vld [vmem:[#allocation3 + $0x500] sm:$0xff] }
 0x277   : > { %2764 = vrot.lane.b32.xlu0 %v2671_v12, %s6650_s25  ;;  %1596 = vst.msk [vmem:[#allocation3 + $0x528] sm:$0xff] %vm1562_vm4, %v1524_v15  ;;  %v6576_v12 = vld [vmem:[%s8200_s3 + $0xf8] sm:$0xff]  }
 0x278   : > { %3903 = vmatpush1.bf16.msra.mxu1 %v6569_v8  ;;  %2350 = vrot.lane.b32.xlu1 %v2254_v16, %s6650_s25  ;;  %v2222_v8 = vld [vmem:[#allocation2 + $0x21e] sm:$0xff] }
 0x279   : > { %3904 = vmatprep.subr.bf16.mxu1 %v6649_v0  ;;  %v2260_v11 = vpack.c.bf16 %v2223_v4, %v2222_v8 }
 0x27a   : > { %v1943_v20 = vpop.permute.xlu0 %1942  ;;  %v3154_v21 = vld [vmem:[#allocation3 + $0x4e0] sm:$0xff] }
 0x27b   : > { %2015 = vst.msk [vmem:[#allocation3 + $0x508] sm:$0xff] %vm1562_vm4, %v1943_v20  ;;  %3853 = vmatprep.mubr.bf16.mxu1 %v3154_v21  ;;  %2766 = vrot.lane.b32.xlu0 %v2672_v22, %s6650_s25  ;;  %v2261_v21 = vpack.c.bf16 %v2225_v14, %v2224_v18  ;;  %v2640_v22 = vld [vmem:[#allocation2 + $0x229] sm:$0xff]  ;;  %v1328_v18 = vld [vmem:[#allocation2 + $0x59] sm:$0xff] }
 0x27c   : > { %3905 = vmatpush1.bf16.msra.mxu1 %v6570_v17  ;;  %2352 = vrot.lane.b32.xlu1 %v2255_v25, %s6650_s25  ;;  %v2678_v17 = vpack.c.bf16 %v2639_v9, %v2638_v13  ;;  %v2679_v27 = vpack.c.bf16 %v2641_v19, %v2640_v22  ;;  %v1740_v9 = vld [vmem:[#allocation2 + $0x2c] sm:$0xff]  ;;  %v1325_v13 = vld [vmem:[#allocation2 + $0x41] sm:$0xff] }
 0x27d   : > { %3906 = vmatprep.subr.bf16.mxu1 %v6649_v0  ;;  %v1743_v14 = vld [vmem:[#allocation2 + $0x44] sm:$0xff] }
 0x27e   : > { %3854 = vmatmul.mubr.bf16.gmra.mrb[20].mxu1 %v3153_v29  ;;  %v1526_v33 = vpop.permute.xlu1 %1525  ;;  %v3163_v6 = vld [vmem:[#allocation3 + $0x528] sm:$0xff] }
 0x27f   : > { %2768 = vrot.lane.b32.xlu0 %v2673_v30, %s6650_s25  ;;  %1597 = vst.msk [vmem:[#allocation3 + $0x550] sm:$0xff] %vm1562_vm4, %v1526_v33  ;;  %v2226_v30 = vld [vmem:[#allocation2 + $0x23e] sm:$0xff] }
 0x280   : > { %3907 = vmatpush1.bf16.msra.mxu1 %v6571_v44  ;;  %2354 = vrot.lane.b32.xlu1 %v2256_v34, %s6650_s25  ;;  %v2262_v33 = vpack.c.bf16 %v2227_v23, %v2226_v30  ;;  %v2642_v34 = vld [vmem:[#allocation2 + $0x239] sm:$0xff]  ;;  %v1327_v23 = vld [vmem:[#allocation2 + $0x51] sm:$0xff]  ;;  %v1329_v30 = vld [vmem:[#allocation2 + $0x61] sm:$0xff] }
 0x281   : > { %3908 = vmatprep.subr.bf16.mxu1 %v6649_v0  ;;  %v1945_v38 = vpop.permute.xlu0 %1944  ;;  %v2680_v37 = vpack.c.bf16 %v2643_v26, %v2642_v34  ;;  %v1747_v26 = vld [vmem:[#allocation2 + $0x64] sm:$0xff]  ;;  %v1746_v34 = vld [vmem:[#allocation2 + $0x5c] sm:$0xff] }
 0x282   : > { %v3159_v39 = vld [vmem:[#allocation3 + $0x508] sm:$0xff]  ;;  %2016 = vst.msk [vmem:[#allocation3 + $0x530] sm:$0xff] %vm1562_vm4, %v1945_v38  ;;  %v2299_v43 = vpop.permute.xlu1 %2298  ;;  %v1317_v38 = vld [vmem:[#allocation2 + $0x1] sm:$0xff] }
 0x283   : > { %3861 = vmatprep.mubr.bf16.mxu1 %v3159_v39  ;;  %2770 = vrot.lane.b32.xlu0 %v2674_v40, %s6650_s25  ;;  %2403 = vst.msk [vmem:[#allocation3 + $0x10] sm:$0xff] %vm1562_vm4, %v2299_v43  ;;  %v2645_v39 = vld [vmem:[#allocation2 + $0x251] sm:$0xff]  ;;  %v1320_v43 = vld [vmem:[#allocation2 + $0x19] sm:$0xff] }
 0x284   : > { %3909 = vmatpush1.bf16.msra.mxu1 %v6572_v35  ;;  %2356 = vrot.lane.b32.xlu1 %v2257_v45, %s6650_s25  ;;  %v1318_v35 = vld [vmem:[#allocation2 + $0x9] sm:$0xff]  ;;  %v2646_v45 = vld [vmem:[#allocation2 + $0x259] sm:$0xff] }
 0x285   : > { %3910 = vmatprep.subr.bf16.mxu1 %v6649_v0  ;;  %v1387_v41 = vpack.c.bf16 %v1318_v35, %v1317_v38  ;;  %v1332_v35 = vld [vmem:[#allocation2 + $0x79] sm:$0xff]  ;;  %v1812_v38 = vpack.c.bf16 %v1747_v26, %v1746_v34 }
 0x286   : > { %3862 = vmatmul.mubr.bf16.gmra.mrb[24].mxu1 %v3158_v48  ;;  %v2301_v52 = vpop.permute.xlu1 %2300  ;;  %v3168_v44 = vld [vmem:[#allocation3 + $0x550] sm:$0xff] }
 0x287   : > { %2772 = vrot.lane.b32.xlu0 %v2675_v49, %s6650_s25  ;;  %2404 = vst.msk [vmem:[#allocation3 + $0x38] sm:$0xff] %vm1562_vm4, %v2301_v52  ;;  %v2681_v49 = vpack.c.bf16 %v2645_v39, %v2644_v42 }
 0x288   : > { %3911 = vmatpush1.bf16.msra.mxu1 %v6573_v32  ;;  %2358 = vrot.lane.b32.xlu1 %v2258_v53, %s6650_s25  ;;  %v2647_v32 = vld [vmem:[#allocation2 + $0x261] sm:$0xff]  ;;  %v1388_v53 = vpack.c.bf16 %v1320_v43, %v1319_v51 }
 0x289   : > { %3912 = vmatprep.subr.bf16.mxu1 %v6649_v0  ;;  %v1947_v57 = vpop.permute.xlu0 %1946  ;;  %v3164_v58 = vld [vmem:[#allocation3 + $0x530] sm:$0xff] }
 0x28a   : > { %2017 = vst.msk [vmem:[#allocation3 + $0x558] sm:$0xff] %vm1562_vm4, %v1947_v57  ;;  %3869 = vmatprep.mubr.bf16.mxu1 %v3164_v58  ;;  %v2303_v62 = vpop.permute.xlu1 %2302  ;;  %v3000_v48 = vld [vmem:[#allocation3 + $0x10] sm:$0xff] }
 0x28b   : > { %2774 = vrot.lane.b32.xlu0 %v2676_v59, %s6650_s25  ;;  %2405 = vst.msk [vmem:[#allocation3 + $0x60] sm:$0xff] %vm1562_vm4, %v2303_v62  ;;  %v1321_v57 = vld [vmem:[#allocation2 + $0x21] sm:$0xff]  ;;  %v1324_v62 = vld [vmem:[#allocation2 + $0x39] sm:$0xff] }
 0x28c   : > { %3913 = vmatpush1.bf16.msra.mxu1 %v6574_v54  ;;  %2360 = vrot.lane.b32.xlu1 %v2259_v63, %s6650_s25  ;;  %v2682_v54 = vpack.c.bf16 %v2647_v32, %v2646_v45  ;;  %v1739_v58 = vld [vmem:[#allocation2 + $0x24] sm:$0xff]  ;;  %v1389_v60 = vpack.c.bf16 %v1322_v55, %v1321_v57  ;;  %v1748_v45 = vld [vmem:[#allocation2 + $0x6c] sm:$0xff] }
 0x28d   : > { %3914 = vmatprep.subr.bf16.mxu1 %v6649_v0  ;;  %v2719_v5 = vpop.permute.xlu0 %2718  ;;  %v1808_v3 = vpack.c.bf16 %v1739_v58, %v1738_v61  ;;  %v1334_v32 = vld [vmem:[#allocation2 + $0x89] sm:$0xff] }
 0x28e   : > { %2823 = vst.msk [vmem:[#allocation3 + $0x18] sm:$0xff] %vm1562_vm4, %v2719_v5  ;;  %3870 = vmatmul.mubr.bf16.gmra.mrb[28].mxu1 %v3163_v6  ;;  %v2305_v10 = vpop.permute.xlu1 %2304  ;;  %v1323_v5 = vld [vmem:[#allocation2 + $0x31] sm:$0xff] }
 0x28f   : > { %2776 = vrot.lane.b32.xlu0 %v2677_v7, %s6650_s25  ;;  %2406 = vst.msk [vmem:[#allocation3 + $0x88] sm:$0xff] %vm1562_vm4, %v2305_v10  ;;  %v1741_v6 = vld [vmem:[#allocation2 + $0x34] sm:$0xff]  ;;  %v1390_v8 = vpack.c.bf16 %v1324_v62, %v1323_v5  ;;  %v1326_v10 = vld [vmem:[#allocation2 + $0x49] sm:$0xff]  ;;  %v1337_v5 = vld [vmem:[#allocation2 + $0xa1] sm:$0xff] }
 0x290   : > { %3915 = vmatpush1.bf16.msra.mxu1 %v6575_v2  ;;  %2362 = vrot.lane.b32.xlu1 %v2260_v11, %s6650_s25  ;;  %v3005_v2 = vld [vmem:[#allocation3 + $0x38] sm:$0xff] }
 0x291   : > { %3916 = vmatprep.subr.bf16.mxu1 %v6649_v0  ;;  %v2721_v15 = vpop.permute.xlu0 %2720  ;;  %v3169_v16 = vld [vmem:[#allocation3 + $0x558] sm:$0xff]  ;;  %v2506_v0 = vld [vmem:[#allocation2 + $0x258] sm:$0xff] }
 0x292   : > { %2824 = vst.msk [vmem:[#allocation3 + $0x40] sm:$0xff] %vm1562_vm4, %v2721_v15  ;;  %3877 = vmatprep.mubr.bf16.mxu1 %v3169_v16  ;;  %v2307_v20 = vpop.permute.xlu1 %2306  ;;  %v2542_v29 = vpack.c.bf16 %v2507_v24, %v2506_v0  ;;  %v1391_v16 = vpack.c.bf16 %v1326_v10, %v1325_v13  ;;  %v1745_v0 = vld [vmem:[#allocation2 + $0x54] sm:$0xff] }
 0x293   : > { %2778 = vrot.lane.b32.xlu0 %v2678_v17, %s6650_s25  ;;  %2407 = vst.msk [vmem:[#allocation3 + $0xb0] sm:$0xff] %vm1562_vm4, %v2307_v20  ;;  %v1742_v17 = vld [vmem:[#allocation2 + $0x3c] sm:$0xff]  ;;  %v3010_v20 = vld [vmem:[#allocation3 + $0x60] sm:$0xff] }
 0x294   : > { %3917 = vmatpush1.bf16.msra.mxu1 %v6576_v12  ;;  %2364 = vrot.lane.b32.xlu1 %v2261_v21, %s6650_s25  ;;  %2577 = vst.msk [vmem:[#allocation3 + $0x568] sm:$0xff] %vm1098_vm3, %v2542_v29  ;;  %v1809_v12 = vpack.c.bf16 %v1741_v6, %v1740_v9  ;;  %v1810_v21 = vpack.c.bf16 %v1743_v14, %v1742_v17  ;;  %v1755_v6 = vld [vmem:[#allocation2 + $0xa4] sm:$0xff]  ;;  %v1754_v9 = vld [vmem:[#allocation2 + $0x9c] sm:$0xff] }
 0x295   : > { %5990 = vmatprep.subr.bf16.mxu1 %v6647_v1  ;;  %v2723_v25 = vpop.permute.xlu0 %2722  ;;  %v3001_v28 = vld [vmem:[#allocation3 + $0x18] sm:$0xff]  ;;  %v1340_v10 = vld [vmem:[#allocation2 + $0xb9] sm:$0xff]  ;;  %v1816_v13 = vpack.c.bf16 %v1755_v6, %v1754_v9  ;;  %v1351_v6 = vld [vmem:[#allocation2 + $0x111] sm:$0xff] }
 0x296   : > { %2825 = vst.msk [vmem:[#allocation3 + $0x68] sm:$0xff] %vm1562_vm4, %v2723_v25  ;;  %3878 = vmatmul.mubr.bf16.gmra.mrb[32].mxu1 %v3168_v44  ;;  %v2309_v31 = vpop.permute.xlu1 %2308  ;;  %v1392_v25 = vpack.c.bf16 %v1328_v18, %v1327_v23  ;;  %v1744_v44 = vld [vmem:[#allocation2 + $0x4c] sm:$0xff]  ;;  %v1341_v23 = vld [vmem:[#allocation2 + $0xc1] sm:$0xff] }
 0x297   : > { %2780 = vrot.lane.b32.xlu0 %v2679_v27, %s6650_s25  ;;  %3918 = vmatprep.mubr.bf16.mxu1 %v3001_v28  ;;  %2408 = vst.msk [vmem:[#allocation3 + $0xd8] sm:$0xff] %vm1562_vm4, %v2309_v31  ;;  %v1330_v27 = vld [vmem:[#allocation2 + $0x69] sm:$0xff]  ;;  %v1811_v29 = vpack.c.bf16 %v1745_v0, %v1744_v44  ;;  %v1758_v44 = vld [vmem:[#allocation2 + $0xbc] sm:$0xff] }
 0x298   : > { %2366 = vrot.lane.b32.xlu1 %v2262_v33, %s6650_s25  ;;  %v1393_v33 = vpack.c.bf16 %v1330_v27, %v1329_v30  ;;  %v1759_v0 = vld [vmem:[#allocation2 + $0xc4] sm:$0xff]  ;;  %v1344_v27 = vld [vmem:[#allocation2 + $0xd9] sm:$0xff] }
 0x299   : > { %v2725_v36 = vpop.permute.xlu0 %2724  ;;  %v3006_v50 = vld [vmem:[#allocation3 + $0x40] sm:$0xff]  ;;  %v1818_v30 = vpack.c.bf16 %v1759_v0, %v1758_v44 }
 0x29a   : > { %2826 = vst.msk [vmem:[#allocation3 + $0x90] sm:$0xff] %vm1562_vm4, %v2725_v36  ;;  %v2311_v40 = vpop.permute.xlu1 %2310  ;;  %v1355_v0 = vld [vmem:[#allocation2 + $0x131] sm:$0xff] }
 0x29b   : > { %2782 = vrot.lane.b32.xlu0 %v2680_v37, %s6650_s25  ;;  %2409 = vst.msk [vmem:[#allocation3 + $0x100] sm:$0xff] %vm1562_vm4, %v2311_v40  ;;  %v3015_v37 = vld [vmem:[#allocation3 + $0x88] sm:$0xff] }
 0x29c   : > { %1457 = vrot.lane.b32.xlu1 %v1387_v41, %s6650_s25  ;;  %v1331_v40 = vld [vmem:[#allocation2 + $0x71] sm:$0xff] }
 0x29d   : > { %v2727_v47 = vpop.permute.xlu0 %2726  ;;  %v3011_v4 = vld [vmem:[#allocation3 + $0x68] sm:$0xff]  ;;  %v1394_v43 = vpack.c.bf16 %v1332_v35, %v1331_v40  ;;  %v1345_v40 = vld [vmem:[#allocation2 + $0xe1] sm:$0xff] }
 0x29e   : > { %2827 = vst.msk [vmem:[#allocation3 + $0xb8] sm:$0xff] %vm1562_vm4, %v2727_v47  ;;  %3919 = vmatmul.mubr.bf16.vlgmr.msra.gmra.mrb[36].mxu1 %v3000_v48  ;;  %v2313_v52 = vpop.permute.xlu1 %2312  ;;  %v1749_v41 = vld [vmem:[#allocation2 + $0x74] sm:$0xff] }
 0x29f   : > { %3926 = vmatprep.mubr.bf16.mxu1 %v3006_v50  ;;  %2784 = vrot.lane.b32.xlu0 %v2681_v49, %s6650_s25  ;;  %2410 = vst.msk [vmem:[#allocation3 + $0x128] sm:$0xff] %vm1562_vm4, %v2313_v52  ;;  %v1813_v48 = vpack.c.bf16 %v1749_v41, %v1748_v45  ;;  %v1333_v49 = vld [vmem:[#allocation2 + $0x81] sm:$0xff] }
 0x2a0   : > { %5991 = vmatpush3.bf16.msra.mxu1 %v6577_v46  ;;  %1459 = vrot.lane.b32.xlu1 %v1388_v53, %s6650_s25  ;;  %v6578_v46 = vld [vmem:[%s8200_s3 + $0x108] sm:$0xff]   ;;  %v1395_v52 = vpack.c.bf16 %v1334_v32, %v1333_v49  ;;  %v1750_v53 = vld [vmem:[#allocation2 + $0x7c] sm:$0xff] }
 0x2a1   : > { %v2729_v56 = vpop.permute.xlu0 %2728  ;;  %5992 = vmatprep.subr.bf16.mxu1 %v6647_v1  ;;  %v3016_v22 = vld [vmem:[#allocation3 + $0x90] sm:$0xff] }
 0x2a2   : > { %2828 = vst.msk [vmem:[#allocation3 + $0xe0] sm:$0xff] %vm1562_vm4, %v2729_v56  ;;  %v2315_v59 = vpop.permute.xlu1 %2314  ;;  %v1751_v50 = vld [vmem:[#allocation2 + $0x84] sm:$0xff]  ;;  %v1762_v45 = vld [vmem:[#allocation2 + $0xdc] sm:$0xff] }
 0x2a3   : > { %2786 = vrot.lane.b32.xlu0 %v2682_v54, %s6650_s25  ;;  %2411 = vst.msk [vmem:[#allocation3 + $0x150] sm:$0xff] %vm1562_vm4, %v2315_v59  ;;  %v1336_v54 = vld [vmem:[#allocation2 + $0x99] sm:$0xff]  ;;  %v1814_v57 = vpack.c.bf16 %v1751_v50, %v1750_v53  ;;  %v1335_v59 = vld [vmem:[#allocation2 + $0x91] sm:$0xff]  ;;  %v1763_v41 = vld [vmem:[#allocation2 + $0xe4] sm:$0xff] }
 0x2a4   : > { %1461 = vrot.lane.b32.xlu1 %v1389_v60, %s6650_s25  ;;  %5993 = vmatpush3.bf16.msra.mxu1 %v6578_v46  ;;  %v3020_v56 = vld [vmem:[#allocation3 + $0xb0] sm:$0xff]  ;;  %v1753_v60 = vld [vmem:[#allocation2 + $0x94] sm:$0xff]  ;;  %v1396_v62 = vpack.c.bf16 %v1336_v54, %v1335_v59  ;;  %v1764_v54 = vld [vmem:[#allocation2 + $0xec] sm:$0xff] }
 0x2a5   : > { %v2731_v63 = vpop.permute.xlu0 %2730  ;;  %v3021_v39 = vld [vmem:[#allocation3 + $0xb8] sm:$0xff]  ;;  %5994 = vmatprep.subr.bf16.mxu1 %v6647_v1  ;;  %v1348_v32 = vld [vmem:[#allocation2 + $0xf9] sm:$0xff]  ;;  %v1347_v50 = vld [vmem:[#allocation2 + $0xf1] sm:$0xff] }
 0x2a6   : > { %2829 = vst.msk [vmem:[#allocation3 + $0x108] sm:$0xff] %vm1562_vm4, %v2731_v63  ;;  %3927 = vmatmul.mubr.bf16.gmra.mrb[40].mxu1 %v3005_v2  ;;  %v2317_v7 = vpop.permute.xlu1 %2316  ;;  %v1752_v63 = vld [vmem:[#allocation2 + $0x8c] sm:$0xff]  ;;  %v1402_v53 = vpack.c.bf16 %v1348_v32, %v1347_v50  ;;  %v1767_v59 = vld [vmem:[#allocation2 + $0x104] sm:$0xff] }
 0x2a7   : > { %3934 = vmatprep.mubr.bf16.mxu1 %v3011_v4  ;;  %1878 = vrot.lane.b32.xlu0 %v1808_v3, %s6650_s25  ;;  %2412 = vst.msk [vmem:[#allocation3 + $0x178] sm:$0xff] %vm1562_vm4, %v2317_v7  ;;  %v1338_v2 = vld [vmem:[#allocation2 + $0xa9] sm:$0xff]  ;;  %v1815_v4 = vpack.c.bf16 %v1753_v60, %v1752_v63  ;;  %v1352_v63 = vld [vmem:[#allocation2 + $0x119] sm:$0xff] }
 0x2a8   : > { %1463 = vrot.lane.b32.xlu1 %v1390_v8, %s6650_s25  ;;  %v1397_v8 = vpack.c.bf16 %v1338_v2, %v1337_v5  ;;  %v1404_v9 = vpack.c.bf16 %v1352_v63, %v1351_v6  ;;  %v1776_v32 = vld [vmem:[#allocation2 + $0x14c] sm:$0xff]  ;;  %v1779_v50 = vld [vmem:[#allocation2 + $0x164] sm:$0xff] }
 0x2a9   : > { %v2733_v11 = vpop.permute.xlu0 %2732  ;;  %v3026_v58 = vld [vmem:[#allocation3 + $0xe0] sm:$0xff]  ;;  %v1783_v6 = vld [vmem:[#allocation2 + $0x184] sm:$0xff] }
 0x2aa   : > { %2830 = vst.msk [vmem:[#allocation3 + $0x130] sm:$0xff] %vm1562_vm4, %v2733_v11  ;;  %v2319_v15 = vpop.permute.xlu1 %2318  ;;  %v1780_v63 = vld [vmem:[#allocation2 + $0x16c] sm:$0xff] }
 0x2ab   : > { %1880 = vrot.lane.b32.xlu0 %v1809_v12, %s6650_s25  ;;  %2413 = vst.msk [vmem:[#allocation3 + $0x1a0] sm:$0xff] %vm1562_vm4, %v2319_v15  ;;  %v3025_v12 = vld [vmem:[#allocation3 + $0xd8] sm:$0xff]  ;;  %v1339_v15 = vld [vmem:[#allocation2 + $0xb1] sm:$0xff] }
 0x2ac   : > { %1465 = vrot.lane.b32.xlu1 %v1391_v16, %s6650_s25  ;;  %v1757_v16 = vld [vmem:[#allocation2 + $0xb4] sm:$0xff]  ;;  %v1398_v18 = vpack.c.bf16 %v1340_v10, %v1339_v15  ;;  %v1768_v10 = vld [vmem:[#allocation2 + $0x10c] sm:$0xff]  ;;  %v1771_v15 = vld [vmem:[#allocation2 + $0x124] sm:$0xff] }
 0x2ad   : > { %v2735_v19 = vpop.permute.xlu0 %2734  ;;  %v3031_v14 = vld [vmem:[#allocation3 + $0x108] sm:$0xff] }
 0x2ae   : > { %2831 = vst.msk [vmem:[#allocation3 + $0x158] sm:$0xff] %vm1562_vm4, %v2735_v19  ;;  %3935 = vmatmul.mubr.bf16.gmra.mrb[44].mxu1 %v3010_v20  ;;  %v2321_v24 = vpop.permute.xlu1 %2320  ;;  %v1756_v19 = vld [vmem:[#allocation2 + $0xac] sm:$0xff] }
 0x2af   : > { %3942 = vmatprep.mubr.bf16.mxu1 %v3016_v22  ;;  %1882 = vrot.lane.b32.xlu0 %v1810_v21, %s6650_s25  ;;  %2414 = vst.msk [vmem:[#allocation3 + $0x1c8] sm:$0xff] %vm1562_vm4, %v2321_v24  ;;  %v1342_v20 = vld [vmem:[#allocation2 + $0xc9] sm:$0xff]  ;;  %v1817_v22 = vpack.c.bf16 %v1757_v16, %v1756_v19  ;;  %v1356_v19 = vld [vmem:[#allocation2 + $0x139] sm:$0xff] }
 0x2b0   : > { %1467 = vrot.lane.b32.xlu1 %v1392_v25, %s6650_s25  ;;  %v1399_v25 = vpack.c.bf16 %v1342_v20, %v1341_v23  ;;  %v1406_v44 = vpack.c.bf16 %v1356_v19, %v1355_v0  ;;  %v6579_v19 = vld [vmem:[%s8200_s3 + $0x110] sm:$0xff]  }
 0x2b1   : > { %v2737_v28 = vpop.permute.xlu0 %2736  ;;  %v3036_v26 = vld [vmem:[#allocation3 + $0x130] sm:$0xff]  ;;  %5995 = vmatpush3.bf16.msra.mxu1 %v6579_v19 }
 0x2b2   : > { %2832 = vst.msk [vmem:[#allocation3 + $0x180] sm:$0xff] %vm1562_vm4, %v2737_v28  ;;  %v2323_v31 = vpop.permute.xlu1 %2322  ;;  %5996 = vmatprep.subr.bf16.mxu1 %v6647_v1 }
 0x2b3   : > { %1884 = vrot.lane.b32.xlu0 %v1811_v29, %s6650_s25  ;;  %2415 = vst.msk [vmem:[#allocation3 + $0x1f0] sm:$0xff] %vm1562_vm4, %v2323_v31  ;;  %v3030_v29 = vld [vmem:[#allocation3 + $0x100] sm:$0xff] }
 0x2b4   : > { %1469 = vrot.lane.b32.xlu1 %v1393_v33, %s6650_s25  ;;  %v1343_v31 = vld [vmem:[#allocation2 + $0xd1] sm:$0xff] }
 0x2b5   : > { %v2739_v36 = vpop.permute.xlu0 %2738  ;;  %v1761_v33 = vld [vmem:[#allocation2 + $0xd4] sm:$0xff]  ;;  %v1400_v35 = vpack.c.bf16 %v1344_v27, %v1343_v31  ;;  %v3041_v49 = vld [vmem:[#allocation3 + $0x158] sm:$0xff] }
 0x2b6   : > { %2833 = vst.msk [vmem:[#allocation3 + $0x1a8] sm:$0xff] %vm1562_vm4, %v2739_v36  ;;  %3943 = vmatmul.mubr.bf16.gmra.mrb[48].mxu1 %v3015_v37  ;;  %v2325_v42 = vpop.permute.xlu1 %2324  ;;  %v1760_v36 = vld [vmem:[#allocation2 + $0xcc] sm:$0xff]  ;;  %v1775_v31 = vld [vmem:[#allocation2 + $0x144] sm:$0xff] }
 0x2b7   : > { %3950 = vmatprep.mubr.bf16.mxu1 %v3021_v39  ;;  %1886 = vrot.lane.b32.xlu0 %v1812_v38, %s6650_s25  ;;  %2416 = vst.msk [vmem:[#allocation3 + $0x218] sm:$0xff] %vm1562_vm4, %v2325_v42  ;;  %v1346_v37 = vld [vmem:[#allocation2 + $0xe9] sm:$0xff]  ;;  %v1819_v39 = vpack.c.bf16 %v1761_v33, %v1760_v36  ;;  %v1360_v36 = vld [vmem:[#allocation2 + $0x159] sm:$0xff] }
 0x2b8   : > { %1471 = vrot.lane.b32.xlu1 %v1394_v43, %s6650_s25  ;;  %v1401_v43 = vpack.c.bf16 %v1346_v37, %v1345_v40  ;;  %v1772_v27 = vld [vmem:[#allocation2 + $0x12c] sm:$0xff] }
 0x2b9   : > { %v2741_v47 = vpop.permute.xlu0 %2740  ;;  %v3046_v5 = vld [vmem:[#allocation3 + $0x180] sm:$0xff] }
 0x2ba   : > { %2834 = vst.msk [vmem:[#allocation3 + $0x1d0] sm:$0xff] %vm1562_vm4, %v2741_v47  ;;  %v2327_v51 = vpop.permute.xlu1 %2326  ;;  %v3035_v47 = vld [vmem:[#allocation3 + $0x128] sm:$0xff] }
 0x2bb   : > { %1888 = vrot.lane.b32.xlu0 %v1813_v48, %s6650_s25  ;;  %2417 = vst.msk [vmem:[#allocation3 + $0x240] sm:$0xff] %vm1562_vm4, %v2327_v51  ;;  %v1820_v48 = vpack.c.bf16 %v1763_v41, %v1762_v45  ;;  %v1765_v51 = vld [vmem:[#allocation2 + $0xf4] sm:$0xff] }
 0x2bc   : > { %1473 = vrot.lane.b32.xlu1 %v1395_v52, %s6650_s25  ;;  %v1359_v41 = vld [vmem:[#allocation2 + $0x151] sm:$0xff] }
 0x2bd   : > { %v2743_v55 = vpop.permute.xlu0 %2742  ;;  %v3051_v23 = vld [vmem:[#allocation3 + $0x1a8] sm:$0xff]  ;;  %v1408_v45 = vpack.c.bf16 %v1360_v36, %v1359_v41 }
 0x2be   : > { %2835 = vst.msk [vmem:[#allocation3 + $0x1f8] sm:$0xff] %vm1562_vm4, %v2743_v55  ;;  %3951 = vmatmul.mubr.bf16.gmra.mrb[52].mxu1 %v3020_v56  ;;  %v2329_v61 = vpop.permute.xlu1 %2328  ;;  %v1350_v55 = vld [vmem:[#allocation2 + $0x109] sm:$0xff] }
 0x2bf   : > { %3958 = vmatprep.mubr.bf16.mxu1 %v3026_v58  ;;  %1890 = vrot.lane.b32.xlu0 %v1814_v57, %s6650_s25  ;;  %2418 = vst.msk [vmem:[#allocation3 + $0x268] sm:$0xff] %vm1562_vm4, %v2329_v61  ;;  %v1821_v57 = vpack.c.bf16 %v1765_v51, %v1764_v54  ;;  %v1349_v58 = vld [vmem:[#allocation2 + $0x101] sm:$0xff]  ;;  %v1364_v54 = vld [vmem:[#allocation2 + $0x179] sm:$0xff] }
 0x2c0   : > { %1475 = vrot.lane.b32.xlu1 %v1396_v62, %s6650_s25  ;;  %v1403_v61 = vpack.c.bf16 %v1350_v55, %v1349_v58  ;;  %v1766_v62 = vld [vmem:[#allocation2 + $0xfc] sm:$0xff] }
 0x2c1   : > { %v2745_v3 = vpop.permute.xlu0 %2744  ;;  %v3056_v40 = vld [vmem:[#allocation3 + $0x1d0] sm:$0xff] }
 0x2c2   : > { %2836 = vst.msk [vmem:[#allocation3 + $0x220] sm:$0xff] %vm1562_vm4, %v2745_v3  ;;  %v2331_v7 = vpop.permute.xlu1 %2330  ;;  %v3040_v3 = vld [vmem:[#allocation3 + $0x150] sm:$0xff]  ;;  %v3070_v36 = vld [vmem:[#allocation3 + $0x240] sm:$0xff] }
 0x2c3   : > { %1892 = vrot.lane.b32.xlu0 %v1815_v4, %s6650_s25  ;;  %2419 = vst.msk [vmem:[#allocation3 + $0x290] sm:$0xff] %vm1562_vm4, %v2331_v7  ;;  %v1822_v4 = vpack.c.bf16 %v1767_v59, %v1766_v62  ;;  %v1769_v7 = vld [vmem:[#allocation2 + $0x114] sm:$0xff] }
 0x2c4   : > { %1477 = vrot.lane.b32.xlu1 %v1397_v8, %s6650_s25  ;;  %v1363_v59 = vld [vmem:[#allocation2 + $0x171] sm:$0xff] }
 0x2c5   : > { %v2747_v11 = vpop.permute.xlu0 %2746  ;;  %v3061_v58 = vld [vmem:[#allocation3 + $0x1f8] sm:$0xff]  ;;  %v1410_v62 = vpack.c.bf16 %v1364_v54, %v1363_v59 }
 0x2c6   : > { %2837 = vst.msk [vmem:[#allocation3 + $0x248] sm:$0xff] %vm1562_vm4, %v2747_v11  ;;  %3959 = vmatmul.mubr.bf16.gmra.mrb[56].mxu1 %v3025_v12  ;;  %v2333_v17 = vpop.permute.xlu1 %2332  ;;  %v1354_v11 = vld [vmem:[#allocation2 + $0x129] sm:$0xff] }
 0x2c7   : > { %3966 = vmatprep.mubr.bf16.mxu1 %v3031_v14  ;;  %1894 = vrot.lane.b32.xlu0 %v1816_v13, %s6650_s25  ;;  %2420 = vst.msk [vmem:[#allocation3 + $0x2b8] sm:$0xff] %vm1562_vm4, %v2333_v17  ;;  %v1823_v13 = vpack.c.bf16 %v1769_v7, %v1768_v10  ;;  %v1353_v14 = vld [vmem:[#allocation2 + $0x121] sm:$0xff]  ;;  %v1368_v10 = vld [vmem:[#allocation2 + $0x199] sm:$0xff] }
 0x2c8   : > { %1479 = vrot.lane.b32.xlu1 %v1398_v18, %s6650_s25  ;;  %v1405_v17 = vpack.c.bf16 %v1354_v11, %v1353_v14  ;;  %v1770_v18 = vld [vmem:[#allocation2 + $0x11c] sm:$0xff] }
 0x2c9   : > { %v2749_v21 = vpop.permute.xlu0 %2748  ;;  %v3066_v14 = vld [vmem:[#allocation3 + $0x220] sm:$0xff] }
 0x2ca   : > { %2838 = vst.msk [vmem:[#allocation3 + $0x270] sm:$0xff] %vm1562_vm4, %v2749_v21  ;;  %v2335_v24 = vpop.permute.xlu1 %2334  ;;  %v3045_v21 = vld [vmem:[#allocation3 + $0x178] sm:$0xff] }
 0x2cb   : > { %1896 = vrot.lane.b32.xlu0 %v1817_v22, %s6650_s25  ;;  %2421 = vst.msk [vmem:[#allocation3 + $0x2e0] sm:$0xff] %vm1562_vm4, %v2335_v24  ;;  %v1824_v22 = vpack.c.bf16 %v1771_v15, %v1770_v18  ;;  %v1773_v24 = vld [vmem:[#allocation2 + $0x134] sm:$0xff] }
 0x2cc   : > { %1481 = vrot.lane.b32.xlu1 %v1399_v25, %s6650_s25  ;;  %v1367_v15 = vld [vmem:[#allocation2 + $0x191] sm:$0xff] }
 0x2cd   : > { %v2751_v28 = vpop.permute.xlu0 %2750  ;;  %v1412_v18 = vpack.c.bf16 %v1368_v10, %v1367_v15  ;;  %v6580_v10 = vld [vmem:[%s8200_s3 + $0x118] sm:$0xff]  }
 0x2ce   : > { %2839 = vst.msk [vmem:[#allocation3 + $0x298] sm:$0xff] %vm1562_vm4, %v2751_v28  ;;  %3967 = vmatmul.mubr.bf16.gmra.mrb[60].mxu1 %v3030_v29  ;;  %v2337_v34 = vpop.permute.xlu1 %2336  ;;  %v1358_v28 = vld [vmem:[#allocation2 + $0x149] sm:$0xff] }
 0x2cf   : > { %3974 = vmatprep.mubr.bf16.mxu1 %v3036_v26  ;;  %1898 = vrot.lane.b32.xlu0 %v1818_v30, %s6650_s25  ;;  %2422 = vst.msk [vmem:[#allocation3 + $0x308] sm:$0xff] %vm1562_vm4, %v2337_v34  ;;  %v1825_v30 = vpack.c.bf16 %v1773_v24, %v1772_v27  ;;  %v1357_v26 = vld [vmem:[#allocation2 + $0x141] sm:$0xff] }
 0x2d0   : > { %1483 = vrot.lane.b32.xlu1 %v1400_v35, %s6650_s25  ;;  %v1407_v34 = vpack.c.bf16 %v1358_v28, %v1357_v26  ;;  %v1774_v35 = vld [vmem:[#allocation2 + $0x13c] sm:$0xff]  ;;  %v1788_v26 = vld [vmem:[#allocation2 + $0x1ac] sm:$0xff]  ;;  %5997 = vmatpush3.bf16.msra.mxu1 %v6580_v10 }
 0x2d1   : > { %v2753_v38 = vpop.permute.xlu0 %2752  ;;  %v1786_v24 = vld [vmem:[#allocation2 + $0x19c] sm:$0xff] }
 0x2d2   : > { %2840 = vst.msk [vmem:[#allocation3 + $0x2c0] sm:$0xff] %vm1562_vm4, %v2753_v38  ;;  %v2339_v42 = vpop.permute.xlu1 %2338  ;;  %v3050_v38 = vld [vmem:[#allocation3 + $0x1a0] sm:$0xff]  ;;  %v3071_v28 = vld [vmem:[#allocation3 + $0x248] sm:$0xff] }
 0x2d3   : > { %1900 = vrot.lane.b32.xlu0 %v1819_v39, %s6650_s25  ;;  %2423 = vst.msk [vmem:[#allocation3 + $0x330] sm:$0xff] %vm1562_vm4, %v2339_v42  ;;  %v1826_v39 = vpack.c.bf16 %v1775_v31, %v1774_v35  ;;  %v1777_v42 = vld [vmem:[#allocation2 + $0x154] sm:$0xff] }
 0x2d4   : > { %1485 = vrot.lane.b32.xlu1 %v1401_v43, %s6650_s25 }
 0x2d5   : > { %v2755_v46 = vpop.permute.xlu0 %2754 }
 0x2d6   : > { %2841 = vst.msk [vmem:[#allocation3 + $0x2e8] sm:$0xff] %vm1562_vm4, %v2755_v46  ;;  %3975 = vmatmul.mubr.bf16.gmra.mrb[64].mxu1 %v3035_v47  ;;  %v2341_v52 = vpop.permute.xlu1 %2340  ;;  %v1362_v46 = vld [vmem:[#allocation2 + $0x169] sm:$0xff] }
 0x2d7   : > { %3982 = vmatprep.mubr.bf16.mxu1 %v3041_v49  ;;  %1902 = vrot.lane.b32.xlu0 %v1820_v48, %s6650_s25  ;;  %2424 = vst.msk [vmem:[#allocation3 + $0x358] sm:$0xff] %vm1562_vm4, %v2341_v52  ;;  %v1827_v48 = vpack.c.bf16 %v1777_v42, %v1776_v32  ;;  %v1361_v49 = vld [vmem:[#allocation2 + $0x161] sm:$0xff]  ;;  %v3075_v42 = vld [vmem:[#allocation3 + $0x268] sm:$0xff] }
 0x2d8   : > { %1487 = vrot.lane.b32.xlu1 %v1402_v53, %s6650_s25  ;;  %v1409_v52 = vpack.c.bf16 %v1362_v46, %v1361_v49  ;;  %v1778_v53 = vld [vmem:[#allocation2 + $0x15c] sm:$0xff] }
 0x2d9   : > { %v2757_v56 = vpop.permute.xlu0 %2756  ;;  %v3086_v49 = vld [vmem:[#allocation3 + $0x2c0] sm:$0xff] }
 0x2da   : > { %2842 = vst.msk [vmem:[#allocation3 + $0x310] sm:$0xff] %vm1562_vm4, %v2757_v56  ;;  %v2343_v60 = vpop.permute.xlu1 %2342  ;;  %v3055_v56 = vld [vmem:[#allocation3 + $0x1c8] sm:$0xff] }
 0x2db   : > { %1904 = vrot.lane.b32.xlu0 %v1821_v57, %s6650_s25  ;;  %2425 = vst.msk [vmem:[#allocation3 + $0x380] sm:$0xff] %vm1562_vm4, %v2343_v60  ;;  %v1828_v57 = vpack.c.bf16 %v1779_v50, %v1778_v53  ;;  %v1781_v60 = vld [vmem:[#allocation2 + $0x174] sm:$0xff] }
 0x2dc   : > { %1489 = vrot.lane.b32.xlu1 %v1403_v61, %s6650_s25 }
 0x2dd   : > { %v2759_v2 = vpop.permute.xlu0 %2758 }
 0x2de   : > { %2843 = vst.msk [vmem:[#allocation3 + $0x338] sm:$0xff] %vm1562_vm4, %v2759_v2  ;;  %3983 = vmatmul.mubr.bf16.gmra.mrb[68].mxu1 %v3040_v3  ;;  %v2345_v8 = vpop.permute.xlu1 %2344  ;;  %v1366_v2 = vld [vmem:[#allocation2 + $0x189] sm:$0xff] }
 0x2df   : > { %3990 = vmatprep.mubr.bf16.mxu1 %v3046_v5  ;;  %1906 = vrot.lane.b32.xlu0 %v1822_v4, %s6650_s25  ;;  %2426 = vst.msk [vmem:[#allocation3 + $0x3a8] sm:$0xff] %vm1562_vm4, %v2345_v8  ;;  %v1829_v4 = vpack.c.bf16 %v1781_v60, %v1780_v63  ;;  %v1365_v5 = vld [vmem:[#allocation2 + $0x181] sm:$0xff] }
 0x2e0   : > { %1491 = vrot.lane.b32.xlu1 %v1404_v9, %s6650_s25  ;;  %v1411_v8 = vpack.c.bf16 %v1366_v2, %v1365_v5  ;;  %v1782_v9 = vld [vmem:[#allocation2 + $0x17c] sm:$0xff] }
 0x2e1   : > { %v2761_v12 = vpop.permute.xlu0 %2760 }
 0x2e2   : > { %2844 = vst.msk [vmem:[#allocation3 + $0x360] sm:$0xff] %vm1562_vm4, %v2761_v12  ;;  %v2347_v16 = vpop.permute.xlu1 %2346  ;;  %v3060_v12 = vld [vmem:[#allocation3 + $0x1f0] sm:$0xff] }
 0x2e3   : > { %1908 = vrot.lane.b32.xlu0 %v1823_v13, %s6650_s25  ;;  %2427 = vst.msk [vmem:[#allocation3 + $0x3d0] sm:$0xff] %vm1562_vm4, %v2347_v16  ;;  %v1830_v13 = vpack.c.bf16 %v1783_v6, %v1782_v9  ;;  %v1785_v16 = vld [vmem:[#allocation2 + $0x194] sm:$0xff] }
 0x2e4   : > { %1493 = vrot.lane.b32.xlu1 %v1405_v17, %s6650_s25 }
 0x2e5   : > { %v2763_v20 = vpop.permute.xlu0 %2762 }
 0x2e6   : > { %2845 = vst.msk [vmem:[#allocation3 + $0x388] sm:$0xff] %vm1562_vm4, %v2763_v20  ;;  %3991 = vmatmul.mubr.bf16.gmra.mrb[72].mxu1 %v3045_v21  ;;  %v2349_v25 = vpop.permute.xlu1 %2348  ;;  %v1784_v20 = vld [vmem:[#allocation2 + $0x18c] sm:$0xff] }
 0x2e7   : > { %3998 = vmatprep.mubr.bf16.mxu1 %v3051_v23  ;;  %1910 = vrot.lane.b32.xlu0 %v1824_v22, %s6650_s25  ;;  %2428 = vst.msk [vmem:[#allocation3 + $0x3f8] sm:$0xff] %vm1562_vm4, %v2349_v25  ;;  %v1831_v22 = vpack.c.bf16 %v1785_v16, %v1784_v20  ;;  %v1787_v23 = vld [vmem:[#allocation2 + $0x1a4] sm:$0xff] }
 0x2e8   : > { %1495 = vrot.lane.b32.xlu1 %v1406_v44, %s6650_s25  ;;  %v3065_v44 = vld [vmem:[#allocation3 + $0x218] sm:$0xff]  ;;  %v1832_v27 = vpack.c.bf16 %v1787_v23, %v1786_v24  ;;  %v3100_v20 = vld [vmem:[#allocation3 + $0x330] sm:$0xff] }
 0x2e9   : > { %v2765_v29 = vpop.permute.xlu0 %2764 }
 0x2ea   : > { %2846 = vst.msk [vmem:[#allocation3 + $0x3b0] sm:$0xff] %vm1562_vm4, %v2765_v29  ;;  %v2351_v33 = vpop.permute.xlu1 %2350  ;;  %v1789_v29 = vld [vmem:[#allocation2 + $0x1b4] sm:$0xff] }
 0x2eb   : > { %1912 = vrot.lane.b32.xlu0 %v1825_v30, %s6650_s25  ;;  %2429 = vst.msk [vmem:[#allocation3 + $0x420] sm:$0xff] %vm1562_vm4, %v2351_v33  ;;  %v1833_v33 = vpack.c.bf16 %v1789_v29, %v1788_v26 }
 0x2ec   : > { %1497 = vrot.lane.b32.xlu1 %v1407_v34, %s6650_s25 }
 0x2ed   : > { %v2767_v37 = vpop.permute.xlu0 %2766 }
 0x2ee   : > { %2847 = vst.msk [vmem:[#allocation3 + $0x3d8] sm:$0xff] %vm1562_vm4, %v2767_v37  ;;  %3999 = vmatmul.mubr.bf16.gmra.mrb[76].mxu1 %v3050_v38  ;;  %v2353_v43 = vpop.permute.xlu1 %2352  ;;  %v3076_v37 = vld [vmem:[#allocation3 + $0x270] sm:$0xff] }
 0x2ef   : > { %4006 = vmatprep.mubr.bf16.mxu1 %v3056_v40  ;;  %1914 = vrot.lane.b32.xlu0 %v1826_v39, %s6650_s25  ;;  %2430 = vst.msk [vmem:[#allocation3 + $0x448] sm:$0xff] %vm1562_vm4, %v2353_v43  ;;  %v3081_v43 = vld [vmem:[#allocation3 + $0x298] sm:$0xff] }
 0x2f0   : > { %1499 = vrot.lane.b32.xlu1 %v1408_v45, %s6650_s25 }
 0x2f1   : > { %v2769_v47 = vpop.permute.xlu0 %2768 }
 0x2f2   : > { %2848 = vst.msk [vmem:[#allocation3 + $0x400] sm:$0xff] %vm1562_vm4, %v2769_v47  ;;  %v2355_v51 = vpop.permute.xlu1 %2354 }
 0x2f3   : > { %1916 = vrot.lane.b32.xlu0 %v1827_v48, %s6650_s25  ;;  %2431 = vst.msk [vmem:[#allocation3 + $0x470] sm:$0xff] %vm1562_vm4, %v2355_v51  ;;  %v3080_v48 = vld [vmem:[#allocation3 + $0x290] sm:$0xff] }
 0x2f4   : > { %1501 = vrot.lane.b32.xlu1 %v1409_v52, %s6650_s25 }
 0x2f5   : > { %v2771_v55 = vpop.permute.xlu0 %2770 }
 0x2f6   : > { %2849 = vst.msk [vmem:[#allocation3 + $0x428] sm:$0xff] %vm1562_vm4, %v2771_v55  ;;  %4007 = vmatmul.mubr.bf16.gmra.mrb[80].mxu1 %v3055_v56  ;;  %v2357_v61 = vpop.permute.xlu1 %2356 }
 0x2f7   : > { %4014 = vmatprep.mubr.bf16.mxu1 %v3061_v58  ;;  %1918 = vrot.lane.b32.xlu0 %v1828_v57, %s6650_s25  ;;  %2432 = vst.msk [vmem:[#allocation3 + $0x498] sm:$0xff] %vm1562_vm4, %v2357_v61  ;;  %v3085_v57 = vld [vmem:[#allocation3 + $0x2b8] sm:$0xff]  ;;  %v3091_v58 = vld [vmem:[#allocation3 + $0x2e8] sm:$0xff] }
 0x2f8   : > { %1503 = vrot.lane.b32.xlu1 %v1410_v62, %s6650_s25 }
 0x2f9   : > { %v2773_v3 = vpop.permute.xlu0 %2772 }
 0x2fa   : > { %2850 = vst.msk [vmem:[#allocation3 + $0x450] sm:$0xff] %vm1562_vm4, %v2773_v3  ;;  %v2359_v7 = vpop.permute.xlu1 %2358  ;;  %v3090_v3 = vld [vmem:[#allocation3 + $0x2e0] sm:$0xff] }
 0x2fb   : > { %1920 = vrot.lane.b32.xlu0 %v1829_v4, %s6650_s25  ;;  %2433 = vst.msk [vmem:[#allocation3 + $0x4c0] sm:$0xff] %vm1562_vm4, %v2359_v7  ;;  %v3096_v4 = vld [vmem:[#allocation3 + $0x310] sm:$0xff] }
 0x2fc   : > { %1505 = vrot.lane.b32.xlu1 %v1411_v8, %s6650_s25 }
 0x2fd   : > { %v2775_v11 = vpop.permute.xlu0 %2774 }
 0x2fe   : > { %2851 = vst.msk [vmem:[#allocation3 + $0x478] sm:$0xff] %vm1562_vm4, %v2775_v11  ;;  %4015 = vmatmul.mubr.bf16.gmra.mrb[84].mxu1 %v3060_v12  ;;  %v2361_v17 = vpop.permute.xlu1 %2360  ;;  %v3095_v12 = vld [vmem:[#allocation3 + $0x308] sm:$0xff] }
 0x2ff   : > { %4022 = vmatprep.mubr.bf16.mxu1 %v3066_v14  ;;  %1922 = vrot.lane.b32.xlu0 %v1830_v13, %s6650_s25  ;;  %2434 = vst.msk [vmem:[#allocation3 + $0x4e8] sm:$0xff] %vm1562_vm4, %v2361_v17  ;;  %v3101_v13 = vld [vmem:[#allocation3 + $0x338] sm:$0xff] }
 0x300   : > { %1507 = vrot.lane.b32.xlu1 %v1412_v18, %s6650_s25 }
 0x301   : > { %v2777_v21 = vpop.permute.xlu0 %2776 }
 0x302   : > { %2852 = vst.msk [vmem:[#allocation3 + $0x4a0] sm:$0xff] %vm1562_vm4, %v2777_v21  ;;  %v2363_v0 = vpop.permute.xlu1 %2362  ;;  %v3106_v21 = vld [vmem:[#allocation3 + $0x360] sm:$0xff] }
 0x303   : > { %1924 = vrot.lane.b32.xlu0 %v1831_v22, %s6650_s25  ;;  %2435 = vst.msk [vmem:[#allocation3 + $0x510] sm:$0xff] %vm1562_vm4, %v2363_v0 }
 0x305   : > { %v2779_v25 = vpop.permute.xlu0 %2778 }
 0x306   : > { %2853 = vst.msk [vmem:[#allocation3 + $0x4c8] sm:$0xff] %vm1562_vm4, %v2779_v25  ;;  %4023 = vmatmul.mubr.bf16.gmra.mrb[88].mxu1 %v3065_v44  ;;  %v2365_v30 = vpop.permute.xlu1 %2364 }
 0x307   : > { %4030 = vmatprep.mubr.bf16.mxu1 %v3071_v28  ;;  %1926 = vrot.lane.b32.xlu0 %v1832_v27, %s6650_s25  ;;  %2436 = vst.msk [vmem:[#allocation3 + $0x538] sm:$0xff] %vm1562_vm4, %v2365_v30  ;;  %v3105_v27 = vld [vmem:[#allocation3 + $0x358] sm:$0xff]  ;;  %v3111_v28 = vld [vmem:[#allocation3 + $0x388] sm:$0xff] }
 0x309   : > { %v2781_v31 = vpop.permute.xlu0 %2780 }
 0x30a   : > { %2854 = vst.msk [vmem:[#allocation3 + $0x4f0] sm:$0xff] %vm1562_vm4, %v2781_v31  ;;  %v2367_v34 = vpop.permute.xlu1 %2366 }
 0x30b   : > { %1928 = vrot.lane.b32.xlu0 %v1833_v33, %s6650_s25  ;;  %2437 = vst.msk [vmem:[#allocation3 + $0x560] sm:$0xff] %vm1562_vm4, %v2367_v34 }
 0x30d   : > { %v2783_v35 = vpop.permute.xlu0 %2782 }
 0x30e   : > { %2855 = vst.msk [vmem:[#allocation3 + $0x518] sm:$0xff] %vm1562_vm4, %v2783_v35  ;;  %4031 = vmatmul.mubr.bf16.gmra.mrb[92].mxu1 %v3070_v36  ;;  %v1458_v38 = vpop.permute.xlu1 %1457  ;;  %v3110_v35 = vld [vmem:[#allocation3 + $0x380] sm:$0xff]  ;;  %v3116_v36 = vld [vmem:[#allocation3 + $0x3b0] sm:$0xff] }
 0x30f   : > { %4038 = vmatprep.mubr.bf16.mxu1 %v3076_v37  ;;  %1563 = vst.msk [vmem:[#allocation3] sm:$0xff] %vm1562_vm4, %v1458_v38 }
 0x311   : > { %v2785_v39 = vpop.permute.xlu0 %2784 }
 0x312   : > { %2856 = vst.msk [vmem:[#allocation3 + $0x540] sm:$0xff] %vm1562_vm4, %v2785_v39  ;;  %v1460_v40 = vpop.permute.xlu1 %1459 }
 0x313   : > { %1564 = vst.msk [vmem:[#allocation3 + $0x28] sm:$0xff] %vm1562_vm4, %v1460_v40 }
 0x315   : > { %v2787_v41 = vpop.permute.xlu0 %2786 }
 0x316   : > { %2857 = vst.msk [vmem:[#allocation3 + $0x568] sm:$0xff] %vm1562_vm4, %v2787_v41  ;;  %4039 = vmatmul.mubr.bf16.gmra.mrb[96].mxu1 %v3075_v42  ;;  %v1462_v45 = vpop.permute.xlu1 %1461  ;;  %v2998_v53 = vld [vmem:[#allocation3] sm:$0xff] }
 0x317   : > { %4046 = vmatprep.mubr.bf16.mxu1 %v3081_v43  ;;  %1565 = vst.msk [vmem:[#allocation3 + $0x50] sm:$0xff] %vm1562_vm4, %v1462_v45  ;;  %v3115_v43 = vld [vmem:[#allocation3 + $0x3a8] sm:$0xff]  ;;  %v3121_v45 = vld [vmem:[#allocation3 + $0x3d8] sm:$0xff] }
 0x319   : > { %v1879_v32 = vpop.permute.xlu0 %1878 }
 0x31a   : > { %1983 = vst.msk [vmem:[#allocation3 + $0x8] sm:$0xff] %vm1562_vm4, %v1879_v32  ;;  %v1464_v46 = vpop.permute.xlu1 %1463  ;;  %v3003_v61 = vld [vmem:[#allocation3 + $0x28] sm:$0xff] }
 0x31b   : > { %1566 = vst.msk [vmem:[#allocation3 + $0x78] sm:$0xff] %vm1562_vm4, %v1464_v46 }
 0x31d   : > { %v1881_v47 = vpop.permute.xlu0 %1880 }
 0x31e   : > { %1984 = vst.msk [vmem:[#allocation3 + $0x30] sm:$0xff] %vm1562_vm4, %v1881_v47  ;;  %4047 = vmatmul.mubr.bf16.gmra.mrb[100].mxu1 %v3080_v48  ;;  %v1466_v50 = vpop.permute.xlu1 %1465  ;;  %v3008_v7 = vld [vmem:[#allocation3 + $0x50] sm:$0xff] }
 0x31f   : > { %4054 = vmatprep.mubr.bf16.mxu1 %v3086_v49  ;;  %1567 = vst.msk [vmem:[#allocation3 + $0xa0] sm:$0xff] %vm1562_vm4, %v1466_v50 }
 0x321   : > { %v1883_v51 = vpop.permute.xlu0 %1882  ;;  %v2999_v52 = vld [vmem:[#allocation3 + $0x8] sm:$0xff] }
 0x322   : > { %1985 = vst.msk [vmem:[#allocation3 + $0x58] sm:$0xff] %vm1562_vm4, %v1883_v51  ;;  %3605 = vmatprep.mubr.bf16.mxu0 %v2999_v52  ;;  %v1468_v54 = vpop.permute.xlu1 %1467  ;;  %v3013_v16 = vld [vmem:[#allocation3 + $0x78] sm:$0xff]  ;;  %v3120_v51 = vld [vmem:[#allocation3 + $0x3d0] sm:$0xff]  ;;  %v3126_v52 = vld [vmem:[#allocation3 + $0x400] sm:$0xff] }
 0x323   : > { %3606 = vmatmul.mubr.bf16.vlgmr.msra.gmra.mrb[156].mxu0 %v2998_v53  ;;  %1568 = vst.msk [vmem:[#allocation3 + $0xc8] sm:$0xff] %vm1562_vm4, %v1468_v54 }
 0x325   : > { %v1885_v55 = vpop.permute.xlu0 %1884  ;;  %v3004_v56 = vld [vmem:[#allocation3 + $0x30] sm:$0xff] }
 0x326   : > { %1986 = vst.msk [vmem:[#allocation3 + $0x80] sm:$0xff] %vm1562_vm4, %v1885_v55  ;;  %3613 = vmatprep.mubr.bf16.mxu0 %v3004_v56  ;;  %4055 = vmatmul.mubr.bf16.gmra.mrb[104].mxu1 %v3085_v57  ;;  %v1470_v59 = vpop.permute.xlu1 %1469  ;;  %v3018_v0 = vld [vmem:[#allocation3 + $0xa0] sm:$0xff] }
 0x327   : > { %4062 = vmatprep.mubr.bf16.mxu1 %v3091_v58  ;;  %1569 = vst.msk [vmem:[#allocation3 + $0xf0] sm:$0xff] %vm1562_vm4, %v1470_v59  ;;  %v3125_v59 = vld [vmem:[#allocation3 + $0x3f8] sm:$0xff] }
 0x329   : > { %v1887_v60 = vpop.permute.xlu0 %1886  ;;  %v3009_v63 = vld [vmem:[#allocation3 + $0x58] sm:$0xff] }
 0x32a   : > { %1987 = vst.msk [vmem:[#allocation3 + $0xa8] sm:$0xff] %vm1562_vm4, %v1887_v60  ;;  %v1472_v62 = vpop.permute.xlu1 %1471  ;;  %v3023_v26 = vld [vmem:[#allocation3 + $0xc8] sm:$0xff] }
 0x32b   : > { %3614 = vmatmul.mubr.bf16.gmra.mrb[160].mxu0 %v3003_v61  ;;  %1570 = vst.msk [vmem:[#allocation3 + $0x118] sm:$0xff] %vm1562_vm4, %v1472_v62  ;;  %v3131_v60 = vld [vmem:[#allocation3 + $0x428] sm:$0xff] }
 0x32c   : > { %3621 = vmatprep.mubr.bf16.mxu0 %v3009_v63 }
 0x32d   : > { %v1889_v2 = vpop.permute.xlu0 %1888  ;;  %v3014_v9 = vld [vmem:[#allocation3 + $0x80] sm:$0xff] }
 0x32e   : > { %1988 = vst.msk [vmem:[#allocation3 + $0xd0] sm:$0xff] %vm1562_vm4, %v1889_v2  ;;  %4063 = vmatmul.mubr.bf16.gmra.mrb[108].mxu1 %v3090_v3  ;;  %v1474_v5 = vpop.permute.xlu1 %1473  ;;  %v3028_v39 = vld [vmem:[#allocation3 + $0xf0] sm:$0xff] }
 0x32f   : > { %4070 = vmatprep.mubr.bf16.mxu1 %v3096_v4  ;;  %1571 = vst.msk [vmem:[#allocation3 + $0x140] sm:$0xff] %vm1562_vm4, %v1474_v5  ;;  %v3130_v5 = vld [vmem:[#allocation3 + $0x420] sm:$0xff] }
 0x331   : > { %v1891_v6 = vpop.permute.xlu0 %1890  ;;  %v3019_v18 = vld [vmem:[#allocation3 + $0xa8] sm:$0xff] }
 0x332   : > { %1989 = vst.msk [vmem:[#allocation3 + $0xf8] sm:$0xff] %vm1562_vm4, %v1891_v6  ;;  %v1476_v8 = vpop.permute.xlu1 %1475  ;;  %v3033_v47 = vld [vmem:[#allocation3 + $0x118] sm:$0xff]  ;;  %v3136_v6 = vld [vmem:[#allocation3 + $0x450] sm:$0xff] }
 0x333   : > { %3622 = vmatmul.mubr.bf16.gmra.mrb[164].mxu0 %v3008_v7  ;;  %1572 = vst.msk [vmem:[#allocation3 + $0x168] sm:$0xff] %vm1562_vm4, %v1476_v8 }
 0x334   : > { %3629 = vmatprep.mubr.bf16.mxu0 %v3014_v9 }
 0x335   : > { %v1893_v11 = vpop.permute.xlu0 %1892  ;;  %v3024_v25 = vld [vmem:[#allocation3 + $0xd0] sm:$0xff] }
 0x336   : > { %1990 = vst.msk [vmem:[#allocation3 + $0x120] sm:$0xff] %vm1562_vm4, %v1893_v11  ;;  %4071 = vmatmul.mubr.bf16.gmra.mrb[112].mxu1 %v3095_v12  ;;  %v1478_v14 = vpop.permute.xlu1 %1477  ;;  %v3038_v55 = vld [vmem:[#allocation3 + $0x140] sm:$0xff] }
 0x337   : > { %4078 = vmatprep.mubr.bf16.mxu1 %v3101_v13  ;;  %1573 = vst.msk [vmem:[#allocation3 + $0x190] sm:$0xff] %vm1562_vm4, %v1478_v14  ;;  %v3135_v13 = vld [vmem:[#allocation3 + $0x448] sm:$0xff]  ;;  %v3141_v14 = vld [vmem:[#allocation3 + $0x478] sm:$0xff] }
 0x339   : > { %v1895_v15 = vpop.permute.xlu0 %1894  ;;  %v3029_v33 = vld [vmem:[#allocation3 + $0xf8] sm:$0xff] }
 0x33a   : > { %1991 = vst.msk [vmem:[#allocation3 + $0x148] sm:$0xff] %vm1562_vm4, %v1895_v15  ;;  %v1480_v17 = vpop.permute.xlu1 %1479  ;;  %v3043_v63 = vld [vmem:[#allocation3 + $0x168] sm:$0xff] }
 0x33b   : > { %3630 = vmatmul.mubr.bf16.gmra.mrb[168].mxu0 %v3013_v16  ;;  %1574 = vst.msk [vmem:[#allocation3 + $0x1b8] sm:$0xff] %vm1562_vm4, %v1480_v17 }
 0x33c   : > { %3637 = vmatprep.mubr.bf16.mxu0 %v3019_v18 }
 0x33d   : > { %v1897_v19 = vpop.permute.xlu0 %1896  ;;  %v3034_v41 = vld [vmem:[#allocation3 + $0x120] sm:$0xff] }
 0x33e   : > { %1992 = vst.msk [vmem:[#allocation3 + $0x170] sm:$0xff] %vm1562_vm4, %v1897_v19  ;;  %4079 = vmatmul.mubr.bf16.gmra.mrb[116].mxu1 %v3100_v20  ;;  %v1482_v22 = vpop.permute.xlu1 %1481  ;;  %v3048_v9 = vld [vmem:[#allocation3 + $0x190] sm:$0xff]  ;;  %v3146_v20 = vld [vmem:[#allocation3 + $0x4a0] sm:$0xff] }
 0x33f   : > { %4086 = vmatprep.mubr.bf16.mxu1 %v3106_v21  ;;  %1575 = vst.msk [vmem:[#allocation3 + $0x1e0] sm:$0xff] %vm1562_vm4, %v1482_v22  ;;  %v3140_v19 = vld [vmem:[#allocation3 + $0x470] sm:$0xff] }
 0x341   : > { %v1899_v23 = vpop.permute.xlu0 %1898  ;;  %v3039_v49 = vld [vmem:[#allocation3 + $0x148] sm:$0xff] }
 0x342   : > { %1993 = vst.msk [vmem:[#allocation3 + $0x198] sm:$0xff] %vm1562_vm4, %v1899_v23  ;;  %v1484_v24 = vpop.permute.xlu1 %1483  ;;  %v3053_v16 = vld [vmem:[#allocation3 + $0x1b8] sm:$0xff] }
 0x343   : > { %3638 = vmatmul.mubr.bf16.gmra.mrb[172].mxu0 %v3018_v0  ;;  %1576 = vst.msk [vmem:[#allocation3 + $0x208] sm:$0xff] %vm1562_vm4, %v1484_v24  ;;  %v3145_v23 = vld [vmem:[#allocation3 + $0x498] sm:$0xff]  ;;  %v3151_v0 = vld [vmem:[#allocation3 + $0x4c8] sm:$0xff] }
 0x344   : > { %3645 = vmatprep.mubr.bf16.mxu0 %v3024_v25 }
 0x345   : > { %v1901_v44 = vpop.permute.xlu0 %1900  ;;  %v3044_v57 = vld [vmem:[#allocation3 + $0x170] sm:$0xff] }
 0x346   : > { %1994 = vst.msk [vmem:[#allocation3 + $0x1c0] sm:$0xff] %vm1562_vm4, %v1901_v44  ;;  %4087 = vmatmul.mubr.bf16.gmra.mrb[120].mxu1 %v3105_v27  ;;  %v1486_v29 = vpop.permute.xlu1 %1485  ;;  %v3058_v21 = vld [vmem:[#allocation3 + $0x1e0] sm:$0xff]  ;;  %v3156_v27 = vld [vmem:[#allocation3 + $0x4f0] sm:$0xff] }
 0x347   : > { %4094 = vmatprep.mubr.bf16.mxu1 %v3111_v28  ;;  %1577 = vst.msk [vmem:[#allocation3 + $0x230] sm:$0xff] %vm1562_vm4, %v1486_v29  ;;  %v3150_v44 = vld [vmem:[#allocation3 + $0x4c0] sm:$0xff] }
 0x349   : > { %v1903_v30 = vpop.permute.xlu0 %1902  ;;  %v3049_v3 = vld [vmem:[#allocation3 + $0x198] sm:$0xff] }
 0x34a   : > { %1995 = vst.msk [vmem:[#allocation3 + $0x1e8] sm:$0xff] %vm1562_vm4, %v1903_v30  ;;  %v1488_v31 = vpop.permute.xlu1 %1487  ;;  %v3063_v24 = vld [vmem:[#allocation3 + $0x208] sm:$0xff] }
 0x34b   : > { %3646 = vmatmul.mubr.bf16.gmra.mrb[176].mxu0 %v3023_v26  ;;  %1578 = vst.msk [vmem:[#allocation3 + $0x258] sm:$0xff] %vm1562_vm4, %v1488_v31  ;;  %v3155_v30 = vld [vmem:[#allocation3 + $0x4e8] sm:$0xff]  ;;  %v3161_v26 = vld [vmem:[#allocation3 + $0x518] sm:$0xff] }
 0x34c   : > { %3653 = vmatprep.mubr.bf16.mxu0 %v3029_v33 }
 0x34d   : > { %v1905_v34 = vpop.permute.xlu0 %1904  ;;  %v3054_v11 = vld [vmem:[#allocation3 + $0x1c0] sm:$0xff] }
 0x34e   : > { %1996 = vst.msk [vmem:[#allocation3 + $0x210] sm:$0xff] %vm1562_vm4, %v1905_v34  ;;  %4095 = vmatmul.mubr.bf16.gmra.mrb[124].mxu1 %v3110_v35  ;;  %v1490_v37 = vpop.permute.xlu1 %1489  ;;  %v3068_v28 = vld [vmem:[#allocation3 + $0x230] sm:$0xff]  ;;  %v3166_v35 = vld [vmem:[#allocation3 + $0x540] sm:$0xff] }
 0x34f   : > { %4102 = vmatprep.mubr.bf16.mxu1 %v3116_v36  ;;  %1579 = vst.msk [vmem:[#allocation3 + $0x280] sm:$0xff] %vm1562_vm4, %v1490_v37  ;;  %v3160_v34 = vld [vmem:[#allocation3 + $0x510] sm:$0xff] }
 0x351   : > { %v1907_v38 = vpop.permute.xlu0 %1906  ;;  %v3059_v17 = vld [vmem:[#allocation3 + $0x1e8] sm:$0xff] }
 0x352   : > { %1997 = vst.msk [vmem:[#allocation3 + $0x238] sm:$0xff] %vm1562_vm4, %v1907_v38  ;;  %v1492_v40 = vpop.permute.xlu1 %1491  ;;  %v3073_v31 = vld [vmem:[#allocation3 + $0x258] sm:$0xff] }
 0x353   : > { %3654 = vmatmul.mubr.bf16.gmra.mrb[180].mxu0 %v3028_v39  ;;  %1580 = vst.msk [vmem:[#allocation3 + $0x2a8] sm:$0xff] %vm1562_vm4, %v1492_v40  ;;  %v3165_v38 = vld [vmem:[#allocation3 + $0x538] sm:$0xff]  ;;  %v3171_v39 = vld [vmem:[#allocation3 + $0x568] sm:$0xff] }
 0x354   : > { %3661 = vmatprep.mubr.bf16.mxu0 %v3034_v41 }
 0x355   : > { %v1909_v42 = vpop.permute.xlu0 %1908  ;;  %v3064_v22 = vld [vmem:[#allocation3 + $0x210] sm:$0xff] }
 0x356   : > { %1998 = vst.msk [vmem:[#allocation3 + $0x260] sm:$0xff] %vm1562_vm4, %v1909_v42  ;;  %4103 = vmatmul.mubr.bf16.gmra.mrb[128].mxu1 %v3115_v43  ;;  %v1494_v32 = vpop.permute.xlu1 %1493  ;;  %v3078_v36 = vld [vmem:[#allocation3 + $0x280] sm:$0xff] }
 0x357   : > { %4110 = vmatprep.mubr.bf16.mxu1 %v3121_v45  ;;  %1581 = vst.msk [vmem:[#allocation3 + $0x2d0] sm:$0xff] %vm1562_vm4, %v1494_v32  ;;  %v3170_v42 = vld [vmem:[#allocation3 + $0x560] sm:$0xff] }
 0x358   : > { %v3002_v32 = vld [vmem:[#allocation3 + $0x20] sm:$0xff] }
 0x359   : > { %v1911_v46 = vpop.permute.xlu0 %1910  ;;  %v3069_v25 = vld [vmem:[#allocation3 + $0x238] sm:$0xff] }
 0x35a   : > { %1999 = vst.msk [vmem:[#allocation3 + $0x288] sm:$0xff] %vm1562_vm4, %v1911_v46  ;;  %v1496_v48 = vpop.permute.xlu1 %1495  ;;  %v3083_v40 = vld [vmem:[#allocation3 + $0x2a8] sm:$0xff] }
 0x35b   : > { %3662 = vmatmul.mubr.bf16.gmra.mrb[184].mxu0 %v3033_v47  ;;  %1582 = vst.msk [vmem:[#allocation3 + $0x2f8] sm:$0xff] %vm1562_vm4, %v1496_v48  ;;  %v3007_v48 = vld [vmem:[#allocation3 + $0x48] sm:$0xff] }
 0x35c   : > { %3669 = vmatprep.mubr.bf16.mxu0 %v3039_v49 }
 0x35d   : > { %v1913_v50 = vpop.permute.xlu0 %1912  ;;  %v3074_v29 = vld [vmem:[#allocation3 + $0x260] sm:$0xff] }
 0x35e   : > { %2000 = vst.msk [vmem:[#allocation3 + $0x2b0] sm:$0xff] %vm1562_vm4, %v1913_v50  ;;  %4111 = vmatmul.mubr.bf16.gmra.mrb[132].mxu1 %v3120_v51  ;;  %v1498_v53 = vpop.permute.xlu1 %1497  ;;  %v3088_v43 = vld [vmem:[#allocation3 + $0x2d0] sm:$0xff] }
 0x35f   : > { %4118 = vmatprep.mubr.bf16.mxu1 %v3126_v52  ;;  %1583 = vst.msk [vmem:[#allocation3 + $0x320] sm:$0xff] %vm1562_vm4, %v1498_v53  ;;  %v3012_v51 = vld [vmem:[#allocation3 + $0x70] sm:$0xff] }
 0x361   : > { %v1915_v54 = vpop.permute.xlu0 %1914  ;;  %v3079_v33 = vld [vmem:[#allocation3 + $0x288] sm:$0xff] }
 0x362   : > { %2001 = vst.msk [vmem:[#allocation3 + $0x2d8] sm:$0xff] %vm1562_vm4, %v1915_v54  ;;  %v1500_v56 = vpop.permute.xlu1 %1499  ;;  %v3093_v46 = vld [vmem:[#allocation3 + $0x2f8] sm:$0xff] }
 0x363   : > { %3670 = vmatmul.mubr.bf16.gmra.mrb[188].mxu0 %v3038_v55  ;;  %1584 = vst.msk [vmem:[#allocation3 + $0x348] sm:$0xff] %vm1562_vm4, %v1500_v56  ;;  %v3017_v54 = vld [vmem:[#allocation3 + $0x98] sm:$0xff] }
 0x364   : > { %3677 = vmatprep.mubr.bf16.mxu0 %v3044_v57  ;;  %v3022_v57 = vld [vmem:[#allocation3 + $0xc0] sm:$0xff] }
 0x365   : > { %v1917_v58 = vpop.permute.xlu0 %1916  ;;  %v3084_v37 = vld [vmem:[#allocation3 + $0x2b0] sm:$0xff] }
 0x366   : > { %2002 = vst.msk [vmem:[#allocation3 + $0x300] sm:$0xff] %vm1562_vm4, %v1917_v58  ;;  %4119 = vmatmul.mubr.bf16.gmra.mrb[136].mxu1 %v3125_v59  ;;  %v1502_v61 = vpop.permute.xlu1 %1501  ;;  %v3098_v49 = vld [vmem:[#allocation3 + $0x320] sm:$0xff] }
 0x367   : > { %4126 = vmatprep.mubr.bf16.mxu1 %v3131_v60  ;;  %1585 = vst.msk [vmem:[#allocation3 + $0x370] sm:$0xff] %vm1562_vm4, %v1502_v61  ;;  %v3027_v60 = vld [vmem:[#allocation3 + $0xe8] sm:$0xff] }
 0x369   : > { %v1919_v62 = vpop.permute.xlu0 %1918  ;;  %v3089_v41 = vld [vmem:[#allocation3 + $0x2d8] sm:$0xff] }
 0x36a   : > { %2003 = vst.msk [vmem:[#allocation3 + $0x328] sm:$0xff] %vm1562_vm4, %v1919_v62  ;;  %v1504_v2 = vpop.permute.xlu1 %1503  ;;  %v3103_v52 = vld [vmem:[#allocation3 + $0x348] sm:$0xff] }
 0x36b   : > { %3678 = vmatmul.mubr.bf16.gmra.mrb[192].mxu0 %v3043_v63  ;;  %1586 = vst.msk [vmem:[#allocation3 + $0x398] sm:$0xff] %vm1562_vm4, %v1504_v2  ;;  %v3032_v63 = vld [vmem:[#allocation3 + $0x110] sm:$0xff] }
 0x36c   : > { %3685 = vmatprep.mubr.bf16.mxu0 %v3049_v3  ;;  %v3037_v3 = vld [vmem:[#allocation3 + $0x138] sm:$0xff] }
 0x36d   : > { %v1921_v4 = vpop.permute.xlu0 %1920  ;;  %v3094_v45 = vld [vmem:[#allocation3 + $0x300] sm:$0xff] }
 0x36e   : > { %2004 = vst.msk [vmem:[#allocation3 + $0x350] sm:$0xff] %vm1562_vm4, %v1921_v4  ;;  %4127 = vmatmul.mubr.bf16.gmra.mrb[0].mxu1 %v3130_v5  ;;  %v1506_v7 = vpop.permute.xlu1 %1505  ;;  %v3108_v55 = vld [vmem:[#allocation3 + $0x370] sm:$0xff]  ;;  %v3042_v4 = vld [vmem:[#allocation3 + $0x160] sm:$0xff] }
 0x36f   : > { %4134 = vmatprep.mubr.bf16.mxu1 %v3136_v6  ;;  %1587 = vst.msk [vmem:[#allocation3 + $0x3c0] sm:$0xff] %vm1562_vm4, %v1506_v7 }
 0x371   : > { %v1923_v8 = vpop.permute.xlu0 %1922  ;;  %v3099_v47 = vld [vmem:[#allocation3 + $0x328] sm:$0xff] }
 0x372   : > { %2005 = vst.msk [vmem:[#allocation3 + $0x378] sm:$0xff] %vm1562_vm4, %v1923_v8  ;;  %v1508_v10 = vpop.permute.xlu1 %1507  ;;  %v3113_v58 = vld [vmem:[#allocation3 + $0x398] sm:$0xff] }
 0x373   : > { %3686 = vmatmul.mubr.bf16.gmra.mrb[196].mxu0 %v3048_v9  ;;  %1588 = vst.msk [vmem:[#allocation3 + $0x3e8] sm:$0xff] %vm1562_vm4, %v1508_v10  ;;  %v3047_v9 = vld [vmem:[#allocation3 + $0x188] sm:$0xff] }
 0x374   : > { %3693 = vmatprep.mubr.bf16.mxu0 %v3054_v11 }
 0x375   : > { %v1925_v12 = vpop.permute.xlu0 %1924  ;;  %v3104_v50 = vld [vmem:[#allocation3 + $0x350] sm:$0xff] }
 0x376   : > { %2006 = vst.msk [vmem:[#allocation3 + $0x3a0] sm:$0xff] %vm1562_vm4, %v1925_v12  ;;  %4135 = vmatmul.mubr.bf16.gmra.mrb[4].mxu1 %v3135_v13  ;;  %v3118_v61 = vld [vmem:[#allocation3 + $0x3c0] sm:$0xff] }
 0x377   : > { %4142 = vmatprep.mubr.bf16.mxu1 %v3141_v14  ;;  %v3052_v14 = vld [vmem:[#allocation3 + $0x1b0] sm:$0xff] }
 0x379   : > { %v1927_v15 = vpop.permute.xlu0 %1926  ;;  %v3109_v53 = vld [vmem:[#allocation3 + $0x378] sm:$0xff] }
 0x37a   : > { %2007 = vst.msk [vmem:[#allocation3 + $0x3c8] sm:$0xff] %vm1562_vm4, %v1927_v15  ;;  %v3123_v2 = vld [vmem:[#allocation3 + $0x3e8] sm:$0xff] }
 0x37b   : > { %3694 = vmatmul.mubr.bf16.gmra.mrb[200].mxu0 %v3053_v16 }
 0x37c   : > { %3701 = vmatprep.mubr.bf16.mxu0 %v3059_v17 }
 0x37d   : > { %v1929_v18 = vpop.permute.xlu0 %1928  ;;  %v3114_v56 = vld [vmem:[#allocation3 + $0x3a0] sm:$0xff] }
 0x37e   : > { %2008 = vst.msk [vmem:[#allocation3 + $0x3f0] sm:$0xff] %vm1562_vm4, %v1929_v18  ;;  %4143 = vmatmul.mubr.bf16.gmra.mrb[8].mxu1 %v3140_v19  ;;  %v3057_v19 = vld [vmem:[#allocation3 + $0x1d8] sm:$0xff] }
 0x37f   : > { %4150 = vmatprep.mubr.bf16.mxu1 %v3146_v20 }
 0x381   : > { %v3119_v59 = vld [vmem:[#allocation3 + $0x3c8] sm:$0xff] }
 0x383   : > { %3702 = vmatmul.mubr.bf16.gmra.mrb[204].mxu0 %v3058_v21 }
 0x384   : > { %3709 = vmatprep.mubr.bf16.mxu0 %v3064_v22 }
 0x385   : > { %v3124_v62 = vld [vmem:[#allocation3 + $0x3f0] sm:$0xff] }
 0x386   : > { %4151 = vmatmul.mubr.bf16.gmra.mrb[12].mxu1 %v3145_v23 }
 0x387   : > { %4158 = vmatprep.mubr.bf16.mxu1 %v3151_v0  ;;  %v3062_v0 = vld [vmem:[#allocation3 + $0x200] sm:$0xff] }
 0x38b   : > { %3710 = vmatmul.mubr.bf16.gmra.mrb[208].mxu0 %v3063_v24 }
 0x38c   : > { %3717 = vmatprep.mubr.bf16.mxu0 %v3069_v25 }
 0x38e   : > { %4159 = vmatmul.mubr.bf16.gmra.mrb[16].mxu1 %v3150_v44 }
 0x38f   : > { %4166 = vmatprep.mubr.bf16.mxu1 %v3156_v27 }
 0x393   : > { %3718 = vmatmul.mubr.bf16.gmra.mrb[212].mxu0 %v3068_v28  ;;  %v3067_v28 = vld [vmem:[#allocation3 + $0x228] sm:$0xff] }
 0x394   : > { %3725 = vmatprep.mubr.bf16.mxu0 %v3074_v29 }
 0x396   : > { %4167 = vmatmul.mubr.bf16.gmra.mrb[20].mxu1 %v3155_v30 }
 0x397   : > { %4174 = vmatprep.mubr.bf16.mxu1 %v3161_v26 }
 0x39b   : > { %3726 = vmatmul.mubr.bf16.gmra.mrb[216].mxu0 %v3073_v31 }
 0x39c   : > { %3733 = vmatprep.mubr.bf16.mxu0 %v3079_v33  ;;  %v3072_v33 = vld [vmem:[#allocation3 + $0x250] sm:$0xff] }
 0x39e   : > { %4175 = vmatmul.mubr.bf16.gmra.mrb[24].mxu1 %v3160_v34 }
 0x39f   : > { %4182 = vmatprep.mubr.bf16.mxu1 %v3166_v35 }
 0x3a3   : > { %3734 = vmatmul.mubr.bf16.gmra.mrb[220].mxu0 %v3078_v36 }
 0x3a4   : > { %3741 = vmatprep.mubr.bf16.mxu0 %v3084_v37 }
 0x3a6   : > { %4183 = vmatmul.mubr.bf16.gmra.mrb[28].mxu1 %v3165_v38  ;;  %v3077_v38 = vld [vmem:[#allocation3 + $0x278] sm:$0xff] }
 0x3a7   : > { %4190 = vmatprep.mubr.bf16.mxu1 %v3171_v39 }
 0x3ab   : > { %3742 = vmatmul.mubr.bf16.gmra.mrb[224].mxu0 %v3083_v40 }
 0x3ac   : > { %3749 = vmatprep.mubr.bf16.mxu0 %v3089_v41 }
 0x3ae   : > { %4191 = vmatmul.mubr.bf16.gmra.mrb[32].mxu1 %v3170_v42 }
 0x3af   : > { %5998 = vmatprep.mubr.msk.bf16.mxu1 %vm6648_vm1, %v6647_v1 }
 0x3b3   : > { %3750 = vmatmul.mubr.bf16.gmra.mrb[228].mxu0 %v3088_v43  ;;  %v3082_v43 = vld [vmem:[#allocation3 + $0x2a0] sm:$0xff] }
 0x3b4   : > { %3757 = vmatprep.mubr.bf16.mxu0 %v3094_v45 }
 0x3b6   : > { %5999 = vmatmul.mubr.msk.bf16.vlgmr.msra.gmra.mrb[36].mxu1 %vm1098_vm3, %v3002_v32 }
 0x3b7   : > { %6002 = vmatprep.mubr.msk.bf16.mxu1 %vm6648_vm1, %v6647_v1 }
 0x3bb   : > { %3758 = vmatmul.mubr.bf16.gmra.mrb[232].mxu0 %v3093_v46 }
 0x3bc   : > { %3765 = vmatprep.mubr.bf16.mxu0 %v3099_v47 }
 0x3be   : > { %6003 = vmatmul.mubr.msk.bf16.gmra.mrb[40].mxu1 %vm1098_vm3, %v3007_v48  ;;  %v3087_v48 = vld [vmem:[#allocation3 + $0x2c8] sm:$0xff] }
 0x3bf   : > { %6006 = vmatprep.mubr.msk.bf16.mxu1 %vm6648_vm1, %v6647_v1 }
 0x3c3   : > { %3766 = vmatmul.mubr.bf16.gmra.mrb[236].mxu0 %v3098_v49 }
 0x3c4   : > { %3773 = vmatprep.mubr.bf16.mxu0 %v3104_v50 }
 0x3c6   : > { %6007 = vmatmul.mubr.msk.bf16.gmra.mrb[44].mxu1 %vm1098_vm3, %v3012_v51 }
 0x3c7   : > { %6010 = vmatprep.mubr.msk.bf16.mxu1 %vm6648_vm1, %v6647_v1 }
 0x3cb   : > { %3774 = vmatmul.mubr.bf16.gmra.mrb[240].mxu0 %v3103_v52 }
 0x3cc   : > { %3781 = vmatprep.mubr.bf16.mxu0 %v3109_v53  ;;  %v3092_v53 = vld [vmem:[#allocation3 + $0x2f0] sm:$0xff] }
 0x3ce   : > { %6011 = vmatmul.mubr.msk.bf16.gmra.mrb[48].mxu1 %vm1098_vm3, %v3017_v54 }
 0x3cf   : > { %6014 = vmatprep.mubr.msk.bf16.mxu1 %vm6648_vm1, %v6647_v1 }
 0x3d3   : > { %3782 = vmatmul.mubr.bf16.gmra.mrb[244].mxu0 %v3108_v55 }
 0x3d4   : > { %3789 = vmatprep.mubr.bf16.mxu0 %v3114_v56 }
 0x3d6   : > { %6015 = vmatmul.mubr.msk.bf16.gmra.mrb[52].mxu1 %vm1098_vm3, %v3022_v57 }
 0x3d7   : > { %6018 = vmatprep.mubr.msk.bf16.mxu1 %vm6648_vm1, %v6647_v1 }
 0x3db   : > { %3790 = vmatmul.mubr.bf16.gmra.mrb[248].mxu0 %v3113_v58  ;;  %v3097_v58 = vld [vmem:[#allocation3 + $0x318] sm:$0xff] }
 0x3dc   : > { %3797 = vmatprep.mubr.bf16.mxu0 %v3119_v59 }
 0x3de   : > { %6019 = vmatmul.mubr.msk.bf16.gmra.mrb[56].mxu1 %vm1098_vm3, %v3027_v60 }
 0x3df   : > { %6022 = vmatprep.mubr.msk.bf16.mxu1 %vm6648_vm1, %v6647_v1 }
 0x3e3   : > { %3798 = vmatmul.mubr.bf16.gmra.mrb[252].mxu0 %v3118_v61 }
 0x3e4   : > { %3805 = vmatprep.mubr.bf16.mxu0 %v3124_v62 }
 0x3e6   : > { %6023 = vmatmul.mubr.msk.bf16.gmra.mrb[60].mxu1 %vm1098_vm3, %v3032_v63  ;;  %v3102_v63 = vld [vmem:[#allocation3 + $0x340] sm:$0xff] }
 0x3e7   : > { %6026 = vmatprep.mubr.msk.bf16.mxu1 %vm6648_vm1, %v6647_v1 }
 0x3eb   : > { %3806 = vmatmul.mubr.bf16.gmra.mrb[0].mxu0 %v3123_v2 }
 0x3ee   : > { %6027 = vmatmul.mubr.msk.bf16.gmra.mrb[64].mxu1 %vm1098_vm3, %v3037_v3 }
 0x3ef   : > { %6030 = vmatprep.mubr.msk.bf16.mxu1 %vm6648_vm1, %v6647_v1 }
 0x3f6   : > { %v7682_v5 = vpop.f32.mrb[156].mxu0  ;;  %6031 = vmatmul.mubr.msk.bf16.gmra.mrb[68].mxu1 %vm1098_vm3, %v3042_v4 }
 0x3f7   : > { %v3609_v6 = vpop.f32.mrb[157].mxu0  ;;  %6034 = vmatprep.mubr.msk.bf16.mxu1 %vm6648_vm1, %v6647_v1 }
 0x3f8   : > { %v7687_v7 = vpop.f32.mrb[158].mxu0 }
 0x3f9   : > { %v3612_v8 = vpop.f32.mrb[159].mxu0 }
 0x3fa   : > { %v3107_v8 = vld [vmem:[#allocation3 + $0x368] sm:$0xff] }
 0x3fe   : > { %v7689_v10 = vpop.f32.mrb[160].mxu0  ;;  %6035 = vmatmul.mubr.msk.bf16.gmra.mrb[72].mxu1 %vm1098_vm3, %v3047_v9 }
 0x3ff   : > { %v3617_v11 = vpop.f32.mrb[161].mxu0  ;;  %6038 = vmatprep.mubr.msk.bf16.mxu1 %vm6648_vm1, %v6647_v1 }
 0x400   : > { %v7694_v12 = vpop.f32.mrb[162].mxu0 }
 0x401   : > { %v3620_v13 = vpop.f32.mrb[163].mxu0 }
 0x406   : > { %v7696_v15 = vpop.f32.mrb[164].mxu0  ;;  %6039 = vmatmul.mubr.msk.bf16.gmra.mrb[76].mxu1 %vm1098_vm3, %v3052_v14 }
 0x407   : > { %v3625_v16 = vpop.f32.mrb[165].mxu0  ;;  %6042 = vmatprep.mubr.msk.bf16.mxu1 %vm6648_vm1, %v6647_v1 }
 0x408   : > { %v7701_v17 = vpop.f32.mrb[166].mxu0  ;;  %v3112_v16 = vld [vmem:[#allocation3 + $0x390] sm:$0xff] }
 0x409   : > { %v3628_v18 = vpop.f32.mrb[167].mxu0 }
 0x40e   : > { %v7703_v20 = vpop.f32.mrb[168].mxu0  ;;  %6043 = vmatmul.mubr.msk.bf16.gmra.mrb[80].mxu1 %vm1098_vm3, %v3057_v19 }
 0x40f   : > { %v3633_v21 = vpop.f32.mrb[169].mxu0  ;;  %6046 = vmatprep.mubr.msk.bf16.mxu1 %vm6648_vm1, %v6647_v1 }
 0x410   : > { %v7708_v22 = vpop.f32.mrb[170].mxu0 }
 0x411   : > { %v3636_v23 = vpop.f32.mrb[171].mxu0 }
 0x416   : > { %v7710_v24 = vpop.f32.mrb[172].mxu0  ;;  %6047 = vmatmul.mubr.msk.bf16.gmra.mrb[84].mxu1 %vm1098_vm3, %v3062_v0  ;;  %v3117_v0 = vld [vmem:[#allocation3 + $0x3b8] sm:$0xff] }
 0x417   : > { %v3641_v25 = vpop.f32.mrb[173].mxu0  ;;  %6050 = vmatprep.mubr.msk.bf16.mxu1 %vm6648_vm1, %v6647_v1 }
 0x418   : > { %v7715_v44 = vpop.f32.mrb[174].mxu0 }
 0x419   : > { %v3644_v27 = vpop.f32.mrb[175].mxu0 }
 0x41e   : > { %v7717_v29 = vpop.f32.mrb[176].mxu0  ;;  %6051 = vmatmul.mubr.msk.bf16.gmra.mrb[88].mxu1 %vm1098_vm3, %v3067_v28 }
 0x41f   : > { %v3649_v30 = vpop.f32.mrb[177].mxu0  ;;  %6054 = vmatprep.mubr.msk.bf16.mxu1 %vm6648_vm1, %v6647_v1 }
 0x420   : > { %v7722_v26 = vpop.f32.mrb[178].mxu0 }
 0x421   : > { %v3652_v31 = vpop.f32.mrb[179].mxu0 }
 0x422   : > { %v3122_v31 = vld [vmem:[#allocation3 + $0x3e0] sm:$0xff] }
 0x426   : > { %v7724_v34 = vpop.f32.mrb[180].mxu0  ;;  %6055 = vmatmul.mubr.msk.bf16.gmra.mrb[92].mxu1 %vm1098_vm3, %v3072_v33 }
 0x427   : > { %v3657_v35 = vpop.f32.mrb[181].mxu0  ;;  %6058 = vmatprep.mubr.msk.bf16.mxu1 %vm6648_vm1, %v6647_v1 }
 0x428   : > { %v7729_v36 = vpop.f32.mrb[182].mxu0 }
 0x429   : > { %v3660_v37 = vpop.f32.mrb[183].mxu0 }
 0x42e   : > { %v7731_v39 = vpop.f32.mrb[184].mxu0  ;;  %6059 = vmatmul.mubr.msk.bf16.gmra.mrb[96].mxu1 %vm1098_vm3, %v3077_v38 }
 0x42f   : > { %v3665_v40 = vpop.f32.mrb[185].mxu0  ;;  %6062 = vmatprep.mubr.msk.bf16.mxu1 %vm6648_vm1, %v6647_v1 }
 0x430   : > { %v7736_v41 = vpop.f32.mrb[186].mxu0  ;;  %v3127_v40 = vld [vmem:[#allocation3 + $0x408] sm:$0xff] }
 0x431   : > { %v3668_v42 = vpop.f32.mrb[187].mxu0 }
 0x436   : > { %v7738_v45 = vpop.f32.mrb[188].mxu0  ;;  %6063 = vmatmul.mubr.msk.bf16.gmra.mrb[100].mxu1 %vm1098_vm3, %v3082_v43 }
 0x437   : > { %v3673_v32 = vpop.f32.mrb[189].mxu0  ;;  %6066 = vmatprep.mubr.msk.bf16.mxu1 %vm6648_vm1, %v6647_v1 }
 0x438   : > { %v7743_v46 = vpop.f32.mrb[190].mxu0 }
 0x439   : > { %v3676_v47 = vpop.f32.mrb[191].mxu0 }
 0x43e   : > { %v7745_v49 = vpop.f32.mrb[192].mxu0  ;;  %6067 = vmatmul.mubr.msk.bf16.gmra.mrb[104].mxu1 %vm1098_vm3, %v3087_v48  ;;  %v7811_v48 = vld [vmem:[%s8201_s4] ss:$0 sm:$0xff] }
 0x43f   : > { %v3681_v50 = vpop.f32.mrb[193].mxu0  ;;  %6070 = vmatprep.mubr.msk.bf16.mxu1 %vm6648_vm1, %v6647_v1 }
 0x440   : > { %v7750_v51 = vpop.f32.mrb[194].mxu0  ;;  %v3132_v50 = vld [vmem:[#allocation3 + $0x430] sm:$0xff] }
 0x441   : > { %v3684_v52 = vpop.f32.mrb[195].mxu0 }
 0x446   : > { %v7752_v54 = vpop.f32.mrb[196].mxu0  ;;  %6071 = vmatmul.mubr.msk.bf16.gmra.mrb[108].mxu1 %vm1098_vm3, %v3092_v53 }
 0x447   : > { %v3689_v55 = vpop.f32.mrb[197].mxu0  ;;  %6074 = vmatprep.mubr.msk.bf16.mxu1 %vm6648_vm1, %v6647_v1 }
 0x448   : > { %v7757_v56 = vpop.f32.mrb[198].mxu0  ;;  %v3608_v55 = vadd.f32 %v7811_v48, %v7682_v5 }
 0x449   : > { %v3692_v57 = vpop.f32.mrb[199].mxu0 }
 0x44e   : > { %v7759_v59 = vpop.f32.mrb[200].mxu0  ;;  %6075 = vmatmul.mubr.msk.bf16.gmra.mrb[112].mxu1 %vm1098_vm3, %v3097_v58 }
 0x44f   : > { %v3697_v60 = vpop.f32.mrb[201].mxu0  ;;  %6078 = vmatprep.mubr.msk.bf16.mxu1 %vm6648_vm1, %v6647_v1 }
 0x450   : > { %v7764_v61 = vpop.f32.mrb[202].mxu0 }
 0x451   : > { %v3700_v62 = vpop.f32.mrb[203].mxu0 }
 0x452   : > { %v3611_v62 = vadd.f32 %v7811_v48, %v7687_v7 }
 0x456   : > { %v7766_v2 = vpop.f32.mrb[204].mxu0  ;;  %6079 = vmatmul.mubr.msk.bf16.gmra.mrb[116].mxu1 %vm1098_vm3, %v3102_v63 }
 0x457   : > { %v3705_v3 = vpop.f32.mrb[205].mxu0  ;;  %6082 = vmatprep.mubr.msk.bf16.mxu1 %vm6648_vm1, %v6647_v1 }
 0x458   : > { %v7771_v4 = vpop.f32.mrb[206].mxu0 }
 0x459   : > { %v3708_v6 = vpop.f32.mrb[207].mxu0 }
 0x45e   : > { %v7773_v9 = vpop.f32.mrb[208].mxu0  ;;  %6083 = vmatmul.mubr.msk.bf16.gmra.mrb[120].mxu1 %vm1098_vm3, %v3107_v8 }
 0x45f   : > { %v3713_v11 = vpop.f32.mrb[209].mxu0  ;;  %6086 = vmatprep.mubr.msk.bf16.mxu1 %vm6648_vm1, %v6647_v1 }
 0x460   : > { %v7778_v13 = vpop.f32.mrb[210].mxu0 }
 0x461   : > { %v3716_v14 = vpop.f32.mrb[211].mxu0 }
 0x462   : > { %v3137_v14 = vld [vmem:[#allocation3 + $0x458] sm:$0xff] }
 0x466   : > { %v7780_v18 = vpop.f32.mrb[212].mxu0  ;;  %6087 = vmatmul.mubr.msk.bf16.gmra.mrb[124].mxu1 %vm1098_vm3, %v3112_v16 }
 0x467   : > { %v3721_v19 = vpop.f32.mrb[213].mxu0  ;;  %6090 = vmatprep.mubr.msk.bf16.mxu1 %vm6648_vm1, %v6647_v1 }
 0x468   : > { %v7785_v21 = vpop.f32.mrb[214].mxu0 }
 0x469   : > { %v3724_v23 = vpop.f32.mrb[215].mxu0 }
 0x46e   : > { %v7787_v25 = vpop.f32.mrb[216].mxu0  ;;  %6091 = vmatmul.mubr.msk.bf16.gmra.mrb[128].mxu1 %vm1098_vm3, %v3117_v0  ;;  %v3616_v0 = vadd.f32 %v7811_v48, %v7689_v10 }
 0x46f   : > { %v3729_v27 = vpop.f32.mrb[217].mxu0  ;;  %6094 = vmatprep.mubr.msk.bf16.mxu1 %vm6648_vm1, %v6647_v1 }
 0x470   : > { %v7792_v28 = vpop.f32.mrb[218].mxu0 }
 0x471   : > { %v3732_v30 = vpop.f32.mrb[219].mxu0 }
 0x476   : > { %v7794_v33 = vpop.f32.mrb[220].mxu0  ;;  %6095 = vmatmul.mubr.msk.bf16.gmra.mrb[132].mxu1 %vm1098_vm3, %v3122_v31 }
 0x477   : > { %v3737_v35 = vpop.f32.mrb[221].mxu0  ;;  %6098 = vmatprep.mubr.msk.bf16.mxu1 %vm6648_vm1, %v6647_v1 }
 0x478   : > { %v7799_v37 = vpop.f32.mrb[222].mxu0  ;;  %v3619_v35 = vadd.f32 %v7811_v48, %v7694_v12 }
 0x479   : > { %v3740_v38 = vpop.f32.mrb[223].mxu0 }
 0x47e   : > { %v7801_v42 = vpop.f32.mrb[224].mxu0  ;;  %6099 = vmatmul.mubr.msk.bf16.gmra.mrb[136].mxu1 %vm1098_vm3, %v3127_v40 }
 0x47f   : > { %v3745_v43 = vpop.f32.mrb[225].mxu0  ;;  %6102 = vmatprep.mubr.msk.bf16.mxu1 %vm6648_vm1, %v6647_v1 }
 0x480   : > { %v7806_v32 = vpop.f32.mrb[226].mxu0 }
 0x481   : > { %v3748_v47 = vpop.f32.mrb[227].mxu0 }
 0x486   : > { %v7813_v52 = vpop.f32.mrb[228].mxu0  ;;  %6103 = vmatmul.mubr.msk.bf16.gmra.mrb[0].mxu1 %vm1098_vm3, %v3132_v50 }
 0x487   : > { %v3753_v53 = vpop.f32.mrb[229].mxu0  ;;  %6106 = vmatprep.mubr.msk.bf16.mxu1 %vm6648_vm1, %v6647_v1 }
 0x488   : > { %v7820_v57 = vpop.f32.mrb[230].mxu0  ;;  %v3142_v53 = vld [vmem:[#allocation3 + $0x480] sm:$0xff] }
 0x489   : > { %v3756_v58 = vpop.f32.mrb[231].mxu0  ;;  %v4233_v60 = vpop.f32.mrb[36].mxu1 }
 0x48a   : > { %v6193_v63 = vadd.f32 %v4233_v60, %v3608_v55  ;;  %v6000_v3 = vpop.f32.mrb[37].mxu1 }
 0x48b   : > { %v4236_v6 = vpop.f32.mrb[38].mxu1 }
 0x48c   : > { %v6195_v8 = vadd.f32 %v4236_v6, %v3611_v62  ;;  %v6001_v11 = vpop.f32.mrb[39].mxu1  ;;  %v4512_v16 = vmax.f32 %v6193_v63, 0.0  ;;  %v3624_v62 = vadd.f32 %v7811_v48, %v7696_v15 }
 0x48e   : > { %v4513_v19 = vmax.f32 %v6195_v8, 0.0  ;;  %v7824_v23 = vpop.f32.mrb[232].mxu0  ;;  %6107 = vmatmul.mubr.msk.bf16.gmra.mrb[4].mxu1 %vm1098_vm3, %v3137_v14  ;;  %v3627_v8 = vadd.f32 %v7811_v48, %v7701_v17 }
 0x48f   : > { %v3761_v5 = vpop.f32.mrb[233].mxu0  ;;  %6110 = vmatprep.mubr.msk.bf16.mxu1 %vm6648_vm1, %v6647_v1 }
 0x490   : > { %v7831_v7 = vpack.c.bf16 %v4513_v19, %v4512_v16  ;;  %v7833_v27 = vpop.f32.mrb[234].mxu0 }
 0x491   : > { %v3764_v30 = vpop.f32.mrb[235].mxu0  ;;  %v4241_v31 = vpop.f32.mrb[40].mxu1 }
 0x492   : > { %v6197_v38 = vadd.f32 %v4241_v31, %v3616_v0  ;;  %v6004_v40 = vpop.f32.mrb[41].mxu1  ;;  %v3147_v0 = vld [vmem:[#allocation3 + $0x4a8] sm:$0xff] }
 0x493   : > { %v4244_v43 = vpop.f32.mrb[42].mxu1 }
 0x494   : > { %v6199_v47 = vadd.f32 %v4244_v43, %v3619_v35  ;;  %v6005_v50 = vpop.f32.mrb[43].mxu1  ;;  %v4514_v55 = vmax.f32 %v6197_v38, 0.0  ;;  %v3632_v38 = vadd.f32 %v7811_v48, %v7703_v20 }
 0x495   : > { %v3635_v50 = vadd.f32 %v7811_v48, %v7708_v22 }
 0x496   : > { %v4515_v58 = vmax.f32 %v6199_v47, 0.0  ;;  %v7837_v60 = vpop.f32.mrb[236].mxu0  ;;  %6111 = vmatmul.mubr.msk.bf16.gmra.mrb[8].mxu1 %vm1098_vm3, %v3142_v53 }
 0x497   : > { %v3769_v10 = vpop.f32.mrb[237].mxu0  ;;  %6114 = vmatprep.mubr.msk.bf16.mxu1 %vm6648_vm1, %v6647_v1 }
 0x498   : > { %v7844_v12 = vpack.c.bf16 %v4515_v58, %v4514_v55  ;;  %v7846_v63 = vpop.f32.mrb[238].mxu0 }
 0x499   : > { %v3772_v3 = vpop.f32.mrb[239].mxu0  ;;  %v4249_v6 = vpop.f32.mrb[44].mxu1 }
 0x49a   : > { %v6201_v11 = vadd.f32 %v4249_v6, %v3624_v62  ;;  %v6008_v14 = vpop.f32.mrb[45].mxu1  ;;  %v3152_v3 = vld [vmem:[#allocation3 + $0x4d0] sm:$0xff] }
 0x49b   : > { %v4252_v16 = vpop.f32.mrb[46].mxu1  ;;  %v3640_v14 = vadd.f32 %v7811_v48, %v7710_v24 }
 0x49c   : > { %v6203_v19 = vadd.f32 %v4252_v16, %v3627_v8  ;;  %v6009_v5 = vpop.f32.mrb[47].mxu1  ;;  %v4516_v30 = vmax.f32 %v6201_v11, 0.0 }
 0x49e   : > { %v4517_v31 = vmax.f32 %v6203_v19, 0.0  ;;  %v7850_v35 = vpop.f32.mrb[240].mxu0  ;;  %6115 = vmatmul.mubr.msk.bf16.gmra.mrb[12].mxu1 %vm1098_vm3, %v3147_v0  ;;  %v3643_v0 = vadd.f32 %v7811_v48, %v7715_v44 }
 0x49f   : > { %v3777_v15 = vpop.f32.mrb[241].mxu0  ;;  %6118 = vmatprep.mubr.msk.bf16.mxu1 %vm6648_vm1, %v6647_v1 }
 0x4a0   : > { %v7857_v17 = vpack.c.bf16 %v4517_v31, %v4516_v30  ;;  %v7859_v40 = vpop.f32.mrb[242].mxu0 }
 0x4a1   : > { %v3780_v43 = vpop.f32.mrb[243].mxu0  ;;  %v4257_v47 = vpop.f32.mrb[48].mxu1 }
 0x4a2   : > { %v6205_v53 = vadd.f32 %v4257_v47, %v3632_v38  ;;  %v6012_v55 = vpop.f32.mrb[49].mxu1  ;;  %v3157_v47 = vld [vmem:[#allocation3 + $0x4f8] sm:$0xff] }
 0x4a3   : > { %v4260_v58 = vpop.f32.mrb[50].mxu1 }
 0x4a4   : > { %v6207_v10 = vadd.f32 %v4260_v58, %v3635_v50  ;;  %v6013_v62 = vpop.f32.mrb[51].mxu1  ;;  %v4518_v6 = vmax.f32 %v6205_v53, 0.0  ;;  %v3648_v58 = vadd.f32 %v7811_v48, %v7717_v29 }
 0x4a6   : > { %v4519_v8 = vmax.f32 %v6207_v10, 0.0  ;;  %v7863_v11 = vpop.f32.mrb[244].mxu0  ;;  %6119 = vmatmul.mubr.msk.bf16.gmra.mrb[16].mxu1 %vm1098_vm3, %v3152_v3 }
 0x4a7   : > { %v3785_v20 = vpop.f32.mrb[245].mxu0  ;;  %6122 = vmatprep.mubr.msk.bf16.mxu1 %vm6648_vm1, %v6647_v1 }
 0x4a8   : > { %v7870_v22 = vpack.c.bf16 %v4519_v8, %v4518_v6  ;;  %v7872_v16 = vpop.f32.mrb[246].mxu0  ;;  %v3651_v6 = vadd.f32 %v7811_v48, %v7722_v26 }
 0x4a9   : > { %v3788_v19 = vpop.f32.mrb[247].mxu0  ;;  %v4265_v5 = vpop.f32.mrb[52].mxu1 }
 0x4aa   : > { %v6209_v30 = vadd.f32 %v4265_v5, %v3640_v14  ;;  %v6016_v31 = vpop.f32.mrb[53].mxu1 }
 0x4ab   : > { %v4268_v15 = vpop.f32.mrb[54].mxu1 }
 0x4ac   : > { %v6211_v38 = vadd.f32 %v4268_v15, %v3643_v0  ;;  %v6017_v43 = vpop.f32.mrb[55].mxu1  ;;  %v4520_v50 = vmax.f32 %v6209_v30, 0.0  ;;  %v3162_v0 = vld [vmem:[#allocation3 + $0x520] sm:$0xff] }
 0x4ae   : > { %v4521_v53 = vmax.f32 %v6211_v38, 0.0  ;;  %v7876_v55 = vpop.f32.mrb[248].mxu0  ;;  %6123 = vmatmul.mubr.msk.bf16.gmra.mrb[20].mxu1 %vm1098_vm3, %v3157_v47  ;;  %v3656_v38 = vadd.f32 %v7811_v48, %v7724_v34 }
 0x4af   : > { %v3793_v24 = vpop.f32.mrb[249].mxu0  ;;  %6126 = vmatprep.mubr.msk.bf16.mxu1 %vm6648_vm1, %v6647_v1 }
 0x4b0   : > { %v7883_v44 = vpack.c.bf16 %v4521_v53, %v4520_v50  ;;  %v7885_v10 = vpop.f32.mrb[250].mxu0  ;;  %v3659_v53 = vadd.f32 %v7811_v48, %v7729_v36 }
 0x4b1   : > { %v3796_v62 = vpop.f32.mrb[251].mxu0  ;;  %v4273_v3 = vpop.f32.mrb[56].mxu1 }
 0x4b2   : > { %v6213_v8 = vadd.f32 %v4273_v3, %v3648_v58  ;;  %v6020_v20 = vpop.f32.mrb[57].mxu1 }
 0x4b3   : > { %v4276_v14 = vpop.f32.mrb[58].mxu1 }
 0x4b4   : > { %v6215_v19 = vadd.f32 %v4276_v14, %v3651_v6  ;;  %v6021_v5 = vpop.f32.mrb[59].mxu1  ;;  %v4522_v30 = vmax.f32 %v6213_v8, 0.0  ;;  %v3167_v8 = vld [vmem:[#allocation3 + $0x548] sm:$0xff] }
 0x4b5   : > { %v3664_v5 = vadd.f32 %v7811_v48, %v7731_v39  ;;  %v3672_v39 = vadd.f32 %v7811_v48, %v7738_v45  ;;  %v3680_v45 = vadd.f32 %v7811_v48, %v7745_v49 }
 0x4b6   : > { %v4523_v31 = vmax.f32 %v6215_v19, 0.0  ;;  %v7889_v15 = vpop.f32.mrb[252].mxu0  ;;  %6127 = vmatmul.mubr.msk.bf16.gmra.mrb[24].mxu1 %vm1098_vm3, %v3162_v0 }
 0x4b7   : > { %v3801_v29 = vpop.f32.mrb[253].mxu0  ;;  %6130 = vmatprep.mubr.msk.bf16.mxu1 %vm6648_vm1, %v6647_v1 }
 0x4b8   : > { %v7896_v26 = vpack.c.bf16 %v4523_v31, %v4522_v30  ;;  %v7898_v43 = vpop.f32.mrb[254].mxu0  ;;  %v3667_v29 = vadd.f32 %v7811_v48, %v7736_v41 }
 0x4b9   : > { %v3804_v47 = vpop.f32.mrb[255].mxu0  ;;  %v4281_v50 = vpop.f32.mrb[60].mxu1 }
 0x4ba   : > { %v6217_v24 = vadd.f32 %v4281_v50, %v3656_v38  ;;  %v6024_v58 = vpop.f32.mrb[61].mxu1 }
 0x4bb   : > { %v4284_v62 = vpop.f32.mrb[62].mxu1  ;;  %v3172_v58 = vld [vmem:[#allocation3 + $0x570] sm:$0xff] }
 0x4bc   : > { %v6219_v3 = vadd.f32 %v4284_v62, %v3659_v53  ;;  %v6025_v6 = vpop.f32.mrb[63].mxu1  ;;  %v4524_v20 = vmax.f32 %v6217_v24, 0.0 }
 0x4be   : > { %v4525_v14 = vmax.f32 %v6219_v3, 0.0  ;;  %v7902_v19 = vpop.f32.mrb[0].mxu0  ;;  %6131 = vmatmul.mubr.msk.bf16.gmra.mrb[28].mxu1 %vm1098_vm3, %v3167_v8  ;;  %v3675_v8 = vadd.f32 %v7811_v48, %v7743_v46  ;;  %v3683_v46 = vadd.f32 %v7811_v48, %v7750_v51 }
 0x4bf   : > { %v3809_v34 = vpop.f32.mrb[1].mxu0  ;;  %6134 = vmatprep.mubr.msk.bf16.mxu1 %vm6648_vm1, %v6647_v1 }
 0x4c0   : > { %v7909_v36 = vpack.c.bf16 %v4525_v14, %v4524_v20  ;;  %v7911_v0 = vpop.f32.mrb[2].mxu0 }
 0x4c1   : > { %v3812_v30 = vpop.f32.mrb[3].mxu0  ;;  %v4289_v31 = vpop.f32.mrb[64].mxu1 }
 0x4c2   : > { %v6221_v38 = vadd.f32 %v4289_v31, %v3664_v5  ;;  %v6028_v47 = vpop.f32.mrb[65].mxu1 }
 0x4c3   : > { %v4292_v50 = vpop.f32.mrb[66].mxu1 }
 0x4c4   : > { %v6223_v53 = vadd.f32 %v4292_v50, %v3667_v29  ;;  %v6029_v24 = vpop.f32.mrb[67].mxu1  ;;  %v4526_v62 = vmax.f32 %v6221_v38, 0.0  ;;  %v6583_v29 = vld [vmem:[%s8202_s5 + $0x4] ss:$20 sps:$4 sm:$0xff]  }
 0x4c5   : > { %4922 = vmatprep.mubr.bf16.mxu0 %v6583_v29 }
 0x4c6   : > { %v4527_v1 = vmax.f32 %v6223_v53, 0.0  ;;  %6135 = vmatmul.mubr.msk.bf16.gmra.mrb[32].mxu1 %vm1098_vm3, %v3172_v58 }
 0x4c8   : > { %v7918_v3 = vpack.c.bf16 %v4527_v1, %v4526_v62 }
 0x4c9   : > { %v4297_v6 = vpop.f32.mrb[68].mxu1 }
 0x4ca   : > { %v6225_v41 = vadd.f32 %v4297_v6, %v3672_v39  ;;  %v6032_v20 = vpop.f32.mrb[69].mxu1  ;;  %v3688_v6 = vadd.f32 %v7811_v48, %v7752_v54 }
 0x4cb   : > { %v4300_v14 = vpop.f32.mrb[70].mxu1 }
 0x4cc   : > { %v6227_v34 = vadd.f32 %v4300_v14, %v3675_v8  ;;  %v6033_v5 = vpop.f32.mrb[71].mxu1  ;;  %v4528_v30 = vmax.f32 %v6225_v41, 0.0  ;;  %v3691_v41 = vadd.f32 %v7811_v48, %v7757_v56 }
 0x4ce   : > { %v4529_v31 = vmax.f32 %v6227_v34, 0.0 }
 0x4d0   : > { %v4590_v38 = vpack.c.bf16 %v4529_v31, %v4528_v30  ;;  %v3696_v31 = vadd.f32 %v7811_v48, %v7759_v59 }
 0x4d1   : > { %v4305_v47 = vpop.f32.mrb[72].mxu1 }
 0x4d2   : > { %v6229_v50 = vadd.f32 %v4305_v47, %v3680_v45  ;;  %v6036_v53 = vpop.f32.mrb[73].mxu1  ;;  %5689 = vmatprep.subr.bf16.mxu0 %v4590_v38  ;;  %v3699_v45 = vadd.f32 %v7811_v48, %v7764_v61 }
 0x4d3   : > { %v4308_v24 = vpop.f32.mrb[74].mxu1  ;;  %5690 = vmatpush3.bf16.msra.mxu0 %v7831_v7 }
 0x4d4   : > { %v6231_v58 = vadd.f32 %v4308_v24, %v3683_v46  ;;  %v6037_v62 = vpop.f32.mrb[75].mxu1  ;;  %v4530_v1 = vmax.f32 %v6229_v50, 0.0  ;;  %v3704_v24 = vadd.f32 %v7811_v48, %v7766_v2 }
 0x4d5   : > { %v3707_v62 = vadd.f32 %v7811_v48, %v7771_v4 }
 0x4d6   : > { %v4531_v39 = vmax.f32 %v6231_v58, 0.0 }
 0x4d8   : > { %v4591_v49 = vpack.c.bf16 %v4531_v39, %v4530_v1 }
 0x4d9   : > { %v4313_v8 = vpop.f32.mrb[76].mxu1 }
 0x4da   : > { %v6233_v20 = vadd.f32 %v4313_v8, %v3688_v6  ;;  %v6040_v51 = vpop.f32.mrb[77].mxu1  ;;  %5691 = vmatprep.subr.bf16.mxu0 %v4591_v49 }
 0x4db   : > { %v4316_v14 = vpop.f32.mrb[78].mxu1  ;;  %5692 = vmatpush3.bf16.msra.mxu0 %v7844_v12  ;;  %v3715_v51 = vadd.f32 %v7811_v48, %v7778_v13 }
 0x4dc   : > { %v6235_v34 = vadd.f32 %v4316_v14, %v3691_v41  ;;  %v6041_v7 = vpop.f32.mrb[79].mxu1  ;;  %v4532_v5 = vmax.f32 %v6233_v20, 0.0  ;;  %v3712_v41 = vadd.f32 %v7811_v48, %v7773_v9 }
 0x4de   : > { %v4533_v30 = vmax.f32 %v6235_v34, 0.0 }
 0x4e0   : > { %v4592_v29 = vpack.c.bf16 %v4533_v30, %v4532_v5 }
 0x4e1   : > { %v4321_v54 = vpop.f32.mrb[80].mxu1 }
 0x4e2   : > { %v6237_v38 = vadd.f32 %v4321_v54, %v3696_v31  ;;  %v6044_v56 = vpop.f32.mrb[81].mxu1  ;;  %5693 = vmatprep.subr.bf16.mxu0 %v4592_v29  ;;  %v3720_v31 = vadd.f32 %v7811_v48, %v7780_v18  ;;  %v3723_v54 = vadd.f32 %v7811_v48, %v7785_v21 }
 0x4e3   : > { %v4324_v47 = vpop.f32.mrb[82].mxu1  ;;  %5694 = vmatpush3.bf16.msra.mxu0 %v7857_v17 }
 0x4e4   : > { %v6239_v46 = vadd.f32 %v4324_v47, %v3699_v45  ;;  %v6045_v12 = vpop.f32.mrb[83].mxu1  ;;  %v4534_v50 = vmax.f32 %v6237_v38, 0.0 }
 0x4e5   : > { %v3728_v12 = vadd.f32 %v7811_v48, %v7787_v25 }
 0x4e6   : > { %v4535_v53 = vmax.f32 %v6239_v46, 0.0 }
 0x4e8   : > { %v4593_v58 = vpack.c.bf16 %v4535_v53, %v4534_v50  ;;  %v3731_v53 = vadd.f32 %v7811_v48, %v7792_v28 }
 0x4e9   : > { %v4329_v59 = vpop.f32.mrb[84].mxu1 }
 0x4ea   : > { %v6241_v1 = vadd.f32 %v4329_v59, %v3704_v24  ;;  %v6048_v61 = vpop.f32.mrb[85].mxu1  ;;  %5695 = vmatprep.subr.bf16.mxu0 %v4593_v58 }
 0x4eb   : > { %v4332_v39 = vpop.f32.mrb[86].mxu1  ;;  %5696 = vmatpush3.bf16.msra.mxu0 %v7870_v22  ;;  %v3736_v61 = vadd.f32 %v7811_v48, %v7794_v33 }
 0x4ec   : > { %v6243_v6 = vadd.f32 %v4332_v39, %v3707_v62  ;;  %v6049_v17 = vpop.f32.mrb[87].mxu1  ;;  %v4536_v49 = vmax.f32 %v6241_v1, 0.0 }
 0x4ee   : > { %v4537_v8 = vmax.f32 %v6243_v6, 0.0  ;;  %v3739_v6 = vadd.f32 %v7811_v48, %v7799_v37  ;;  %v3744_v37 = vadd.f32 %v7811_v48, %v7801_v42 }
 0x4f0   : > { %v4594_v20 = vpack.c.bf16 %v4537_v8, %v4536_v49  ;;  %v6581_v49 = vld [vmem:[%s8202_s5] ss:$20 sps:$4 sm:$0xff]  }
 0x4f1   : > { %v4337_v2 = vpop.f32.mrb[88].mxu1  ;;  %v6586_v8 = vld [vmem:[%s8202_s5 + $0x2c] ss:$20 sps:$4 sm:$0xff]  }
 0x4f2   : > { %v6245_v14 = vadd.f32 %v4337_v2, %v3712_v41  ;;  %v6052_v4 = vpop.f32.mrb[89].mxu1  ;;  %5697 = vmatprep.subr.bf16.mxu0 %v4594_v20 }
 0x4f3   : > { %v4340_v34 = vpop.f32.mrb[90].mxu1  ;;  %5698 = vmatpush3.bf16.msra.mxu0 %v7883_v44  ;;  %v3747_v4 = vadd.f32 %v7811_v48, %v7806_v32  ;;  %v3752_v32 = vadd.f32 %v7811_v48, %v7813_v52 }
 0x4f4   : > { %v6247_v7 = vadd.f32 %v4340_v34, %v3715_v51  ;;  %v6053_v22 = vpop.f32.mrb[91].mxu1  ;;  %v4538_v5 = vmax.f32 %v6245_v14, 0.0 }
 0x4f6   : > { %v4539_v30 = vmax.f32 %v6247_v7, 0.0  ;;  %v6584_v7 = vld [vmem:[%s8202_s5 + $0x28] ss:$20 sps:$4 sm:$0xff]  }
 0x4f8   : > { %v4595_v29 = vpack.c.bf16 %v4539_v30, %v4538_v5  ;;  %v6589_v5 = vld [vmem:[%s8202_s5 + $0x54] ss:$20 sps:$4 sm:$0xff]  }
 0x4f9   : > { %v4345_v9 = vpop.f32.mrb[92].mxu1 }
 0x4fa   : > { %v6249_v45 = vadd.f32 %v4345_v9, %v3720_v31  ;;  %v6056_v13 = vpop.f32.mrb[93].mxu1  ;;  %5699 = vmatprep.subr.bf16.mxu0 %v4595_v29 }
 0x4fb   : > { %v4348_v38 = vpop.f32.mrb[94].mxu1  ;;  %5700 = vmatpush3.bf16.msra.mxu0 %v7896_v26 }
 0x4fc   : > { %v6251_v56 = vadd.f32 %v4348_v38, %v3723_v54  ;;  %v6057_v44 = vpop.f32.mrb[95].mxu1  ;;  %v4540_v47 = vmax.f32 %v6249_v45, 0.0  ;;  %v3755_v45 = vadd.f32 %v7811_v48, %v7820_v57  ;;  %v3760_v57 = vadd.f32 %v7811_v48, %v7824_v23 }
 0x4fe   : > { %v4541_v46 = vmax.f32 %v6251_v56, 0.0  ;;  %v6587_v56 = vld [vmem:[%s8202_s5 + $0x50] ss:$20 sps:$4 sm:$0xff]  }
 0x500   : > { %v4596_v50 = vpack.c.bf16 %v4541_v46, %v4540_v47  ;;  %v6592_v47 = vld [vmem:[%s8202_s5 + $0x7c] ss:$20 sps:$4 sm:$0xff]  }
 0x501   : > { %v4353_v18 = vpop.f32.mrb[96].mxu1 }
 0x502   : > { %v6253_v24 = vadd.f32 %v4353_v18, %v3728_v12  ;;  %v6060_v21 = vpop.f32.mrb[97].mxu1  ;;  %5701 = vmatprep.subr.bf16.mxu0 %v4596_v50 }
 0x503   : > { %v4356_v58 = vpop.f32.mrb[98].mxu1  ;;  %5702 = vmatpush3.bf16.msra.mxu0 %v7909_v36 }
 0x504   : > { %v6255_v59 = vadd.f32 %v4356_v58, %v3731_v53  ;;  %v6061_v26 = vpop.f32.mrb[99].mxu1  ;;  %v4542_v62 = vmax.f32 %v6253_v24, 0.0  ;;  %v3763_v24 = vadd.f32 %v7811_v48, %v7833_v27  ;;  %v3768_v27 = vadd.f32 %v7811_v48, %v7837_v60 }
 0x506   : > { %v4543_v1 = vmax.f32 %v6255_v59, 0.0  ;;  %v6590_v59 = vld [vmem:[%s8202_s5 + $0x78] ss:$20 sps:$4 sm:$0xff]  }
 0x508   : > { %v4597_v39 = vpack.c.bf16 %v4543_v1, %v4542_v62  ;;  %v6595_v62 = vld [vmem:[%s8202_s5 + $0xa4] ss:$20 sps:$4 sm:$0xff]  }
 0x509   : > { %v4361_v25 = vpop.f32.mrb[100].mxu1 }
 0x50a   : > { %v6257_v17 = vadd.f32 %v4361_v25, %v3736_v61  ;;  %v6064_v28 = vpop.f32.mrb[101].mxu1  ;;  %5703 = vmatprep.subr.bf16.mxu0 %v4597_v39 }
 0x50b   : > { %v4364_v36 = vpop.f32.mrb[102].mxu1  ;;  %5704 = vmatpush3.bf16.msra.mxu0 %v7918_v3 }
 0x50c   : > { %v6259_v33 = vadd.f32 %v4364_v36, %v3739_v6  ;;  %v6065_v41 = vpop.f32.mrb[103].mxu1  ;;  %v4544_v20 = vmax.f32 %v6257_v17, 0.0  ;;  %v3771_v17 = vadd.f32 %v7811_v48, %v7846_v63  ;;  %v6593_v36 = vld [vmem:[%s8202_s5 + $0xa0] ss:$20 sps:$4 sm:$0xff]   ;;  %v3776_v63 = vadd.f32 %v7811_v48, %v7850_v35 }
 0x50e   : > { %v4545_v2 = vmax.f32 %v6259_v33, 0.0  ;;  %4923 = vmatmul.mubr.bf16.vlgmr.msra.gmra.mrb[4].mxu0 %v6581_v49  ;;  %v6598_v33 = vld [vmem:[%s8202_s5 + $0xcc] ss:$20 sps:$4 sm:$0xff]  }
 0x50f   : > { %4930 = vmatprep.mubr.bf16.mxu0 %v6586_v8 }
 0x510   : > { %v7973_v51 = vpack.c.bf16 %v4545_v2, %v4544_v20 }
 0x511   : > { %v4369_v14 = vpop.f32.mrb[104].mxu1 }
 0x512   : > { %v6261_v3 = vadd.f32 %v4369_v14, %v3744_v37  ;;  %v6068_v34 = vpop.f32.mrb[105].mxu1 }
 0x513   : > { %v4372_v22 = vpop.f32.mrb[106].mxu1 }
 0x514   : > { %v6263_v30 = vadd.f32 %v4372_v22, %v3747_v4  ;;  %v6069_v31 = vpop.f32.mrb[107].mxu1  ;;  %v4546_v42 = vmax.f32 %v6261_v3, 0.0  ;;  %v3779_v4 = vadd.f32 %v7811_v48, %v7859_v40  ;;  %v3784_v40 = vadd.f32 %v7811_v48, %v7863_v11 }
 0x516   : > { %v4547_v29 = vmax.f32 %v6263_v30, 0.0  ;;  %4931 = vmatmul.mubr.bf16.gmra.mrb[8].mxu0 %v6584_v7  ;;  %v6596_v7 = vld [vmem:[%s8202_s5 + $0xc8] ss:$20 sps:$4 sm:$0xff]  }
 0x517   : > { %4938 = vmatprep.mubr.bf16.mxu0 %v6589_v5  ;;  %v6601_v5 = vld [vmem:[%s8202_s5 + $0xf4] ss:$20 sps:$4 sm:$0xff]  }
 0x518   : > { %v7985_v9 = vpack.c.bf16 %v4547_v29, %v4546_v42 }
 0x519   : > { %v4377_v54 = vpop.f32.mrb[108].mxu1 }
 0x51a   : > { %v6265_v13 = vadd.f32 %v4377_v54, %v3752_v32  ;;  %v6072_v38 = vpop.f32.mrb[109].mxu1  ;;  %v3787_v54 = vadd.f32 %v7811_v48, %v7872_v16  ;;  %v3792_v16 = vadd.f32 %v7811_v48, %v7876_v55 }
 0x51b   : > { %v4380_v44 = vpop.f32.mrb[110].mxu1  ;;  %v6599_v38 = vld [vmem:[%s8202_s5 + $0xf0] ss:$20 sps:$4 sm:$0xff]  }
 0x51c   : > { %v6267_v46 = vadd.f32 %v4380_v44, %v3755_v45  ;;  %v6073_v12 = vpop.f32.mrb[111].mxu1  ;;  %v4548_v52 = vmax.f32 %v6265_v13, 0.0  ;;  %v6604_v44 = vld [vmem:[%s8202_s5 + $0x11c] ss:$20 sps:$4 sm:$0xff]  }
 0x51e   : > { %v4549_v50 = vmax.f32 %v6267_v46, 0.0  ;;  %4939 = vmatmul.mubr.bf16.gmra.mrb[12].mxu0 %v6587_v56 }
 0x51f   : > { %4946 = vmatprep.mubr.bf16.mxu0 %v6592_v47 }
 0x520   : > { %v7997_v18 = vpack.c.bf16 %v4549_v50, %v4548_v52 }
 0x521   : > { %v4385_v53 = vpop.f32.mrb[112].mxu1 }
 0x522   : > { %v6269_v21 = vadd.f32 %v4385_v53, %v3760_v57  ;;  %v6076_v58 = vpop.f32.mrb[113].mxu1  ;;  %v3795_v57 = vadd.f32 %v7811_v48, %v7885_v10  ;;  %v3800_v10 = vadd.f32 %v7811_v48, %v7889_v15  ;;  %v3811_v15 = vadd.f32 %v7811_v48, %v7911_v0 }
 0x523   : > { %v4388_v26 = vpop.f32.mrb[114].mxu1 }
 0x524   : > { %v6271_v1 = vadd.f32 %v4388_v26, %v3763_v24  ;;  %v6077_v61 = vpop.f32.mrb[115].mxu1  ;;  %v4550_v23 = vmax.f32 %v6269_v21, 0.0  ;;  %v6602_v21 = vld [vmem:[%s8202_s5 + $0x118] ss:$20 sps:$4 sm:$0xff]  }
 0x526   : > { %v4551_v39 = vmax.f32 %v6271_v1, 0.0  ;;  %4947 = vmatmul.mubr.bf16.gmra.mrb[16].mxu0 %v6590_v59  ;;  %v6607_v59 = vld [vmem:[%s8202_s5 + $0xc] ss:$20 sps:$4 sm:$0xff]  }
 0x527   : > { %4954 = vmatprep.mubr.bf16.mxu0 %v6595_v62 }
 0x528   : > { %v8009_v25 = vpack.c.bf16 %v4551_v39, %v4550_v23  ;;  %v3803_v39 = vadd.f32 %v7811_v48, %v7898_v43 }
 0x529   : > { %v4393_v6 = vpop.f32.mrb[116].mxu1 }
 0x52a   : > { %v6273_v28 = vadd.f32 %v4393_v6, %v3768_v27  ;;  %v6080_v49 = vpop.f32.mrb[117].mxu1 }
 0x52b   : > { %v4396_v8 = vpop.f32.mrb[118].mxu1 }
 0x52c   : > { %v6275_v41 = vadd.f32 %v4396_v8, %v3771_v17  ;;  %v6081_v20 = vpop.f32.mrb[119].mxu1  ;;  %v4552_v60 = vmax.f32 %v6273_v28, 0.0 }
 0x52e   : > { %v4553_v2 = vmax.f32 %v6275_v41, 0.0  ;;  %4955 = vmatmul.mubr.bf16.gmra.mrb[20].mxu0 %v6593_v36 }
 0x52f   : > { %4962 = vmatprep.mubr.bf16.mxu0 %v6598_v33  ;;  %v3808_v33 = vadd.f32 %v7811_v48, %v7902_v19 }
 0x530   : > { %v8021_v37 = vpack.c.bf16 %v4553_v2, %v4552_v60 }
 0x531   : > { %v4401_v14 = vpop.f32.mrb[120].mxu1 }
 0x532   : > { %v6277_v3 = vadd.f32 %v4401_v14, %v3776_v63  ;;  %v6084_v34 = vpop.f32.mrb[121].mxu1 }
 0x533   : > { %v4404_v22 = vpop.f32.mrb[122].mxu1 }
 0x534   : > { %v6279_v30 = vadd.f32 %v4404_v22, %v3779_v4  ;;  %v6085_v31 = vpop.f32.mrb[123].mxu1  ;;  %v4554_v35 = vmax.f32 %v6277_v3, 0.0 }
 0x536   : > { %v4555_v42 = vmax.f32 %v6279_v30, 0.0  ;;  %4963 = vmatmul.mubr.bf16.gmra.mrb[24].mxu0 %v6596_v7 }
 0x537   : > { %4970 = vmatprep.mubr.bf16.mxu0 %v6601_v5 }
 0x538   : > { %v8033_v29 = vpack.c.bf16 %v4555_v42, %v4554_v35 }
 0x539   : > { %v4409_v32 = vpop.f32.mrb[124].mxu1 }
 0x53a   : > { %v6281_v45 = vadd.f32 %v4409_v32, %v3784_v40  ;;  %v6088_v13 = vpop.f32.mrb[125].mxu1 }
 0x53b   : > { %v4412_v56 = vpop.f32.mrb[126].mxu1 }
 0x53c   : > { %v6283_v47 = vadd.f32 %v4412_v56, %v3787_v54  ;;  %v6089_v46 = vpop.f32.mrb[127].mxu1  ;;  %v4556_v11 = vmax.f32 %v6281_v45, 0.0 }
 0x53e   : > { %v4557_v12 = vmax.f32 %v6283_v47, 0.0  ;;  %4971 = vmatmul.mubr.bf16.gmra.mrb[28].mxu0 %v6599_v38 }
 0x53f   : > { %4978 = vmatprep.mubr.bf16.mxu0 %v6604_v44 }
 0x540   : > { %v8045_v52 = vpack.c.bf16 %v4557_v12, %v4556_v11 }
 0x541   : > { %v4417_v50 = vpop.f32.mrb[128].mxu1 }
 0x542   : > { %v6285_v53 = vadd.f32 %v4417_v50, %v3792_v16  ;;  %v6092_v24 = vpop.f32.mrb[129].mxu1 }
 0x543   : > { %v4420_v58 = vpop.f32.mrb[130].mxu1 }
 0x544   : > { %v6287_v26 = vadd.f32 %v4420_v58, %v3795_v57  ;;  %v6093_v62 = vpop.f32.mrb[131].mxu1  ;;  %v4558_v55 = vmax.f32 %v6285_v53, 0.0 }
 0x546   : > { %v4559_v1 = vmax.f32 %v6287_v26, 0.0  ;;  %4979 = vmatmul.mubr.bf16.gmra.mrb[32].mxu0 %v6602_v21 }
 0x547   : > { %5019 = vmatprep.mubr.bf16.mxu0 %v6607_v59 }
 0x548   : > { %v8057_v61 = vpack.c.bf16 %v4559_v1, %v4558_v55 }
 0x549   : > { %v4425_v23 = vpop.f32.mrb[132].mxu1 }
 0x54a   : > { %v6289_v27 = vadd.f32 %v4425_v23, %v3800_v10  ;;  %v6096_v6 = vpop.f32.mrb[133].mxu1 }
 0x54b   : > { %v4428_v17 = vpop.f32.mrb[134].mxu1 }
 0x54c   : > { %v6291_v28 = vadd.f32 %v4428_v17, %v3803_v39  ;;  %v6097_v49 = vpop.f32.mrb[135].mxu1  ;;  %v4560_v36 = vmax.f32 %v6289_v27, 0.0 }
 0x54e   : > { %v4561_v8 = vmax.f32 %v6291_v28, 0.0 }
 0x550   : > { %v4606_v41 = vpack.c.bf16 %v4561_v8, %v4560_v36 }
 0x551   : > { %v4433_v20 = vpop.f32.mrb[136].mxu1 }
 0x552   : > { %v6293_v60 = vadd.f32 %v4433_v20, %v3808_v33  ;;  %v6100_v2 = vpop.f32.mrb[137].mxu1  ;;  %5753 = vmatprep.subr.bf16.mxu0 %v4606_v41 }
 0x553   : > { %v4436_v63 = vpop.f32.mrb[138].mxu1  ;;  %5754 = vmatpush3.bf16.msra.mxu0 %v7973_v51 }
 0x554   : > { %v6295_v43 = vadd.f32 %v4436_v63, %v3811_v15  ;;  %v6101_v14 = vpop.f32.mrb[139].mxu1  ;;  %v4562_v4 = vmax.f32 %v6293_v60, 0.0 }
 0x555   : > { %v6605_v14 = vld [vmem:[%s8202_s5 + $0x8] ss:$20 sps:$4 sm:$0xff]  }
 0x556   : > { %v4563_v3 = vmax.f32 %v6295_v43, 0.0 }
 0x558   : > { %v4607_v34 = vpack.c.bf16 %v4563_v3, %v4562_v4 }
 0x559   : > { %v4441_v7 = vpop.f32.mrb[0].mxu1 }
 0x55a   : > { %v6296_v22 = vadd.f32 %v7811_v48, %v4441_v7  ;;  %v6104_v19 = vpop.f32.mrb[1].mxu1  ;;  %5755 = vmatprep.subr.bf16.mxu0 %v4607_v34 }
 0x55b   : > { %v4444_v5 = vpop.f32.mrb[2].mxu1  ;;  %5756 = vmatpush3.bf16.msra.mxu0 %v7985_v9 }
 0x55c   : > { %v6297_v0 = vadd.f32 %v7811_v48, %v4444_v5  ;;  %v6105_v30 = vpop.f32.mrb[3].mxu1  ;;  %v4564_v31 = vmax.f32 %v6296_v22, 0.0 }
 0x55e   : > { %v4565_v35 = vmax.f32 %v6297_v0, 0.0 }
 0x560   : > { %v4608_v42 = vpack.c.bf16 %v4565_v35, %v4564_v31  ;;  %v6613_v35 = vld [vmem:[%s8202_s5 + $0x5c] ss:$20 sps:$4 sm:$0xff]  }
 0x561   : > { %v4449_v51 = vpop.f32.mrb[4].mxu1 }
 0x562   : > { %v6298_v40 = vadd.f32 %v7811_v48, %v4449_v51  ;;  %v6108_v32 = vpop.f32.mrb[5].mxu1  ;;  %5757 = vmatprep.subr.bf16.mxu0 %v4608_v42 }
 0x563   : > { %v4452_v54 = vpop.f32.mrb[6].mxu1  ;;  %5758 = vmatpush3.bf16.msra.mxu0 %v7997_v18 }
 0x564   : > { %v6299_v45 = vadd.f32 %v7811_v48, %v4452_v54  ;;  %v6109_v13 = vpop.f32.mrb[7].mxu1  ;;  %v4566_v38 = vmax.f32 %v6298_v40, 0.0 }
 0x566   : > { %v4567_v56 = vmax.f32 %v6299_v45, 0.0 }
 0x568   : > { %v4609_v9 = vpack.c.bf16 %v4567_v56, %v4566_v38  ;;  %v6611_v56 = vld [vmem:[%s8202_s5 + $0x58] ss:$20 sps:$4 sm:$0xff]  }
 0x569   : > { %v4457_v44 = vpop.f32.mrb[8].mxu1 }
 0x56a   : > { %v6300_v47 = vadd.f32 %v7811_v48, %v4457_v44  ;;  %v6112_v46 = vpop.f32.mrb[9].mxu1  ;;  %5759 = vmatprep.subr.bf16.mxu0 %v4609_v9  ;;  %v6616_v44 = vld [vmem:[%s8202_s5 + $0x84] ss:$20 sps:$4 sm:$0xff]  }
 0x56b   : > { %v4460_v11 = vpop.f32.mrb[10].mxu1  ;;  %5760 = vmatpush3.bf16.msra.mxu0 %v8009_v25 }
 0x56c   : > { %v6301_v12 = vadd.f32 %v7811_v48, %v4460_v11  ;;  %v6113_v16 = vpop.f32.mrb[11].mxu1  ;;  %v4568_v50 = vmax.f32 %v6300_v47, 0.0 }
 0x56e   : > { %v4569_v57 = vmax.f32 %v6301_v12, 0.0 }
 0x570   : > { %v4610_v18 = vpack.c.bf16 %v4569_v57, %v4568_v50  ;;  %v6614_v50 = vld [vmem:[%s8202_s5 + $0x80] ss:$20 sps:$4 sm:$0xff]  }
 0x571   : > { %v4465_v53 = vpop.f32.mrb[12].mxu1  ;;  %v6619_v57 = vld [vmem:[%s8202_s5 + $0xac] ss:$20 sps:$4 sm:$0xff]  }
 0x572   : > { %v6302_v24 = vadd.f32 %v7811_v48, %v4465_v53  ;;  %v6116_v21 = vpop.f32.mrb[13].mxu1  ;;  %5761 = vmatprep.subr.bf16.mxu0 %v4610_v18  ;;  %v6622_v18 = vld [vmem:[%s8202_s5 + $0xd4] ss:$20 sps:$4 sm:$0xff]   ;;  %v6620_v53 = vld [vmem:[%s8202_s5 + $0xd0] ss:$20 sps:$4 sm:$0xff]  }
 0x573   : > { %v4468_v58 = vpop.f32.mrb[14].mxu1  ;;  %5762 = vmatpush3.bf16.msra.mxu0 %v8021_v37  ;;  %v6623_v21 = vld [vmem:[%s8202_s5 + $0xf8] ss:$20 sps:$4 sm:$0xff]  }
 0x574   : > { %v6303_v59 = vadd.f32 %v7811_v48, %v4468_v58  ;;  %v6117_v26 = vpop.f32.mrb[15].mxu1  ;;  %v4570_v62 = vmax.f32 %v6302_v24, 0.0  ;;  %v6625_v24 = vld [vmem:[%s8202_s5 + $0xfc] ss:$20 sps:$4 sm:$0xff]   ;;  %v6628_v58 = vld [vmem:[%s8202_s5 + $0x124] ss:$20 sps:$4 sm:$0xff]  }
 0x575   : > { %v6629_v26 = vld [vmem:[%s8202_s5 + $0x10] ss:$20 sps:$4 sm:$0xff]  }
 0x576   : > { %v4571_v55 = vmax.f32 %v6303_v59, 0.0  ;;  %v6626_v59 = vld [vmem:[%s8202_s5 + $0x120] ss:$20 sps:$4 sm:$0xff]  }
 0x578   : > { %v4611_v25 = vpack.c.bf16 %v4571_v55, %v4570_v62  ;;  %v6630_v62 = vld [vmem:[%s8202_s5 + $0x38] ss:$20 sps:$4 sm:$0xff]   ;;  %v6631_v55 = vld [vmem:[%s8202_s5 + $0x60] ss:$20 sps:$4 sm:$0xff]  }
 0x579   : > { %v4473_v1 = vpop.f32.mrb[16].mxu1 }
 0x57a   : > { %v6304_v10 = vadd.f32 %v7811_v48, %v4473_v1  ;;  %v6120_v23 = vpop.f32.mrb[17].mxu1  ;;  %5763 = vmatprep.subr.bf16.mxu0 %v4611_v25  ;;  %v6632_v25 = vld [vmem:[%s8202_s5 + $0x88] ss:$20 sps:$4 sm:$0xff]   ;;  %v6633_v1 = vld [vmem:[%s8202_s5 + $0xb0] ss:$20 sps:$4 sm:$0xff]  }
 0x57b   : > { %v4476_v39 = vpop.f32.mrb[18].mxu1  ;;  %5764 = vmatpush3.bf16.msra.mxu0 %v8033_v29  ;;  %v6635_v23 = vld [vmem:[%s8202_s5 + $0x100] ss:$20 sps:$4 sm:$0xff]  }
 0x57c   : > { %v6305_v27 = vadd.f32 %v7811_v48, %v4476_v39  ;;  %v6121_v6 = vpop.f32.mrb[19].mxu1  ;;  %v4572_v17 = vmax.f32 %v6304_v10, 0.0  ;;  %v6634_v10 = vld [vmem:[%s8202_s5 + $0xd8] ss:$20 sps:$4 sm:$0xff]  }
 0x57e   : > { %v4573_v28 = vmax.f32 %v6305_v27, 0.0  ;;  %v6636_v27 = vld [vmem:[%s8202_s5 + $0x128] ss:$20 sps:$4 sm:$0xff]  }
 0x580   : > { %v4612_v37 = vpack.c.bf16 %v4573_v28, %v4572_v17 }
 0x581   : > { %v4481_v49 = vpop.f32.mrb[20].mxu1 }
 0x582   : > { %v6306_v36 = vadd.f32 %v7811_v48, %v4481_v49  ;;  %v6124_v8 = vpop.f32.mrb[21].mxu1  ;;  %5765 = vmatprep.subr.bf16.mxu0 %v4612_v37 }
 0x583   : > { %v4484_v33 = vpop.f32.mrb[22].mxu1  ;;  %5766 = vmatpush3.bf16.msra.mxu0 %v8045_v52  ;;  %v6610_v52 = vld [vmem:[%s8202_s5 + $0x34] ss:$20 sps:$4 sm:$0xff]  }
 0x584   : > { %v6307_v41 = vadd.f32 %v7811_v48, %v4484_v33  ;;  %v6125_v20 = vpop.f32.mrb[23].mxu1  ;;  %v4574_v15 = vmax.f32 %v6306_v36, 0.0 }
 0x586   : > { %v4575_v60 = vmax.f32 %v6307_v41, 0.0 }
 0x588   : > { %v4613_v29 = vpack.c.bf16 %v4575_v60, %v4574_v15 }
 0x589   : > { %v4489_v2 = vpop.f32.mrb[24].mxu1 }
 0x58a   : > { %v6308_v63 = vadd.f32 %v7811_v48, %v4489_v2  ;;  %v6128_v43 = vpop.f32.mrb[25].mxu1  ;;  %5767 = vmatprep.subr.bf16.mxu0 %v4613_v29 }
 0x58b   : > { %v4492_v4 = vpop.f32.mrb[26].mxu1  ;;  %5768 = vmatpush3.bf16.msra.mxu0 %v8057_v61  ;;  %v6608_v61 = vld [vmem:[%s8202_s5 + $0x30] ss:$20 sps:$4 sm:$0xff]  }
 0x58c   : > { %v6309_v3 = vadd.f32 %v7811_v48, %v4492_v4  ;;  %v6129_v34 = vpop.f32.mrb[27].mxu1  ;;  %v4576_v7 = vmax.f32 %v6308_v63, 0.0 }
 0x58e   : > { %v4577_v22 = vmax.f32 %v6309_v3, 0.0  ;;  %5020 = vmatmul.mubr.bf16.vlgmr.msra.gmra.mrb[36].mxu0 %v6605_v14 }
 0x58f   : > { %5027 = vmatprep.mubr.bf16.mxu0 %v6610_v52 }
 0x590   : > { %v4614_v19 = vpack.c.bf16 %v4577_v22, %v4576_v7 }
 0x591   : > { %v4497_v5 = vpop.f32.mrb[28].mxu1 }
 0x592   : > { %v6310_v0 = vadd.f32 %v7811_v48, %v4497_v5  ;;  %v6132_v30 = vpop.f32.mrb[29].mxu1  ;;  %6138 = vmatprep.subr.bf16.mxu0 %v4614_v19 }
 0x593   : > { %v4500_v31 = vpop.f32.mrb[30].mxu1  ;;  %6139 = vmatpush3.bf16.msra.mxu0 %v4614_v19 }
 0x594   : > { %v6311_v42 = vadd.f32 %v7811_v48, %v4500_v31  ;;  %v6133_v51 = vpop.f32.mrb[31].mxu1  ;;  %v4578_v40 = vmax.f32 %v6310_v0, 0.0 }
 0x596   : > { %v4579_v32 = vmax.f32 %v6311_v42, 0.0  ;;  %5028 = vmatmul.mubr.bf16.gmra.mrb[40].mxu0 %v6608_v61 }
 0x597   : > { %5035 = vmatprep.mubr.bf16.mxu0 %v6613_v35 }
 0x598   : > { %v4615_v54 = vpack.c.bf16 %v4579_v32, %v4578_v40 }
 0x599   : > { %v4505_v45 = vpop.f32.mrb[32].mxu1 }
 0x59a   : > { %v6312_v13 = vadd.f32 %v7811_v48, %v4505_v45  ;;  %v6136_v38 = vpop.f32.mrb[33].mxu1  ;;  %6140 = vmatprep.subr.bf16.mxu0 %v4615_v54 }
 0x59b   : > { %v4508_v9 = vpop.f32.mrb[34].mxu1  ;;  %6141 = vmatpush3.bf16.msra.mxu0 %v4615_v54 }
 0x59c   : > { %v6313_v47 = vadd.f32 %v7811_v48, %v4508_v9  ;;  %v6137_v46 = vpop.f32.mrb[35].mxu1  ;;  %v4580_v11 = vmax.f32 %v6312_v13, 0.0  ;;  %v6617_v48 = vld [vmem:[%s8202_s5 + $0xa8] ss:$20 sps:$4 sm:$0xff]  }
 0x59e   : > { %v4581_v12 = vmax.f32 %v6313_v47, 0.0  ;;  %5036 = vmatmul.mubr.bf16.gmra.mrb[44].mxu0 %v6611_v56 }
 0x59f   : > { %5043 = vmatprep.mubr.bf16.mxu0 %v6616_v44 }
 0x5a0   : > { %v4616_v16 = vpack.c.bf16 %v4581_v12, %v4580_v11 }
 0x5a2   : > { %6142 = vmatprep.subr.bf16.mxu0 %v4616_v16 }
 0x5a3   : > { %6143 = vmatpush3.bf16.msra.mxu0 %v4616_v16 }
 0x5a6   : > { %5044 = vmatmul.mubr.bf16.gmra.mrb[48].mxu0 %v6614_v50 }
 0x5a7   : > { %5051 = vmatprep.mubr.bf16.mxu0 %v6619_v57 }
 0x5ae   : > { %5052 = vmatmul.mubr.bf16.gmra.mrb[52].mxu0 %v6617_v48 }
 0x5af   : > { %5059 = vmatprep.mubr.bf16.mxu0 %v6622_v18 }
 0x5b6   : > { %5060 = vmatmul.mubr.bf16.gmra.mrb[56].mxu0 %v6620_v53 }
 0x5b7   : > { %5067 = vmatprep.mubr.bf16.mxu0 %v6625_v24 }
 0x5be   : > { %5068 = vmatmul.mubr.bf16.gmra.mrb[60].mxu0 %v6623_v21 }
 0x5bf   : > { %5075 = vmatprep.mubr.bf16.mxu0 %v6628_v58 }
 0x5c6   : > { %5076 = vmatmul.mubr.bf16.gmra.mrb[64].mxu0 %v6626_v59 }
 0x5c7   : > { %6144 = vmatprep.mubr.msk.bf16.mxu0 %vm4865_vm5, %v6629_v26 }
 0x5ce   : > { %6145 = vmatmul.mubr.msk.bf16.vlgmr.msra.gmra.mrb[68].mxu0 %vm4865_vm5, %v6630_v62 }
 0x5cf   : > { %6148 = vmatprep.mubr.msk.bf16.mxu0 %vm4865_vm5, %v6631_v55 }
 0x5d6   : > { %6149 = vmatmul.mubr.msk.bf16.gmra.mrb[72].mxu0 %vm4865_vm5, %v6632_v25 }
 0x5d7   : > { %6152 = vmatprep.mubr.msk.bf16.mxu0 %vm4865_vm5, %v6633_v1 }
 0x5de   : > { %6153 = vmatmul.mubr.msk.bf16.gmra.mrb[76].mxu0 %vm4865_vm5, %v6634_v10 }
 0x5df   : > { %6156 = vmatprep.mubr.msk.bf16.mxu0 %vm4865_vm5, %v6635_v23 }
 0x5e1   : > { %v5705_v39 = vpop.f32.mrb[4].mxu0 }
 0x5e2   : > { %v5706_v6 = vpop.f32.mrb[5].mxu0 }
 0x5e3   : > { %v5707_v17 = vadd.f32 %v5706_v6, %v5705_v39  ;;  %v5708_v28 = vpop.f32.mrb[6].mxu0 }
 0x5e4   : > { %v5709_v37 = vpop.f32.mrb[7].mxu0 }
 0x5e5   : > { %v5710_v49 = vadd.f32 %v5709_v37, %v5708_v28 }
 0x5e6   : > { %6157 = vmatmul.mubr.msk.bf16.gmra.mrb[80].mxu0 %vm4865_vm5, %v6636_v27 }
 0x5e9   : > { %v5711_v36 = vpop.f32.mrb[8].mxu0 }
 0x5ea   : > { %v5712_v8 = vpop.f32.mrb[9].mxu0 }
 0x5eb   : > { %v5713_v33 = vadd.f32 %v5712_v8, %v5711_v36  ;;  %v5714_v41 = vpop.f32.mrb[10].mxu0 }
 0x5ec   : > { %v5715_v20 = vpop.f32.mrb[11].mxu0 }
 0x5ed   : > { %v5716_v15 = vadd.f32 %v5715_v20, %v5714_v41 }
 0x5f1   : > { %v5717_v60 = vpop.f32.mrb[12].mxu0 }
 0x5f2   : > { %v5718_v29 = vpop.f32.mrb[13].mxu0 }
 0x5f3   : > { %v5719_v2 = vadd.f32 %v5718_v29, %v5717_v60  ;;  %v5720_v63 = vpop.f32.mrb[14].mxu0 }
 0x5f4   : > { %v5721_v43 = vpop.f32.mrb[15].mxu0 }
 0x5f5   : > { %v5722_v14 = vadd.f32 %v5721_v43, %v5720_v63 }
 0x5f9   : > { %v5723_v4 = vpop.f32.mrb[16].mxu0 }
 0x5fa   : > { %v5724_v52 = vpop.f32.mrb[17].mxu0 }
 0x5fb   : > { %v5725_v3 = vadd.f32 %v5724_v52, %v5723_v4  ;;  %v5726_v34 = vpop.f32.mrb[18].mxu0 }
 0x5fc   : > { %v5727_v7 = vpop.f32.mrb[19].mxu0 }
 0x5fd   : > { %v5728_v22 = vadd.f32 %v5727_v7, %v5726_v34 }
 0x601   : > { %v5729_v19 = vpop.f32.mrb[20].mxu0 }
 0x602   : > { %v5730_v5 = vpop.f32.mrb[21].mxu0 }
 0x603   : > { %v5731_v0 = vadd.f32 %v5730_v5, %v5729_v19  ;;  %v5732_v30 = vpop.f32.mrb[22].mxu0 }
 0x604   : > { %v5733_v61 = vpop.f32.mrb[23].mxu0 }
 0x605   : > { %v5734_v31 = vadd.f32 %v5733_v61, %v5732_v30 }
 0x609   : > { %v5735_v35 = vpop.f32.mrb[24].mxu0 }
 0x60a   : > { %v5736_v42 = vpop.f32.mrb[25].mxu0 }
 0x60b   : > { %v5737_v51 = vadd.f32 %v5736_v42, %v5735_v35  ;;  %v5738_v40 = vpop.f32.mrb[26].mxu0 }
 0x60c   : > { %v5739_v32 = vpop.f32.mrb[27].mxu0 }
 0x60d   : > { %v5740_v54 = vadd.f32 %v5739_v32, %v5738_v40 }
 0x611   : > { %v5741_v45 = vpop.f32.mrb[28].mxu0 }
 0x612   : > { %v5742_v13 = vpop.f32.mrb[29].mxu0 }
 0x613   : > { %v8168_v38 = vadd.f32 %v5742_v13, %v5741_v45  ;;  %v5744_v56 = vpop.f32.mrb[30].mxu0 }
 0x614   : > { %v5745_v9 = vpop.f32.mrb[31].mxu0 }
 0x615   : > { %v5746_v44 = vadd.f32 %v5745_v9, %v5744_v56 }
 0x619   : > { %v5747_v47 = vpop.f32.mrb[32].mxu0 }
 0x61a   : > { %v5748_v46 = vpop.f32.mrb[33].mxu0 }
 0x61b   : > { %v8170_v11 = vadd.f32 %v5748_v46, %v5747_v47  ;;  %v5750_v12 = vpop.f32.mrb[34].mxu0 }
 0x61c   : > { %v5751_v16 = vpop.f32.mrb[35].mxu0 }
 0x61d   : > { %v8172_v50 = vadd.f32 %v5751_v16, %v5750_v12 }
 0x661   : > { %v5769_v57 = vpop.f32.mrb[36].mxu0 }
 0x662   : > { %v5770_v48 = vpop.f32.mrb[37].mxu0 }
 0x663   : > { %v5771_v18 = vadd.f32 %v5770_v48, %v5769_v57  ;;  %v5772_v53 = vpop.f32.mrb[38].mxu0 }
 0x664   : > { %v5773_v24 = vpop.f32.mrb[39].mxu0 }
 0x665   : > { %v5774_v21 = vadd.f32 %v5773_v24, %v5772_v53  ;;  %v5022_v58 = vadd.f32 %v5771_v18, %v5707_v17 }
 0x667   : > { %v8174_v59 = vadd.f32 %v5774_v21, %v5710_v49 }
 0x669   : > { %v5775_v26 = vpop.f32.mrb[40].mxu0 }
 0x66a   : > { %v5776_v62 = vpop.f32.mrb[41].mxu0 }
 0x66b   : > { %v5777_v55 = vadd.f32 %v5776_v62, %v5775_v26  ;;  %v5778_v25 = vpop.f32.mrb[42].mxu0 }
 0x66c   : > { %v5779_v1 = vpop.f32.mrb[43].mxu0 }
 0x66d   : > { %v5780_v10 = vadd.f32 %v5779_v1, %v5778_v25  ;;  %v5030_v23 = vadd.f32 %v5777_v55, %v5713_v33 }
 0x66f   : > { %v5033_v39 = vadd.f32 %v5780_v10, %v5716_v15 }
 0x671   : > { %v5781_v27 = vpop.f32.mrb[44].mxu0 }
 0x672   : > { %v5782_v6 = vpop.f32.mrb[45].mxu0 }
 0x673   : > { %v5783_v28 = vadd.f32 %v5782_v6, %v5781_v27  ;;  %v5784_v37 = vpop.f32.mrb[46].mxu0 }
 0x674   : > { %v5785_v36 = vpop.f32.mrb[47].mxu0 }
 0x675   : > { %v5786_v8 = vadd.f32 %v5785_v36, %v5784_v37  ;;  %v5038_v41 = vadd.f32 %v5783_v28, %v5719_v2 }
 0x677   : > { %v5041_v20 = vadd.f32 %v5786_v8, %v5722_v14 }
 0x679   : > { %v5787_v60 = vpop.f32.mrb[48].mxu0 }
 0x67a   : > { %v5788_v17 = vpop.f32.mrb[49].mxu0 }
 0x67b   : > { %v5789_v49 = vadd.f32 %v5788_v17, %v5787_v60  ;;  %v5790_v29 = vpop.f32.mrb[50].mxu0 }
 0x67c   : > { %v5791_v63 = vpop.f32.mrb[51].mxu0 }
 0x67d   : > { %v5792_v43 = vadd.f32 %v5791_v63, %v5790_v29  ;;  %v5046_v4 = vadd.f32 %v5789_v49, %v5725_v3 }
 0x67f   : > { %v5049_v52 = vadd.f32 %v5792_v43, %v5728_v22 }
 0x681   : > { %v5793_v34 = vpop.f32.mrb[52].mxu0 }
 0x682   : > { %v5794_v7 = vpop.f32.mrb[53].mxu0 }
 0x683   : > { %v5795_v33 = vadd.f32 %v5794_v7, %v5793_v34  ;;  %v5796_v15 = vpop.f32.mrb[54].mxu0 }
 0x684   : > { %v5797_v19 = vpop.f32.mrb[55].mxu0 }
 0x685   : > { %v5798_v5 = vadd.f32 %v5797_v19, %v5796_v15  ;;  %v5054_v30 = vadd.f32 %v5795_v33, %v5731_v0 }
 0x687   : > { %v5057_v61 = vadd.f32 %v5798_v5, %v5734_v31 }
 0x689   : > { %v5799_v35 = vpop.f32.mrb[56].mxu0 }
 0x68a   : > { %v5800_v42 = vpop.f32.mrb[57].mxu0 }
 0x68b   : > { %v5801_v2 = vadd.f32 %v5800_v42, %v5799_v35  ;;  %v5802_v14 = vpop.f32.mrb[58].mxu0 }
 0x68c   : > { %v5803_v40 = vpop.f32.mrb[59].mxu0 }
 0x68d   : > { %v5804_v32 = vadd.f32 %v5803_v40, %v5802_v14  ;;  %v5062_v45 = vadd.f32 %v5801_v2, %v5737_v51 }
 0x68f   : > { %v5065_v13 = vadd.f32 %v5804_v32, %v5740_v54 }
 0x691   : > { %v5805_v56 = vpop.f32.mrb[60].mxu0 }
 0x692   : > { %v5806_v9 = vpop.f32.mrb[61].mxu0 }
 0x693   : > { %v5807_v3 = vadd.f32 %v5806_v9, %v5805_v56  ;;  %v5808_v22 = vpop.f32.mrb[62].mxu0 }
 0x694   : > { %v5809_v47 = vpop.f32.mrb[63].mxu0 }
 0x695   : > { %v5810_v46 = vadd.f32 %v5809_v47, %v5808_v22  ;;  %v5070_v12 = vadd.f32 %v5807_v3, %v8168_v38 }
 0x697   : > { %v5073_v16 = vadd.f32 %v5810_v46, %v5746_v44 }
 0x699   : > { %v5811_v0 = vpop.f32.mrb[64].mxu0 }
 0x69a   : > { %v5812_v31 = vpop.f32.mrb[65].mxu0 }
 0x69b   : > { %v5813_v57 = vadd.f32 %v5812_v31, %v5811_v0  ;;  %v5814_v48 = vpop.f32.mrb[66].mxu0 }
 0x69c   : > { %v5815_v18 = vpop.f32.mrb[67].mxu0 }
 0x69d   : > { %v5816_v53 = vadd.f32 %v5815_v18, %v5814_v48  ;;  %v5078_v24 = vadd.f32 %v5813_v57, %v8170_v11 }
 0x69f   : > { %v5081_v51 = vadd.f32 %v5816_v53, %v8172_v50 }
 0x6a1   : > { %v6146_v54 = vpop.f32.mrb[68].mxu0 }
 0x6a2   : > { %v5127_v21 = vadd.f32 %v6146_v54, %v5030_v23  ;;  %v5118_v26 = vpop.f32.mrb[69].mxu0 }
 0x6a3   : > { %v5119_v62 = vadd.f32 %v5118_v26, %v5022_v58  ;;  %v6147_v55 = vpop.f32.mrb[70].mxu0 }
 0x6a4   : > { %v5130_v25 = vadd.f32 %v6147_v55, %v5033_v39  ;;  %v5121_v1 = vpop.f32.mrb[71].mxu0 }
 0x6a5   : > { %v5122_v38 = vadd.f32 %v5121_v1, %v8174_v59 }
 0x6a6   : > { %v5569_v44 = vpack.c.bf16 %v5130_v25, %v5127_v21 }
 0x6a7   : > { %v5564_v11 = vpack.c.bf16 %v5122_v38, %v5119_v62 }
 0x6a8   : > { %5601 = vst [vmem:[%s8183_s20 + $0x8] sm:$0xff] %v5569_v44  }
 0x6a9   : > { %5565 = vst [vmem:[%s8183_s20] sm:$0xff] %v5564_v11   ;;  %v6150_v50 = vpop.f32.mrb[72].mxu0 }
 0x6aa   : > { %v5143_v58 = vadd.f32 %v6150_v50, %v5046_v4  ;;  %v5134_v10 = vpop.f32.mrb[73].mxu0 }
 0x6ab   : > { %v5135_v23 = vadd.f32 %v5134_v10, %v5038_v41  ;;  %v6151_v39 = vpop.f32.mrb[74].mxu0 }
 0x6ac   : > { %v5146_v27 = vadd.f32 %v6151_v39, %v5049_v52  ;;  %v5137_v6 = vpop.f32.mrb[75].mxu0 }
 0x6ad   : > { %v5138_v28 = vadd.f32 %v5137_v6, %v5041_v20 }
 0x6ae   : > { %v5579_v37 = vpack.c.bf16 %v5146_v27, %v5143_v58 }
 0x6af   : > { %v5574_v36 = vpack.c.bf16 %v5138_v28, %v5135_v23 }
 0x6b0   : > { %5603 = vst [vmem:[%s8183_s20 + $0x18] sm:$0xff] %v5579_v37  }
 0x6b1   : > { %5602 = vst [vmem:[%s8183_s20 + $0x10] sm:$0xff] %v5574_v36   ;;  %v6154_v59 = vpop.f32.mrb[76].mxu0 }
 0x6b2   : > { %v5159_v8 = vadd.f32 %v6154_v59, %v5062_v45  ;;  %v5150_v60 = vpop.f32.mrb[77].mxu0 }
 0x6b3   : > { %v5151_v17 = vadd.f32 %v5150_v60, %v5054_v30  ;;  %v6155_v49 = vpop.f32.mrb[78].mxu0 }
 0x6b4   : > { %v5162_v29 = vadd.f32 %v6155_v49, %v5065_v13  ;;  %v5153_v63 = vpop.f32.mrb[79].mxu0 }
 0x6b5   : > { %v5154_v43 = vadd.f32 %v5153_v63, %v5057_v61 }
 0x6b6   : > { %v5589_v41 = vpack.c.bf16 %v5162_v29, %v5159_v8 }
 0x6b7   : > { %v5584_v4 = vpack.c.bf16 %v5154_v43, %v5151_v17 }
 0x6b8   : > { %5605 = vst [vmem:[%s8183_s20 + $0x28] sm:$0xff] %v5589_v41  }
 0x6b9   : > { %5604 = vst [vmem:[%s8183_s20 + $0x20] sm:$0xff] %v5584_v4   ;;  %v6158_v20 = vpop.f32.mrb[80].mxu0 }
 0x6ba   : > { %v5175_v52 = vadd.f32 %v6158_v20, %v5078_v24  ;;  %v5166_v34 = vpop.f32.mrb[81].mxu0 }
 0x6bb   : > { %v5167_v7 = vadd.f32 %v5166_v34, %v5070_v12  ;;  %v6159_v33 = vpop.f32.mrb[82].mxu0 }
 0x6bc   : > { %v5178_v15 = vadd.f32 %v6159_v33, %v5081_v51  ;;  %v5169_v19 = vpop.f32.mrb[83].mxu0 }
 0x6bd   : > { %v5170_v5 = vadd.f32 %v5169_v19, %v5073_v16 }
 0x6be   : > { %v5599_v35 = vpack.c.bf16 %v5178_v15, %v5175_v52 }
 0x6bf   : > { %v5594_v30 = vpack.c.bf16 %v5170_v5, %v5167_v7 }
 0x6c0   : > { %5607 = vst [vmem:[%s8183_s20 + $0x38] sm:$0xff] %v5599_v35  }
 0x6c1   : > { %5606 = vst [vmem:[%s8183_s20 + $0x30] sm:$0xff] %v5594_v30  }
 0x6c2 PF: > { %s16_s21 = sadd.s32 1, %s6645_s21  }
 0x6c3   : > { %p13_p4 = scmp.ge.s32.totalorder %s16_s21, 4  }
 0x6c5   :  { %15 = sbr.rel (!%p13_p4) target bundleno = 1 (0x1), region = 74 }

// kernel: net_forward.3
= control target key start
LH: loop header
LB: loop body
LE: loop exit
PB: predicated region body
PF: predicated region fallthrough
CT: control target
= control target key end

     0   :  { %s7966_s20 = smov 0   ;;  %s8636_s0 = inlined_call_operand.vmem [shape: bf16[2,16384], index: 0, kind: input, shape index: {}]   ;;  %s8637_s1 = inlined_call_operand.vmem [shape: bf16[16384,128], index: 1, kind: input, shape index: {}]   ;;  %s8638_s2 = inlined_call_operand.vmem [shape: f32[1,128], index: 2, kind: input, shape index: {}]   ;;  %s8639_s3 = inlined_call_operand.vmem [shape: f32[1,128], index: 3, kind: input, shape index: {}]   ;;  %s8640_s4 = inlined_call_operand.<no memory space> [shape: f32[1,1], index: 4, kind: input, shape index: {}]   ;;  %s8641_s5 = inlined_call_operand.vmem [shape: f32[2,1], index: 5, kind: output, shape index: {}]  }
   0x1   :  { %v10_v0 = vstv %s8640_s4 }
   0x2   :  { %11 = vst [vmem:[#allocation3] sm:$0x1] %v10_v0 }
   0x3 LB: > { %s7972_s21 = sadd.s32 4294967295, %s7929_s20   ;;  %p6166_p0 = scmp.ge.s32.totalorder %s7929_s20, 1  ;;  %s7929_s20 = sphi %s7966_s20, %s17_s20  }
   0x4   : > { %p195_p1 = scmp.lt.s32.totalorder %s7929_s20, 3 }
   0x6   : > { %p196_p2 = pnand %p6166_p0, %p195_p1 }
   0x7   : > { %s6167_s4 = sshll.u32 (!%p196_p2), %s7972_s21, 6  ;;  %s6168_s22 = sshll.u32 (!%p196_p2), %s7972_s21, 10 }
   0x8   : > { %199 = sbr.rel (%p196_p2) target bundleno = 919 (0x397), region = 40  ;;  %p223_p3 = scmp.lt.s32.totalorder (!%p196_p2), %s6167_s4, 127 }
   0x9   : > { %p228_p4 = scmp.lt.s32.totalorder (!%p196_p2), %s6168_s22, 2047  ;;  %p6170_p5 = scmp.ne.s32.totalorder (!%p196_p2), %s7972_s21, 0 }
   0xf   : > { %s8643_s4 = smov (!%p223_p3, %s6167_s4), 127  ;;  %s8645_s22 = smov (!%p228_p4, %s6168_s22), 2047 }
  0x10   : > { %s7981_s25 = scalar_lea.vmem %s8636_s0, %s8643_s4  ;;  %s6169_s26 = sshll.u32 %s8645_s22, 2  ;;  %v7931_v1 = vmov (!%p6170_p5), 0.0  }
  0x11   : > { %s7986_s29 = scalar_lea.vmem %s8637_s1, %s6169_s26  ;;  %237 = sbr.rel (%p6170_p5) target bundleno = 24 (0x18), region = 44  ;;  %238 = vst [vmem:[#allocation2] sm:$0x3] (!%p6170_p5), %v7931_v1 }
  0x18 PF: > { %v7403_v2 = vld [vmem:[%s7986_s29 + $0x40] sm:$0xff]   ;;  %v7407_v6 = vld [vmem:[%s7986_s29 + $0x48] sm:$0xff]   ;;  %v7411_v10 = vld [vmem:[%s7986_s29 + $0x50] sm:$0xff]   ;;  %v1284_v30 = vlaneseq  ;;  %v7932_v38 = vmov 1966171168   ;;  %p6683_p6 = scmp.ne.s32.totalorder %s7972_s21, 1 }
  0x19   : > { %v7404_v3 = vld [vmem:[%s7986_s29 + $0xc0] sm:$0xff]   ;;  %6689 = vmatprep.subr.bf16.mxu0 %v7403_v2  ;;  %v7408_v7 = vld [vmem:[%s7986_s29 + $0xc8] sm:$0xff]   ;;  %v7412_v11 = vld [vmem:[%s7986_s29 + $0xd0] sm:$0xff]   ;;  %v1282_v39 = vunpack.c.l.s4 %v7932_v38  ;;  %vm6112_vm0 = vcmask (!%p6683_p6), 1041408   ;;  %vm6124_vm1 = vcmask (!%p6683_p6), 1024  }
  0x1a   : > { %v7405_v4 = vld [vmem:[%s7986_s29] sm:$0xff]   ;;  %6711 = vmatprep.subr.bf16.mxu1 %v7404_v3  ;;  %v7409_v8 = vld [vmem:[%s7986_s29 + $0x8] sm:$0xff]   ;;  %v7413_v12 = vld [vmem:[%s7986_s29 + $0x10] sm:$0xff]   ;;  %v1285_v35 = vshrl.u32 %v1284_v30, 7 }
  0x1b   : > { %v7406_v5 = vld [vmem:[%s7986_s29 + $0x80] sm:$0xff]   ;;  %6690 = vmatpush3.bf16.msra.mxu0 %v7405_v4  ;;  %v7410_v9 = vld [vmem:[%s7986_s29 + $0x88] sm:$0xff]   ;;  %v7414_v13 = vld [vmem:[%s7986_s29 + $0x90] sm:$0xff]   ;;  %v1283_v42 = vunpack.c.0.s8 %v1282_v39 }
  0x1c   : > { %6712 = vmatpush3.bf16.msra.mxu1 %v7406_v5  ;;  %6691 = vmatprep.subr.bf16.mxu0 %v7407_v6  ;;  %v7415_v14 = vld [vmem:[%s7986_s29 + $0x58] sm:$0xff]   ;;  %v7419_v18 = vld [vmem:[%s7986_s29 + $0x60] sm:$0xff]   ;;  %v7423_v22 = vld [vmem:[%s7986_s29 + $0x68] sm:$0xff]  }
  0x1d   : > { %6713 = vmatprep.subr.bf16.mxu1 %v7408_v7  ;;  %v7416_v15 = vld [vmem:[%s7986_s29 + $0xd8] sm:$0xff]   ;;  %v7420_v19 = vld [vmem:[%s7986_s29 + $0xe0] sm:$0xff]   ;;  %v7424_v23 = vld [vmem:[%s7986_s29 + $0xe8] sm:$0xff]   ;;  %v8024_v43 = vsub.s32 %v1283_v42, %v1285_v35 }
  0x1e   : > { %v7417_v16 = vld [vmem:[%s7986_s29 + $0x18] sm:$0xff]   ;;  %v7421_v20 = vld [vmem:[%s7986_s29 + $0x20] sm:$0xff]   ;;  %v7425_v24 = vld [vmem:[%s7986_s29 + $0x28] sm:$0xff]  }
  0x1f   : > { %6692 = vmatpush3.bf16.msra.mxu0 %v7409_v8  ;;  %v7418_v17 = vld [vmem:[%s7986_s29 + $0x98] sm:$0xff]   ;;  %v7422_v21 = vld [vmem:[%s7986_s29 + $0xa0] sm:$0xff]   ;;  %v7426_v25 = vld [vmem:[%s7986_s29 + $0xa8] sm:$0xff]  }
  0x20   : > { %6714 = vmatpush3.bf16.msra.mxu1 %v7410_v9  ;;  %6693 = vmatprep.subr.bf16.mxu0 %v7411_v10  ;;  %v7427_v26 = vld [vmem:[%s7986_s29 + $0x70] sm:$0xff]   ;;  %v7431_v31 = vld [vmem:[%s7986_s29 + $0x78] sm:$0xff]   ;;  %v240_v36 = vld [vmem:[%s7981_s25] sm:$0xff] }
  0x21   : > { %6715 = vmatprep.subr.bf16.mxu1 %v7412_v11  ;;  %v7428_v27 = vld [vmem:[%s7986_s29 + $0xf0] sm:$0xff]   ;;  %v7432_v32 = vld [vmem:[%s7986_s29 + $0xf8] sm:$0xff]   ;;  %v7436_v37 = vld [vmem:[%s7986_s29 + $0x140] sm:$0xff]   ;;  %v1280_v41 = vcombine.high %v240_v36, %v240_v36  ;;  %v1287_v44 = vrot.slane %v240_v36, %v8024_v43 }
  0x22   : > { %v7429_v28 = vld [vmem:[%s7986_s29 + $0x30] sm:$0xff]   ;;  %v7433_v33 = vld [vmem:[%s7986_s29 + $0x38] sm:$0xff]   ;;  %v7437_v40 = vld [vmem:[%s7986_s29 + $0x1c0] sm:$0xff]  }
  0x23   : > { %6694 = vmatpush3.bf16.msra.mxu0 %v7413_v12  ;;  %v7430_v29 = vld [vmem:[%s7986_s29 + $0xb0] sm:$0xff]   ;;  %v7434_v34 = vld [vmem:[%s7986_s29 + $0xb8] sm:$0xff]   ;;  %v8028_v45 = vrot.slane %v1280_v41, %v8024_v43  ;;  %v1295_v46 = vcombine.high %v1287_v44, %v1287_v44  ;;  %v1303_v47 = vrot.slane %v1287_v44, %v8024_v43  ;;  %v7438_v49 = vld [vmem:[%s7986_s29 + $0x100] sm:$0xff]  }
  0x24   : > { %6716 = vmatpush3.bf16.msra.mxu1 %v7414_v13  ;;  %6695 = vmatprep.subr.bf16.mxu0 %v7415_v14  ;;  %v7439_v51 = vld [vmem:[%s7986_s29 + $0x180] sm:$0xff]   ;;  %v7440_v54 = vld [vmem:[%s7986_s29 + $0x148] sm:$0xff]   ;;  %v7444_v60 = vld [vmem:[%s7986_s29 + $0x150] sm:$0xff]  }
  0x25   : > { %6717 = vmatprep.subr.bf16.mxu1 %v7416_v15  ;;  %v1296_v48 = vcombine.high %v8028_v45, %v8028_v45  ;;  %v1317_v50 = vrot.slane %v1295_v46, %v8024_v43  ;;  %v1325_v53 = vcombine.high %v1303_v47, %v1303_v47  ;;  %v7441_v56 = vld [vmem:[%s7986_s29 + $0x1c8] sm:$0xff]   ;;  %v7445_v61 = vld [vmem:[%s7986_s29 + $0x1d0] sm:$0xff]   ;;  %v7448_v0 = vld [vmem:[%s7986_s29 + $0x158] sm:$0xff]  }
  0x26   : > { %v7442_v57 = vld [vmem:[%s7986_s29 + $0x108] sm:$0xff]   ;;  %v7446_v62 = vld [vmem:[%s7986_s29 + $0x110] sm:$0xff]   ;;  %v7449_v1 = vld [vmem:[%s7986_s29 + $0x1d8] sm:$0xff]  }
  0x27   : > { %6696 = vmatpush3.bf16.msra.mxu0 %v7417_v16  ;;  %v1324_v52 = vrot.slane %v1296_v48, %v8024_v43  ;;  %4840 = vmatprep.mubr.bf16.mxu0 %v1317_v50  ;;  %v1327_v55 = vcombine.high %v1317_v50, %v1317_v50  ;;  %v7443_v59 = vld [vmem:[%s7986_s29 + $0x188] sm:$0xff]   ;;  %v7447_v63 = vld [vmem:[%s7986_s29 + $0x190] sm:$0xff]   ;;  %v7450_v2 = vld [vmem:[%s7986_s29 + $0x118] sm:$0xff]  }
  0x28   : > { %6718 = vmatpush3.bf16.msra.mxu1 %v7418_v17  ;;  %6697 = vmatprep.subr.bf16.mxu0 %v7419_v18  ;;  %v7451_v3 = vld [vmem:[%s7986_s29 + $0x198] sm:$0xff]   ;;  %v7452_v4 = vld [vmem:[%s7986_s29 + $0x160] sm:$0xff]   ;;  %v7456_v8 = vld [vmem:[%s7986_s29 + $0x168] sm:$0xff]  }
  0x29   : > { %6719 = vmatprep.subr.bf16.mxu1 %v7420_v19  ;;  %v1328_v58 = vcombine.high %v1324_v52, %v1324_v52  ;;  %4880 = vmatprep.mubr.bf16.mxu1 %v1327_v55  ;;  %v7453_v5 = vld [vmem:[%s7986_s29 + $0x1e0] sm:$0xff]   ;;  %v7457_v9 = vld [vmem:[%s7986_s29 + $0x1e8] sm:$0xff]   ;;  %v7460_v12 = vld [vmem:[%s7986_s29 + $0x170] sm:$0xff]  }
  0x2a   : > { %v7454_v6 = vld [vmem:[%s7986_s29 + $0x120] sm:$0xff]   ;;  %v7458_v10 = vld [vmem:[%s7986_s29 + $0x128] sm:$0xff]   ;;  %v7461_v13 = vld [vmem:[%s7986_s29 + $0x1f0] sm:$0xff]  }
  0x2b   : > { %6698 = vmatpush3.bf16.msra.mxu0 %v7421_v20  ;;  %v7455_v7 = vld [vmem:[%s7986_s29 + $0x1a0] sm:$0xff]   ;;  %v7459_v11 = vld [vmem:[%s7986_s29 + $0x1a8] sm:$0xff]   ;;  %v7462_v14 = vld [vmem:[%s7986_s29 + $0x130] sm:$0xff]   ;;  %v1310_v20 = vrot.slane %v8028_v45, %v8024_v43 }
  0x2c   : > { %6720 = vmatpush3.bf16.msra.mxu1 %v7422_v21  ;;  %6699 = vmatprep.subr.bf16.mxu0 %v7423_v22  ;;  %v7463_v15 = vld [vmem:[%s7986_s29 + $0x1b0] sm:$0xff]   ;;  %v7464_v16 = vld [vmem:[%s7986_s29 + $0x178] sm:$0xff]   ;;  %v7468_v21 = vld [vmem:[%s7986_s29 + $0x240] sm:$0xff]  }
  0x2d   : > { %6721 = vmatprep.subr.bf16.mxu1 %v7424_v23  ;;  %v7465_v17 = vld [vmem:[%s7986_s29 + $0x1f8] sm:$0xff]   ;;  %v7469_v22 = vld [vmem:[%s7986_s29 + $0x2c0] sm:$0xff]   ;;  %v7476_v30 = vld [vmem:[%s7986_s29 + $0x250] sm:$0xff]  }
  0x2e   : > { %v7466_v18 = vld [vmem:[%s7986_s29 + $0x138] sm:$0xff]   ;;  %v7470_v23 = vld [vmem:[%s7986_s29 + $0x200] sm:$0xff]   ;;  %v7488_v42 = vld [vmem:[%s7986_s29 + $0x268] sm:$0xff]  }
  0x2f   : > { %6700 = vmatpush3.bf16.msra.mxu0 %v7425_v24  ;;  %v7467_v19 = vld [vmem:[%s7986_s29 + $0x1b8] sm:$0xff]   ;;  %v7471_v24 = vld [vmem:[%s7986_s29 + $0x280] sm:$0xff]   ;;  %v7489_v44 = vld [vmem:[%s7986_s29 + $0x2e8] sm:$0xff]  }
  0x30   : > { %6722 = vmatpush3.bf16.msra.mxu1 %v7426_v25  ;;  %6701 = vmatprep.subr.bf16.mxu0 %v7427_v26  ;;  %v1326_v25 = vcombine.high %v1310_v20, %v1310_v20  ;;  %v7472_v26 = vld [vmem:[%s7986_s29 + $0x248] sm:$0xff]   ;;  %v7481_v35 = vld [vmem:[%s7986_s29 + $0x2d8] sm:$0xff]   ;;  %v7484_v38 = vld [vmem:[%s7986_s29 + $0x260] sm:$0xff]  }
  0x31   : > { %6723 = vmatprep.subr.bf16.mxu1 %v7428_v27  ;;  %v7473_v27 = vld [vmem:[%s7986_s29 + $0x2c8] sm:$0xff]   ;;  %v7482_v36 = vld [vmem:[%s7986_s29 + $0x218] sm:$0xff]   ;;  %v7485_v39 = vld [vmem:[%s7986_s29 + $0x2e0] sm:$0xff]  }
  0x32   : > { %v7487_v41 = vld [vmem:[%s7986_s29 + $0x2a0] sm:$0xff]   ;;  %v7490_v45 = vld [vmem:[%s7986_s29 + $0x228] sm:$0xff]  }
  0x33   : > { %6702 = vmatpush3.bf16.msra.mxu0 %v7429_v28  ;;  %v7474_v28 = vld [vmem:[%s7986_s29 + $0x208] sm:$0xff]  }
  0x34   : > { %6724 = vmatpush3.bf16.msra.mxu1 %v7430_v29  ;;  %6703 = vmatprep.subr.bf16.mxu0 %v7431_v31  ;;  %v7475_v29 = vld [vmem:[%s7986_s29 + $0x288] sm:$0xff]   ;;  %v7477_v31 = vld [vmem:[%s7986_s29 + $0x2d0] sm:$0xff]  }
  0x35   : > { %6725 = vmatprep.subr.bf16.mxu1 %v7432_v32  ;;  %v7478_v32 = vld [vmem:[%s7986_s29 + $0x210] sm:$0xff]   ;;  %v7491_v46 = vld [vmem:[%s7986_s29 + $0x2a8] sm:$0xff]  }
  0x36   : > { %v241_v48 = vld [vmem:[%s7981_s25 + $0x8] sm:$0xff] }
  0x37   : > { %6704 = vmatpush3.bf16.msra.mxu0 %v7433_v33  ;;  %v7479_v33 = vld [vmem:[%s7986_s29 + $0x290] sm:$0xff]   ;;  %v1336_v50 = vrot.slane %v241_v48, %v8024_v43 }
  0x38   : > { %6726 = vmatpush3.bf16.msra.mxu1 %v7434_v34  ;;  %6733 = vmatprep.subr.bf16.mxu0 %v7436_v37  ;;  %v7480_v34 = vld [vmem:[%s7986_s29 + $0x258] sm:$0xff]  }
  0x39   : > { %6755 = vmatprep.subr.bf16.mxu1 %v7437_v40  ;;  %v7483_v37 = vld [vmem:[%s7986_s29 + $0x298] sm:$0xff]   ;;  %v7486_v40 = vld [vmem:[%s7986_s29 + $0x220] sm:$0xff]  }
  0x3a   : > { %4841 = vmatmul.mubr.bf16.vlgmr.msra.gmra.mrb[0].mxu0 %v1303_v47  ;;  %v7492_v47 = vld [vmem:[%s7986_s29 + $0x270] sm:$0xff]  }
  0x3b   : > { %6734 = vmatpush3.bf16.msra.mxu0 %v7438_v49  ;;  %4881 = vmatmul.mubr.bf16.vlgmr.msra.gmra.mrb[0].mxu1 %v1325_v53  ;;  %v7493_v49 = vld [vmem:[%s7986_s29 + $0x2f0] sm:$0xff]  }
  0x3c   : > { %6735 = vmatprep.subr.bf16.mxu0 %v7440_v54  ;;  %6756 = vmatpush3.bf16.msra.mxu1 %v7439_v51  ;;  %v1329_v51 = vcombine.high %v241_v48, %v241_v48  ;;  %v7495_v53 = vld [vmem:[%s7986_s29 + $0x2b0] sm:$0xff]   ;;  %v1344_v54 = vcombine.high %v1336_v50, %v1336_v50 }
  0x3d   : > { %4920 = vmatprep.mubr.bf16.mxu0 %v1324_v52  ;;  %6757 = vmatprep.subr.bf16.mxu1 %v7441_v56  ;;  %v7494_v52 = vld [vmem:[%s7986_s29 + $0x230] sm:$0xff]   ;;  %v7496_v56 = vld [vmem:[%s7986_s29 + $0x278] sm:$0xff]  }
  0x3e   : > { %4960 = vmatprep.mubr.bf16.mxu1 %v1328_v58  ;;  %v8098_v55 = vrot.slane %v1329_v51, %v8024_v43  ;;  %v1366_v58 = vrot.slane %v1344_v54, %v8024_v43  ;;  %v7543_v48 = vld [vmem:[%s7986_s29 + $0x410] sm:$0xff]   ;;  %v7546_v51 = vld [vmem:[%s7986_s29 + $0x4d8] sm:$0xff]   ;;  %v7549_v54 = vld [vmem:[%s7986_s29 + $0x460] sm:$0xff]  }
  0x3f   : > { %6736 = vmatpush3.bf16.msra.mxu0 %v7442_v57  ;;  %v7497_v57 = vld [vmem:[%s7986_s29 + $0x2f8] sm:$0xff]  }
  0x40   : > { %6737 = vmatprep.subr.bf16.mxu0 %v7444_v60  ;;  %6758 = vmatpush3.bf16.msra.mxu1 %v7443_v59  ;;  %v1345_v59 = vcombine.high %v8098_v55, %v8098_v55  ;;  %v7498_v60 = vld [vmem:[%s7986_s29 + $0x238] sm:$0xff]  }
  0x41   : > { %6759 = vmatprep.subr.bf16.mxu1 %v7445_v61  ;;  %v7499_v61 = vld [vmem:[%s7986_s29 + $0x2b8] sm:$0xff]  }
  0x43   : > { %6738 = vmatpush3.bf16.msra.mxu0 %v7446_v62  ;;  %v1376_v62 = vcombine.high %v1366_v58, %v1366_v58 }
  0x44   : > { %6739 = vmatprep.subr.bf16.mxu0 %v7448_v0  ;;  %6760 = vmatpush3.bf16.msra.mxu1 %v7447_v63  ;;  %v1352_v63 = vrot.slane %v1336_v50, %v8024_v43  ;;  %v7500_v0 = vld [vmem:[%s7986_s29 + $0x340] sm:$0xff]   ;;  %v7545_v50 = vld [vmem:[%s7986_s29 + $0x458] sm:$0xff]  }
  0x45   : > { %6761 = vmatprep.subr.bf16.mxu1 %v7449_v1  ;;  %v7501_v1 = vld [vmem:[%s7986_s29 + $0x3c0] sm:$0xff]  }
  0x47   : > { %6740 = vmatpush3.bf16.msra.mxu0 %v7450_v2  ;;  %v1373_v2 = vrot.slane %v1345_v59, %v8024_v43  ;;  %v7554_v59 = vld [vmem:[%s7986_s29 + $0x4e8] sm:$0xff]  }
  0x48   : > { %6741 = vmatprep.subr.bf16.mxu0 %v7452_v4  ;;  %6762 = vmatpush3.bf16.msra.mxu1 %v7451_v3  ;;  %v7502_v3 = vld [vmem:[%s7986_s29 + $0x300] sm:$0xff]  }
  0x49   : > { %6763 = vmatprep.subr.bf16.mxu1 %v7453_v5  ;;  %v7503_v4 = vld [vmem:[%s7986_s29 + $0x380] sm:$0xff]   ;;  %v1374_v5 = vcombine.high %v1352_v63, %v1352_v63 }
  0x4b   : > { %6742 = vmatpush3.bf16.msra.mxu0 %v7454_v6  ;;  %v7504_v6 = vld [vmem:[%s7986_s29 + $0x348] sm:$0xff]  }
  0x4c   : > { %6743 = vmatprep.subr.bf16.mxu0 %v7456_v8  ;;  %6764 = vmatpush3.bf16.msra.mxu1 %v7455_v7  ;;  %v7505_v7 = vld [vmem:[%s7986_s29 + $0x3c8] sm:$0xff]   ;;  %v1377_v8 = vcombine.high %v1373_v2, %v1373_v2 }
  0x4d   : > { %6765 = vmatprep.subr.bf16.mxu1 %v7457_v9  ;;  %v7506_v9 = vld [vmem:[%s7986_s29 + $0x308] sm:$0xff]  }
  0x4f   : > { %6744 = vmatpush3.bf16.msra.mxu0 %v7458_v10  ;;  %v7507_v10 = vld [vmem:[%s7986_s29 + $0x388] sm:$0xff]  }
  0x50   : > { %6745 = vmatprep.subr.bf16.mxu0 %v7460_v12  ;;  %6766 = vmatpush3.bf16.msra.mxu1 %v7459_v11  ;;  %v7508_v11 = vld [vmem:[%s7986_s29 + $0x350] sm:$0xff]  }
  0x51   : > { %6767 = vmatprep.subr.bf16.mxu1 %v7461_v13  ;;  %v7509_v12 = vld [vmem:[%s7986_s29 + $0x3d0] sm:$0xff]  }
  0x52   : > { %v7510_v13 = vld [vmem:[%s7986_s29 + $0x310] sm:$0xff]  }
  0x53   : > { %6746 = vmatpush3.bf16.msra.mxu0 %v7462_v14  ;;  %v7511_v14 = vld [vmem:[%s7986_s29 + $0x390] sm:$0xff]  }
  0x54   : > { %6747 = vmatprep.subr.bf16.mxu0 %v7464_v16  ;;  %6768 = vmatpush3.bf16.msra.mxu1 %v7463_v15  ;;  %v7512_v15 = vld [vmem:[%s7986_s29 + $0x358] sm:$0xff]  }
  0x55   : > { %6769 = vmatprep.subr.bf16.mxu1 %v7465_v17  ;;  %v7513_v16 = vld [vmem:[%s7986_s29 + $0x3d8] sm:$0xff]  }
  0x56   : > { %v7514_v17 = vld [vmem:[%s7986_s29 + $0x318] sm:$0xff]  }
  0x57   : > { %6748 = vmatpush3.bf16.msra.mxu0 %v7466_v18  ;;  %v7515_v18 = vld [vmem:[%s7986_s29 + $0x398] sm:$0xff]  }
  0x58   : > { %6777 = vmatprep.subr.bf16.mxu0 %v7468_v21  ;;  %6770 = vmatpush3.bf16.msra.mxu1 %v7467_v19  ;;  %v7516_v19 = vld [vmem:[%s7986_s29 + $0x360] sm:$0xff]  }
  0x59   : > { %6799 = vmatprep.subr.bf16.mxu1 %v7469_v22  ;;  %v7518_v21 = vld [vmem:[%s7986_s29 + $0x320] sm:$0xff]  }
  0x5a   : > { %4921 = vmatmul.mubr.bf16.vlgmr.msra.gmra.mrb[4].mxu0 %v1310_v20  ;;  %v7517_v20 = vld [vmem:[%s7986_s29 + $0x3e0] sm:$0xff]  }
  0x5b   : > { %6778 = vmatpush3.bf16.msra.mxu0 %v7470_v23  ;;  %4961 = vmatmul.mubr.bf16.vlgmr.msra.gmra.mrb[4].mxu1 %v1326_v25  ;;  %v7519_v22 = vld [vmem:[%s7986_s29 + $0x3a0] sm:$0xff]   ;;  %v7520_v23 = vld [vmem:[%s7986_s29 + $0x368] sm:$0xff]  }
  0x5c   : > { %6779 = vmatprep.subr.bf16.mxu0 %v7472_v26  ;;  %6800 = vmatpush3.bf16.msra.mxu1 %v7471_v24  ;;  %v7521_v24 = vld [vmem:[%s7986_s29 + $0x3e8] sm:$0xff]  }
  0x5d   : > { %6801 = vmatprep.subr.bf16.mxu1 %v7473_v27  ;;  %5000 = vmatprep.mubr.bf16.mxu0 %v1366_v58  ;;  %v7522_v25 = vld [vmem:[%s7986_s29 + $0x328] sm:$0xff]   ;;  %v7524_v27 = vld [vmem:[%s7986_s29 + $0x370] sm:$0xff]  }
  0x5e   : > { %5040 = vmatprep.mubr.bf16.mxu1 %v1376_v62  ;;  %v7523_v26 = vld [vmem:[%s7986_s29 + $0x3a8] sm:$0xff]   ;;  %v7557_v62 = vld [vmem:[%s7986_s29 + $0x470] sm:$0xff]  }
  0x5f   : > { %6780 = vmatpush3.bf16.msra.mxu0 %v7474_v28  ;;  %v7525_v28 = vld [vmem:[%s7986_s29 + $0x3f0] sm:$0xff]   ;;  %v7553_v58 = vld [vmem:[%s7986_s29 + $0x468] sm:$0xff]  }
  0x60   : > { %6781 = vmatprep.subr.bf16.mxu0 %v7476_v30  ;;  %6802 = vmatpush3.bf16.msra.mxu1 %v7475_v29  ;;  %v7526_v29 = vld [vmem:[%s7986_s29 + $0x330] sm:$0xff]  }
  0x61   : > { %6803 = vmatprep.subr.bf16.mxu1 %v7477_v31  ;;  %v7527_v30 = vld [vmem:[%s7986_s29 + $0x3b0] sm:$0xff]   ;;  %v7528_v31 = vld [vmem:[%s7986_s29 + $0x378] sm:$0xff]  }
  0x63   : > { %6782 = vmatpush3.bf16.msra.mxu0 %v7478_v32  ;;  %v7529_v32 = vld [vmem:[%s7986_s29 + $0x3f8] sm:$0xff]  }
  0x64   : > { %6783 = vmatprep.subr.bf16.mxu0 %v7480_v34  ;;  %6804 = vmatpush3.bf16.msra.mxu1 %v7479_v33  ;;  %v7530_v33 = vld [vmem:[%s7986_s29 + $0x338] sm:$0xff]  }
  0x65   : > { %6805 = vmatprep.subr.bf16.mxu1 %v7481_v35  ;;  %v7531_v34 = vld [vmem:[%s7986_s29 + $0x3b8] sm:$0xff]   ;;  %v1359_v35 = vrot.slane %v8098_v55, %v8024_v43  ;;  %v7550_v55 = vld [vmem:[%s7986_s29 + $0x4e0] sm:$0xff]  }
  0x67   : > { %6784 = vmatpush3.bf16.msra.mxu0 %v7482_v36  ;;  %v7533_v36 = vld [vmem:[%s7986_s29 + $0x440] sm:$0xff]  }
  0x68   : > { %6785 = vmatprep.subr.bf16.mxu0 %v7484_v38  ;;  %6806 = vmatpush3.bf16.msra.mxu1 %v7483_v37  ;;  %v7534_v37 = vld [vmem:[%s7986_s29 + $0x4c0] sm:$0xff]  }
  0x69   : > { %6807 = vmatprep.subr.bf16.mxu1 %v7485_v39  ;;  %v7535_v38 = vld [vmem:[%s7986_s29 + $0x400] sm:$0xff]  }
  0x6a   : > { %v7536_v39 = vld [vmem:[%s7986_s29 + $0x480] sm:$0xff]  }
  0x6b   : > { %6786 = vmatpush3.bf16.msra.mxu0 %v7486_v40  ;;  %v1375_v40 = vcombine.high %v1359_v35, %v1359_v35 }
  0x6c   : > { %6787 = vmatprep.subr.bf16.mxu0 %v7488_v42  ;;  %6808 = vmatpush3.bf16.msra.mxu1 %v7487_v41  ;;  %v7537_v41 = vld [vmem:[%s7986_s29 + $0x448] sm:$0xff]  }
  0x6d   : > { %6809 = vmatprep.subr.bf16.mxu1 %v7489_v44  ;;  %v7538_v42 = vld [vmem:[%s7986_s29 + $0x4c8] sm:$0xff]  }
  0x6e   : > { %v7539_v44 = vld [vmem:[%s7986_s29 + $0x408] sm:$0xff]  }
  0x6f   : > { %6788 = vmatpush3.bf16.msra.mxu0 %v7490_v45  ;;  %v7540_v45 = vld [vmem:[%s7986_s29 + $0x488] sm:$0xff]  }
  0x70   : > { %6789 = vmatprep.subr.bf16.mxu0 %v7492_v47  ;;  %6810 = vmatpush3.bf16.msra.mxu1 %v7491_v46  ;;  %v7541_v46 = vld [vmem:[%s7986_s29 + $0x450] sm:$0xff]  }
  0x71   : > { %6811 = vmatprep.subr.bf16.mxu1 %v7493_v49  ;;  %v7542_v47 = vld [vmem:[%s7986_s29 + $0x4d0] sm:$0xff]  }
  0x72   : > { %v7544_v49 = vld [vmem:[%s7986_s29 + $0x490] sm:$0xff]  }
  0x73   : > { %6790 = vmatpush3.bf16.msra.mxu0 %v7494_v52  ;;  %v7547_v52 = vld [vmem:[%s7986_s29 + $0x418] sm:$0xff]  }
  0x74   : > { %6791 = vmatprep.subr.bf16.mxu0 %v7496_v56  ;;  %6812 = vmatpush3.bf16.msra.mxu1 %v7495_v53  ;;  %v7548_v53 = vld [vmem:[%s7986_s29 + $0x498] sm:$0xff]   ;;  %v7551_v56 = vld [vmem:[%s7986_s29 + $0x420] sm:$0xff]  }
  0x75   : > { %6813 = vmatprep.subr.bf16.mxu1 %v7497_v57  ;;  %v7552_v57 = vld [vmem:[%s7986_s29 + $0x4a0] sm:$0xff]  }
  0x77   : > { %6792 = vmatpush3.bf16.msra.mxu0 %v7498_v60  ;;  %v7555_v60 = vld [vmem:[%s7986_s29 + $0x428] sm:$0xff]  }
  0x78   : > { %6821 = vmatprep.subr.bf16.mxu0 %v7500_v0  ;;  %6814 = vmatpush3.bf16.msra.mxu1 %v7499_v61  ;;  %v7556_v61 = vld [vmem:[%s7986_s29 + $0x4a8] sm:$0xff]   ;;  %v7558_v0 = vld [vmem:[%s7986_s29 + $0x4f0] sm:$0xff]  }
  0x79   : > { %6843 = vmatprep.subr.bf16.mxu1 %v7501_v1 }
  0x7a   : > { %5001 = vmatmul.mubr.bf16.vlgmr.msra.gmra.mrb[8].mxu0 %v1352_v63  ;;  %v242_v63 = vld [vmem:[%s7981_s25 + $0x10] sm:$0xff] }
  0x7b   : > { %6822 = vmatpush3.bf16.msra.mxu0 %v7502_v3  ;;  %5080 = vmatprep.mubr.bf16.mxu0 %v1373_v2  ;;  %v1385_v1 = vrot.slane %v242_v63, %v8024_v43  ;;  %v1378_v2 = vcombine.high %v242_v63, %v242_v63  ;;  %v7559_v3 = vld [vmem:[%s7986_s29 + $0x430] sm:$0xff]  }
  0x7c   : > { %5041 = vmatmul.mubr.bf16.vlgmr.msra.gmra.mrb[8].mxu1 %v1374_v5  ;;  %6823 = vmatprep.subr.bf16.mxu0 %v7504_v6  ;;  %v7608_v63 = vld [vmem:[%s7986_s29 + $0x610] sm:$0xff]  }
  0x7d   : > { %6844 = vmatpush3.bf16.msra.mxu1 %v7503_v4  ;;  %5120 = vmatprep.mubr.bf16.mxu1 %v1377_v8  ;;  %v7560_v4 = vld [vmem:[%s7986_s29 + $0x4b0] sm:$0xff]   ;;  %v1393_v5 = vcombine.high %v1385_v1, %v1385_v1  ;;  %v8174_v6 = vrot.slane %v1378_v2, %v8024_v43  ;;  %v7562_v8 = vld [vmem:[%s7986_s29 + $0x4f8] sm:$0xff]  }
  0x7e   : > { %6845 = vmatprep.subr.bf16.mxu1 %v7505_v7  ;;  %v7561_v7 = vld [vmem:[%s7986_s29 + $0x478] sm:$0xff]  }
  0x7f   : > { %6824 = vmatpush3.bf16.msra.mxu0 %v7506_v9  ;;  %v1415_v9 = vrot.slane %v1393_v5, %v8024_v43  ;;  %v7611_v2 = vld [vmem:[%s7986_s29 + $0x6d8] sm:$0xff]   ;;  %v7614_v5 = vld [vmem:[%s7986_s29 + $0x660] sm:$0xff]  }
  0x80   : > { %6825 = vmatprep.subr.bf16.mxu0 %v7508_v11  ;;  %v7563_v11 = vld [vmem:[%s7986_s29 + $0x438] sm:$0xff]  }
  0x81   : > { %6846 = vmatpush3.bf16.msra.mxu1 %v7507_v10  ;;  %v1394_v10 = vcombine.high %v8174_v6, %v8174_v6 }
  0x82   : > { %6847 = vmatprep.subr.bf16.mxu1 %v7509_v12  ;;  %v7564_v12 = vld [vmem:[%s7986_s29 + $0x4b8] sm:$0xff]  }
  0x83   : > { %6826 = vmatpush3.bf16.msra.mxu0 %v7510_v13  ;;  %v1425_v13 = vcombine.high %v1415_v9, %v1415_v9 }
  0x84   : > { %6827 = vmatprep.subr.bf16.mxu0 %v7512_v15  ;;  %v7565_v15 = vld [vmem:[%s7986_s29 + $0x540] sm:$0xff]  }
  0x85   : > { %6848 = vmatpush3.bf16.msra.mxu1 %v7511_v14  ;;  %v1401_v14 = vrot.slane %v1385_v1, %v8024_v43  ;;  %v7610_v1 = vld [vmem:[%s7986_s29 + $0x658] sm:$0xff]  }
  0x86   : > { %6849 = vmatprep.subr.bf16.mxu1 %v7513_v16  ;;  %v7566_v16 = vld [vmem:[%s7986_s29 + $0x5c0] sm:$0xff]  }
  0x87   : > { %6828 = vmatpush3.bf16.msra.mxu0 %v7514_v17  ;;  %v1422_v17 = vrot.slane %v1394_v10, %v8024_v43  ;;  %v7619_v10 = vld [vmem:[%s7986_s29 + $0x6e8] sm:$0xff]  }
  0x88   : > { %6829 = vmatprep.subr.bf16.mxu0 %v7516_v19  ;;  %v7568_v19 = vld [vmem:[%s7986_s29 + $0x580] sm:$0xff]  }
  0x89   : > { %6850 = vmatpush3.bf16.msra.mxu1 %v7515_v18  ;;  %v7567_v18 = vld [vmem:[%s7986_s29 + $0x500] sm:$0xff]  }
  0x8a   : > { %6851 = vmatprep.subr.bf16.mxu1 %v7517_v20  ;;  %v1423_v20 = vcombine.high %v1401_v14, %v1401_v14 }
  0x8b   : > { %6830 = vmatpush3.bf16.msra.mxu0 %v7518_v21  ;;  %v7569_v21 = vld [vmem:[%s7986_s29 + $0x548] sm:$0xff]  }
  0x8c   : > { %6831 = vmatprep.subr.bf16.mxu0 %v7520_v23  ;;  %v1426_v23 = vcombine.high %v1422_v17, %v1422_v17 }
  0x8d   : > { %6852 = vmatpush3.bf16.msra.mxu1 %v7519_v22  ;;  %v7570_v22 = vld [vmem:[%s7986_s29 + $0x5c8] sm:$0xff]  }
  0x8e   : > { %6853 = vmatprep.subr.bf16.mxu1 %v7521_v24  ;;  %v7571_v24 = vld [vmem:[%s7986_s29 + $0x508] sm:$0xff]  }
  0x8f   : > { %6832 = vmatpush3.bf16.msra.mxu0 %v7522_v25  ;;  %v7572_v25 = vld [vmem:[%s7986_s29 + $0x588] sm:$0xff]  }
  0x90   : > { %6833 = vmatprep.subr.bf16.mxu0 %v7524_v27  ;;  %v7574_v27 = vld [vmem:[%s7986_s29 + $0x5d0] sm:$0xff]  }
  0x91   : > { %6854 = vmatpush3.bf16.msra.mxu1 %v7523_v26  ;;  %v7573_v26 = vld [vmem:[%s7986_s29 + $0x550] sm:$0xff]  }
  0x92   : > { %6855 = vmatprep.subr.bf16.mxu1 %v7525_v28  ;;  %v7575_v28 = vld [vmem:[%s7986_s29 + $0x510] sm:$0xff]  }
  0x93   : > { %6834 = vmatpush3.bf16.msra.mxu0 %v7526_v29  ;;  %v7576_v29 = vld [vmem:[%s7986_s29 + $0x590] sm:$0xff]  }
  0x94   : > { %6835 = vmatprep.subr.bf16.mxu0 %v7528_v31  ;;  %v7578_v31 = vld [vmem:[%s7986_s29 + $0x5d8] sm:$0xff]  }
  0x95   : > { %6856 = vmatpush3.bf16.msra.mxu1 %v7527_v30  ;;  %v7577_v30 = vld [vmem:[%s7986_s29 + $0x558] sm:$0xff]  }
  0x96   : > { %6857 = vmatprep.subr.bf16.mxu1 %v7529_v32  ;;  %v7579_v32 = vld [vmem:[%s7986_s29 + $0x518] sm:$0xff]  }
  0x97   : > { %6836 = vmatpush3.bf16.msra.mxu0 %v7530_v33  ;;  %v7580_v33 = vld [vmem:[%s7986_s29 + $0x598] sm:$0xff]  }
  0x98   : > { %6865 = vmatprep.subr.bf16.mxu0 %v7533_v36  ;;  %v7583_v36 = vld [vmem:[%s7986_s29 + $0x520] sm:$0xff]  }
  0x99   : > { %6858 = vmatpush3.bf16.msra.mxu1 %v7531_v34  ;;  %v7581_v34 = vld [vmem:[%s7986_s29 + $0x560] sm:$0xff]  }
  0x9a   : > { %5081 = vmatmul.mubr.bf16.vlgmr.msra.gmra.mrb[12].mxu0 %v1359_v35  ;;  %6887 = vmatprep.subr.bf16.mxu1 %v7534_v37  ;;  %v7582_v35 = vld [vmem:[%s7986_s29 + $0x5e0] sm:$0xff]  }
  0x9b   : > { %6866 = vmatpush3.bf16.msra.mxu0 %v7535_v38  ;;  %5160 = vmatprep.mubr.bf16.mxu0 %v1415_v9  ;;  %v7584_v37 = vld [vmem:[%s7986_s29 + $0x5a0] sm:$0xff]   ;;  %v7585_v38 = vld [vmem:[%s7986_s29 + $0x568] sm:$0xff]  }
  0x9c   : > { %5121 = vmatmul.mubr.bf16.vlgmr.msra.gmra.mrb[12].mxu1 %v1375_v40  ;;  %6867 = vmatprep.subr.bf16.mxu0 %v7537_v41  ;;  %v7587_v40 = vld [vmem:[%s7986_s29 + $0x528] sm:$0xff]  }
  0x9d   : > { %6888 = vmatpush3.bf16.msra.mxu1 %v7536_v39  ;;  %5200 = vmatprep.mubr.bf16.mxu1 %v1425_v13  ;;  %v7586_v39 = vld [vmem:[%s7986_s29 + $0x5e8] sm:$0xff]   ;;  %v7622_v13 = vld [vmem:[%s7986_s29 + $0x670] sm:$0xff]  }
  0x9e   : > { %6889 = vmatprep.subr.bf16.mxu1 %v7538_v42  ;;  %v7588_v41 = vld [vmem:[%s7986_s29 + $0x5a8] sm:$0xff]   ;;  %v7589_v42 = vld [vmem:[%s7986_s29 + $0x570] sm:$0xff]  }
  0x9f   : > { %6868 = vmatpush3.bf16.msra.mxu0 %v7539_v44  ;;  %v7590_v44 = vld [vmem:[%s7986_s29 + $0x5f0] sm:$0xff]   ;;  %v7618_v9 = vld [vmem:[%s7986_s29 + $0x668] sm:$0xff]  }
  0xa0   : > { %6869 = vmatprep.subr.bf16.mxu0 %v7541_v46  ;;  %v7592_v46 = vld [vmem:[%s7986_s29 + $0x5b0] sm:$0xff]  }
  0xa1   : > { %6890 = vmatpush3.bf16.msra.mxu1 %v7540_v45  ;;  %v7591_v45 = vld [vmem:[%s7986_s29 + $0x530] sm:$0xff]  }
  0xa2   : > { %6891 = vmatprep.subr.bf16.mxu1 %v7542_v47  ;;  %v7593_v47 = vld [vmem:[%s7986_s29 + $0x578] sm:$0xff]  }
  0xa3   : > { %6870 = vmatpush3.bf16.msra.mxu0 %v7543_v48  ;;  %v7594_v48 = vld [vmem:[%s7986_s29 + $0x5f8] sm:$0xff]  }
  0xa4   : > { %6871 = vmatprep.subr.bf16.mxu0 %v7545_v50  ;;  %v7596_v50 = vld [vmem:[%s7986_s29 + $0x5b8] sm:$0xff]  }
  0xa5   : > { %6892 = vmatpush3.bf16.msra.mxu1 %v7544_v49  ;;  %v7595_v49 = vld [vmem:[%s7986_s29 + $0x538] sm:$0xff]  }
  0xa6   : > { %6893 = vmatprep.subr.bf16.mxu1 %v7546_v51  ;;  %v1408_v51 = vrot.slane %v8174_v6, %v8024_v43  ;;  %v7615_v6 = vld [vmem:[%s7986_s29 + $0x6e0] sm:$0xff]  }
  0xa7   : > { %6872 = vmatpush3.bf16.msra.mxu0 %v7547_v52  ;;  %v7598_v52 = vld [vmem:[%s7986_s29 + $0x640] sm:$0xff]  }
  0xa8   : > { %6873 = vmatprep.subr.bf16.mxu0 %v7549_v54  ;;  %v7600_v54 = vld [vmem:[%s7986_s29 + $0x600] sm:$0xff]  }
  0xa9   : > { %6894 = vmatpush3.bf16.msra.mxu1 %v7548_v53  ;;  %v7599_v53 = vld [vmem:[%s7986_s29 + $0x6c0] sm:$0xff]  }
  0xaa   : > { %6895 = vmatprep.subr.bf16.mxu1 %v7550_v55  ;;  %v7601_v55 = vld [vmem:[%s7986_s29 + $0x680] sm:$0xff]  }
  0xab   : > { %6874 = vmatpush3.bf16.msra.mxu0 %v7551_v56  ;;  %v1424_v56 = vcombine.high %v1408_v51, %v1408_v51 }
  0xac   : > { %6875 = vmatprep.subr.bf16.mxu0 %v7553_v58  ;;  %v7603_v58 = vld [vmem:[%s7986_s29 + $0x6c8] sm:$0xff]  }
  0xad   : > { %6896 = vmatpush3.bf16.msra.mxu1 %v7552_v57  ;;  %v7602_v57 = vld [vmem:[%s7986_s29 + $0x648] sm:$0xff]  }
  0xae   : > { %6897 = vmatprep.subr.bf16.mxu1 %v7554_v59  ;;  %v7604_v59 = vld [vmem:[%s7986_s29 + $0x608] sm:$0xff]  }
  0xaf   : > { %6876 = vmatpush3.bf16.msra.mxu0 %v7555_v60  ;;  %v7605_v60 = vld [vmem:[%s7986_s29 + $0x688] sm:$0xff]  }
  0xb0   : > { %6877 = vmatprep.subr.bf16.mxu0 %v7557_v62  ;;  %v7607_v62 = vld [vmem:[%s7986_s29 + $0x6d0] sm:$0xff]  }
  0xb1   : > { %6898 = vmatpush3.bf16.msra.mxu1 %v7556_v61  ;;  %v7606_v61 = vld [vmem:[%s7986_s29 + $0x650] sm:$0xff]  }
  0xb2   : > { %6899 = vmatprep.subr.bf16.mxu1 %v7558_v0  ;;  %v7609_v0 = vld [vmem:[%s7986_s29 + $0x690] sm:$0xff]  }
  0xb3   : > { %6878 = vmatpush3.bf16.msra.mxu0 %v7559_v3  ;;  %v7612_v3 = vld [vmem:[%s7986_s29 + $0x618] sm:$0xff]  }
  0xb4   : > { %6879 = vmatprep.subr.bf16.mxu0 %v7561_v7  ;;  %v7616_v7 = vld [vmem:[%s7986_s29 + $0x620] sm:$0xff]  }
  0xb5   : > { %6900 = vmatpush3.bf16.msra.mxu1 %v7560_v4  ;;  %v7613_v4 = vld [vmem:[%s7986_s29 + $0x698] sm:$0xff]  }
  0xb6   : > { %6901 = vmatprep.subr.bf16.mxu1 %v7562_v8  ;;  %v7617_v8 = vld [vmem:[%s7986_s29 + $0x6a0] sm:$0xff]  }
  0xb7   : > { %6880 = vmatpush3.bf16.msra.mxu0 %v7563_v11  ;;  %v7620_v11 = vld [vmem:[%s7986_s29 + $0x628] sm:$0xff]  }
  0xb8   : > { %6909 = vmatprep.subr.bf16.mxu0 %v7565_v15  ;;  %v243_v15 = vld [vmem:[%s7981_s25 + $0x18] sm:$0xff] }
  0xb9   : > { %6902 = vmatpush3.bf16.msra.mxu1 %v7564_v12  ;;  %v7621_v12 = vld [vmem:[%s7986_s29 + $0x6a8] sm:$0xff]  }
  0xba   : > { %5161 = vmatmul.mubr.bf16.vlgmr.msra.gmra.mrb[16].mxu0 %v1401_v14  ;;  %6931 = vmatprep.subr.bf16.mxu1 %v7566_v16  ;;  %v7623_v14 = vld [vmem:[%s7986_s29 + $0x6f0] sm:$0xff]  }
  0xbb   : > { %6910 = vmatpush3.bf16.msra.mxu0 %v7567_v18  ;;  %5240 = vmatprep.mubr.bf16.mxu0 %v1422_v17  ;;  %v7624_v16 = vld [vmem:[%s7986_s29 + $0x630] sm:$0xff]   ;;  %v1434_v17 = vrot.slane %v243_v15, %v8024_v43  ;;  %v1427_v18 = vcombine.high %v243_v15, %v243_v15  ;;  %v7664_v15 = vld [vmem:[%s7986_s29 + $0x8c0] sm:$0xff]  }
  0xbc   : > { %5201 = vmatmul.mubr.bf16.vlgmr.msra.gmra.mrb[16].mxu1 %v1423_v20  ;;  %6911 = vmatprep.subr.bf16.mxu0 %v7569_v21  ;;  %v7626_v20 = vld [vmem:[%s7986_s29 + $0x678] sm:$0xff]  }
  0xbd   : > { %6932 = vmatpush3.bf16.msra.mxu1 %v7568_v19  ;;  %5280 = vmatprep.mubr.bf16.mxu1 %v1426_v23  ;;  %v7625_v19 = vld [vmem:[%s7986_s29 + $0x6b0] sm:$0xff]   ;;  %v1442_v21 = vcombine.high %v1434_v17, %v1434_v17  ;;  %v7627_v23 = vld [vmem:[%s7986_s29 + $0x6f8] sm:$0xff]  }
  0xbe   : > { %6933 = vmatprep.subr.bf16.mxu1 %v7570_v22  ;;  %v8251_v22 = vrot.slane %v1427_v18, %v8024_v43 }
  0xbf   : > { %6912 = vmatpush3.bf16.msra.mxu0 %v7571_v24  ;;  %v7628_v24 = vld [vmem:[%s7986_s29 + $0x638] sm:$0xff]  }
  0xc0   : > { %6913 = vmatprep.subr.bf16.mxu0 %v7573_v26  ;;  %v1443_v26 = vcombine.high %v8251_v22, %v8251_v22 }
  0xc1   : > { %6934 = vmatpush3.bf16.msra.mxu1 %v7572_v25  ;;  %v1464_v25 = vrot.slane %v1442_v21, %v8024_v43  ;;  %v7669_v21 = vld [vmem:[%s7986_s29 + $0x808] sm:$0xff]  }
  0xc2   : > { %6935 = vmatprep.subr.bf16.mxu1 %v7574_v27  ;;  %v7629_v27 = vld [vmem:[%s7986_s29 + $0x6b8] sm:$0xff]  }
  0xc3   : > { %6914 = vmatpush3.bf16.msra.mxu0 %v7575_v28  ;;  %v1474_v28 = vcombine.high %v1464_v25, %v1464_v25 }
  0xc4   : > { %6915 = vmatprep.subr.bf16.mxu0 %v7577_v30  ;;  %v7630_v30 = vld [vmem:[%s7986_s29 + $0x740] sm:$0xff]  }
  0xc5   : > { %6936 = vmatpush3.bf16.msra.mxu1 %v7576_v29  ;;  %v1450_v29 = vrot.slane %v1434_v17, %v8024_v43  ;;  %v7666_v17 = vld [vmem:[%s7986_s29 + $0x880] sm:$0xff]  }
  0xc6   : > { %6937 = vmatprep.subr.bf16.mxu1 %v7578_v31  ;;  %v7631_v31 = vld [vmem:[%s7986_s29 + $0x7c0] sm:$0xff]  }
  0xc7   : > { %6916 = vmatpush3.bf16.msra.mxu0 %v7579_v32  ;;  %v1471_v32 = vrot.slane %v1443_v26, %v8024_v43  ;;  %v7674_v26 = vld [vmem:[%s7986_s29 + $0x890] sm:$0xff]  }
  0xc8   : > { %6917 = vmatprep.subr.bf16.mxu0 %v7581_v34  ;;  %v7633_v34 = vld [vmem:[%s7986_s29 + $0x780] sm:$0xff]  }
  0xc9   : > { %6938 = vmatpush3.bf16.msra.mxu1 %v7580_v33  ;;  %v7632_v33 = vld [vmem:[%s7986_s29 + $0x700] sm:$0xff]  }
  0xca   : > { %6939 = vmatprep.subr.bf16.mxu1 %v7582_v35  ;;  %v1472_v35 = vcombine.high %v1450_v29, %v1450_v29 }
  0xcb   : > { %6918 = vmatpush3.bf16.msra.mxu0 %v7583_v36  ;;  %v7634_v36 = vld [vmem:[%s7986_s29 + $0x748] sm:$0xff]  }
  0xcc   : > { %6919 = vmatprep.subr.bf16.mxu0 %v7585_v38  ;;  %v1475_v38 = vcombine.high %v1471_v32, %v1471_v32 }
  0xcd   : > { %6940 = vmatpush3.bf16.msra.mxu1 %v7584_v37  ;;  %v7635_v37 = vld [vmem:[%s7986_s29 + $0x7c8] sm:$0xff]  }
  0xce   : > { %6941 = vmatprep.subr.bf16.mxu1 %v7586_v39  ;;  %v7636_v39 = vld [vmem:[%s7986_s29 + $0x708] sm:$0xff]  }
  0xcf   : > { %6920 = vmatpush3.bf16.msra.mxu0 %v7587_v40  ;;  %v7637_v40 = vld [vmem:[%s7986_s29 + $0x788] sm:$0xff]  }
  0xd0   : > { %6921 = vmatprep.subr.bf16.mxu0 %v7589_v42  ;;  %v7639_v42 = vld [vmem:[%s7986_s29 + $0x7d0] sm:$0xff]  }
  0xd1   : > { %6942 = vmatpush3.bf16.msra.mxu1 %v7588_v41  ;;  %v7638_v41 = vld [vmem:[%s7986_s29 + $0x750] sm:$0xff]  }
  0xd2   : > { %6943 = vmatprep.subr.bf16.mxu1 %v7590_v44  ;;  %v7640_v44 = vld [vmem:[%s7986_s29 + $0x710] sm:$0xff]  }
  0xd3   : > { %6922 = vmatpush3.bf16.msra.mxu0 %v7591_v45  ;;  %v7641_v45 = vld [vmem:[%s7986_s29 + $0x790] sm:$0xff]  }
  0xd4   : > { %6923 = vmatprep.subr.bf16.mxu0 %v7593_v47  ;;  %v7643_v47 = vld [vmem:[%s7986_s29 + $0x7d8] sm:$0xff]  }
  0xd5   : > { %6944 = vmatpush3.bf16.msra.mxu1 %v7592_v46  ;;  %v7642_v46 = vld [vmem:[%s7986_s29 + $0x758] sm:$0xff]  }
  0xd6   : > { %6945 = vmatprep.subr.bf16.mxu1 %v7594_v48  ;;  %v7644_v48 = vld [vmem:[%s7986_s29 + $0x718] sm:$0xff]  }
  0xd7   : > { %6924 = vmatpush3.bf16.msra.mxu0 %v7595_v49  ;;  %v7645_v49 = vld [vmem:[%s7986_s29 + $0x798] sm:$0xff]  }
  0xd8   : > { %6953 = vmatprep.subr.bf16.mxu0 %v7598_v52  ;;  %v7648_v52 = vld [vmem:[%s7986_s29 + $0x720] sm:$0xff]  }
  0xd9   : > { %6946 = vmatpush3.bf16.msra.mxu1 %v7596_v50  ;;  %v7646_v50 = vld [vmem:[%s7986_s29 + $0x760] sm:$0xff]  }
  0xda   : > { %5241 = vmatmul.mubr.bf16.vlgmr.msra.gmra.mrb[20].mxu0 %v1408_v51  ;;  %6975 = vmatprep.subr.bf16.mxu1 %v7599_v53  ;;  %v7647_v51 = vld [vmem:[%s7986_s29 + $0x7e0] sm:$0xff]  }
  0xdb   : > { %6954 = vmatpush3.bf16.msra.mxu0 %v7600_v54  ;;  %5320 = vmatprep.mubr.bf16.mxu0 %v1464_v25  ;;  %v7649_v53 = vld [vmem:[%s7986_s29 + $0x7a0] sm:$0xff]   ;;  %v7650_v54 = vld [vmem:[%s7986_s29 + $0x768] sm:$0xff]   ;;  %v7673_v25 = vld [vmem:[%s7986_s29 + $0x810] sm:$0xff]  }
  0xdc   : > { %5281 = vmatmul.mubr.bf16.vlgmr.msra.gmra.mrb[20].mxu1 %v1424_v56  ;;  %6955 = vmatprep.subr.bf16.mxu0 %v7602_v57  ;;  %v7652_v56 = vld [vmem:[%s7986_s29 + $0x728] sm:$0xff]  }
  0xdd   : > { %6976 = vmatpush3.bf16.msra.mxu1 %v7601_v55  ;;  %5360 = vmatprep.mubr.bf16.mxu1 %v1474_v28  ;;  %v7651_v55 = vld [vmem:[%s7986_s29 + $0x7e8] sm:$0xff]   ;;  %v7676_v28 = vld [vmem:[%s7986_s29 + $0x8d8] sm:$0xff]  }
  0xde   : > { %6977 = vmatprep.subr.bf16.mxu1 %v7603_v58  ;;  %v7653_v57 = vld [vmem:[%s7986_s29 + $0x7a8] sm:$0xff]   ;;  %v7654_v58 = vld [vmem:[%s7986_s29 + $0x770] sm:$0xff]  }
  0xdf   : > { %6956 = vmatpush3.bf16.msra.mxu0 %v7604_v59 }
  0xe0   : > { %6957 = vmatprep.subr.bf16.mxu0 %v7606_v61 }
  0xe1   : > { %6978 = vmatpush3.bf16.msra.mxu1 %v7605_v60  ;;  %v7655_v60 = vld [vmem:[%s7986_s29 + $0x7f0] sm:$0xff]  }
  0xe2   : > { %6979 = vmatprep.subr.bf16.mxu1 %v7607_v62  ;;  %v7656_v62 = vld [vmem:[%s7986_s29 + $0x730] sm:$0xff]  }
  0xe3   : > { %6958 = vmatpush3.bf16.msra.mxu0 %v7608_v63 }
  0xe4   : > { %6959 = vmatprep.subr.bf16.mxu0 %v7610_v1 }
  0xe5   : > { %6980 = vmatpush3.bf16.msra.mxu1 %v7609_v0 }
  0xe6   : > { %6981 = vmatprep.subr.bf16.mxu1 %v7611_v2  ;;  %v7657_v2 = vld [vmem:[%s7986_s29 + $0x7b0] sm:$0xff]  }
  0xe7   : > { %6960 = vmatpush3.bf16.msra.mxu0 %v7612_v3  ;;  %v7658_v3 = vld [vmem:[%s7986_s29 + $0x778] sm:$0xff]  }
  0xe8   : > { %6961 = vmatprep.subr.bf16.mxu0 %v7614_v5 }
  0xe9   : > { %6982 = vmatpush3.bf16.msra.mxu1 %v7613_v4 }
  0xea   : > { %6983 = vmatprep.subr.bf16.mxu1 %v7615_v6 }
  0xeb   : > { %6962 = vmatpush3.bf16.msra.mxu0 %v7616_v7 }
  0xec   : > { %6963 = vmatprep.subr.bf16.mxu0 %v7618_v9 }
  0xed   : > { %6984 = vmatpush3.bf16.msra.mxu1 %v7617_v8  ;;  %v7659_v8 = vld [vmem:[%s7986_s29 + $0x7f8] sm:$0xff]  }
  0xee   : > { %6985 = vmatprep.subr.bf16.mxu1 %v7619_v10  ;;  %v7660_v10 = vld [vmem:[%s7986_s29 + $0x738] sm:$0xff]  }
  0xef   : > { %6964 = vmatpush3.bf16.msra.mxu0 %v7620_v11 }
  0xf0   : > { %6965 = vmatprep.subr.bf16.mxu0 %v7622_v13  ;;  %v1457_v13 = vrot.slane %v8251_v22, %v8024_v43  ;;  %v7670_v22 = vld [vmem:[%s7986_s29 + $0x888] sm:$0xff]  }
  0xf1   : > { %6986 = vmatpush3.bf16.msra.mxu1 %v7621_v12  ;;  %v7661_v12 = vld [vmem:[%s7986_s29 + $0x7b8] sm:$0xff]  }
  0xf2   : > { %6987 = vmatprep.subr.bf16.mxu1 %v7623_v14  ;;  %v7663_v14 = vld [vmem:[%s7986_s29 + $0x840] sm:$0xff]   ;;  %v1473_v18 = vcombine.high %v1457_v13, %v1457_v13 }
  0xf3   : > { %6966 = vmatpush3.bf16.msra.mxu0 %v7624_v16  ;;  %v7665_v16 = vld [vmem:[%s7986_s29 + $0x800] sm:$0xff]  }
  0xf4   : > { %6967 = vmatprep.subr.bf16.mxu0 %v7626_v20  ;;  %v7668_v20 = vld [vmem:[%s7986_s29 + $0x8c8] sm:$0xff]  }
  0xf5   : > { %6988 = vmatpush3.bf16.msra.mxu1 %v7625_v19  ;;  %v7667_v19 = vld [vmem:[%s7986_s29 + $0x848] sm:$0xff]  }
  0xf6   : > { %6989 = vmatprep.subr.bf16.mxu1 %v7627_v23  ;;  %v7671_v23 = vld [vmem:[%s7986_s29 + $0x850] sm:$0xff]  }
  0xf7   : > { %6968 = vmatpush3.bf16.msra.mxu0 %v7628_v24  ;;  %v7672_v24 = vld [vmem:[%s7986_s29 + $0x8d0] sm:$0xff]  }
  0xf8   : > { %6997 = vmatprep.subr.bf16.mxu0 %v7630_v30  ;;  %v7678_v30 = vld [vmem:[%s7986_s29 + $0x898] sm:$0xff]  }
  0xf9   : > { %6990 = vmatpush3.bf16.msra.mxu1 %v7629_v27  ;;  %v7675_v27 = vld [vmem:[%s7986_s29 + $0x858] sm:$0xff]  }
  0xfa   : > { %5321 = vmatmul.mubr.bf16.vlgmr.msra.gmra.mrb[24].mxu0 %v1450_v29  ;;  %7019 = vmatprep.subr.bf16.mxu1 %v7631_v31  ;;  %v7677_v29 = vld [vmem:[%s7986_s29 + $0x818] sm:$0xff]   ;;  %v7679_v31 = vld [vmem:[%s7986_s29 + $0x860] sm:$0xff]  }
  0xfb   : > { %6998 = vmatpush3.bf16.msra.mxu0 %v7632_v33  ;;  %5400 = vmatprep.mubr.bf16.mxu0 %v1471_v32  ;;  %v7680_v32 = vld [vmem:[%s7986_s29 + $0x8e0] sm:$0xff]  }
  0xfc   : > { %5361 = vmatmul.mubr.bf16.vlgmr.msra.gmra.mrb[24].mxu1 %v1472_v35  ;;  %6999 = vmatprep.subr.bf16.mxu0 %v7634_v36  ;;  %v7681_v33 = vld [vmem:[%s7986_s29 + $0x820] sm:$0xff]   ;;  %v7683_v35 = vld [vmem:[%s7986_s29 + $0x868] sm:$0xff]  }
  0xfd   : > { %7020 = vmatpush3.bf16.msra.mxu1 %v7633_v34  ;;  %5440 = vmatprep.mubr.bf16.mxu1 %v1475_v38  ;;  %v7682_v34 = vld [vmem:[%s7986_s29 + $0x8a0] sm:$0xff]   ;;  %v7684_v36 = vld [vmem:[%s7986_s29 + $0x8e8] sm:$0xff]  }
  0xfe   : > { %7021 = vmatprep.subr.bf16.mxu1 %v7635_v37  ;;  %v7685_v37 = vld [vmem:[%s7986_s29 + $0x828] sm:$0xff]  }
  0xff   : > { %7000 = vmatpush3.bf16.msra.mxu0 %v7636_v39  ;;  %v7686_v38 = vld [vmem:[%s7986_s29 + $0x8a8] sm:$0xff]   ;;  %v7687_v39 = vld [vmem:[%s7986_s29 + $0x870] sm:$0xff]  }
 0x100   : > { %7001 = vmatprep.subr.bf16.mxu0 %v7638_v41  ;;  %v7688_v41 = vld [vmem:[%s7986_s29 + $0x8f0] sm:$0xff]  }
 0x101   : > { %7022 = vmatpush3.bf16.msra.mxu1 %v7637_v40 }
 0x102   : > { %7023 = vmatprep.subr.bf16.mxu1 %v7639_v42  ;;  %v244_v42 = vld [vmem:[%s7981_s25 + $0x20] sm:$0xff] }
 0x103   : > { %7002 = vmatpush3.bf16.msra.mxu0 %v7640_v44 }
 0x104   : > { %7003 = vmatprep.subr.bf16.mxu0 %v7642_v46  ;;  %v1483_v46 = vrot.slane %v244_v42, %v8024_v43 }
 0x105   : > { %7024 = vmatpush3.bf16.msra.mxu1 %v7641_v45  ;;  %v7689_v45 = vld [vmem:[%s7986_s29 + $0x830] sm:$0xff]  }
 0x106   : > { %7025 = vmatprep.subr.bf16.mxu1 %v7643_v47  ;;  %v1476_v47 = vcombine.high %v244_v42, %v244_v42 }
 0x107   : > { %7004 = vmatpush3.bf16.msra.mxu0 %v7644_v48 }
 0x108   : > { %7005 = vmatprep.subr.bf16.mxu0 %v7646_v50 }
 0x109   : > { %7026 = vmatpush3.bf16.msra.mxu1 %v7645_v49 }
 0x10a   : > { %7027 = vmatprep.subr.bf16.mxu1 %v7647_v51 }
 0x10b   : > { %7006 = vmatpush3.bf16.msra.mxu0 %v7648_v52 }
 0x10c   : > { %7007 = vmatprep.subr.bf16.mxu0 %v7650_v54  ;;  %v7691_v54 = vld [vmem:[%s7986_s29 + $0x878] sm:$0xff]  }
 0x10d   : > { %7028 = vmatpush3.bf16.msra.mxu1 %v7649_v53  ;;  %v6705_v59 = vpop.f32.mrb[0].mxu0  ;;  %v7690_v53 = vld [vmem:[%s7986_s29 + $0x8b0] sm:$0xff]  }
 0x10e   : > { %v6706_v61 = vpop.f32.mrb[1].mxu0  ;;  %7029 = vmatprep.subr.bf16.mxu1 %v7651_v55  ;;  %v6727_v63 = vpop.f32.mrb[0].mxu1  ;;  %v1491_v55 = vcombine.high %v1483_v46, %v1483_v46 }
 0x10f   : > { %v6707_v0 = vadd.f32 %v6706_v61, %v6705_v59  ;;  %v6708_v1 = vpop.f32.mrb[2].mxu0  ;;  %7008 = vmatpush3.bf16.msra.mxu0 %v7652_v56  ;;  %v6728_v4 = vpop.f32.mrb[1].mxu1  ;;  %v8329_v56 = vrot.slane %v1476_v47, %v8024_v43 }
 0x110   : > { %v6709_v5 = vpop.f32.mrb[3].mxu0  ;;  %7009 = vmatprep.subr.bf16.mxu0 %v7654_v58  ;;  %v6729_v6 = vadd.f32 %v6728_v4, %v6727_v63  ;;  %v6730_v7 = vpop.f32.mrb[2].mxu1  ;;  %v1513_v63 = vrot.slane %v1491_v55, %v8024_v43  ;;  %v1499_v4 = vrot.slane %v1483_v46, %v8024_v43  ;;  %v7729_v55 = vld [vmem:[%s7986_s29 + $0xac0] sm:$0xff]  }
 0x111   : > { %7030 = vmatpush3.bf16.msra.mxu1 %v7653_v57  ;;  %v6731_v9 = vpop.f32.mrb[3].mxu1  ;;  %v7695_v5 = vld [vmem:[%s7986_s29 + $0x940] sm:$0xff]  }
 0x112   : > { %7031 = vmatprep.subr.bf16.mxu1 %v7655_v60  ;;  %v8292_v11 = vadd.f32 %v6729_v6, %v6707_v0  ;;  %v7692_v60 = vld [vmem:[%s7986_s29 + $0x8f8] sm:$0xff]   ;;  %v1492_v0 = vcombine.high %v8329_v56, %v8329_v56  ;;  %v7696_v6 = vld [vmem:[%s7986_s29 + $0x9c0] sm:$0xff]  }
 0x113   : > { %7010 = vmatpush3.bf16.msra.mxu0 %v7656_v62  ;;  %v7693_v62 = vld [vmem:[%s7986_s29 + $0x838] sm:$0xff]   ;;  %v7698_v9 = vld [vmem:[%s7986_s29 + $0x980] sm:$0xff]  }
 0x114   : > { %7011 = vmatprep.subr.bf16.mxu0 %v7658_v3  ;;  %v1523_v3 = vcombine.high %v1513_v63, %v1513_v63  ;;  %v1520_v7 = vrot.slane %v1492_v0, %v8024_v43  ;;  %v7737_v0 = vld [vmem:[%s7986_s29 + $0xad0] sm:$0xff]  }
 0x115   : > { %7032 = vmatpush3.bf16.msra.mxu1 %v7657_v2  ;;  %v7694_v2 = vld [vmem:[%s7986_s29 + $0x8b8] sm:$0xff]  }
 0x116   : > { %7033 = vmatprep.subr.bf16.mxu1 %v7659_v8  ;;  %v7697_v8 = vld [vmem:[%s7986_s29 + $0x900] sm:$0xff]  }
 0x117   : > { %7012 = vmatpush3.bf16.msra.mxu0 %v7660_v10  ;;  %v1521_v10 = vcombine.high %v1499_v4, %v1499_v4 }
 0x118   : > { %7041 = vmatprep.subr.bf16.mxu0 %v7663_v14  ;;  %v7701_v14 = vld [vmem:[%s7986_s29 + $0x908] sm:$0xff]  }
 0x119   : > { %7034 = vmatpush3.bf16.msra.mxu1 %v7661_v12  ;;  %v7700_v12 = vld [vmem:[%s7986_s29 + $0x9c8] sm:$0xff]  }
 0x11a   : > { %5401 = vmatmul.mubr.bf16.vlgmr.msra.gmra.mrb[28].mxu0 %v1457_v13  ;;  %7063 = vmatprep.subr.bf16.mxu1 %v7664_v15  ;;  %v1524_v13 = vcombine.high %v1520_v7, %v1520_v7  ;;  %v7702_v15 = vld [vmem:[%s7986_s29 + $0x988] sm:$0xff]  }
 0x11b   : > { %7042 = vmatpush3.bf16.msra.mxu0 %v7665_v16  ;;  %5480 = vmatprep.mubr.bf16.mxu0 %v1513_v63  ;;  %v7703_v16 = vld [vmem:[%s7986_s29 + $0x950] sm:$0xff]  }
 0x11c   : > { %5441 = vmatmul.mubr.bf16.vlgmr.msra.gmra.mrb[28].mxu1 %v1473_v18  ;;  %7043 = vmatprep.subr.bf16.mxu0 %v7667_v19  ;;  %v7705_v18 = vld [vmem:[%s7986_s29 + $0x910] sm:$0xff]  }
 0x11d   : > { %7064 = vmatpush3.bf16.msra.mxu1 %v7666_v17  ;;  %5520 = vmatprep.mubr.bf16.mxu1 %v1523_v3  ;;  %v7704_v17 = vld [vmem:[%s7986_s29 + $0x9d0] sm:$0xff]   ;;  %v7740_v3 = vld [vmem:[%s7986_s29 + $0xa58] sm:$0xff]  }
 0x11e   : > { %7065 = vmatprep.subr.bf16.mxu1 %v7668_v20  ;;  %v7706_v19 = vld [vmem:[%s7986_s29 + $0x990] sm:$0xff]   ;;  %v7707_v20 = vld [vmem:[%s7986_s29 + $0x958] sm:$0xff]  }
 0x11f   : > { %7044 = vmatpush3.bf16.msra.mxu0 %v7669_v21  ;;  %v7708_v21 = vld [vmem:[%s7986_s29 + $0x9d8] sm:$0xff]   ;;  %v7736_v63 = vld [vmem:[%s7986_s29 + $0xa50] sm:$0xff]  }
 0x120   : > { %7045 = vmatprep.subr.bf16.mxu0 %v7671_v23  ;;  %v7710_v23 = vld [vmem:[%s7986_s29 + $0x998] sm:$0xff]  }
 0x121   : > { %7066 = vmatpush3.bf16.msra.mxu1 %v7670_v22  ;;  %v7709_v22 = vld [vmem:[%s7986_s29 + $0x918] sm:$0xff]  }
 0x122   : > { %7067 = vmatprep.subr.bf16.mxu1 %v7672_v24  ;;  %v7711_v24 = vld [vmem:[%s7986_s29 + $0x960] sm:$0xff]  }
 0x123   : > { %7046 = vmatpush3.bf16.msra.mxu0 %v7673_v25  ;;  %v7712_v25 = vld [vmem:[%s7986_s29 + $0x9e0] sm:$0xff]  }
 0x124   : > { %7047 = vmatprep.subr.bf16.mxu0 %v7675_v27  ;;  %v7714_v27 = vld [vmem:[%s7986_s29 + $0x9a0] sm:$0xff]  }
 0x125   : > { %7068 = vmatpush3.bf16.msra.mxu1 %v7674_v26  ;;  %v7713_v26 = vld [vmem:[%s7986_s29 + $0x920] sm:$0xff]  }
 0x126   : > { %7069 = vmatprep.subr.bf16.mxu1 %v7676_v28  ;;  %v7715_v28 = vld [vmem:[%s7986_s29 + $0x968] sm:$0xff]  }
 0x127   : > { %7048 = vmatpush3.bf16.msra.mxu0 %v7677_v29  ;;  %v7716_v29 = vld [vmem:[%s7986_s29 + $0x9e8] sm:$0xff]  }
 0x128   : > { %7049 = vmatprep.subr.bf16.mxu0 %v7679_v31  ;;  %v7718_v31 = vld [vmem:[%s7986_s29 + $0x9a8] sm:$0xff]  }
 0x129   : > { %7070 = vmatpush3.bf16.msra.mxu1 %v7678_v30  ;;  %v7717_v30 = vld [vmem:[%s7986_s29 + $0x928] sm:$0xff]  }
 0x12a   : > { %7071 = vmatprep.subr.bf16.mxu1 %v7680_v32  ;;  %v7719_v32 = vld [vmem:[%s7986_s29 + $0x970] sm:$0xff]  }
 0x12b   : > { %7050 = vmatpush3.bf16.msra.mxu0 %v7681_v33 }
 0x12c   : > { %7051 = vmatprep.subr.bf16.mxu0 %v7683_v35 }
 0x12d   : > { %7072 = vmatpush3.bf16.msra.mxu1 %v7682_v34  ;;  %v6749_v40 = vpop.f32.mrb[4].mxu0  ;;  %v7720_v34 = vld [vmem:[%s7986_s29 + $0x9f0] sm:$0xff]  }
 0x12e   : > { %v6750_v44 = vpop.f32.mrb[5].mxu0  ;;  %7073 = vmatprep.subr.bf16.mxu1 %v7684_v36  ;;  %v6771_v48 = vpop.f32.mrb[4].mxu1  ;;  %v7721_v36 = vld [vmem:[%s7986_s29 + $0x930] sm:$0xff]  }
 0x12f   : > { %v6751_v49 = vadd.f32 %v6750_v44, %v6749_v40  ;;  %v6752_v50 = vpop.f32.mrb[6].mxu0  ;;  %7052 = vmatpush3.bf16.msra.mxu0 %v7685_v37  ;;  %v6772_v51 = vpop.f32.mrb[5].mxu1  ;;  %v7722_v40 = vld [vmem:[%s7986_s29 + $0x9b0] sm:$0xff]  }
 0x130   : > { %v6753_v52 = vpop.f32.mrb[7].mxu0  ;;  %7053 = vmatprep.subr.bf16.mxu0 %v7687_v39  ;;  %v6773_v58 = vadd.f32 %v6772_v51, %v6771_v48  ;;  %v6774_v59 = vpop.f32.mrb[6].mxu1  ;;  %v7724_v48 = vld [vmem:[%s7986_s29 + $0x9f8] sm:$0xff]  }
 0x131   : > { %v4923_v57 = vadd.f32 %v6751_v49, %v8292_v11  ;;  %7074 = vmatpush3.bf16.msra.mxu1 %v7686_v38  ;;  %v6775_v61 = vpop.f32.mrb[7].mxu1  ;;  %v7699_v11 = vld [vmem:[%s7986_s29 + $0x948] sm:$0xff]   ;;  %v7725_v50 = vld [vmem:[%s7986_s29 + $0x938] sm:$0xff]  }
 0x132   : > { %7075 = vmatprep.subr.bf16.mxu1 %v7688_v41  ;;  %v7723_v41 = vld [vmem:[%s7986_s29 + $0x978] sm:$0xff]   ;;  %v7733_v61 = vld [vmem:[%s7986_s29 + $0xac8] sm:$0xff]  }
 0x133   : > { %v8337_v1 = vadd.f32 %v6773_v58, %v4923_v57  ;;  %7054 = vmatpush3.bf16.msra.mxu0 %v7689_v45  ;;  %v7726_v52 = vld [vmem:[%s7986_s29 + $0x9b8] sm:$0xff]   ;;  %v7730_v57 = vld [vmem:[%s7986_s29 + $0xa00] sm:$0xff]  }
 0x134   : > { %7055 = vmatprep.subr.bf16.mxu0 %v7691_v54  ;;  %v7728_v54 = vld [vmem:[%s7986_s29 + $0xa40] sm:$0xff]  }
 0x135   : > { %7076 = vmatpush3.bf16.msra.mxu1 %v7690_v53  ;;  %v1506_v53 = vrot.slane %v8329_v56, %v8024_v43  ;;  %v7731_v58 = vld [vmem:[%s7986_s29 + $0xa80] sm:$0xff]   ;;  %v7734_v56 = vld [vmem:[%s7986_s29 + $0xa08] sm:$0xff]  }
 0x136   : > { %7077 = vmatprep.subr.bf16.mxu1 %v7692_v60  ;;  %v7732_v60 = vld [vmem:[%s7986_s29 + $0xa48] sm:$0xff]  }
 0x137   : > { %7056 = vmatpush3.bf16.msra.mxu0 %v7693_v62  ;;  %v1522_v59 = vcombine.high %v1506_v53, %v1506_v53  ;;  %v7735_v62 = vld [vmem:[%s7986_s29 + $0xa88] sm:$0xff]  }
 0x138   : > { %7085 = vmatprep.subr.bf16.mxu0 %v7695_v5  ;;  %v7742_v5 = vld [vmem:[%s7986_s29 + $0xa18] sm:$0xff]  }
 0x139   : > { %7078 = vmatpush3.bf16.msra.mxu1 %v7694_v2  ;;  %v7739_v2 = vld [vmem:[%s7986_s29 + $0xa90] sm:$0xff]  }
 0x13a   : > { %5481 = vmatmul.mubr.bf16.vlgmr.msra.gmra.mrb[32].mxu0 %v1499_v4  ;;  %7107 = vmatprep.subr.bf16.mxu1 %v7696_v6  ;;  %v7741_v4 = vld [vmem:[%s7986_s29 + $0xad8] sm:$0xff]  }
 0x13b   : > { %7086 = vmatpush3.bf16.msra.mxu0 %v7697_v8  ;;  %5560 = vmatprep.mubr.bf16.mxu0 %v1520_v7  ;;  %v7743_v6 = vld [vmem:[%s7986_s29 + $0xa98] sm:$0xff]   ;;  %v7744_v7 = vld [vmem:[%s7986_s29 + $0xa60] sm:$0xff]  }
 0x13c   : > { %5521 = vmatmul.mubr.bf16.vlgmr.msra.gmra.mrb[32].mxu1 %v1521_v10  ;;  %7087 = vmatprep.subr.bf16.mxu0 %v7699_v11  ;;  %v7745_v8 = vld [vmem:[%s7986_s29 + $0xae0] sm:$0xff]   ;;  %v7748_v11 = vld [vmem:[%s7986_s29 + $0xa68] sm:$0xff]  }
 0x13d   : > { %7108 = vmatpush3.bf16.msra.mxu1 %v7698_v9  ;;  %5600 = vmatprep.mubr.bf16.mxu1 %v1524_v13  ;;  %v7746_v9 = vld [vmem:[%s7986_s29 + $0xa20] sm:$0xff]   ;;  %v7750_v13 = vld [vmem:[%s7986_s29 + $0xa28] sm:$0xff]  }
 0x13e   : > { %7109 = vmatprep.subr.bf16.mxu1 %v7700_v12  ;;  %v7747_v10 = vld [vmem:[%s7986_s29 + $0xaa0] sm:$0xff]   ;;  %v7749_v12 = vld [vmem:[%s7986_s29 + $0xae8] sm:$0xff]  }
 0x13f   : > { %7088 = vmatpush3.bf16.msra.mxu0 %v7701_v14  ;;  %v7751_v14 = vld [vmem:[%s7986_s29 + $0xaa8] sm:$0xff]  }
 0x140   : > { %7089 = vmatprep.subr.bf16.mxu0 %v7703_v16 }
 0x141   : > { %7110 = vmatpush3.bf16.msra.mxu1 %v7702_v15  ;;  %v7752_v15 = vld [vmem:[%s7986_s29 + $0xa70] sm:$0xff]  }
 0x142   : > { %7111 = vmatprep.subr.bf16.mxu1 %v7704_v17  ;;  %v7753_v17 = vld [vmem:[%s7986_s29 + $0xaf0] sm:$0xff]  }
 0x143   : > { %7090 = vmatpush3.bf16.msra.mxu0 %v7705_v18 }
 0x144   : > { %7091 = vmatprep.subr.bf16.mxu0 %v7707_v20  ;;  %v245_v20 = vld [vmem:[%s7981_s25 + $0x28] sm:$0xff] }
 0x145   : > { %7112 = vmatpush3.bf16.msra.mxu1 %v7706_v19  ;;  %v7754_v19 = vld [vmem:[%s7986_s29 + $0xa30] sm:$0xff]  }
 0x146   : > { %7113 = vmatprep.subr.bf16.mxu1 %v7708_v21 }
 0x147   : > { %7092 = vmatpush3.bf16.msra.mxu0 %v7709_v22 }
 0x148   : > { %7093 = vmatprep.subr.bf16.mxu0 %v7711_v24  ;;  %v1532_v24 = vrot.slane %v245_v20, %v8024_v43 }
 0x149   : > { %7114 = vmatpush3.bf16.msra.mxu1 %v7710_v23 }
 0x14a   : > { %7115 = vmatprep.subr.bf16.mxu1 %v7712_v25  ;;  %v1525_v25 = vcombine.high %v245_v20, %v245_v20 }
 0x14b   : > { %7094 = vmatpush3.bf16.msra.mxu0 %v7713_v26 }
 0x14c   : > { %7095 = vmatprep.subr.bf16.mxu0 %v7715_v28  ;;  %v7755_v28 = vld [vmem:[%s7986_s29 + $0xab0] sm:$0xff]  }
 0x14d   : > { %7116 = vmatpush3.bf16.msra.mxu1 %v7714_v27  ;;  %v6793_v33 = vpop.f32.mrb[8].mxu0 }
 0x14e   : > { %v6794_v35 = vpop.f32.mrb[9].mxu0  ;;  %7117 = vmatprep.subr.bf16.mxu1 %v7716_v29  ;;  %v7756_v29 = vld [vmem:[%s7986_s29 + $0xa78] sm:$0xff]  }
 0x14f   : > { %v6815_v37 = vpop.f32.mrb[8].mxu1  ;;  %v6795_v38 = vadd.f32 %v6794_v35, %v6793_v33  ;;  %v6796_v39 = vpop.f32.mrb[10].mxu0  ;;  %7096 = vmatpush3.bf16.msra.mxu0 %v7717_v30  ;;  %v7757_v33 = vld [vmem:[%s7986_s29 + $0xaf8] sm:$0xff]  }
 0x150   : > { %v6816_v42 = vpop.f32.mrb[9].mxu1  ;;  %v6797_v44 = vpop.f32.mrb[11].mxu0  ;;  %7097 = vmatprep.subr.bf16.mxu0 %v7719_v32  ;;  %v7759_v39 = vld [vmem:[%s7986_s29 + $0xab8] sm:$0xff]  }
 0x151   : > { %v5003_v45 = vadd.f32 %v6795_v38, %v8337_v1  ;;  %v6817_v46 = vadd.f32 %v6816_v42, %v6815_v37  ;;  %v6818_v47 = vpop.f32.mrb[10].mxu1  ;;  %7118 = vmatpush3.bf16.msra.mxu1 %v7718_v31  ;;  %v7738_v1 = vld [vmem:[%s7986_s29 + $0xa10] sm:$0xff]   ;;  %v8414_v37 = vrot.slane %v1525_v25, %v8024_v43  ;;  %v7760_v42 = vld [vmem:[%s7986_s29 + $0xb40] sm:$0xff]   ;;  %v7790_v25 = vld [vmem:[%s7986_s29 + $0xb38] sm:$0xff]  }
 0x152   : > { %v6819_v49 = vpop.f32.mrb[11].mxu1  ;;  %7119 = vmatprep.subr.bf16.mxu1 %v7720_v34  ;;  %v1540_v34 = vcombine.high %v1532_v24, %v1532_v24  ;;  %v7762_v47 = vld [vmem:[%s7986_s29 + $0xb00] sm:$0xff]  }
 0x153   : > { %v8374_v51 = vadd.f32 %v6817_v46, %v5003_v45  ;;  %7098 = vmatpush3.bf16.msra.mxu0 %v7721_v36  ;;  %v7758_v36 = vld [vmem:[%s7986_s29 + $0xa38] sm:$0xff]   ;;  %v1541_v44 = vcombine.high %v8414_v37, %v8414_v37  ;;  %v7761_v46 = vld [vmem:[%s7986_s29 + $0xbc0] sm:$0xff]  }
 0x154   : > { %7099 = vmatprep.subr.bf16.mxu0 %v7723_v41  ;;  %v1548_v41 = vrot.slane %v1532_v24, %v8024_v43  ;;  %v7763_v49 = vld [vmem:[%s7986_s29 + $0xb80] sm:$0xff]  }
 0x155   : > { %7120 = vmatpush3.bf16.msra.mxu1 %v7722_v40  ;;  %v1562_v40 = vrot.slane %v1540_v34, %v8024_v43  ;;  %v7797_v34 = vld [vmem:[%s7986_s29 + $0xc48] sm:$0xff]  }
 0x156   : > { %7121 = vmatprep.subr.bf16.mxu1 %v7724_v48  ;;  %v1569_v48 = vrot.slane %v1541_v44, %v8024_v43  ;;  %v7806_v44 = vld [vmem:[%s7986_s29 + $0xcd8] sm:$0xff]  }
 0x157   : > { %7100 = vmatpush3.bf16.msra.mxu0 %v7725_v50  ;;  %v1572_v45 = vcombine.high %v1562_v40, %v1562_v40  ;;  %v1570_v50 = vcombine.high %v1548_v41, %v1548_v41 }
 0x158   : > { %7129 = vmatprep.subr.bf16.mxu0 %v7728_v54  ;;  %v7766_v54 = vld [vmem:[%s7986_s29 + $0xb08] sm:$0xff]  }
 0x159   : > { %7122 = vmatpush3.bf16.msra.mxu1 %v7726_v52  ;;  %v7765_v52 = vld [vmem:[%s7986_s29 + $0xbc8] sm:$0xff]  }
 0x15a   : > { %5561 = vmatmul.mubr.bf16.vlgmr.msra.gmra.mrb[36].mxu0 %v1506_v53  ;;  %7151 = vmatprep.subr.bf16.mxu1 %v7729_v55  ;;  %v1573_v53 = vcombine.high %v1569_v48, %v1569_v48  ;;  %v7767_v55 = vld [vmem:[%s7986_s29 + $0xb88] sm:$0xff]  }
 0x15b   : > { %7130 = vmatpush3.bf16.msra.mxu0 %v7730_v57  ;;  %5640 = vmatprep.mubr.bf16.mxu0 %v1562_v40  ;;  %v7768_v57 = vld [vmem:[%s7986_s29 + $0xb50] sm:$0xff]  }
 0x15c   : > { %5601 = vmatmul.mubr.bf16.vlgmr.msra.gmra.mrb[36].mxu1 %v1522_v59  ;;  %7131 = vmatprep.subr.bf16.mxu0 %v7732_v60  ;;  %v7770_v59 = vld [vmem:[%s7986_s29 + $0xb10] sm:$0xff]  }
 0x15d   : > { %7152 = vmatpush3.bf16.msra.mxu1 %v7731_v58  ;;  %5680 = vmatprep.mubr.bf16.mxu1 %v1572_v45  ;;  %v7769_v58 = vld [vmem:[%s7986_s29 + $0xbd0] sm:$0xff]   ;;  %v7807_v45 = vld [vmem:[%s7986_s29 + $0xc18] sm:$0xff]  }
 0x15e   : > { %7153 = vmatprep.subr.bf16.mxu1 %v7733_v61  ;;  %v7771_v60 = vld [vmem:[%s7986_s29 + $0xb90] sm:$0xff]   ;;  %v7772_v61 = vld [vmem:[%s7986_s29 + $0xb58] sm:$0xff]  }
 0x15f   : > { %7132 = vmatpush3.bf16.msra.mxu0 %v7734_v56  ;;  %v7773_v56 = vld [vmem:[%s7986_s29 + $0xbd8] sm:$0xff]   ;;  %v7803_v40 = vld [vmem:[%s7986_s29 + $0xc10] sm:$0xff]  }
 0x160   : > { %7133 = vmatprep.subr.bf16.mxu0 %v7736_v63  ;;  %v7775_v63 = vld [vmem:[%s7986_s29 + $0xb98] sm:$0xff]  }
 0x161   : > { %7154 = vmatpush3.bf16.msra.mxu1 %v7735_v62  ;;  %v7774_v62 = vld [vmem:[%s7986_s29 + $0xb18] sm:$0xff]  }
 0x162   : > { %7155 = vmatprep.subr.bf16.mxu1 %v7737_v0  ;;  %v7776_v0 = vld [vmem:[%s7986_s29 + $0xb60] sm:$0xff]  }
 0x163   : > { %7134 = vmatpush3.bf16.msra.mxu0 %v7738_v1  ;;  %v7777_v1 = vld [vmem:[%s7986_s29 + $0xbe0] sm:$0xff]  }
 0x164   : > { %7135 = vmatprep.subr.bf16.mxu0 %v7740_v3  ;;  %v7779_v3 = vld [vmem:[%s7986_s29 + $0xba0] sm:$0xff]  }
 0x165   : > { %7156 = vmatpush3.bf16.msra.mxu1 %v7739_v2  ;;  %v7778_v2 = vld [vmem:[%s7986_s29 + $0xb20] sm:$0xff]  }
 0x166   : > { %7157 = vmatprep.subr.bf16.mxu1 %v7741_v4  ;;  %v7780_v4 = vld [vmem:[%s7986_s29 + $0xb68] sm:$0xff]  }
 0x167   : > { %7136 = vmatpush3.bf16.msra.mxu0 %v7742_v5  ;;  %v7781_v5 = vld [vmem:[%s7986_s29 + $0xbe8] sm:$0xff]  }
 0x168   : > { %7137 = vmatprep.subr.bf16.mxu0 %v7744_v7  ;;  %v7783_v7 = vld [vmem:[%s7986_s29 + $0xba8] sm:$0xff]  }
 0x169   : > { %7158 = vmatpush3.bf16.msra.mxu1 %v7743_v6  ;;  %v7782_v6 = vld [vmem:[%s7986_s29 + $0xb28] sm:$0xff]  }
 0x16a   : > { %7159 = vmatprep.subr.bf16.mxu1 %v7745_v8  ;;  %v7784_v8 = vld [vmem:[%s7986_s29 + $0xb70] sm:$0xff]  }
 0x16b   : > { %7138 = vmatpush3.bf16.msra.mxu0 %v7746_v9 }
 0x16c   : > { %7139 = vmatprep.subr.bf16.mxu0 %v7748_v11 }
 0x16d   : > { %7160 = vmatpush3.bf16.msra.mxu1 %v7747_v10  ;;  %v6837_v16 = vpop.f32.mrb[12].mxu0  ;;  %v7785_v10 = vld [vmem:[%s7986_s29 + $0xbf0] sm:$0xff]  }
 0x16e   : > { %v6838_v18 = vpop.f32.mrb[13].mxu0  ;;  %7161 = vmatprep.subr.bf16.mxu1 %v7749_v12  ;;  %v7786_v12 = vld [vmem:[%s7986_s29 + $0xb30] sm:$0xff]  }
 0x16f   : > { %v6859_v21 = vpop.f32.mrb[12].mxu1  ;;  %v6839_v22 = vadd.f32 %v6838_v18, %v6837_v16  ;;  %v6840_v23 = vpop.f32.mrb[14].mxu0  ;;  %7140 = vmatpush3.bf16.msra.mxu0 %v7750_v13  ;;  %v7787_v16 = vld [vmem:[%s7986_s29 + $0xbb0] sm:$0xff]  }
 0x170   : > { %v6860_v26 = vpop.f32.mrb[13].mxu1  ;;  %v6841_v27 = vpop.f32.mrb[15].mxu0  ;;  %7141 = vmatprep.subr.bf16.mxu0 %v7752_v15  ;;  %v7789_v23 = vld [vmem:[%s7986_s29 + $0xbf8] sm:$0xff]  }
 0x171   : > { %v5083_v30 = vadd.f32 %v6839_v22, %v8374_v51  ;;  %v6861_v31 = vadd.f32 %v6860_v26, %v6859_v21  ;;  %v6862_v32 = vpop.f32.mrb[14].mxu1  ;;  %7162 = vmatpush3.bf16.msra.mxu1 %v7751_v14  ;;  %v7764_v51 = vld [vmem:[%s7986_s29 + $0xb48] sm:$0xff]   ;;  %v7791_v27 = vld [vmem:[%s7986_s29 + $0xbb8] sm:$0xff]  }
 0x172   : > { %v6863_v35 = vpop.f32.mrb[15].mxu1  ;;  %7163 = vmatprep.subr.bf16.mxu1 %v7753_v17  ;;  %v7788_v17 = vld [vmem:[%s7986_s29 + $0xb78] sm:$0xff]   ;;  %v7796_v32 = vld [vmem:[%s7986_s29 + $0xc80] sm:$0xff]  }
 0x173   : > { %v8416_v38 = vadd.f32 %v6861_v31, %v5083_v30  ;;  %7142 = vmatpush3.bf16.msra.mxu0 %v7754_v19  ;;  %v7794_v30 = vld [vmem:[%s7986_s29 + $0xcc0] sm:$0xff]   ;;  %v7798_v35 = vld [vmem:[%s7986_s29 + $0xcc8] sm:$0xff]  }
 0x174   : > { %7143 = vmatprep.subr.bf16.mxu0 %v7756_v29  ;;  %v7793_v29 = vld [vmem:[%s7986_s29 + $0xc40] sm:$0xff]  }
 0x175   : > { %7164 = vmatpush3.bf16.msra.mxu1 %v7755_v28  ;;  %v1555_v28 = vrot.slane %v8414_v37, %v8024_v43  ;;  %v7795_v31 = vld [vmem:[%s7986_s29 + $0xc00] sm:$0xff]   ;;  %v7800_v37 = vld [vmem:[%s7986_s29 + $0xc88] sm:$0xff]  }
 0x176   : > { %7165 = vmatprep.subr.bf16.mxu1 %v7757_v33 }
 0x177   : > { %7144 = vmatpush3.bf16.msra.mxu0 %v7758_v36  ;;  %v1571_v33 = vcombine.high %v1555_v28, %v1555_v28  ;;  %v7799_v36 = vld [vmem:[%s7986_s29 + $0xc08] sm:$0xff]  }
 0x178   : > { %7173 = vmatprep.subr.bf16.mxu0 %v7760_v42  ;;  %v7805_v42 = vld [vmem:[%s7986_s29 + $0xc58] sm:$0xff]  }
 0x179   : > { %7166 = vmatpush3.bf16.msra.mxu1 %v7759_v39  ;;  %v7802_v39 = vld [vmem:[%s7986_s29 + $0xcd0] sm:$0xff]  }
 0x17a   : > { %5641 = vmatmul.mubr.bf16.vlgmr.msra.gmra.mrb[40].mxu0 %v1548_v41  ;;  %7195 = vmatprep.subr.bf16.mxu1 %v7761_v46  ;;  %v7804_v41 = vld [vmem:[%s7986_s29 + $0xc90] sm:$0xff]   ;;  %v7808_v46 = vld [vmem:[%s7986_s29 + $0xc98] sm:$0xff]  }
 0x17b   : > { %7174 = vmatpush3.bf16.msra.mxu0 %v7762_v47  ;;  %5720 = vmatprep.mubr.bf16.mxu0 %v1569_v48  ;;  %v7809_v47 = vld [vmem:[%s7986_s29 + $0xc60] sm:$0xff]  }
 0x17c   : > { %5681 = vmatmul.mubr.bf16.vlgmr.msra.gmra.mrb[40].mxu1 %v1570_v50  ;;  %7175 = vmatprep.subr.bf16.mxu0 %v7764_v51  ;;  %v7810_v48 = vld [vmem:[%s7986_s29 + $0xce0] sm:$0xff]   ;;  %v7813_v51 = vld [vmem:[%s7986_s29 + $0xc68] sm:$0xff]  }
 0x17d   : > { %7196 = vmatpush3.bf16.msra.mxu1 %v7763_v49  ;;  %5760 = vmatprep.mubr.bf16.mxu1 %v1573_v53  ;;  %v7811_v49 = vld [vmem:[%s7986_s29 + $0xc20] sm:$0xff]   ;;  %v7815_v53 = vld [vmem:[%s7986_s29 + $0xc28] sm:$0xff]  }
 0x17e   : > { %7197 = vmatprep.subr.bf16.mxu1 %v7765_v52  ;;  %v7812_v50 = vld [vmem:[%s7986_s29 + $0xca0] sm:$0xff]   ;;  %v7814_v52 = vld [vmem:[%s7986_s29 + $0xce8] sm:$0xff]  }
 0x17f   : > { %7176 = vmatpush3.bf16.msra.mxu0 %v7766_v54  ;;  %v7816_v54 = vld [vmem:[%s7986_s29 + $0xca8] sm:$0xff]  }
 0x180   : > { %7177 = vmatprep.subr.bf16.mxu0 %v7768_v57 }
 0x181   : > { %7198 = vmatpush3.bf16.msra.mxu1 %v7767_v55  ;;  %v7817_v55 = vld [vmem:[%s7986_s29 + $0xc70] sm:$0xff]  }
 0x182   : > { %7199 = vmatprep.subr.bf16.mxu1 %v7769_v58  ;;  %v7818_v58 = vld [vmem:[%s7986_s29 + $0xcf0] sm:$0xff]  }
 0x183   : > { %7178 = vmatpush3.bf16.msra.mxu0 %v7770_v59 }
 0x184   : > { %7179 = vmatprep.subr.bf16.mxu0 %v7772_v61 }
 0x185   : > { %7200 = vmatpush3.bf16.msra.mxu1 %v7771_v60  ;;  %v7819_v60 = vld [vmem:[%s7986_s29 + $0xc30] sm:$0xff]  }
 0x186   : > { %7201 = vmatprep.subr.bf16.mxu1 %v7773_v56 }
 0x187   : > { %7180 = vmatpush3.bf16.msra.mxu0 %v7774_v62 }
 0x188   : > { %7181 = vmatprep.subr.bf16.mxu0 %v7776_v0  ;;  %v7821_v0 = vld [vmem:[%s7986_s29 + $0xc78] sm:$0xff]  }
 0x189   : > { %7202 = vmatpush3.bf16.msra.mxu1 %v7775_v63  ;;  %v7820_v63 = vld [vmem:[%s7986_s29 + $0xcb0] sm:$0xff]  }
 0x18a   : > { %7203 = vmatprep.subr.bf16.mxu1 %v7777_v1  ;;  %v246_v1 = vld [vmem:[%s7981_s25 + $0x30] sm:$0xff] }
 0x18b   : > { %7182 = vmatpush3.bf16.msra.mxu0 %v7778_v2 }
 0x18c   : > { %7183 = vmatprep.subr.bf16.mxu0 %v7780_v4  ;;  %v1581_v4 = vrot.slane %v246_v1, %v8024_v43 }
 0x18d   : > { %7204 = vmatpush3.bf16.msra.mxu1 %v7779_v3  ;;  %v6881_v9 = vpop.f32.mrb[16].mxu0 }
 0x18e   : > { %v6882_v11 = vpop.f32.mrb[17].mxu0  ;;  %7205 = vmatprep.subr.bf16.mxu1 %v7781_v5  ;;  %v1574_v5 = vcombine.high %v246_v1, %v246_v1  ;;  %v7855_v1 = vld [vmem:[%s7986_s29 + $0xd38] sm:$0xff]  }
 0x18f   : > { %v6903_v13 = vpop.f32.mrb[16].mxu1  ;;  %v6883_v14 = vadd.f32 %v6882_v11, %v6881_v9  ;;  %v6884_v15 = vpop.f32.mrb[18].mxu0  ;;  %7184 = vmatpush3.bf16.msra.mxu0 %v7782_v6  ;;  %v7822_v9 = vld [vmem:[%s7986_s29 + $0xcf8] sm:$0xff]  }
 0x190   : > { %v6904_v18 = vpop.f32.mrb[17].mxu1  ;;  %v6885_v19 = vpop.f32.mrb[19].mxu0  ;;  %7185 = vmatprep.subr.bf16.mxu0 %v7784_v8  ;;  %v7823_v11 = vld [vmem:[%s7986_s29 + $0xc38] sm:$0xff]  }
 0x191   : > { %v5163_v20 = vadd.f32 %v6883_v14, %v8416_v38  ;;  %v6905_v21 = vadd.f32 %v6904_v18, %v6903_v13  ;;  %v6906_v22 = vpop.f32.mrb[18].mxu1  ;;  %7206 = vmatpush3.bf16.msra.mxu1 %v7783_v7  ;;  %v7801_v38 = vld [vmem:[%s7986_s29 + $0xc50] sm:$0xff]   ;;  %v8496_v13 = vrot.slane %v1574_v5, %v8024_v43  ;;  %v7824_v15 = vld [vmem:[%s7986_s29 + $0xcb8] sm:$0xff]   ;;  %v7825_v18 = vld [vmem:[%s7986_s29 + $0xd40] sm:$0xff]  }
 0x192   : > { %v6907_v24 = vpop.f32.mrb[19].mxu1  ;;  %7207 = vmatprep.subr.bf16.mxu1 %v7785_v10  ;;  %v7827_v22 = vld [vmem:[%s7986_s29 + $0xd00] sm:$0xff]  }
 0x193   : > { %v8456_v26 = vadd.f32 %v6905_v21, %v5163_v20  ;;  %7186 = vmatpush3.bf16.msra.mxu0 %v7786_v12  ;;  %v1589_v12 = vcombine.high %v1581_v4, %v1581_v4  ;;  %v1590_v19 = vcombine.high %v8496_v13, %v8496_v13  ;;  %v7826_v20 = vld [vmem:[%s7986_s29 + $0xdc0] sm:$0xff]  }
 0x194   : > { %7187 = vmatprep.subr.bf16.mxu0 %v7788_v17  ;;  %v1597_v17 = vrot.slane %v1581_v4, %v8024_v43  ;;  %v7828_v24 = vld [vmem:[%s7986_s29 + $0xd80] sm:$0xff]   ;;  %v1604_v4 = vrot.slane %v8496_v13, %v8024_v43  ;;  %v7865_v13 = vld [vmem:[%s7986_s29 + $0xe88] sm:$0xff]  }
 0x195   : > { %7208 = vmatpush3.bf16.msra.mxu1 %v7787_v16  ;;  %v1611_v16 = vrot.slane %v1589_v12, %v8024_v43  ;;  %v7858_v5 = vld [vmem:[%s7986_s29 + $0xe40] sm:$0xff]   ;;  %v7864_v12 = vld [vmem:[%s7986_s29 + $0xe08] sm:$0xff]  }
 0x196   : > { %7209 = vmatprep.subr.bf16.mxu1 %v7789_v23  ;;  %v1618_v23 = vrot.slane %v1590_v19, %v8024_v43  ;;  %v7871_v19 = vld [vmem:[%s7986_s29 + $0xed8] sm:$0xff]  }
 0x197   : > { %7188 = vmatpush3.bf16.msra.mxu0 %v7790_v25  ;;  %v1621_v21 = vcombine.high %v1611_v16, %v1611_v16  ;;  %v1619_v25 = vcombine.high %v1597_v17, %v1597_v17 }
 0x198   : > { %7217 = vmatprep.subr.bf16.mxu0 %v7793_v29  ;;  %v7831_v29 = vld [vmem:[%s7986_s29 + $0xd08] sm:$0xff]  }
 0x199   : > { %7210 = vmatpush3.bf16.msra.mxu1 %v7791_v27  ;;  %v7830_v27 = vld [vmem:[%s7986_s29 + $0xdc8] sm:$0xff]  }
 0x19a   : > { %5721 = vmatmul.mubr.bf16.vlgmr.msra.gmra.mrb[44].mxu0 %v1555_v28  ;;  %7239 = vmatprep.subr.bf16.mxu1 %v7794_v30  ;;  %v1622_v28 = vcombine.high %v1618_v23, %v1618_v23  ;;  %v7832_v30 = vld [vmem:[%s7986_s29 + $0xd88] sm:$0xff]  }
 0x19b   : > { %7218 = vmatpush3.bf16.msra.mxu0 %v7795_v31  ;;  %5800 = vmatprep.mubr.bf16.mxu0 %v1611_v16  ;;  %v7833_v31 = vld [vmem:[%s7986_s29 + $0xd50] sm:$0xff]  }
 0x19c   : > { %5761 = vmatmul.mubr.bf16.vlgmr.msra.gmra.mrb[44].mxu1 %v1571_v33  ;;  %7219 = vmatprep.subr.bf16.mxu0 %v7797_v34  ;;  %v7835_v33 = vld [vmem:[%s7986_s29 + $0xd10] sm:$0xff]  }
 0x19d   : > { %7240 = vmatpush3.bf16.msra.mxu1 %v7796_v32  ;;  %5840 = vmatprep.mubr.bf16.mxu1 %v1621_v21  ;;  %v7834_v32 = vld [vmem:[%s7986_s29 + $0xdd0] sm:$0xff]   ;;  %v7873_v21 = vld [vmem:[%s7986_s29 + $0xe98] sm:$0xff]  }
 0x19e   : > { %7241 = vmatprep.subr.bf16.mxu1 %v7798_v35  ;;  %v7836_v34 = vld [vmem:[%s7986_s29 + $0xd90] sm:$0xff]   ;;  %v7837_v35 = vld [vmem:[%s7986_s29 + $0xd58] sm:$0xff]  }
 0x19f   : > { %7220 = vmatpush3.bf16.msra.mxu0 %v7799_v36  ;;  %v7838_v36 = vld [vmem:[%s7986_s29 + $0xdd8] sm:$0xff]   ;;  %v7868_v16 = vld [vmem:[%s7986_s29 + $0xe10] sm:$0xff]  }
 0x1a0   : > { %7221 = vmatprep.subr.bf16.mxu0 %v7801_v38  ;;  %v7840_v38 = vld [vmem:[%s7986_s29 + $0xd98] sm:$0xff]  }
 0x1a1   : > { %7242 = vmatpush3.bf16.msra.mxu1 %v7800_v37  ;;  %v7839_v37 = vld [vmem:[%s7986_s29 + $0xd18] sm:$0xff]  }
 0x1a2   : > { %7243 = vmatprep.subr.bf16.mxu1 %v7802_v39  ;;  %v7841_v39 = vld [vmem:[%s7986_s29 + $0xd60] sm:$0xff]  }
 0x1a3   : > { %7222 = vmatpush3.bf16.msra.mxu0 %v7803_v40  ;;  %v7842_v40 = vld [vmem:[%s7986_s29 + $0xde0] sm:$0xff]  }
 0x1a4   : > { %7223 = vmatprep.subr.bf16.mxu0 %v7805_v42  ;;  %v7844_v42 = vld [vmem:[%s7986_s29 + $0xda0] sm:$0xff]  }
 0x1a5   : > { %7244 = vmatpush3.bf16.msra.mxu1 %v7804_v41  ;;  %v7843_v41 = vld [vmem:[%s7986_s29 + $0xd20] sm:$0xff]  }
 0x1a6   : > { %7245 = vmatprep.subr.bf16.mxu1 %v7806_v44  ;;  %v7845_v44 = vld [vmem:[%s7986_s29 + $0xd68] sm:$0xff]  }
 0x1a7   : > { %7224 = vmatpush3.bf16.msra.mxu0 %v7807_v45  ;;  %v7846_v45 = vld [vmem:[%s7986_s29 + $0xde8] sm:$0xff]  }
 0x1a8   : > { %7225 = vmatprep.subr.bf16.mxu0 %v7809_v47  ;;  %v7848_v47 = vld [vmem:[%s7986_s29 + $0xda8] sm:$0xff]  }
 0x1a9   : > { %7246 = vmatpush3.bf16.msra.mxu1 %v7808_v46  ;;  %v7847_v46 = vld [vmem:[%s7986_s29 + $0xd28] sm:$0xff]  }
 0x1aa   : > { %7247 = vmatprep.subr.bf16.mxu1 %v7810_v48  ;;  %v7849_v48 = vld [vmem:[%s7986_s29 + $0xd70] sm:$0xff]  }
 0x1ab   : > { %7226 = vmatpush3.bf16.msra.mxu0 %v7811_v49 }
 0x1ac   : > { %7227 = vmatprep.subr.bf16.mxu0 %v7813_v51 }
 0x1ad   : > { %7248 = vmatpush3.bf16.msra.mxu1 %v7812_v50  ;;  %v6925_v57 = vpop.f32.mrb[20].mxu0  ;;  %v7850_v50 = vld [vmem:[%s7986_s29 + $0xdf0] sm:$0xff]  }
 0x1ae   : > { %v6926_v59 = vpop.f32.mrb[21].mxu0  ;;  %7249 = vmatprep.subr.bf16.mxu1 %v7814_v52  ;;  %v7851_v52 = vld [vmem:[%s7986_s29 + $0xd30] sm:$0xff]  }
 0x1af   : > { %v6947_v61 = vpop.f32.mrb[20].mxu1  ;;  %v6927_v56 = vadd.f32 %v6926_v59, %v6925_v57  ;;  %v6928_v62 = vpop.f32.mrb[22].mxu0  ;;  %7228 = vmatpush3.bf16.msra.mxu0 %v7815_v53  ;;  %v7852_v57 = vld [vmem:[%s7986_s29 + $0xdb0] sm:$0xff]  }
 0x1b0   : > { %v6948_v2 = vpop.f32.mrb[21].mxu1  ;;  %v6929_v3 = vpop.f32.mrb[23].mxu0  ;;  %7229 = vmatprep.subr.bf16.mxu0 %v7817_v55 }
 0x1b1   : > { %v5243_v6 = vadd.f32 %v6927_v56, %v8456_v26  ;;  %v6949_v7 = vadd.f32 %v6948_v2, %v6947_v61  ;;  %v6950_v8 = vpop.f32.mrb[22].mxu1  ;;  %7250 = vmatpush3.bf16.msra.mxu1 %v7816_v54  ;;  %v7829_v26 = vld [vmem:[%s7986_s29 + $0xd48] sm:$0xff]   ;;  %v7856_v3 = vld [vmem:[%s7986_s29 + $0xdb8] sm:$0xff]  }
 0x1b2   : > { %v6951_v10 = vpop.f32.mrb[23].mxu1  ;;  %7251 = vmatprep.subr.bf16.mxu1 %v7818_v58  ;;  %v7853_v58 = vld [vmem:[%s7986_s29 + $0xd78] sm:$0xff]   ;;  %v7861_v8 = vld [vmem:[%s7986_s29 + $0xe80] sm:$0xff]  }
 0x1b3   : > { %v8498_v14 = vadd.f32 %v6949_v7, %v5243_v6  ;;  %7230 = vmatpush3.bf16.msra.mxu0 %v7819_v60  ;;  %v7859_v6 = vld [vmem:[%s7986_s29 + $0xec0] sm:$0xff]   ;;  %v7862_v10 = vld [vmem:[%s7986_s29 + $0xe48] sm:$0xff]  }
 0x1b4   : > { %7231 = vmatprep.subr.bf16.mxu0 %v7821_v0  ;;  %v7860_v7 = vld [vmem:[%s7986_s29 + $0xe00] sm:$0xff]  }
 0x1b5   : > { %7252 = vmatpush3.bf16.msra.mxu1 %v7820_v63  ;;  %v7854_v63 = vld [vmem:[%s7986_s29 + $0xdf8] sm:$0xff]  }
 0x1b6   : > { %7253 = vmatprep.subr.bf16.mxu1 %v7822_v9  ;;  %v1620_v9 = vcombine.high %v1604_v4, %v1604_v4 }
 0x1b7   : > { %7232 = vmatpush3.bf16.msra.mxu0 %v7823_v11  ;;  %v7863_v11 = vld [vmem:[%s7986_s29 + $0xec8] sm:$0xff]  }
 0x1b8   : > { %7261 = vmatprep.subr.bf16.mxu0 %v7825_v18  ;;  %v7870_v18 = vld [vmem:[%s7986_s29 + $0xe58] sm:$0xff]  }
 0x1b9   : > { %7254 = vmatpush3.bf16.msra.mxu1 %v7824_v15  ;;  %v7867_v15 = vld [vmem:[%s7986_s29 + $0xed0] sm:$0xff]  }
 0x1ba   : > { %5801 = vmatmul.mubr.bf16.vlgmr.msra.gmra.mrb[48].mxu0 %v1597_v17  ;;  %7283 = vmatprep.subr.bf16.mxu1 %v7826_v20  ;;  %v7869_v17 = vld [vmem:[%s7986_s29 + $0xe90] sm:$0xff]   ;;  %v7872_v20 = vld [vmem:[%s7986_s29 + $0xe18] sm:$0xff]  }
 0x1bb   : > { %7262 = vmatpush3.bf16.msra.mxu0 %v7827_v22  ;;  %5880 = vmatprep.mubr.bf16.mxu0 %v1618_v23  ;;  %v7874_v22 = vld [vmem:[%s7986_s29 + $0xe60] sm:$0xff]  }
 0x1bc   : > { %5841 = vmatmul.mubr.bf16.vlgmr.msra.gmra.mrb[48].mxu1 %v1619_v25  ;;  %7263 = vmatprep.subr.bf16.mxu0 %v7829_v26  ;;  %v7875_v23 = vld [vmem:[%s7986_s29 + $0xee0] sm:$0xff]   ;;  %v7878_v26 = vld [vmem:[%s7986_s29 + $0xe68] sm:$0xff]  }
 0x1bd   : > { %7284 = vmatpush3.bf16.msra.mxu1 %v7828_v24  ;;  %5920 = vmatprep.mubr.bf16.mxu1 %v1622_v28  ;;  %v7876_v24 = vld [vmem:[%s7986_s29 + $0xe20] sm:$0xff]   ;;  %v7880_v28 = vld [vmem:[%s7986_s29 + $0xe28] sm:$0xff]  }
 0x1be   : > { %7285 = vmatprep.subr.bf16.mxu1 %v7830_v27  ;;  %v7877_v25 = vld [vmem:[%s7986_s29 + $0xea0] sm:$0xff]   ;;  %v7879_v27 = vld [vmem:[%s7986_s29 + $0xee8] sm:$0xff]  }
 0x1bf   : > { %7264 = vmatpush3.bf16.msra.mxu0 %v7831_v29  ;;  %v7881_v29 = vld [vmem:[%s7986_s29 + $0xea8] sm:$0xff]  }
 0x1c0   : > { %7265 = vmatprep.subr.bf16.mxu0 %v7833_v31 }
 0x1c1   : > { %7286 = vmatpush3.bf16.msra.mxu1 %v7832_v30  ;;  %v7882_v30 = vld [vmem:[%s7986_s29 + $0xe70] sm:$0xff]  }
 0x1c2   : > { %7287 = vmatprep.subr.bf16.mxu1 %v7834_v32  ;;  %v7883_v32 = vld [vmem:[%s7986_s29 + $0xef0] sm:$0xff]  }
 0x1c3   : > { %7266 = vmatpush3.bf16.msra.mxu0 %v7835_v33 }
 0x1c4   : > { %7267 = vmatprep.subr.bf16.mxu0 %v7837_v35 }
 0x1c5   : > { %7288 = vmatpush3.bf16.msra.mxu1 %v7836_v34  ;;  %v7884_v34 = vld [vmem:[%s7986_s29 + $0xe30] sm:$0xff]  }
 0x1c6   : > { %7289 = vmatprep.subr.bf16.mxu1 %v7838_v36 }
 0x1c7   : > { %7268 = vmatpush3.bf16.msra.mxu0 %v7839_v37 }
 0x1c8   : > { %7269 = vmatprep.subr.bf16.mxu0 %v7841_v39  ;;  %v7886_v39 = vld [vmem:[%s7986_s29 + $0xe78] sm:$0xff]  }
 0x1c9   : > { %7290 = vmatpush3.bf16.msra.mxu1 %v7840_v38  ;;  %v7885_v38 = vld [vmem:[%s7986_s29 + $0xeb0] sm:$0xff]  }
 0x1ca   : > { %7291 = vmatprep.subr.bf16.mxu1 %v7842_v40 }
 0x1cb   : > { %7270 = vmatpush3.bf16.msra.mxu0 %v7843_v41 }
 0x1cc   : > { %7271 = vmatprep.subr.bf16.mxu0 %v7845_v44 }
 0x1cd   : > { %7292 = vmatpush3.bf16.msra.mxu1 %v7844_v42  ;;  %v6969_v49 = vpop.f32.mrb[24].mxu0 }
 0x1ce   : > { %v6970_v51 = vpop.f32.mrb[25].mxu0  ;;  %7293 = vmatprep.subr.bf16.mxu1 %v7846_v45 }
 0x1cf   : > { %v6991_v53 = vpop.f32.mrb[24].mxu1  ;;  %v6971_v54 = vadd.f32 %v6970_v51, %v6969_v49  ;;  %v6972_v55 = vpop.f32.mrb[26].mxu0  ;;  %7272 = vmatpush3.bf16.msra.mxu0 %v7847_v46  ;;  %v247_v46 = vld [vmem:[%s7981_s25 + $0x38] sm:$0xff] }
 0x1d0   : > { %v6992_v59 = vpop.f32.mrb[25].mxu1  ;;  %v6973_v60 = vpop.f32.mrb[27].mxu0  ;;  %7273 = vmatprep.subr.bf16.mxu0 %v7849_v48  ;;  %v7887_v48 = vld [vmem:[%s7986_s29 + $0xef8] sm:$0xff]   ;;  %v1630_v49 = vrot.slane %v247_v46, %v8024_v43  ;;  %v7890_v55 = vld [vmem:[%s7986_s29 + $0xf40] sm:$0xff]  }
 0x1d1   : > { %v5323_v61 = vadd.f32 %v6971_v54, %v8498_v14  ;;  %v6993_v56 = vadd.f32 %v6992_v59, %v6991_v53  ;;  %v6994_v62 = vpop.f32.mrb[26].mxu1  ;;  %7294 = vmatpush3.bf16.msra.mxu1 %v7848_v47  ;;  %v7866_v14 = vld [vmem:[%s7986_s29 + $0xe50] sm:$0xff]   ;;  %v7891_v60 = vld [vmem:[%s7986_s29 + $0xfc0] sm:$0xff]  }
 0x1d2   : > { %v6995_v0 = vpop.f32.mrb[27].mxu1  ;;  %7295 = vmatprep.subr.bf16.mxu1 %v7850_v50  ;;  %v1623_v50 = vcombine.high %v247_v46, %v247_v46  ;;  %v1638_v53 = vcombine.high %v1630_v49, %v1630_v49  ;;  %v1646_v54 = vrot.slane %v1630_v49, %v8024_v43 }
 0x1d3   : > { %v8538_v2 = vadd.f32 %v6993_v56, %v5323_v61  ;;  %7274 = vmatpush3.bf16.msra.mxu0 %v7851_v52  ;;  %v7888_v52 = vld [vmem:[%s7986_s29 + $0xe38] sm:$0xff]   ;;  %v7892_v56 = vld [vmem:[%s7986_s29 + $0xf00] sm:$0xff]   ;;  %v7894_v0 = vld [vmem:[%s7986_s29 + $0xf48] sm:$0xff]  }
 0x1d4   : > { %7275 = vmatprep.subr.bf16.mxu0 %v7853_v58  ;;  %v7889_v58 = vld [vmem:[%s7986_s29 + $0xeb8] sm:$0xff]   ;;  %v1660_v59 = vrot.slane %v1638_v53, %v8024_v43 }
 0x1d5   : > { %7296 = vmatpush3.bf16.msra.mxu1 %v7852_v57  ;;  %v8582_v57 = vrot.slane %v1623_v50, %v8024_v43 }
 0x1d6   : > { %7297 = vmatprep.subr.bf16.mxu1 %v7854_v63  ;;  %v1670_v62 = vcombine.high %v1660_v59, %v1660_v59  ;;  %v1668_v63 = vcombine.high %v1646_v54, %v1646_v54 }
 0x1d7   : > { %7276 = vmatpush3.bf16.msra.mxu0 %v7855_v1  ;;  %v1639_v61 = vcombine.high %v8582_v57, %v8582_v57 }
 0x1d8   : > { %7305 = vmatprep.subr.bf16.mxu0 %v7858_v5  ;;  %v7896_v5 = vld [vmem:[%s7986_s29 + $0xf08] sm:$0xff]  }
 0x1d9   : > { %7298 = vmatpush3.bf16.msra.mxu1 %v7856_v3  ;;  %v1667_v1 = vrot.slane %v1639_v61, %v8024_v43  ;;  %v7895_v3 = vld [vmem:[%s7986_s29 + $0xfc8] sm:$0xff]  }
 0x1da   : > { %5881 = vmatmul.mubr.bf16.vlgmr.msra.gmra.mrb[52].mxu0 %v1604_v4  ;;  %7327 = vmatprep.subr.bf16.mxu1 %v7859_v6  ;;  %v7898_v6 = vld [vmem:[%s7986_s29 + $0xf50] sm:$0xff]  }
 0x1db   : > { %7306 = vmatpush3.bf16.msra.mxu0 %v7860_v7  ;;  %5960 = vmatprep.mubr.bf16.mxu0 %v1660_v59  ;;  %v1671_v4 = vcombine.high %v1667_v1, %v1667_v1  ;;  %v7897_v7 = vld [vmem:[%s7986_s29 + $0xf88] sm:$0xff]  }
 0x1dc   : > { %5921 = vmatmul.mubr.bf16.vlgmr.msra.gmra.mrb[52].mxu1 %v1620_v9  ;;  %7307 = vmatprep.subr.bf16.mxu0 %v7862_v10  ;;  %v7900_v9 = vld [vmem:[%s7986_s29 + $0xf10] sm:$0xff]   ;;  %v7902_v10 = vld [vmem:[%s7986_s29 + $0xf58] sm:$0xff]  }
 0x1dd   : > { %7328 = vmatpush3.bf16.msra.mxu1 %v7861_v8  ;;  %6000 = vmatprep.mubr.bf16.mxu1 %v1670_v62  ;;  %v7899_v8 = vld [vmem:[%s7986_s29 + $0xfd0] sm:$0xff]  }
 0x1de   : > { %7329 = vmatprep.subr.bf16.mxu1 %v7863_v11  ;;  %v7901_v11 = vld [vmem:[%s7986_s29 + $0xf90] sm:$0xff]  }
 0x1df   : > { %7308 = vmatpush3.bf16.msra.mxu0 %v7864_v12  ;;  %v7903_v12 = vld [vmem:[%s7986_s29 + $0xfd8] sm:$0xff]  }
 0x1e0   : > { %7309 = vmatprep.subr.bf16.mxu0 %v7866_v14  ;;  %v7906_v14 = vld [vmem:[%s7986_s29 + $0xf60] sm:$0xff]  }
 0x1e1   : > { %7330 = vmatpush3.bf16.msra.mxu1 %v7865_v13  ;;  %v7904_v13 = vld [vmem:[%s7986_s29 + $0xf18] sm:$0xff]  }
 0x1e2   : > { %7331 = vmatprep.subr.bf16.mxu1 %v7867_v15  ;;  %v7905_v15 = vld [vmem:[%s7986_s29 + $0xf98] sm:$0xff]  }
 0x1e3   : > { %7310 = vmatpush3.bf16.msra.mxu0 %v7868_v16  ;;  %v7907_v16 = vld [vmem:[%s7986_s29 + $0xfe0] sm:$0xff]  }
 0x1e4   : > { %7311 = vmatprep.subr.bf16.mxu0 %v7870_v18  ;;  %v7910_v18 = vld [vmem:[%s7986_s29 + $0xf68] sm:$0xff]  }
 0x1e5   : > { %7332 = vmatpush3.bf16.msra.mxu1 %v7869_v17  ;;  %v7908_v17 = vld [vmem:[%s7986_s29 + $0xf20] sm:$0xff]  }
 0x1e6   : > { %7333 = vmatprep.subr.bf16.mxu1 %v7871_v19  ;;  %v7909_v19 = vld [vmem:[%s7986_s29 + $0xfa0] sm:$0xff]  }
 0x1e7   : > { %7312 = vmatpush3.bf16.msra.mxu0 %v7872_v20  ;;  %v7911_v20 = vld [vmem:[%s7986_s29 + $0xfe8] sm:$0xff]  }
 0x1e8   : > { %7313 = vmatprep.subr.bf16.mxu0 %v7874_v22  ;;  %v7914_v22 = vld [vmem:[%s7986_s29 + $0xf70] sm:$0xff]  }
 0x1e9   : > { %7334 = vmatpush3.bf16.msra.mxu1 %v7873_v21  ;;  %v7912_v21 = vld [vmem:[%s7986_s29 + $0xf28] sm:$0xff]  }
 0x1ea   : > { %7335 = vmatprep.subr.bf16.mxu1 %v7875_v23 }
 0x1eb   : > { %7314 = vmatpush3.bf16.msra.mxu0 %v7876_v24  ;;  %v7913_v24 = vld [vmem:[%s7986_s29 + $0xfa8] sm:$0xff]  }
 0x1ec   : > { %7315 = vmatprep.subr.bf16.mxu0 %v7878_v26  ;;  %v7915_v26 = vld [vmem:[%s7986_s29 + $0xff0] sm:$0xff]  }
 0x1ed   : > { %7336 = vmatpush3.bf16.msra.mxu1 %v7877_v25  ;;  %v7013_v31 = vpop.f32.mrb[28].mxu0 }
 0x1ee   : > { %v7014_v33 = vpop.f32.mrb[29].mxu0  ;;  %7337 = vmatprep.subr.bf16.mxu1 %v7879_v27 }
 0x1ef   : > { %v7035_v35 = vpop.f32.mrb[28].mxu1  ;;  %v7015_v36 = vadd.f32 %v7014_v33, %v7013_v31  ;;  %v7016_v37 = vpop.f32.mrb[30].mxu0  ;;  %7316 = vmatpush3.bf16.msra.mxu0 %v7880_v28  ;;  %v7918_v31 = vld [vmem:[%s7986_s29 + $0xf78] sm:$0xff]  }
 0x1f0   : > { %v7036_v40 = vpop.f32.mrb[29].mxu1  ;;  %v7017_v41 = vpop.f32.mrb[31].mxu0  ;;  %7317 = vmatprep.subr.bf16.mxu0 %v7882_v30  ;;  %v7916_v30 = vld [vmem:[%s7986_s29 + $0xf30] sm:$0xff]  }
 0x1f1   : > { %v5403_v42 = vadd.f32 %v7015_v36, %v8538_v2  ;;  %v7037_v44 = vadd.f32 %v7036_v40, %v7035_v35  ;;  %v7038_v45 = vpop.f32.mrb[30].mxu1  ;;  %7338 = vmatpush3.bf16.msra.mxu1 %v7881_v29  ;;  %v7893_v2 = vld [vmem:[%s7986_s29 + $0xf80] sm:$0xff]   ;;  %v7917_v37 = vld [vmem:[%s7986_s29 + $0xfb0] sm:$0xff]   ;;  %v7920_v41 = vld [vmem:[%s7986_s29 + $0xf38] sm:$0xff]  }
 0x1f2   : > { %v7039_v47 = vpop.f32.mrb[31].mxu1  ;;  %7339 = vmatprep.subr.bf16.mxu1 %v7883_v32 }
 0x1f3   : > { %v8576_v51 = vadd.f32 %v7037_v44, %v5403_v42  ;;  %7318 = vmatpush3.bf16.msra.mxu0 %v7884_v34  ;;  %v1653_v42 = vrot.slane %v8582_v57, %v8024_v43  ;;  %v7921_v44 = vld [vmem:[%s7986_s29 + $0xfb8] sm:$0xff]  }
 0x1f4   : > { %7319 = vmatprep.subr.bf16.mxu0 %v7886_v39  ;;  %v7919_v39 = vld [vmem:[%s7986_s29 + $0xff8] sm:$0xff]  }
 0x1f5   : > { %7340 = vmatpush3.bf16.msra.mxu1 %v7885_v38  ;;  %v1669_v45 = vcombine.high %v1653_v42, %v1653_v42 }
 0x1f6   : > { %7341 = vmatprep.subr.bf16.mxu1 %v7887_v48 }
 0x1f7   : > { %7320 = vmatpush3.bf16.msra.mxu0 %v7888_v52 }
 0x1f8   : > { %7349 = vmatprep.subr.bf16.mxu0 %v7890_v55 }
 0x1f9   : > { %7342 = vmatpush3.bf16.msra.mxu1 %v7889_v58 }
 0x1fa   : > { %5961 = vmatmul.mubr.bf16.vlgmr.msra.gmra.mrb[56].mxu0 %v1646_v54  ;;  %7371 = vmatprep.subr.bf16.mxu1 %v7891_v60 }
 0x1fb   : > { %7350 = vmatpush3.bf16.msra.mxu0 %v7892_v56  ;;  %6040 = vmatprep.mubr.bf16.mxu0 %v1667_v1 }
 0x1fc   : > { %6001 = vmatmul.mubr.bf16.vlgmr.msra.gmra.mrb[56].mxu1 %v1668_v63  ;;  %7351 = vmatprep.subr.bf16.mxu0 %v7894_v0 }
 0x1fd   : > { %7372 = vmatpush3.bf16.msra.mxu1 %v7893_v2  ;;  %6080 = vmatprep.mubr.bf16.mxu1 %v1671_v4 }
 0x1fe   : > { %7373 = vmatprep.subr.bf16.mxu1 %v7895_v3 }
 0x1ff   : > { %7352 = vmatpush3.bf16.msra.mxu0 %v7896_v5 }
 0x200   : > { %7353 = vmatprep.subr.bf16.mxu0 %v7898_v6 }
 0x201   : > { %7374 = vmatpush3.bf16.msra.mxu1 %v7897_v7 }
 0x202   : > { %7375 = vmatprep.subr.bf16.mxu1 %v7899_v8 }
 0x203   : > { %7354 = vmatpush3.bf16.msra.mxu0 %v7900_v9 }
 0x204   : > { %7355 = vmatprep.subr.bf16.mxu0 %v7902_v10 }
 0x205   : > { %7376 = vmatpush3.bf16.msra.mxu1 %v7901_v11 }
 0x206   : > { %7377 = vmatprep.subr.bf16.mxu1 %v7903_v12 }
 0x207   : > { %7356 = vmatpush3.bf16.msra.mxu0 %v7904_v13 }
 0x208   : > { %7357 = vmatprep.subr.bf16.mxu0 %v7906_v14 }
 0x209   : > { %7378 = vmatpush3.bf16.msra.mxu1 %v7905_v15 }
 0x20a   : > { %7379 = vmatprep.subr.bf16.mxu1 %v7907_v16 }
 0x20b   : > { %7358 = vmatpush3.bf16.msra.mxu0 %v7908_v17 }
 0x20c   : > { %7359 = vmatprep.subr.bf16.mxu0 %v7910_v18 }
 0x20d   : > { %7380 = vmatpush3.bf16.msra.mxu1 %v7909_v19  ;;  %v7057_v23 = vpop.f32.mrb[32].mxu0 }
 0x20e   : > { %v7058_v25 = vpop.f32.mrb[33].mxu0  ;;  %7381 = vmatprep.subr.bf16.mxu1 %v7911_v20 }
 0x20f   : > { %v7079_v27 = vpop.f32.mrb[32].mxu1  ;;  %v7059_v28 = vadd.f32 %v7058_v25, %v7057_v23  ;;  %v7060_v29 = vpop.f32.mrb[34].mxu0  ;;  %7360 = vmatpush3.bf16.msra.mxu0 %v7912_v21 }
 0x210   : > { %v7080_v32 = vpop.f32.mrb[33].mxu1  ;;  %v7061_v33 = vpop.f32.mrb[35].mxu0  ;;  %7361 = vmatprep.subr.bf16.mxu0 %v7914_v22 }
 0x211   : > { %v5483_v34 = vadd.f32 %v7059_v28, %v8576_v51  ;;  %v7081_v35 = vadd.f32 %v7080_v32, %v7079_v27  ;;  %v7082_v36 = vpop.f32.mrb[34].mxu1  ;;  %7382 = vmatpush3.bf16.msra.mxu1 %v7913_v24 }
 0x212   : > { %v7083_v38 = vpop.f32.mrb[35].mxu1  ;;  %7383 = vmatprep.subr.bf16.mxu1 %v7915_v26 }
 0x213   : > { %v5523_v40 = vadd.f32 %v7081_v35, %v5483_v34  ;;  %7362 = vmatpush3.bf16.msra.mxu0 %v7916_v30 }
 0x214   : > { %7363 = vmatprep.subr.bf16.mxu0 %v7918_v31 }
 0x215   : > { %7384 = vmatpush3.bf16.msra.mxu1 %v7917_v37 }
 0x216   : > { %7385 = vmatprep.subr.bf16.mxu1 %v7919_v39 }
 0x217   : > { %7364 = vmatpush3.bf16.msra.mxu0 %v7920_v41 }
 0x219   : > { %7386 = vmatpush3.bf16.msra.mxu1 %v7921_v44 }
 0x21a   : > { %6041 = vmatmul.mubr.bf16.vlgmr.msra.gmra.mrb[60].mxu0 %v1653_v42 }
 0x21c   : > { %6081 = vmatmul.mubr.bf16.vlgmr.msra.gmra.mrb[60].mxu1 %v1669_v45 }
 0x22d   : > { %v7101_v46 = vpop.f32.mrb[36].mxu0 }
 0x22e   : > { %v7102_v47 = vpop.f32.mrb[37].mxu0 }
 0x22f   : > { %v7123_v48 = vpop.f32.mrb[36].mxu1  ;;  %v7103_v49 = vadd.f32 %v7102_v47, %v7101_v46  ;;  %v7104_v50 = vpop.f32.mrb[38].mxu0 }
 0x230   : > { %v7124_v51 = vpop.f32.mrb[37].mxu1  ;;  %v7105_v52 = vpop.f32.mrb[39].mxu0 }
 0x231   : > { %v5563_v53 = vadd.f32 %v7103_v49, %v5523_v40  ;;  %v7125_v54 = vadd.f32 %v7124_v51, %v7123_v48  ;;  %v7126_v55 = vpop.f32.mrb[38].mxu1 }
 0x232   : > { %v7127_v58 = vpop.f32.mrb[39].mxu1 }
 0x233   : > { %v5603_v43 = vadd.f32 %v7125_v54, %v5563_v53 }
 0x24d   : > { %v7145_v57 = vpop.f32.mrb[40].mxu0 }
 0x24e   : > { %v7146_v59 = vpop.f32.mrb[41].mxu0 }
 0x24f   : > { %v7167_v60 = vpop.f32.mrb[40].mxu1  ;;  %v7147_v61 = vadd.f32 %v7146_v59, %v7145_v57  ;;  %v7148_v56 = vpop.f32.mrb[42].mxu0 }
 0x250   : > { %v7168_v62 = vpop.f32.mrb[41].mxu1  ;;  %v7149_v63 = vpop.f32.mrb[43].mxu0 }
 0x251   : > { %v5643_v0 = vadd.f32 %v7147_v61, %v5603_v43  ;;  %v7169_v1 = vadd.f32 %v7168_v62, %v7167_v60  ;;  %v7170_v2 = vpop.f32.mrb[42].mxu1  ;;  %v239_v63 = vld [vmem:[#allocation2] sm:$0x3] }
 0x252   : > { %v7171_v3 = vpop.f32.mrb[43].mxu1 }
 0x253   : > { %v5683_v4 = vadd.f32 %v7169_v1, %v5643_v0 }
 0x26d   : > { %v7189_v5 = vpop.f32.mrb[44].mxu0 }
 0x26e   : > { %v7190_v6 = vpop.f32.mrb[45].mxu0 }
 0x26f   : > { %v7211_v7 = vpop.f32.mrb[44].mxu1  ;;  %v7191_v8 = vadd.f32 %v7190_v6, %v7189_v5  ;;  %v7192_v9 = vpop.f32.mrb[46].mxu0  ;;  %v6685_v6 = vld [vmem:[%s8639_s3] ss:$0 sm:$0xff] (!%p6683_p6) }
 0x270   : > { %v7212_v10 = vpop.f32.mrb[45].mxu1  ;;  %v7193_v11 = vpop.f32.mrb[47].mxu0 }
 0x271   : > { %v5723_v12 = vadd.f32 %v7191_v8, %v5683_v4  ;;  %v7213_v13 = vadd.f32 %v7212_v10, %v7211_v7  ;;  %v7214_v14 = vpop.f32.mrb[46].mxu1  ;;  %v6684_v4 = vld [vmem:[%s8638_s2] ss:$0 sm:$0xff] (!%p6683_p6)  ;;  %v6686_v10 = vld [vmem:[#allocation3] ss:$0 sm:$0xff] (!%p6683_p6) }
 0x272   : > { %v7215_v15 = vpop.f32.mrb[47].mxu1 }
 0x273   : > { %v5763_v16 = vadd.f32 %v7213_v13, %v5723_v12 }
 0x28d   : > { %v7233_v17 = vpop.f32.mrb[48].mxu0 }
 0x28e   : > { %v7234_v18 = vpop.f32.mrb[49].mxu0 }
 0x28f   : > { %v7255_v19 = vpop.f32.mrb[48].mxu1  ;;  %v7235_v20 = vadd.f32 %v7234_v18, %v7233_v17  ;;  %v7236_v21 = vpop.f32.mrb[50].mxu0 }
 0x290   : > { %v7256_v22 = vpop.f32.mrb[49].mxu1  ;;  %v7237_v23 = vpop.f32.mrb[51].mxu0 }
 0x291   : > { %v5803_v24 = vadd.f32 %v7235_v20, %v5763_v16  ;;  %v7257_v25 = vadd.f32 %v7256_v22, %v7255_v19  ;;  %v7258_v26 = vpop.f32.mrb[50].mxu1 }
 0x292   : > { %v7259_v27 = vpop.f32.mrb[51].mxu1 }
 0x293   : > { %v5843_v28 = vadd.f32 %v7257_v25, %v5803_v24 }
 0x2ad   : > { %v7277_v29 = vpop.f32.mrb[52].mxu0 }
 0x2ae   : > { %v7278_v30 = vpop.f32.mrb[53].mxu0 }
 0x2af   : > { %v7299_v31 = vpop.f32.mrb[52].mxu1  ;;  %v7279_v32 = vadd.f32 %v7278_v30, %v7277_v29  ;;  %v7280_v33 = vpop.f32.mrb[54].mxu0 }
 0x2b0   : > { %v7300_v34 = vpop.f32.mrb[53].mxu1  ;;  %v7281_v35 = vpop.f32.mrb[55].mxu0 }
 0x2b1   : > { %v5883_v36 = vadd.f32 %v7279_v32, %v5843_v28  ;;  %v7301_v37 = vadd.f32 %v7300_v34, %v7299_v31  ;;  %v7302_v38 = vpop.f32.mrb[54].mxu1 }
 0x2b2   : > { %v7303_v39 = vpop.f32.mrb[55].mxu1 }
 0x2b3   : > { %v5923_v40 = vadd.f32 %v7301_v37, %v5883_v36 }
 0x2cd   : > { %v7321_v41 = vpop.f32.mrb[56].mxu0 }
 0x2ce   : > { %v7322_v42 = vpop.f32.mrb[57].mxu0 }
 0x2cf   : > { %v7343_v44 = vpop.f32.mrb[56].mxu1  ;;  %v7323_v45 = vadd.f32 %v7322_v42, %v7321_v41  ;;  %v7324_v46 = vpop.f32.mrb[58].mxu0 }
 0x2d0   : > { %v7344_v47 = vpop.f32.mrb[57].mxu1  ;;  %v7325_v48 = vpop.f32.mrb[59].mxu0 }
 0x2d1   : > { %v5963_v49 = vadd.f32 %v7323_v45, %v5923_v40  ;;  %v7345_v50 = vadd.f32 %v7344_v47, %v7343_v44  ;;  %v7346_v51 = vpop.f32.mrb[58].mxu1 }
 0x2d2   : > { %v7347_v52 = vpop.f32.mrb[59].mxu1 }
 0x2d3   : > { %v6003_v53 = vadd.f32 %v7345_v50, %v5963_v49 }
 0x2ed   : > { %v7365_v54 = vpop.f32.mrb[60].mxu0 }
 0x2ee   : > { %v7366_v55 = vpop.f32.mrb[61].mxu0 }
 0x2ef   : > { %v7387_v58 = vpop.f32.mrb[60].mxu1  ;;  %v7367_v43 = vadd.f32 %v7366_v55, %v7365_v54  ;;  %v7368_v57 = vpop.f32.mrb[62].mxu0 }
 0x2f0   : > { %v7388_v59 = vpop.f32.mrb[61].mxu1  ;;  %v7369_v60 = vpop.f32.mrb[63].mxu0 }
 0x2f1   : > { %v6043_v61 = vadd.f32 %v7367_v43, %v6003_v53  ;;  %v7389_v56 = vadd.f32 %v7388_v59, %v7387_v58  ;;  %v7390_v62 = vpop.f32.mrb[62].mxu1  ;;  %6093 = sbr.rel (%p6683_p6) target bundleno = 919 (0x397), region = 48 }
 0x2f2   : > { %v7391_v0 = vpop.f32.mrb[63].mxu1 }
 0x2f3   : > { %v6083_v1 = vadd.f32 %v7389_v56, %v6043_v61 }
 0x2f5   : > { %v6088_v2 = vadd.f32 %v6083_v1, %v239_v63 }
 0x2f7   : > { %6089 = vst [vmem:[#allocation2] sm:$0x3] %v6088_v2 }
 0x2fe   : > { %v6094_v3 = vld [vmem:[#allocation2] sm:$0x3] }
 0x2ff   : > { %v6102_v5 = vadd.f32 %v6684_v4, %v6094_v3 }
 0x301   : > { %v6103_v7 = vmax.f32 %v6102_v5, 0.0 }
 0x303   : > { %v6111_v8 = vmul.f32 %v6685_v6, %v6103_v7 }
 0x305   : > { %v6113_v9 = vsel %vm6112_vm0, %v6111_v8, 0.0 }
 0x306   : > { %6114 = vadd.xlane.f32.xlu0 %v6113_v9 }
 0x393   : > { %v6115_v11 = vpop.xlane.xlu0 %6114 }
 0x394   : > { %v6123_v12 = vadd.f32 %v6686_v10, %v6115_v11 }
 0x396   : > { %6125 = vst.msk [vmem:[%s8641_s5] sm:$0x3] %vm6124_vm1, %v6123_v12 }
 0x397 PF: > { %s17_s20 = sadd.s32 1, %s7929_s20  }
 0x398   : > { %p14_p7 = scmp.ge.s32.totalorder %s17_s20, 4  }
 0x39a   :  { %16 = sbr.rel (!%p14_p7) target bundleno = 3 (0x3), region = 77 }

</bundles_post_ra>
